<compile_context>
chip_gen: v7x
topology: tpu7x:2x2x1
jax: 0.10.0
libtpu: 0.0.40
codegen_flags: <defaults>
</compile_context>

<pallas_src>
import functools

import jax
import jax.numpy as jnp
from jax.experimental import pallas as pl
from jax.experimental.pallas import tpu as pltpu

_LANE = 128


# ----------------------------- math helpers ---------------------------------


def _elu(x):
    # nn.ELU(alpha=1.0): x if x > 0 else exp(x) - 1  (kept in f32; clamp hoisted)
    return jnp.where(x > 0, x, jnp.exp(jnp.minimum(x, 0.0)) - 1.0)


def _round_up(x, m):
    return ((x + m - 1) // m) * m


def _pad_rows(x, rows):
    if x.shape[0] == rows:
        return x
    return jnp.pad(x, ((0, rows - x.shape[0]), (0, 0)))


def _pick_block_rows(batch, max_block):
    return min(max_block, _round_up(batch, 8))


# ----------------------------- parameter init --------------------------------
# TODO(synk): PyTorch uses orthogonal init; deterministic synthetic init is a
# stand-in with identical shapes and the same forward semantics.


def _init_linear(key, fan_in, fan_out):
    kw, kb = jax.random.split(key)
    w = jax.random.normal(kw, (fan_in, fan_out), jnp.float32) / jnp.sqrt(
        jnp.float32(fan_in)
    )
    b = 0.01 * jax.random.normal(kb, (1, fan_out), jnp.float32)
    return w, b


def _mlp_params(key, dims):
    keys = jax.random.split(key, len(dims) - 1)
    return [_init_linear(keys[i], dims[i], dims[i + 1]) for i in range(len(dims) - 1)]


# ----------------------------- kernel compute --------------------------------


def _mlp_from_refs(x, refs, n_layers):
    """x: f32 activations; refs: [W0, b0, W1, b1, ...] with bf16 W, f32 b."""
    for i in range(n_layers):
        w = refs[2 * i][...]
        b = refs[2 * i + 1][...]
        x = jnp.dot(x.astype(w.dtype), w, preferred_element_type=jnp.float32) + b
        if i < n_layers - 1:
            x = _elu(x)
    return x


def _policy_from_refs(obs_hist, obs_in, est_refs, act_refs, n_est, n_act):
    # estimator MLP (ELU hidden, linear output)
    est = _mlp_from_refs(obs_hist, est_refs, n_est)
    # actor layer 0: concat replaced by split weight (obs part + est part)
    w0o = act_refs[0][...]
    w0e = act_refs[1][...]
    b0 = act_refs[2][...]
    x = (
        jnp.dot(obs_in.astype(w0o.dtype), w0o, preferred_element_type=jnp.float32)
        + jnp.dot(est.astype(w0e.dtype), w0e, preferred_element_type=jnp.float32)
        + b0
    )
    x = _elu(x)
    rest = act_refs[3:]
    for i in range(n_act - 1):
        w = rest[2 * i][...]
        b = rest[2 * i + 1][...]
        x = jnp.dot(x.astype(w.dtype), w, preferred_element_type=jnp.float32) + b
        if i < n_act - 2:
            x = _elu(x)
    return x


def _policy_kernel(n_est, n_act, *refs):
    """refs = (obs_history, obs_input, est W/b..., actor params..., out)."""
    obs_hist_ref, obs_in_ref = refs[0], refs[1]
    out_ref = refs[-1]
    params = refs[2:-1]
    est_p = params[: 2 * n_est]
    act_p = params[2 * n_est:]
    out_ref[...] = _policy_from_refs(
        obs_hist_ref[...], obs_in_ref[...], est_p, act_p, n_est, n_act
    ).astype(out_ref.dtype)


def _critic_kernel(n_cri, *refs):
    """refs = (critic_obs, W/b..., out)."""
    x_ref, out_ref = refs[0], refs[-1]
    out_ref[...] = _mlp_from_refs(x_ref[...], refs[1:-1], n_cri).astype(out_ref.dtype)


def _fused_kernel(n_est, n_act, n_cri, *refs):
    """refs = (obs_history, obs_input, critic_obs, all params..., mean, value)."""
    obs_hist_ref, obs_in_ref, cobs_ref = refs[0], refs[1], refs[2]
    mean_ref, value_ref = refs[-2], refs[-1]
    params = refs[3:-2]
    n_est_p = 2 * n_est
    n_act_p = 3 + 2 * (n_act - 1)
    est_p = params[:n_est_p]
    act_p = params[n_est_p : n_est_p + n_act_p]
    cri_p = params[n_est_p + n_act_p :]
    mean_ref[...] = _policy_from_refs(
        obs_hist_ref[...], obs_in_ref[...], est_p, act_p, n_est, n_act
    ).astype(mean_ref.dtype)
    value_ref[...] = _mlp_from_refs(cobs_ref[...], cri_p, n_cri).astype(value_ref.dtype)


# ----------------------------- module ----------------------------------------


class ActorCriticEstimatorPallas:
    def __init__(
        self,
        num_obs_history,
        num_obs_input,
        num_est_prob,
        num_critic_obs,
        num_actions,
        actor_hidden_dims=(256, 256, 256),
        critic_hidden_dims=(256, 256, 256),
        estimator_hidden_dims=(256, 128, 256, 64),
        init_noise_std=1.0,
        seed=0,
        block_rows=256,
    ):
        key = jax.random.PRNGKey(seed)
        k_est, k_act, k_cri = jax.random.split(key, 3)

        est_dims = [num_obs_history, *estimator_hidden_dims, num_est_prob]
        act_dims = [num_obs_input + num_est_prob, *actor_hidden_dims, num_actions]
        cri_dims = [num_critic_obs, *critic_hidden_dims, 1]

        est_p = _mlp_params(k_est, est_dims)
        act_p = _mlp_params(k_act, act_dims)
        cri_p = _mlp_params(k_cri, cri_dims)

        # estimator: flat [W0, b0, W1, b1, ...]; bf16 weights, f32 biases.
        self.est_flat = []
        for w, b in est_p:
            self.est_flat += [w.astype(jnp.bfloat16), b]

        # actor: split first weight (removes in-kernel concat); pad last layer
        # to a 128-lane-multiple output so stores are lane-dense.
        w0, b0 = act_p[0]
        self.actor_flat = [
            w0[:num_obs_input].astype(jnp.bfloat16),
            w0[num_obs_input:].astype(jnp.bfloat16),
            b0,
        ]
        self._act_out_lanes = _round_up(num_actions, _LANE)
        for i, (w, b) in enumerate(act_p[1:], start=1):
            if i == len(act_p) - 1:
                w = jnp.pad(w, ((0, 0), (0, self._act_out_lanes - w.shape[1])))
                b = jnp.pad(b, ((0, 0), (0, self._act_out_lanes - b.shape[1])))
            self.actor_flat += [w.astype(jnp.bfloat16), b]

        # critic: last layer padded to 128 lanes as well.
        self._cri_out_lanes = _round_up(1, _LANE)
        self.critic_flat = []
        for i, (w, b) in enumerate(cri_p):
            if i == len(cri_p) - 1:
                w = jnp.pad(w, ((0, 0), (0, self._cri_out_lanes - w.shape[1])))
                b = jnp.pad(b, ((0, 0), (0, self._cri_out_lanes - b.shape[1])))
            self.critic_flat += [w.astype(jnp.bfloat16), b]

        self.std = init_noise_std * jnp.ones((num_actions,), jnp.float32)
        self.num_actions = num_actions
        self.num_est_prob = num_est_prob
        self.block_rows = block_rows
        self._n_est = len(est_p)
        self._n_act = len(act_p)
        self._n_cri = len(cri_p)
        self._cparams = pltpu.CompilerParams(
            dimension_semantics=("parallel",),
            vmem_limit_bytes=32 * 1024 * 1024,
        )

    # ------------------------ spec helpers ------------------------------------

    def _grid_setup(self, batch):
        bm = _pick_block_rows(batch, self.block_rows)
        pb = _round_up(batch, bm)
        return bm, pb

    @staticmethod
    def _act_spec(bm, width):
        # activation / output tiles march over the batch axis
        return pl.BlockSpec((bm, width), lambda i: (i, 0))

    @staticmethod
    def _param_specs(flat):
        # constant block index -> weights DMA'd once, stay VMEM-resident
        return [pl.BlockSpec(p.shape, lambda i: (0, 0)) for p in flat]

    # ------------------------ Pallas forward passes ----------------------------

    def act_inference(self, obs_input, obs_history):
        batch = obs_input.shape[0]
        bm, pb = self._grid_setup(batch)
        oh = _pad_rows(obs_history, pb)
        oi = _pad_rows(obs_input, pb)
        flat = self.est_flat + self.actor_flat
        kernel = functools.partial(_policy_kernel, self._n_est, self._n_act)
        out = pl.pallas_call(
            kernel,
            out_shape=jax.ShapeDtypeStruct((pb, self._act_out_lanes), jnp.float32),
            grid=(pb // bm,),
            in_specs=[
                self._act_spec(bm, oh.shape[1]),
                self._act_spec(bm, oi.shape[1]),
            ]
            + self._param_specs(flat),
            out_specs=self._act_spec(bm, self._act_out_lanes),
            compiler_params=self._cparams,
        )(oh, oi, *flat)
        return out[:batch, : self.num_actions]

    def evaluate(self, critic_observations):
        batch = critic_observations.shape[0]
        bm, pb = self._grid_setup(batch)
        co = _pad_rows(critic_observations, pb)
        flat = self.critic_flat
        kernel = functools.partial(_critic_kernel, self._n_cri)
        out = pl.pallas_call(
            kernel,
            out_shape=jax.ShapeDtypeStruct((pb, self._cri_out_lanes), jnp.float32),
            grid=(pb // bm,),
            in_specs=[self._act_spec(bm, co.shape[1])] + self._param_specs(flat),
            out_specs=self._act_spec(bm, self._cri_out_lanes),
            compiler_params=self._cparams,
        )(co, *flat)
        return out[:batch, :1]

    def act_and_evaluate(self, obs_input, obs_history, critic_observations):
        """Fused policy + critic forward: one pallas_call per training step."""
        batch = obs_input.shape[0]
        bm, pb = self._grid_setup(batch)
        oh = _pad_rows(obs_history, pb)
        oi = _pad_rows(obs_input, pb)
        co = _pad_rows(critic_observations, pb)
        flat = self.est_flat + self.actor_flat + self.critic_flat
        kernel = functools.partial(
            _fused_kernel, self._n_est, self._n_act, self._n_cri
        )
        mean, value = pl.pallas_call(
            kernel,
            out_shape=(
                jax.ShapeDtypeStruct((pb, self._act_out_lanes), jnp.float32),
                jax.ShapeDtypeStruct((pb, self._cri_out_lanes), jnp.float32),
            ),
            grid=(pb // bm,),
            in_specs=[
                self._act_spec(bm, oh.shape[1]),
                self._act_spec(bm, oi.shape[1]),
                self._act_spec(bm, co.shape[1]),
            ]
            + self._param_specs(flat),
            out_specs=(
                self._act_spec(bm, self._act_out_lanes),
                self._act_spec(bm, self._cri_out_lanes),
            ),
            compiler_params=self._cparams,
        )(oh, oi, co, *flat)
        return mean[:batch, : self.num_actions], value[:batch, :1]

    # ------------------------ distribution stats -------------------------------

    def action_mean(self, obs_input, obs_history):
        return self.act_inference(obs_input, obs_history)

    def action_std(self, batch):
        return jnp.broadcast_to(self.std, (batch, self.num_actions))

    # ------------------------ pure-JAX reference --------------------------------

    def _ref_mlp(self, x, flat, n_layers):
        for i in range(n_layers):
            w, b = flat[2 * i], flat[2 * i + 1]
            x = jnp.dot(x.astype(w.dtype), w, preferred_element_type=jnp.float32) + b
            if i < n_layers - 1:
                x = _elu(x)
        return x

    def ref_act_inference(self, obs_input, obs_history):
        est = self._ref_mlp(obs_history, self.est_flat, self._n_est)
        w0o, w0e, b0 = self.actor_flat[0], self.actor_flat[1], self.actor_flat[2]
        x = (
            jnp.dot(obs_input.astype(w0o.dtype), w0o, preferred_element_type=jnp.float32)
            + jnp.dot(est.astype(w0e.dtype), w0e, preferred_element_type=jnp.float32)
            + b0
        )
        x = _elu(x)
        rest = self.actor_flat[3:]
        for i in range(self._n_act - 1):
            w, b = rest[2 * i], rest[2 * i + 1]
            x = jnp.dot(x.astype(w.dtype), w, preferred_element_type=jnp.float32) + b
            if i < self._n_act - 2:
                x = _elu(x)
        return x[:, : self.num_actions]

    def ref_evaluate(self, critic_obs):
        v = self._ref_mlp(critic_obs, self.critic_flat, self._n_cri)
        return v[:, :1]


# ----------------------------- main -------------------------------------------

if __name__ == "__main__":
    NUM_OBS_HISTORY = 60   # stacked obs history fed to the estimator
    NUM_OBS_INPUT = 30     # proprioceptive obs fed to the actor
    NUM_EST_PROB = 8       # estimator output dim
    NUM_CRITIC_OBS = 48    # privileged critic obs
    NUM_ACTIONS = 6
    BATCH = 512            # realistic RL env count; tiled as 2 x 256-row blocks

    model = ActorCriticEstimatorPallas(
        NUM_OBS_HISTORY,
        NUM_OBS_INPUT,
        NUM_EST_PROB,
        NUM_CRITIC_OBS,
        NUM_ACTIONS,
        seed=0,
        block_rows=256,
    )

    key = jax.random.PRNGKey(0)
    k1, k2, k3 = jax.random.split(key, 3)
    obs_history = jax.random.normal(k1, (BATCH, NUM_OBS_HISTORY), jnp.float32)
    obs_input = jax.random.normal(k2, (BATCH, NUM_OBS_INPUT), jnp.float32)
    critic_obs = jax.random.normal(k3, (BATCH, NUM_CRITIC_OBS), jnp.float32)

    # fused policy+critic (one pallas_call)
    mean_f, value_f = model.act_and_evaluate(obs_input, obs_history, critic_obs)
    mean_f = jax.block_until_ready(mean_f)
    value_f = jax.block_until_ready(value_f)

    # individual entry points
    mean_s = jax.block_until_ready(model.act_inference(obs_input, obs_history))
    value_s = jax.block_until_ready(model.evaluate(critic_obs))

    # verify against a pure-JAX reference that uses the same bf16 weights
    ref_mean = model.ref_act_inference(obs_input, obs_history)
    ref_value = model.ref_evaluate(critic_obs)

    assert mean_f.shape == (BATCH, NUM_ACTIONS)
    assert value_f.shape == (BATCH, 1)
    assert jnp.allclose(mean_f, ref_mean, atol=1e-2, rtol=1e-2)
    assert jnp.allclose(value_f, ref_value, atol=1e-2, rtol=1e-2)
    assert jnp.allclose(mean_s, ref_mean, atol=1e-2, rtol=1e-2)
    assert jnp.allclose(value_s, ref_value, atol=1e-2, rtol=1e-2)

    print("KERNEL_OK")
</pallas_src>

<mosaic_0001>
module attributes {stable_mosaic.version = 11 : i64} {
  func.func @_fused_kernel(%arg0: i32, %arg1: memref<256x60xf32, #tpu.memory_space<vmem>>, %arg2: memref<256x30xf32, #tpu.memory_space<vmem>>, %arg3: memref<256x48xf32, #tpu.memory_space<vmem>>, %arg4: memref<60x256xbf16, #tpu.memory_space<vmem>>, %arg5: memref<1x256xf32, #tpu.memory_space<vmem>>, %arg6: memref<256x128xbf16, #tpu.memory_space<vmem>>, %arg7: memref<1x128xf32, #tpu.memory_space<vmem>>, %arg8: memref<128x256xbf16, #tpu.memory_space<vmem>>, %arg9: memref<1x256xf32, #tpu.memory_space<vmem>>, %arg10: memref<256x64xbf16, #tpu.memory_space<vmem>>, %arg11: memref<1x64xf32, #tpu.memory_space<vmem>>, %arg12: memref<64x8xbf16, #tpu.memory_space<vmem>>, %arg13: memref<1x8xf32, #tpu.memory_space<vmem>>, %arg14: memref<30x256xbf16, #tpu.memory_space<vmem>>, %arg15: memref<8x256xbf16, #tpu.memory_space<vmem>>, %arg16: memref<1x256xf32, #tpu.memory_space<vmem>>, %arg17: memref<256x256xbf16, #tpu.memory_space<vmem>>, %arg18: memref<1x256xf32, #tpu.memory_space<vmem>>, %arg19: memref<256x256xbf16, #tpu.memory_space<vmem>>, %arg20: memref<1x256xf32, #tpu.memory_space<vmem>>, %arg21: memref<256x128xbf16, #tpu.memory_space<vmem>>, %arg22: memref<1x128xf32, #tpu.memory_space<vmem>>, %arg23: memref<48x256xbf16, #tpu.memory_space<vmem>>, %arg24: memref<1x256xf32, #tpu.memory_space<vmem>>, %arg25: memref<256x256xbf16, #tpu.memory_space<vmem>>, %arg26: memref<1x256xf32, #tpu.memory_space<vmem>>, %arg27: memref<256x256xbf16, #tpu.memory_space<vmem>>, %arg28: memref<1x256xf32, #tpu.memory_space<vmem>>, %arg29: memref<256x128xbf16, #tpu.memory_space<vmem>>, %arg30: memref<1x128xf32, #tpu.memory_space<vmem>>, %arg31: memref<256x128xf32, #tpu.memory_space<vmem>>, %arg32: memref<256x128xf32, #tpu.memory_space<vmem>>) attributes {dimension_semantics = [#tpu.dimension_semantics<parallel>], iteration_bounds = array<i64: 2>, scalar_prefetch = 0 : i64, scratch_operands = 0 : i64, tpu.core_type = #tpu.core_type<tc>, window_params = [{transform_indices = @transform_0, window_bounds = array<i64: 256, 60>}, {transform_indices = @transform_1, window_bounds = array<i64: 256, 30>}, {transform_indices = @transform_2, window_bounds = array<i64: 256, 48>}, {pipeline_mode = #tpu.pipeline_mode<synchronous>, transform_indices = @transform_3, window_bounds = array<i64: 60, 256>}, {pipeline_mode = #tpu.pipeline_mode<synchronous>, transform_indices = @transform_4, window_bounds = array<i64: 1, 256>}, {pipeline_mode = #tpu.pipeline_mode<synchronous>, transform_indices = @transform_5, window_bounds = array<i64: 256, 128>}, {pipeline_mode = #tpu.pipeline_mode<synchronous>, transform_indices = @transform_6, window_bounds = array<i64: 1, 128>}, {pipeline_mode = #tpu.pipeline_mode<synchronous>, transform_indices = @transform_7, window_bounds = array<i64: 128, 256>}, {pipeline_mode = #tpu.pipeline_mode<synchronous>, transform_indices = @transform_8, window_bounds = array<i64: 1, 256>}, {pipeline_mode = #tpu.pipeline_mode<synchronous>, transform_indices = @transform_9, window_bounds = array<i64: 256, 64>}, {pipeline_mode = #tpu.pipeline_mode<synchronous>, transform_indices = @transform_10, window_bounds = array<i64: 1, 64>}, {pipeline_mode = #tpu.pipeline_mode<synchronous>, transform_indices = @transform_11, window_bounds = array<i64: 64, 8>}, {pipeline_mode = #tpu.pipeline_mode<synchronous>, transform_indices = @transform_12, window_bounds = array<i64: 1, 8>}, {pipeline_mode = #tpu.pipeline_mode<synchronous>, transform_indices = @transform_13, window_bounds = array<i64: 30, 256>}, {pipeline_mode = #tpu.pipeline_mode<synchronous>, transform_indices = @transform_14, window_bounds = array<i64: 8, 256>}, {pipeline_mode = #tpu.pipeline_mode<synchronous>, transform_indices = @transform_15, window_bounds = array<i64: 1, 256>}, {pipeline_mode = #tpu.pipeline_mode<synchronous>, transform_indices = @transform_16, window_bounds = array<i64: 256, 256>}, {pipeline_mode = #tpu.pipeline_mode<synchronous>, transform_indices = @transform_17, window_bounds = array<i64: 1, 256>}, {pipeline_mode = #tpu.pipeline_mode<synchronous>, transform_indices = @transform_18, window_bounds = array<i64: 256, 256>}, {pipeline_mode = #tpu.pipeline_mode<synchronous>, transform_indices = @transform_19, window_bounds = array<i64: 1, 256>}, {pipeline_mode = #tpu.pipeline_mode<synchronous>, transform_indices = @transform_20, window_bounds = array<i64: 256, 128>}, {pipeline_mode = #tpu.pipeline_mode<synchronous>, transform_indices = @transform_21, window_bounds = array<i64: 1, 128>}, {pipeline_mode = #tpu.pipeline_mode<synchronous>, transform_indices = @transform_22, window_bounds = array<i64: 48, 256>}, {pipeline_mode = #tpu.pipeline_mode<synchronous>, transform_indices = @transform_23, window_bounds = array<i64: 1, 256>}, {pipeline_mode = #tpu.pipeline_mode<synchronous>, transform_indices = @transform_24, window_bounds = array<i64: 256, 256>}, {pipeline_mode = #tpu.pipeline_mode<synchronous>, transform_indices = @transform_25, window_bounds = array<i64: 1, 256>}, {pipeline_mode = #tpu.pipeline_mode<synchronous>, transform_indices = @transform_26, window_bounds = array<i64: 256, 256>}, {pipeline_mode = #tpu.pipeline_mode<synchronous>, transform_indices = @transform_27, window_bounds = array<i64: 1, 256>}, {pipeline_mode = #tpu.pipeline_mode<synchronous>, transform_indices = @transform_28, window_bounds = array<i64: 256, 128>}, {pipeline_mode = #tpu.pipeline_mode<synchronous>, transform_indices = @transform_29, window_bounds = array<i64: 1, 128>}, {transform_indices = @transform_30, window_bounds = array<i64: 256, 128>}, {transform_indices = @transform_31, window_bounds = array<i64: 256, 128>}]} {
    %c0 = arith.constant 0 : index
    %c0_0 = arith.constant 0 : index
    %0 = vector.load %arg1[%c0, %c0_0] : memref<256x60xf32, #tpu.memory_space<vmem>>, vector<256x60xf32>
    %c0_1 = arith.constant 0 : index
    %c0_2 = arith.constant 0 : index
    %1 = vector.load %arg2[%c0_1, %c0_2] : memref<256x30xf32, #tpu.memory_space<vmem>>, vector<256x30xf32>
    %c0_3 = arith.constant 0 : index
    %c0_4 = arith.constant 0 : index
    %2 = vector.load %arg4[%c0_3, %c0_4] : memref<60x256xbf16, #tpu.memory_space<vmem>>, vector<60x256xbf16>
    %c0_5 = arith.constant 0 : index
    %c0_6 = arith.constant 0 : index
    %3 = vector.load %arg5[%c0_5, %c0_6] : memref<1x256xf32, #tpu.memory_space<vmem>>, vector<1x256xf32>
    %4 = arith.truncf %0 : vector<256x60xf32> to vector<256x60xbf16>
    %cst = arith.constant dense<0.000000e+00> : vector<256x256xf32>
    %5 = tpu.matmul %4, %2, %cst {dimension_numbers = #tpu.dot_dimension_numbers<[1], [0], [0], [1], [0, 0, 1, 1], [], []>} : vector<256x60xbf16>, vector<60x256xbf16>, vector<256x256xf32> -> vector<256x256xf32>
    %6 = vector.broadcast %3 : vector<1x256xf32> to vector<256x256xf32>
    %7 = arith.addf %5, %6 : vector<256x256xf32>
    %cst_7 = arith.constant 0.000000e+00 : f32
    %8 = vector.broadcast %cst_7 : f32 to vector<256x256xf32>
    %9 = arith.cmpf ogt, %7, %8 : vector<256x256xf32>
    %cst_8 = arith.constant 0.000000e+00 : f32
    %10 = vector.broadcast %cst_8 : f32 to vector<256x256xf32>
    %11 = arith.minimumf %7, %10 : vector<256x256xf32>
    %12 = math.exp %11 : vector<256x256xf32>
    %cst_9 = arith.constant 1.000000e+00 : f32
    %13 = vector.broadcast %cst_9 : f32 to vector<256x256xf32>
    %14 = arith.subf %12, %13 : vector<256x256xf32>
    %15 = arith.select %9, %7, %14 : vector<256x256xi1>, vector<256x256xf32>
    %c0_10 = arith.constant 0 : index
    %c0_11 = arith.constant 0 : index
    %16 = vector.load %arg6[%c0_10, %c0_11] : memref<256x128xbf16, #tpu.memory_space<vmem>>, vector<256x128xbf16>
    %c0_12 = arith.constant 0 : index
    %c0_13 = arith.constant 0 : index
    %17 = vector.load %arg7[%c0_12, %c0_13] : memref<1x128xf32, #tpu.memory_space<vmem>>, vector<1x128xf32>
    %18 = arith.truncf %15 : vector<256x256xf32> to vector<256x256xbf16>
    %cst_14 = arith.constant dense<0.000000e+00> : vector<256x128xf32>
    %19 = tpu.matmul %18, %16, %cst_14 {dimension_numbers = #tpu.dot_dimension_numbers<[1], [0], [0], [1], [0, 0, 1, 1], [], []>} : vector<256x256xbf16>, vector<256x128xbf16>, vector<256x128xf32> -> vector<256x128xf32>
    %20 = vector.broadcast %17 : vector<1x128xf32> to vector<256x128xf32>
    %21 = arith.addf %19, %20 : vector<256x128xf32>
    %cst_15 = arith.constant 0.000000e+00 : f32
    %22 = vector.broadcast %cst_15 : f32 to vector<256x128xf32>
    %23 = arith.cmpf ogt, %21, %22 : vector<256x128xf32>
    %cst_16 = arith.constant 0.000000e+00 : f32
    %24 = vector.broadcast %cst_16 : f32 to vector<256x128xf32>
    %25 = arith.minimumf %21, %24 : vector<256x128xf32>
    %26 = math.exp %25 : vector<256x128xf32>
    %cst_17 = arith.constant 1.000000e+00 : f32
    %27 = vector.broadcast %cst_17 : f32 to vector<256x128xf32>
    %28 = arith.subf %26, %27 : vector<256x128xf32>
    %29 = arith.select %23, %21, %28 : vector<256x128xi1>, vector<256x128xf32>
    %c0_18 = arith.constant 0 : index
    %c0_19 = arith.constant 0 : index
    %30 = vector.load %arg8[%c0_18, %c0_19] : memref<128x256xbf16, #tpu.memory_space<vmem>>, vector<128x256xbf16>
    %c0_20 = arith.constant 0 : index
    %c0_21 = arith.constant 0 : index
    %31 = vector.load %arg9[%c0_20, %c0_21] : memref<1x256xf32, #tpu.memory_space<vmem>>, vector<1x256xf32>
    %32 = arith.truncf %29 : vector<256x128xf32> to vector<256x128xbf16>
    %cst_22 = arith.constant dense<0.000000e+00> : vector<256x256xf32>
    %33 = tpu.matmul %32, %30, %cst_22 {dimension_numbers = #tpu.dot_dimension_numbers<[1], [0], [0], [1], [0, 0, 1, 1], [], []>} : vector<256x128xbf16>, vector<128x256xbf16>, vector<256x256xf32> -> vector<256x256xf32>
    %34 = vector.broadcast %31 : vector<1x256xf32> to vector<256x256xf32>
    %35 = arith.addf %33, %34 : vector<256x256xf32>
    %cst_23 = arith.constant 0.000000e+00 : f32
    %36 = vector.broadcast %cst_23 : f32 to vector<256x256xf32>
    %37 = arith.cmpf ogt, %35, %36 : vector<256x256xf32>
    %cst_24 = arith.constant 0.000000e+00 : f32
    %38 = vector.broadcast %cst_24 : f32 to vector<256x256xf32>
    %39 = arith.minimumf %35, %38 : vector<256x256xf32>
    %40 = math.exp %39 : vector<256x256xf32>
    %cst_25 = arith.constant 1.000000e+00 : f32
    %41 = vector.broadcast %cst_25 : f32 to vector<256x256xf32>
    %42 = arith.subf %40, %41 : vector<256x256xf32>
    %43 = arith.select %37, %35, %42 : vector<256x256xi1>, vector<256x256xf32>
    %c0_26 = arith.constant 0 : index
    %c0_27 = arith.constant 0 : index
    %44 = vector.load %arg10[%c0_26, %c0_27] : memref<256x64xbf16, #tpu.memory_space<vmem>>, vector<256x64xbf16>
    %c0_28 = arith.constant 0 : index
    %c0_29 = arith.constant 0 : index
    %45 = vector.load %arg11[%c0_28, %c0_29] : memref<1x64xf32, #tpu.memory_space<vmem>>, vector<1x64xf32>
    %46 = arith.truncf %43 : vector<256x256xf32> to vector<256x256xbf16>
    %cst_30 = arith.constant dense<0.000000e+00> : vector<256x64xf32>
    %47 = tpu.matmul %46, %44, %cst_30 {dimension_numbers = #tpu.dot_dimension_numbers<[1], [0], [0], [1], [0, 0, 1, 1], [], []>} : vector<256x256xbf16>, vector<256x64xbf16>, vector<256x64xf32> -> vector<256x64xf32>
    %48 = vector.broadcast %45 : vector<1x64xf32> to vector<256x64xf32>
    %49 = arith.addf %47, %48 : vector<256x64xf32>
    %cst_31 = arith.constant 0.000000e+00 : f32
    %50 = vector.broadcast %cst_31 : f32 to vector<256x64xf32>
    %51 = arith.cmpf ogt, %49, %50 : vector<256x64xf32>
    %cst_32 = arith.constant 0.000000e+00 : f32
    %52 = vector.broadcast %cst_32 : f32 to vector<256x64xf32>
    %53 = arith.minimumf %49, %52 : vector<256x64xf32>
    %54 = math.exp %53 : vector<256x64xf32>
    %cst_33 = arith.constant 1.000000e+00 : f32
    %55 = vector.broadcast %cst_33 : f32 to vector<256x64xf32>
    %56 = arith.subf %54, %55 : vector<256x64xf32>
    %57 = arith.select %51, %49, %56 : vector<256x64xi1>, vector<256x64xf32>
    %c0_34 = arith.constant 0 : index
    %c0_35 = arith.constant 0 : index
    %58 = vector.load %arg12[%c0_34, %c0_35] : memref<64x8xbf16, #tpu.memory_space<vmem>>, vector<64x8xbf16>
    %c0_36 = arith.constant 0 : index
    %c0_37 = arith.constant 0 : index
    %59 = vector.load %arg13[%c0_36, %c0_37] : memref<1x8xf32, #tpu.memory_space<vmem>>, vector<1x8xf32>
    %60 = arith.truncf %57 : vector<256x64xf32> to vector<256x64xbf16>
    %cst_38 = arith.constant dense<0.000000e+00> : vector<256x8xf32>
    %61 = tpu.matmul %60, %58, %cst_38 {dimension_numbers = #tpu.dot_dimension_numbers<[1], [0], [0], [1], [0, 0, 1, 1], [], []>} : vector<256x64xbf16>, vector<64x8xbf16>, vector<256x8xf32> -> vector<256x8xf32>
    %62 = vector.broadcast %59 : vector<1x8xf32> to vector<256x8xf32>
    %63 = arith.addf %61, %62 : vector<256x8xf32>
    %c0_39 = arith.constant 0 : index
    %c0_40 = arith.constant 0 : index
    %64 = vector.load %arg14[%c0_39, %c0_40] : memref<30x256xbf16, #tpu.memory_space<vmem>>, vector<30x256xbf16>
    %c0_41 = arith.constant 0 : index
    %c0_42 = arith.constant 0 : index
    %65 = vector.load %arg15[%c0_41, %c0_42] : memref<8x256xbf16, #tpu.memory_space<vmem>>, vector<8x256xbf16>
    %c0_43 = arith.constant 0 : index
    %c0_44 = arith.constant 0 : index
    %66 = vector.load %arg16[%c0_43, %c0_44] : memref<1x256xf32, #tpu.memory_space<vmem>>, vector<1x256xf32>
    %67 = arith.truncf %1 : vector<256x30xf32> to vector<256x30xbf16>
    %cst_45 = arith.constant dense<0.000000e+00> : vector<256x256xf32>
    %68 = tpu.matmul %67, %64, %cst_45 {dimension_numbers = #tpu.dot_dimension_numbers<[1], [0], [0], [1], [0, 0, 1, 1], [], []>} : vector<256x30xbf16>, vector<30x256xbf16>, vector<256x256xf32> -> vector<256x256xf32>
    %69 = arith.truncf %63 : vector<256x8xf32> to vector<256x8xbf16>
    %cst_46 = arith.constant dense<0.000000e+00> : vector<256x256xf32>
    %70 = tpu.matmul %69, %65, %cst_46 {dimension_numbers = #tpu.dot_dimension_numbers<[1], [0], [0], [1], [0, 0, 1, 1], [], []>} : vector<256x8xbf16>, vector<8x256xbf16>, vector<256x256xf32> -> vector<256x256xf32>
    %71 = arith.addf %68, %70 : vector<256x256xf32>
    %72 = vector.broadcast %66 : vector<1x256xf32> to vector<256x256xf32>
    %73 = arith.addf %71, %72 : vector<256x256xf32>
    %cst_47 = arith.constant 0.000000e+00 : f32
    %74 = vector.broadcast %cst_47 : f32 to vector<256x256xf32>
    %75 = arith.cmpf ogt, %73, %74 : vector<256x256xf32>
    %cst_48 = arith.constant 0.000000e+00 : f32
    %76 = vector.broadcast %cst_48 : f32 to vector<256x256xf32>
    %77 = arith.minimumf %73, %76 : vector<256x256xf32>
    %78 = math.exp %77 : vector<256x256xf32>
    %cst_49 = arith.constant 1.000000e+00 : f32
    %79 = vector.broadcast %cst_49 : f32 to vector<256x256xf32>
    %80 = arith.subf %78, %79 : vector<256x256xf32>
    %81 = arith.select %75, %73, %80 : vector<256x256xi1>, vector<256x256xf32>
    %c0_50 = arith.constant 0 : index
    %c0_51 = arith.constant 0 : index
    %82 = vector.load %arg17[%c0_50, %c0_51] : memref<256x256xbf16, #tpu.memory_space<vmem>>, vector<256x256xbf16>
    %c0_52 = arith.constant 0 : index
    %c0_53 = arith.constant 0 : index
    %83 = vector.load %arg18[%c0_52, %c0_53] : memref<1x256xf32, #tpu.memory_space<vmem>>, vector<1x256xf32>
    %84 = arith.truncf %81 : vector<256x256xf32> to vector<256x256xbf16>
    %cst_54 = arith.constant dense<0.000000e+00> : vector<256x256xf32>
    %85 = tpu.matmul %84, %82, %cst_54 {dimension_numbers = #tpu.dot_dimension_numbers<[1], [0], [0], [1], [0, 0, 1, 1], [], []>} : vector<256x256xbf16>, vector<256x256xbf16>, vector<256x256xf32> -> vector<256x256xf32>
    %86 = vector.broadcast %83 : vector<1x256xf32> to vector<256x256xf32>
    %87 = arith.addf %85, %86 : vector<256x256xf32>
    %cst_55 = arith.constant 0.000000e+00 : f32
    %88 = vector.broadcast %cst_55 : f32 to vector<256x256xf32>
    %89 = arith.cmpf ogt, %87, %88 : vector<256x256xf32>
    %cst_56 = arith.constant 0.000000e+00 : f32
    %90 = vector.broadcast %cst_56 : f32 to vector<256x256xf32>
    %91 = arith.minimumf %87, %90 : vector<256x256xf32>
    %92 = math.exp %91 : vector<256x256xf32>
    %cst_57 = arith.constant 1.000000e+00 : f32
    %93 = vector.broadcast %cst_57 : f32 to vector<256x256xf32>
    %94 = arith.subf %92, %93 : vector<256x256xf32>
    %95 = arith.select %89, %87, %94 : vector<256x256xi1>, vector<256x256xf32>
    %c0_58 = arith.constant 0 : index
    %c0_59 = arith.constant 0 : index
    %96 = vector.load %arg19[%c0_58, %c0_59] : memref<256x256xbf16, #tpu.memory_space<vmem>>, vector<256x256xbf16>
    %c0_60 = arith.constant 0 : index
    %c0_61 = arith.constant 0 : index
    %97 = vector.load %arg20[%c0_60, %c0_61] : memref<1x256xf32, #tpu.memory_space<vmem>>, vector<1x256xf32>
    %98 = arith.truncf %95 : vector<256x256xf32> to vector<256x256xbf16>
    %cst_62 = arith.constant dense<0.000000e+00> : vector<256x256xf32>
    %99 = tpu.matmul %98, %96, %cst_62 {dimension_numbers = #tpu.dot_dimension_numbers<[1], [0], [0], [1], [0, 0, 1, 1], [], []>} : vector<256x256xbf16>, vector<256x256xbf16>, vector<256x256xf32> -> vector<256x256xf32>
    %100 = vector.broadcast %97 : vector<1x256xf32> to vector<256x256xf32>
    %101 = arith.addf %99, %100 : vector<256x256xf32>
    %cst_63 = arith.constant 0.000000e+00 : f32
    %102 = vector.broadcast %cst_63 : f32 to vector<256x256xf32>
    %103 = arith.cmpf ogt, %101, %102 : vector<256x256xf32>
    %cst_64 = arith.constant 0.000000e+00 : f32
    %104 = vector.broadcast %cst_64 : f32 to vector<256x256xf32>
    %105 = arith.minimumf %101, %104 : vector<256x256xf32>
    %106 = math.exp %105 : vector<256x256xf32>
    %cst_65 = arith.constant 1.000000e+00 : f32
    %107 = vector.broadcast %cst_65 : f32 to vector<256x256xf32>
    %108 = arith.subf %106, %107 : vector<256x256xf32>
    %109 = arith.select %103, %101, %108 : vector<256x256xi1>, vector<256x256xf32>
    %c0_66 = arith.constant 0 : index
    %c0_67 = arith.constant 0 : index
    %110 = vector.load %arg21[%c0_66, %c0_67] : memref<256x128xbf16, #tpu.memory_space<vmem>>, vector<256x128xbf16>
    %c0_68 = arith.constant 0 : index
    %c0_69 = arith.constant 0 : index
    %111 = vector.load %arg22[%c0_68, %c0_69] : memref<1x128xf32, #tpu.memory_space<vmem>>, vector<1x128xf32>
    %112 = arith.truncf %109 : vector<256x256xf32> to vector<256x256xbf16>
    %cst_70 = arith.constant dense<0.000000e+00> : vector<256x128xf32>
    %113 = tpu.matmul %112, %110, %cst_70 {dimension_numbers = #tpu.dot_dimension_numbers<[1], [0], [0], [1], [0, 0, 1, 1], [], []>} : vector<256x256xbf16>, vector<256x128xbf16>, vector<256x128xf32> -> vector<256x128xf32>
    %114 = vector.broadcast %111 : vector<1x128xf32> to vector<256x128xf32>
    %115 = arith.addf %113, %114 : vector<256x128xf32>
    %c0_71 = arith.constant 0 : index
    %c0_72 = arith.constant 0 : index
    %116 = vector.load %arg31[%c0_71, %c0_72] : memref<256x128xf32, #tpu.memory_space<vmem>>, vector<256x128xf32>
    tpu.vector_store %arg31[%c0_71, %c0_72], %115 {strides = array<i32>} : memref<256x128xf32, #tpu.memory_space<vmem>>, vector<256x128xf32>,
    %c0_73 = arith.constant 0 : index
    %c0_74 = arith.constant 0 : index
    %117 = vector.load %arg3[%c0_73, %c0_74] : memref<256x48xf32, #tpu.memory_space<vmem>>, vector<256x48xf32>
    %c0_75 = arith.constant 0 : index
    %c0_76 = arith.constant 0 : index
    %118 = vector.load %arg23[%c0_75, %c0_76] : memref<48x256xbf16, #tpu.memory_space<vmem>>, vector<48x256xbf16>
    %c0_77 = arith.constant 0 : index
    %c0_78 = arith.constant 0 : index
    %119 = vector.load %arg24[%c0_77, %c0_78] : memref<1x256xf32, #tpu.memory_space<vmem>>, vector<1x256xf32>
    %120 = arith.truncf %117 : vector<256x48xf32> to vector<256x48xbf16>
    %cst_79 = arith.constant dense<0.000000e+00> : vector<256x256xf32>
    %121 = tpu.matmul %120, %118, %cst_79 {dimension_numbers = #tpu.dot_dimension_numbers<[1], [0], [0], [1], [0, 0, 1, 1], [], []>} : vector<256x48xbf16>, vector<48x256xbf16>, vector<256x256xf32> -> vector<256x256xf32>
    %122 = vector.broadcast %119 : vector<1x256xf32> to vector<256x256xf32>
    %123 = arith.addf %121, %122 : vector<256x256xf32>
    %cst_80 = arith.constant 0.000000e+00 : f32
    %124 = vector.broadcast %cst_80 : f32 to vector<256x256xf32>
    %125 = arith.cmpf ogt, %123, %124 : vector<256x256xf32>
    %cst_81 = arith.constant 0.000000e+00 : f32
    %126 = vector.broadcast %cst_81 : f32 to vector<256x256xf32>
    %127 = arith.minimumf %123, %126 : vector<256x256xf32>
    %128 = math.exp %127 : vector<256x256xf32>
    %cst_82 = arith.constant 1.000000e+00 : f32
    %129 = vector.broadcast %cst_82 : f32 to vector<256x256xf32>
    %130 = arith.subf %128, %129 : vector<256x256xf32>
    %131 = arith.select %125, %123, %130 : vector<256x256xi1>, vector<256x256xf32>
    %c0_83 = arith.constant 0 : index
    %c0_84 = arith.constant 0 : index
    %132 = vector.load %arg25[%c0_83, %c0_84] : memref<256x256xbf16, #tpu.memory_space<vmem>>, vector<256x256xbf16>
    %c0_85 = arith.constant 0 : index
    %c0_86 = arith.constant 0 : index
    %133 = vector.load %arg26[%c0_85, %c0_86] : memref<1x256xf32, #tpu.memory_space<vmem>>, vector<1x256xf32>
    %134 = arith.truncf %131 : vector<256x256xf32> to vector<256x256xbf16>
    %cst_87 = arith.constant dense<0.000000e+00> : vector<256x256xf32>
    %135 = tpu.matmul %134, %132, %cst_87 {dimension_numbers = #tpu.dot_dimension_numbers<[1], [0], [0], [1], [0, 0, 1, 1], [], []>} : vector<256x256xbf16>, vector<256x256xbf16>, vector<256x256xf32> -> vector<256x256xf32>
    %136 = vector.broadcast %133 : vector<1x256xf32> to vector<256x256xf32>
    %137 = arith.addf %135, %136 : vector<256x256xf32>
    %cst_88 = arith.constant 0.000000e+00 : f32
    %138 = vector.broadcast %cst_88 : f32 to vector<256x256xf32>
    %139 = arith.cmpf ogt, %137, %138 : vector<256x256xf32>
    %cst_89 = arith.constant 0.000000e+00 : f32
    %140 = vector.broadcast %cst_89 : f32 to vector<256x256xf32>
    %141 = arith.minimumf %137, %140 : vector<256x256xf32>
    %142 = math.exp %141 : vector<256x256xf32>
    %cst_90 = arith.constant 1.000000e+00 : f32
    %143 = vector.broadcast %cst_90 : f32 to vector<256x256xf32>
    %144 = arith.subf %142, %143 : vector<256x256xf32>
    %145 = arith.select %139, %137, %144 : vector<256x256xi1>, vector<256x256xf32>
    %c0_91 = arith.constant 0 : index
    %c0_92 = arith.constant 0 : index
    %146 = vector.load %arg27[%c0_91, %c0_92] : memref<256x256xbf16, #tpu.memory_space<vmem>>, vector<256x256xbf16>
    %c0_93 = arith.constant 0 : index
    %c0_94 = arith.constant 0 : index
    %147 = vector.load %arg28[%c0_93, %c0_94] : memref<1x256xf32, #tpu.memory_space<vmem>>, vector<1x256xf32>
    %148 = arith.truncf %145 : vector<256x256xf32> to vector<256x256xbf16>
    %cst_95 = arith.constant dense<0.000000e+00> : vector<256x256xf32>
    %149 = tpu.matmul %148, %146, %cst_95 {dimension_numbers = #tpu.dot_dimension_numbers<[1], [0], [0], [1], [0, 0, 1, 1], [], []>} : vector<256x256xbf16>, vector<256x256xbf16>, vector<256x256xf32> -> vector<256x256xf32>
    %150 = vector.broadcast %147 : vector<1x256xf32> to vector<256x256xf32>
    %151 = arith.addf %149, %150 : vector<256x256xf32>
    %cst_96 = arith.constant 0.000000e+00 : f32
    %152 = vector.broadcast %cst_96 : f32 to vector<256x256xf32>
    %153 = arith.cmpf ogt, %151, %152 : vector<256x256xf32>
    %cst_97 = arith.constant 0.000000e+00 : f32
    %154 = vector.broadcast %cst_97 : f32 to vector<256x256xf32>
    %155 = arith.minimumf %151, %154 : vector<256x256xf32>
    %156 = math.exp %155 : vector<256x256xf32>
    %cst_98 = arith.constant 1.000000e+00 : f32
    %157 = vector.broadcast %cst_98 : f32 to vector<256x256xf32>
    %158 = arith.subf %156, %157 : vector<256x256xf32>
    %159 = arith.select %153, %151, %158 : vector<256x256xi1>, vector<256x256xf32>
    %c0_99 = arith.constant 0 : index
    %c0_100 = arith.constant 0 : index
    %160 = vector.load %arg29[%c0_99, %c0_100] : memref<256x128xbf16, #tpu.memory_space<vmem>>, vector<256x128xbf16>
    %c0_101 = arith.constant 0 : index
    %c0_102 = arith.constant 0 : index
    %161 = vector.load %arg30[%c0_101, %c0_102] : memref<1x128xf32, #tpu.memory_space<vmem>>, vector<1x128xf32>
    %162 = arith.truncf %159 : vector<256x256xf32> to vector<256x256xbf16>
    %cst_103 = arith.constant dense<0.000000e+00> : vector<256x128xf32>
    %163 = tpu.matmul %162, %160, %cst_103 {dimension_numbers = #tpu.dot_dimension_numbers<[1], [0], [0], [1], [0, 0, 1, 1], [], []>} : vector<256x256xbf16>, vector<256x128xbf16>, vector<256x128xf32> -> vector<256x128xf32>
    %164 = vector.broadcast %161 : vector<1x128xf32> to vector<256x128xf32>
    %165 = arith.addf %163, %164 : vector<256x128xf32>
    %c0_104 = arith.constant 0 : index
    %c0_105 = arith.constant 0 : index
    %166 = vector.load %arg32[%c0_104, %c0_105] : memref<256x128xf32, #tpu.memory_space<vmem>>, vector<256x128xf32>
    tpu.vector_store %arg32[%c0_104, %c0_105], %165 {strides = array<i32>} : memref<256x128xf32, #tpu.memory_space<vmem>>, vector<256x128xf32>,
    return
  }
  func.func @transform_0(%arg0: i32) -> (i32, i32) {
    %c0_i32 = arith.constant 0 : i32
    %c0_i32_0 = arith.constant 0 : i32
    return %arg0, %c0_i32 : i32, i32
  }
  func.func @transform_1(%arg0: i32) -> (i32, i32) {
    %c0_i32 = arith.constant 0 : i32
    %c0_i32_0 = arith.constant 0 : i32
    return %arg0, %c0_i32 : i32, i32
  }
  func.func @transform_2(%arg0: i32) -> (i32, i32) {
    %c0_i32 = arith.constant 0 : i32
    %c0_i32_0 = arith.constant 0 : i32
    return %arg0, %c0_i32 : i32, i32
  }
  func.func @transform_3(%arg0: i32) -> (i32, i32) {
    %c0_i32 = arith.constant 0 : i32
    %c0_i32_0 = arith.constant 0 : i32
    %c0_i32_1 = arith.constant 0 : i32
    return %c0_i32, %c0_i32_0 : i32, i32
  }
  func.func @transform_4(%arg0: i32) -> (i32, i32) {
    %c0_i32 = arith.constant 0 : i32
    %c0_i32_0 = arith.constant 0 : i32
    %c0_i32_1 = arith.constant 0 : i32
    return %c0_i32, %c0_i32_0 : i32, i32
  }
  func.func @transform_5(%arg0: i32) -> (i32, i32) {
    %c0_i32 = arith.constant 0 : i32
    %c0_i32_0 = arith.constant 0 : i32
    %c0_i32_1 = arith.constant 0 : i32
    return %c0_i32, %c0_i32_0 : i32, i32
  }
  func.func @transform_6(%arg0: i32) -> (i32, i32) {
    %c0_i32 = arith.constant 0 : i32
    %c0_i32_0 = arith.constant 0 : i32
    %c0_i32_1 = arith.constant 0 : i32
    return %c0_i32, %c0_i32_0 : i32, i32
  }
  func.func @transform_7(%arg0: i32) -> (i32, i32) {
    %c0_i32 = arith.constant 0 : i32
    %c0_i32_0 = arith.constant 0 : i32
    %c0_i32_1 = arith.constant 0 : i32
    return %c0_i32, %c0_i32_0 : i32, i32
  }
  func.func @transform_8(%arg0: i32) -> (i32, i32) {
    %c0_i32 = arith.constant 0 : i32
    %c0_i32_0 = arith.constant 0 : i32
    %c0_i32_1 = arith.constant 0 : i32
    return %c0_i32, %c0_i32_0 : i32, i32
  }
  func.func @transform_9(%arg0: i32) -> (i32, i32) {
    %c0_i32 = arith.constant 0 : i32
    %c0_i32_0 = arith.constant 0 : i32
    %c0_i32_1 = arith.constant 0 : i32
    return %c0_i32, %c0_i32_0 : i32, i32
  }
  func.func @transform_10(%arg0: i32) -> (i32, i32) {
    %c0_i32 = arith.constant 0 : i32
    %c0_i32_0 = arith.constant 0 : i32
    %c0_i32_1 = arith.constant 0 : i32
    return %c0_i32, %c0_i32_0 : i32, i32
  }
  func.func @transform_11(%arg0: i32) -> (i32, i32) {
    %c0_i32 = arith.constant 0 : i32
    %c0_i32_0 = arith.constant 0 : i32
    %c0_i32_1 = arith.constant 0 : i32
    return %c0_i32, %c0_i32_0 : i32, i32
  }
  func.func @transform_12(%arg0: i32) -> (i32, i32) {
    %c0_i32 = arith.constant 0 : i32
    %c0_i32_0 = arith.constant 0 : i32
    %c0_i32_1 = arith.constant 0 : i32
    return %c0_i32, %c0_i32_0 : i32, i32
  }
  func.func @transform_13(%arg0: i32) -> (i32, i32) {
    %c0_i32 = arith.constant 0 : i32
    %c0_i32_0 = arith.constant 0 : i32
    %c0_i32_1 = arith.constant 0 : i32
    return %c0_i32, %c0_i32_0 : i32, i32
  }
  func.func @transform_14(%arg0: i32) -> (i32, i32) {
    %c0_i32 = arith.constant 0 : i32
    %c0_i32_0 = arith.constant 0 : i32
    %c0_i32_1 = arith.constant 0 : i32
    return %c0_i32, %c0_i32_0 : i32, i32
  }
  func.func @transform_15(%arg0: i32) -> (i32, i32) {
    %c0_i32 = arith.constant 0 : i32
    %c0_i32_0 = arith.constant 0 : i32
    %c0_i32_1 = arith.constant 0 : i32
    return %c0_i32, %c0_i32_0 : i32, i32
  }
  func.func @transform_16(%arg0: i32) -> (i32, i32) {
    %c0_i32 = arith.constant 0 : i32
    %c0_i32_0 = arith.constant 0 : i32
    %c0_i32_1 = arith.constant 0 : i32
    return %c0_i32, %c0_i32_0 : i32, i32
  }
  func.func @transform_17(%arg0: i32) -> (i32, i32) {
    %c0_i32 = arith.constant 0 : i32
    %c0_i32_0 = arith.constant 0 : i32
    %c0_i32_1 = arith.constant 0 : i32
    return %c0_i32, %c0_i32_0 : i32, i32
  }
  func.func @transform_18(%arg0: i32) -> (i32, i32) {
    %c0_i32 = arith.constant 0 : i32
    %c0_i32_0 = arith.constant 0 : i32
    %c0_i32_1 = arith.constant 0 : i32
    return %c0_i32, %c0_i32_0 : i32, i32
  }
  func.func @transform_19(%arg0: i32) -> (i32, i32) {
    %c0_i32 = arith.constant 0 : i32
    %c0_i32_0 = arith.constant 0 : i32
    %c0_i32_1 = arith.constant 0 : i32
    return %c0_i32, %c0_i32_0 : i32, i32
  }
  func.func @transform_20(%arg0: i32) -> (i32, i32) {
    %c0_i32 = arith.constant 0 : i32
    %c0_i32_0 = arith.constant 0 : i32
    %c0_i32_1 = arith.constant 0 : i32
    return %c0_i32, %c0_i32_0 : i32, i32
  }
  func.func @transform_21(%arg0: i32) -> (i32, i32) {
    %c0_i32 = arith.constant 0 : i32
    %c0_i32_0 = arith.constant 0 : i32
    %c0_i32_1 = arith.constant 0 : i32
    return %c0_i32, %c0_i32_0 : i32, i32
  }
  func.func @transform_22(%arg0: i32) -> (i32, i32) {
    %c0_i32 = arith.constant 0 : i32
    %c0_i32_0 = arith.constant 0 : i32
    %c0_i32_1 = arith.constant 0 : i32
    return %c0_i32, %c0_i32_0 : i32, i32
  }
  func.func @transform_23(%arg0: i32) -> (i32, i32) {
    %c0_i32 = arith.constant 0 : i32
    %c0_i32_0 = arith.constant 0 : i32
    %c0_i32_1 = arith.constant 0 : i32
    return %c0_i32, %c0_i32_0 : i32, i32
  }
  func.func @transform_24(%arg0: i32) -> (i32, i32) {
    %c0_i32 = arith.constant 0 : i32
    %c0_i32_0 = arith.constant 0 : i32
    %c0_i32_1 = arith.constant 0 : i32
    return %c0_i32, %c0_i32_0 : i32, i32
  }
  func.func @transform_25(%arg0: i32) -> (i32, i32) {
    %c0_i32 = arith.constant 0 : i32
    %c0_i32_0 = arith.constant 0 : i32
    %c0_i32_1 = arith.constant 0 : i32
    return %c0_i32, %c0_i32_0 : i32, i32
  }
  func.func @transform_26(%arg0: i32) -> (i32, i32) {
    %c0_i32 = arith.constant 0 : i32
    %c0_i32_0 = arith.constant 0 : i32
    %c0_i32_1 = arith.constant 0 : i32
    return %c0_i32, %c0_i32_0 : i32, i32
  }
  func.func @transform_27(%arg0: i32) -> (i32, i32) {
    %c0_i32 = arith.constant 0 : i32
    %c0_i32_0 = arith.constant 0 : i32
    %c0_i32_1 = arith.constant 0 : i32
    return %c0_i32, %c0_i32_0 : i32, i32
  }
  func.func @transform_28(%arg0: i32) -> (i32, i32) {
    %c0_i32 = arith.constant 0 : i32
    %c0_i32_0 = arith.constant 0 : i32
    %c0_i32_1 = arith.constant 0 : i32
    return %c0_i32, %c0_i32_0 : i32, i32
  }
  func.func @transform_29(%arg0: i32) -> (i32, i32) {
    %c0_i32 = arith.constant 0 : i32
    %c0_i32_0 = arith.constant 0 : i32
    %c0_i32_1 = arith.constant 0 : i32
    return %c0_i32, %c0_i32_0 : i32, i32
  }
  func.func @transform_30(%arg0: i32) -> (i32, i32) {
    %c0_i32 = arith.constant 0 : i32
    %c0_i32_0 = arith.constant 0 : i32
    return %arg0, %c0_i32 : i32, i32
  }
  func.func @transform_31(%arg0: i32) -> (i32, i32) {
    %c0_i32 = arith.constant 0 : i32
    %c0_i32_0 = arith.constant 0 : i32
    return %arg0, %c0_i32 : i32, i32
  }
}

</mosaic_0001>

<bundles_post_ra>
// kernel: tpu_custom_call.1
= control target key start
LH: loop header
LB: loop body
LE: loop exit
PB: predicated region body
PF: predicated region fallthrough
CT: control target
= control target key end

     0   :  { %s12835_s6 = smov 1   ;;  %s12836_s10 = smov 2   ;;  %s17565_s0 = inlined_call_operand.smem [shape: u32[32], index: -1, kind: input, shape index: {}] }
   0x1   :  { %s12879_s5 = sld [smem:[%s17565_s0]]   ;;  %s12837_s14 = smov 3  }
   0x2   :  { %s12884_s9 = sld [smem:[%s17565_s0 + %s12835_s6]]   ;;  %s12838_s18 = smov 4  }
   0x3   :  { %s12889_s13 = sld [smem:[%s17565_s0 + %s12836_s10]]   ;;  %s12839_s22 = smov 5  }
   0x4   :  { %s12894_s17 = sld [smem:[%s17565_s0 + %s12837_s14]]   ;;  %s12840_s26 = smov 6  }
   0x5   :  { %s12899_s21 = sld [smem:[%s17565_s0 + %s12838_s18]]   ;;  %s12841_s30 = smov 7  }
   0x6   :  { %s12904_s25 = sld [smem:[%s17565_s0 + %s12839_s22]]   ;;  %s12842_s4 = smov 8  }
   0x7   :  { %17583 = sst [smem:[#allocation8_spill]] %s12879_s5  ;;  %s12843_s10 = smov 9  }
   0x8   :  { %17584 = sst [smem:[#allocation9_spill]] %s12884_s9  ;;  %s12844_s15 = smov 10  }
   0x9   :  { %17585 = sst [smem:[#allocation10_spill]] %s12889_s13  ;;  %s12845_s20 = smov 11  }
   0xa   :  { %s12909_s29 = sld [smem:[%s17565_s0 + %s12840_s26]]   ;;  %s12846_s26 = smov 12  }
   0xb   :  { %s12914_s3 = sld [smem:[%s17565_s0 + %s12841_s30]]   ;;  %s12847_s1 = smov 13  }
   0xc   :  { %s12919_s8 = sld [smem:[%s17565_s0 + %s12842_s4]]   ;;  %s12848_s7 = smov 14  }
   0xd   :  { %s12924_s14 = sld [smem:[%s17565_s0 + %s12843_s10]]   ;;  %s12850_s22 = smov 16  }
   0xe   :  { %s12929_s19 = sld [smem:[%s17565_s0 + %s12844_s15]]   ;;  %s12849_s15 = smov 15  }
   0xf   :  { %s12934_s24 = sld [smem:[%s17565_s0 + %s12845_s20]]   ;;  %s12851_s28 = smov 17  }
  0x10   :  { %s12939_s30 = sld [smem:[%s17565_s0 + %s12846_s26]]  }
  0x11   :  { %17586 = sst [smem:[#allocation11_spill]] %s12914_s3 }
  0x12   :  { %17587 = sst [smem:[#allocation12_spill]] %s12919_s8 }
  0x13   :  { %s12944_s6 = sld [smem:[%s17565_s0 + %s12847_s1]]  }
  0x14   :  { %s12949_s12 = sld [smem:[%s17565_s0 + %s12848_s7]]   ;;  %s12852_s7 = smov 18  }
  0x15   :  { %s12954_s20 = sld [smem:[%s17565_s0 + %s12849_s15]]   ;;  %s12853_s15 = smov 19  }
  0x16   :  { %s12959_s27 = sld [smem:[%s17565_s0 + %s12850_s22]]   ;;  %s12854_s22 = smov 20  }
  0x17   :  { %s12964_s4 = sld [smem:[%s17565_s0 + %s12851_s28]]   ;;  %s12855_s28 = smov 21  }
  0x18   :  { %s12969_s13 = sld [smem:[%s17565_s0 + %s12852_s7]]   ;;  %s12856_s7 = smov 22  }
  0x19   :  { %17588 = sst [smem:[#allocation13_spill]] %s12944_s6 }
  0x1a   :  { %17589 = sst [smem:[#allocation14_spill]] %s12949_s12 }
  0x1b   :  { %17590 = sst [smem:[#allocation15_spill]] %s12954_s20 }
  0x1c   :  { %17591 = sst [smem:[#allocation16_spill]] %s12959_s27 }
  0x1d   :  { %17592 = sst [smem:[#allocation17_spill]] %s12964_s4 }
  0x1e   :  { %17593 = sst [smem:[#allocation18_spill]] %s12969_s13 }
  0x1f   :  { %s12974_s20 = sld [smem:[%s17565_s0 + %s12853_s15]]   ;;  %s12857_s15 = smov 23  }
  0x20   :  { %s12979_s27 = sld [smem:[%s17565_s0 + %s12854_s22]]   ;;  %s12858_s22 = smov 24  }
  0x21   :  { %s12984_s4 = sld [smem:[%s17565_s0 + %s12855_s28]]   ;;  %s12859_s28 = smov 25  }
  0x22   :  { %s12989_s13 = sld [smem:[%s17565_s0 + %s12856_s7]]   ;;  %s12860_s7 = smov 26  }
  0x25   :  { %17594 = sst [smem:[#allocation19_spill]] %s12974_s20 }
  0x26   :  { %17595 = sst [smem:[#allocation20_spill]] %s12979_s27 }
  0x27   :  { %17596 = sst [smem:[#allocation21_spill]] %s12984_s4 }
  0x28   :  { %17597 = sst [smem:[#allocation22_spill]] %s12989_s13 }
  0x29   :  { %s12994_s20 = sld [smem:[%s17565_s0 + %s12857_s15]]   ;;  %s12861_s15 = smov 27  }
  0x2a   :  { %s12999_s27 = sld [smem:[%s17565_s0 + %s12858_s22]]   ;;  %s12862_s22 = smov 28  }
  0x2b   :  { %s13004_s4 = sld [smem:[%s17565_s0 + %s12859_s28]]   ;;  %s12863_s28 = smov 29  }
  0x2c   :  { %s13009_s13 = sld [smem:[%s17565_s0 + %s12860_s7]]   ;;  %s12864_s7 = smov 30  }
  0x2f   :  { %17598 = sst [smem:[#allocation23_spill]] %s12994_s20 }
  0x30   :  { %17599 = sst [smem:[#allocation24_spill]] %s12999_s27 }
  0x31   :  { %17600 = sst [smem:[#allocation25_spill]] %s13004_s4 }
  0x32   :  { %17601 = sst [smem:[#allocation26_spill]] %s13009_s13 }
  0x33   :  { %s13014_s20 = sld [smem:[%s17565_s0 + %s12861_s15]]   ;;  %s12865_s15 = smov 31  }
  0x34   :  { %s13019_s27 = sld [smem:[%s17565_s0 + %s12862_s22]]  }
  0x35   :  { %s13024_s4 = sld [smem:[%s17565_s0 + %s12863_s28]]  }
  0x36   :  { %s13029_s13 = sld [smem:[%s17565_s0 + %s12864_s7]]  }
  0x39   :  { %17602 = sst [smem:[#allocation27_spill]] %s13014_s20 }
  0x3a   :  { %s13034_s20 = sld [smem:[%s17565_s0 + %s12865_s15]]  }
  0x3b   :  { %17603 = sst [smem:[#allocation28_spill]] %s13024_s4 }
  0x3c   :  { %69 = vsyncpa [#allocation3], 0 }
  0x3d   :  { %71 = vsyncpa [#allocation3 + $0x1], 0 }
  0x3e   :  { %72 = vsyncpa [#allocation5], 0 }
  0x3f   :  { %74 = vsyncpa [#allocation5 + $0x1], 0  ;;  %s13036_s22 = smov 0   ;;  %s13038_s23 = smov 0  }
  0x40   :  { %s13040_s26 = smov 0   ;;  %s13042_s28 = smov 0  }
  0x41 LB: > { %s17604_s6 = sld [smem:[#allocation13_spill]]  ;;  %s17605_s3 = sld [smem:[#allocation11_spill]]  ;;  %s12825_s23 = sphi %s13038_s23, %s17633_s23   ;;  %s12821_s22 = sphi %s13036_s22, %s17632_s22   ;;  %s12833_s28 = sphi %s13042_s28, %s17635_s28   ;;  %s12829_s26 = sphi %s13040_s26, %s17634_s26  }
  0x42   : > { %s13057_s0 = sadd.s32 4294967295, %s12833_s28   ;;  %s9690_s1 = sadd.s32 4294967294, %s12833_s28  }
  0x43   : > { %s13061_s2 = sadd.s32 1, %s12833_s28   ;;  %s732_s7 = sadd.s32 1, %s12829_s26 }
  0x44   : > { %s729_s10 = ssub.s32 %s12833_s28, %s13061_s2  ;;  %p742_p0 = scmp.ne.s32.totalorder %s12829_s26, %s12825_s23 }
  0x45   : > { %p730_p1 = scmp.eq.s32.totalorder %s729_s10, 0  ;;  %p743_p2 = scmp.eq.s32.totalorder %s13057_s0, 1 }
  0x46   : > { %p748_p3 = scmp.ne.s32.totalorder %s12825_s23, %s12821_s22  ;;  %p749_p4 = scmp.eq.s32.totalorder %s9690_s1, 1 }
  0x47   : > { %s13072_s11 = scalar_select %p730_p1, %s12829_s26, %s732_s7  }
  0x48   : > { %p13074_p5 = por %p743_p2, %p742_p0  ;;  %p13078_p6 = por %p749_p4, %p748_p3 }
  0x49   : > { %p9693_p7 = scmp.ge.s32.totalorder %s12833_s28, 1  ;;  %p901_p8 = scmp.lt.s32.totalorder %s12833_s28, 3 }
  0x4b   : > { %p902_p9 = pnand %p9693_p7, %p901_p8 }
  0x4c   : > { %v11274_v0 = vld [vmem:[%s12894_s17 + $0x4] ss:$8 sps:$4 sm:$0xff] (!%p902_p9)   ;;  %v11276_v1 = vld [vmem:[%s12894_s17] ss:$8 sps:$4 sm:$0xff] (!%p902_p9)   ;;  %v12866_v2 = vmov (!%p902_p9), 0   ;;  %s9696_s18 = sshll.u32 (!%p902_p9), %s13057_s0, 5 }
  0x4d   : > { %905 = sbr.rel (%p902_p9) target bundleno = 3080 (0xc08), region = 140  ;;  %1243 = vmatprep.mubr.bf16.mxu0 (!%p902_p9), %v12866_v2  ;;  %1211 = vmatprep.subr.bf16.mxu0 (!%p902_p9), %v11274_v0  ;;  %s17608_s5 = sld [smem:[#allocation8_spill]] (!%p902_p9)  ;;  %v11277_v3 = vld [vmem:[%s12894_s17 + $0x14] ss:$8 sps:$4 sm:$0xff] (!%p902_p9)   ;;  %v11279_v4 = vld [vmem:[%s12894_s17 + $0x10] ss:$8 sps:$4 sm:$0xff] (!%p902_p9)  }
  0x4e   : > { %p997_p10 = scmp.lt.s32.totalorder (!%p902_p9), %s9696_s18, 63  ;;  %1212 = vmatpush1.bf16.msra.mxu0 (!%p902_p9), %v11276_v1  ;;  %v11280_v5 = vld [vmem:[%s12894_s17 + $0x24] ss:$8 sps:$4 sm:$0xff] (!%p902_p9)   ;;  %v11282_v6 = vld [vmem:[%s12894_s17 + $0x20] ss:$8 sps:$4 sm:$0xff] (!%p902_p9)   ;;  %vm1204_vm0 = vcmask (!%p902_p9), 1045504  }
  0x4f   : > { %1213 = vmatprep.subr.bf16.mxu0 (!%p902_p9), %v11277_v3  ;;  %v11283_v7 = vld [vmem:[%s12894_s17 + $0x34] ss:$8 sps:$4 sm:$0x3f] (!%p902_p9)   ;;  %v11285_v8 = vld [vmem:[%s12894_s17 + $0x30] ss:$8 sps:$4 sm:$0x3f] (!%p902_p9)  }
  0x50   : > { %v11286_v9 = vld [vmem:[%s12904_s25 + $0x40] sm:$0xff] (!%p902_p9)   ;;  %v1206_v13 = vsel (!%p902_p9), %vm1204_vm0, %v11285_v8, 0  ;;  %vm1155_vm1 = vcmask (!%p902_p9), 490496   ;;  %v11288_v17 = vld [vmem:[%s12904_s25 + $0x48] sm:$0xff] (!%p902_p9)   ;;  %v11290_v19 = vld [vmem:[%s12904_s25 + $0x50] sm:$0xff] (!%p902_p9)   ;;  %s17609_s8 = sld [smem:[#allocation12_spill]] (!%p902_p9) }
  0x51   : > { %v11287_v10 = vld [vmem:[%s12904_s25] sm:$0xff] (!%p902_p9)   ;;  %11116 = vmatprep.subr.bf16.mxu1 (!%p902_p9), %v11286_v9  ;;  %v11289_v18 = vld [vmem:[%s12904_s25 + $0x8] sm:$0xff] (!%p902_p9)   ;;  %v11291_v21 = vld [vmem:[%s12904_s25 + $0x10] sm:$0xff] (!%p902_p9)   ;;  %s17610_s12 = sld [smem:[#allocation14_spill]] (!%p902_p9)  ;;  %s17611_s9 = sld [smem:[#allocation9_spill]] (!%p902_p9) }
  0x52   : > { %1214 = vmatpush1.bf16.msra.mxu0 (!%p902_p9), %v11279_v4  ;;  %11124 = vmatpush3.bf16.msra.mxu1 (!%p902_p9), %v11287_v10  ;;  %v11292_v22 = vld [vmem:[%s12904_s25 + $0x58] sm:$0xff] (!%p902_p9)   ;;  %v11294_v26 = vld [vmem:[%s12904_s25 + $0x60] sm:$0xff] (!%p902_p9)   ;;  %v11296_v29 = vld [vmem:[%s12904_s25 + $0x68] sm:$0xff] (!%p902_p9)   ;;  %s17612_s10 = sld [smem:[#allocation16_spill]] (!%p902_p9)  ;;  %s17626_s4 = sld [smem:[#allocation28_spill]] (!%p902_p9) }
  0x53   : > { %1215 = vmatprep.subr.bf16.mxu0 (!%p902_p9), %v11280_v5  ;;  %11117 = vmatprep.subr.bf16.mxu1 (!%p902_p9), %v11288_v17  ;;  %v11293_v25 = vld [vmem:[%s12904_s25 + $0x18] sm:$0xff] (!%p902_p9)   ;;  %v11295_v28 = vld [vmem:[%s12904_s25 + $0x20] sm:$0xff] (!%p902_p9)   ;;  %v11297_v32 = vld [vmem:[%s12904_s25 + $0x28] sm:$0xff] (!%p902_p9)  }
  0x54   : > { %s17637_s18 = smov (!%p997_p10, %s9696_s18), 63  ;;  %v11298_v33 = vld [vmem:[%s12904_s25 + $0x70] sm:$0xff]   ;;  %v11300_v3 = vld [vmem:[%s12904_s25 + $0x78] sm:$0xff]  }
  0x55   : > { %s13095_s1 = sshll.u32 %s17637_s18, 3  ;;  %v11299_v34 = vld [vmem:[%s12904_s25 + $0x30] sm:$0xff]  }
  0x56   : > { %s13100_s7 = scalar_lea.vmem %s17608_s5, %s13095_s1  ;;  %1216 = vmatpush1.bf16.msra.mxu0 %v11282_v6  ;;  %11125 = vmatpush3.bf16.msra.mxu1 %v11289_v18  ;;  %v11301_v6 = vld [vmem:[%s12904_s25 + $0x38] sm:$0xff]   ;;  %s17618_s5 = sld [smem:[#allocation10_spill]] }
  0x57   : > { %v1017_v11 = vld [vmem:[%s13100_s7] sm:$0xff]  ;;  %v1018_v12 = vld [vmem:[%s13100_s7 + $0x8] sm:$0xff]  ;;  %9710 = vmatprep.subr.msk.bf16.mxu0 %vm1204_vm0, %v11283_v7  ;;  %v1019_v15 = vld [vmem:[%s13100_s7 + $0x10] sm:$0xff]  ;;  %11118 = vmatprep.subr.bf16.mxu1 %v11290_v19  ;;  %s14471_s18 = scalar_lea.vmem %s17611_s9, %s13095_s1 }
  0x58   : > { %v1090_v14 = vpack.c.bf16 %v1018_v12, %v1017_v11  ;;  %v1020_v16 = vld [vmem:[%s13100_s7 + $0x18] sm:$0xff]  ;;  %v1021_v23 = vld [vmem:[%s13100_s7 + $0x20] sm:$0xff]  ;;  %v1022_v24 = vld [vmem:[%s13100_s7 + $0x28] sm:$0xff]  ;;  %v1107_v11 = vlaneseq }
  0x59   : > { %v1091_v20 = vpack.c.bf16 %v1020_v16, %v1019_v15  ;;  %v1092_v27 = vpack.c.bf16 %v1022_v24, %v1021_v23  ;;  %v1023_v30 = vld [vmem:[%s13100_s7 + $0x30] sm:$0xff]  ;;  %v1024_v31 = vld [vmem:[%s13100_s7 + $0x38] sm:$0xff]  ;;  %v1025_v36 = vld [vmem:[%s13100_s7 + $0x40] sm:$0xff] }
  0x5a   : > { %1218 = vmatpush1.bf16.msra.mxu0 %v1206_v13  ;;  %11126 = vmatpush3.bf16.msra.mxu1 %v11291_v21  ;;  %v1093_v35 = vpack.c.bf16 %v1024_v31, %v1023_v30  ;;  %v1026_v37 = vld [vmem:[%s13100_s7 + $0x48] sm:$0xff]  ;;  %v1027_v39 = vld [vmem:[%s13100_s7 + $0x50] sm:$0xff]  ;;  %v1028_v40 = vld [vmem:[%s13100_s7 + $0x58] sm:$0xff]  ;;  %v1108_v12 = vshrl.u32 %v1107_v11, 7 }
  0x5b   : > { %10608 = vmatprep.subr.bf16.mxu0 %v11286_v9  ;;  %11119 = vmatprep.subr.bf16.mxu1 %v11292_v22  ;;  %v1094_v38 = vpack.c.bf16 %v1026_v37, %v1025_v36  ;;  %v1095_v41 = vpack.c.bf16 %v1028_v40, %v1027_v39  ;;  %v1029_v42 = vld [vmem:[%s13100_s7 + $0x60] sm:$0xff]  ;;  %v1030_v43 = vld [vmem:[%s13100_s7 + $0x68] sm:$0xff]  ;;  %v1031_v45 = vld [vmem:[%s13100_s7 + $0x70] sm:$0xff] }
  0x5c   : > { %v1096_v44 = vpack.c.bf16 %v1030_v43, %v1029_v42  ;;  %v1032_v46 = vld [vmem:[%s13100_s7 + $0x78] sm:$0xff]  ;;  %v1033_v48 = vld [vmem:[%s13100_s7 + $0x80] sm:$0xff]  ;;  %v1034_v49 = vld [vmem:[%s13100_s7 + $0x88] sm:$0xff]  ;;  %v13179_v13 = vsub.s32 0, %v1108_v12  ;;  %v13182_v15 = vsub.s32 1, %v1108_v12 }
  0x5d   : > { %9711 = vmatmul.mubr.msk.bf16.vlgmr.msra.gmra.mrb[0].mxu0 %vm1155_vm1, %v1090_v14  ;;  %v1097_v47 = vpack.c.bf16 %v1032_v46, %v1031_v45  ;;  %v1098_v50 = vpack.c.bf16 %v1034_v49, %v1033_v48  ;;  %v1035_v51 = vld [vmem:[%s13100_s7 + $0x90] sm:$0xff]  ;;  %v1036_v52 = vld [vmem:[%s13100_s7 + $0x98] sm:$0xff]  ;;  %v1037_v54 = vld [vmem:[%s13100_s7 + $0xa0] sm:$0xff] }
  0x5e   : > { %1253 = vmatprep.mubr.bf16.mxu0 %v12866_v2  ;;  %10609 = vmatpush3.bf16.msra.mxu0 %v11287_v10  ;;  %v1099_v53 = vpack.c.bf16 %v1036_v52, %v1035_v51  ;;  %v1038_v55 = vld [vmem:[%s13100_s7 + $0xa8] sm:$0xff]  ;;  %v1039_v57 = vld [vmem:[%s13100_s7 + $0xb0] sm:$0xff]  ;;  %v1040_v58 = vld [vmem:[%s13100_s7 + $0xb8] sm:$0xff] }
  0x5f   : > { %10610 = vmatprep.subr.bf16.mxu0 %v11288_v17  ;;  %11127 = vmatpush3.bf16.msra.mxu1 %v11293_v25  ;;  %v1100_v56 = vpack.c.bf16 %v1038_v55, %v1037_v54  ;;  %v1101_v59 = vpack.c.bf16 %v1040_v58, %v1039_v57  ;;  %v1041_v60 = vld [vmem:[%s13100_s7 + $0xc0] sm:$0xff]  ;;  %v1042_v61 = vld [vmem:[%s13100_s7 + $0xc8] sm:$0xff]  ;;  %v1043_v63 = vld [vmem:[%s13100_s7 + $0xd0] sm:$0xff] }
  0x60   : > { %11120 = vmatprep.subr.bf16.mxu1 %v11294_v26  ;;  %v1102_v62 = vpack.c.bf16 %v1042_v61, %v1041_v60  ;;  %v1044_v0 = vld [vmem:[%s13100_s7 + $0xd8] sm:$0xff]  ;;  %v1045_v4 = vld [vmem:[%s13100_s7 + $0xe0] sm:$0xff]  ;;  %v1046_v5 = vld [vmem:[%s13100_s7 + $0xe8] sm:$0xff] }
  0x61   : > { %v1103_v1 = vpack.c.bf16 %v1044_v0, %v1043_v63  ;;  %v1104_v7 = vpack.c.bf16 %v1046_v5, %v1045_v4  ;;  %v1047_v8 = vld [vmem:[%s13100_s7 + $0xf0] sm:$0xff]  ;;  %v1048_v9 = vld [vmem:[%s13100_s7 + $0xf8] sm:$0xff]  ;;  %v1089_v14 = vld [vmem:[%s12899_s21] sm:$0x3]  ;;  %s17613_s7 = sld [smem:[#allocation15_spill]] }
  0x62   : > { %10611 = vmatpush3.bf16.msra.mxu0 %v11289_v18  ;;  %v1105_v10 = vpack.c.bf16 %v1048_v9, %v1047_v8  ;;  %v13185_v16 = vrot.slane %v1089_v14, %v13179_v13  ;;  %v13188_v17 = vrot.slane %v1089_v14, %v13182_v15  ;;  %v11304_v4 = vld [vmem:[%s17605_s3 + $0x4] ss:$8 sps:$4 sm:$0xff]  }
  0x63   : > { %10612 = vmatprep.subr.bf16.mxu0 %v11290_v19  ;;  %11128 = vmatpush3.bf16.msra.mxu1 %v11295_v28 }
  0x64   : > { %11121 = vmatprep.subr.bf16.mxu1 %v11296_v29 }
  0x65   : > { %9712 = vmatmul.mubr.msk.bf16.gmra.mrb[4].mxu0 %vm1155_vm1, %v1091_v20 }
  0x66   : > { %1263 = vmatprep.mubr.bf16.mxu0 %v12866_v2  ;;  %10613 = vmatpush3.bf16.msra.mxu0 %v11291_v21 }
  0x67   : > { %10614 = vmatprep.subr.bf16.mxu0 %v11292_v22  ;;  %11129 = vmatpush3.bf16.msra.mxu1 %v11297_v32 }
  0x68   : > { %11122 = vmatprep.subr.bf16.mxu1 %v11298_v33 }
  0x6a   : > { %10615 = vmatpush3.bf16.msra.mxu0 %v11293_v25 }
  0x6b   : > { %10616 = vmatprep.subr.bf16.mxu0 %v11294_v26  ;;  %11130 = vmatpush3.bf16.msra.mxu1 %v11299_v34 }
  0x6c   : > { %11123 = vmatprep.subr.bf16.mxu1 %v11300_v3 }
  0x6d   : > { %9713 = vmatmul.mubr.msk.bf16.gmra.mrb[8].mxu0 %vm1155_vm1, %v1092_v27 }
  0x6e   : > { %1273 = vmatprep.mubr.bf16.mxu0 %v12866_v2  ;;  %10617 = vmatpush3.bf16.msra.mxu0 %v11295_v28 }
  0x6f   : > { %10618 = vmatprep.subr.bf16.mxu0 %v11296_v29  ;;  %11131 = vmatpush3.bf16.msra.mxu1 %v11301_v6 }
  0x72   : > { %10619 = vmatpush3.bf16.msra.mxu0 %v11297_v32 }
  0x73   : > { %10620 = vmatprep.subr.bf16.mxu0 %v11298_v33 }
  0x75   : > { %9714 = vmatmul.mubr.msk.bf16.gmra.mrb[12].mxu0 %vm1155_vm1, %v1093_v35 }
  0x76   : > { %1283 = vmatprep.mubr.bf16.mxu0 %v12866_v2  ;;  %10621 = vmatpush3.bf16.msra.mxu0 %v11299_v34 }
  0x77   : > { %10622 = vmatprep.subr.bf16.mxu0 %v11300_v3 }
  0x7a   : > { %10623 = vmatpush3.bf16.msra.mxu0 %v11301_v6 }
  0x7b   : > { %2432 = vmatprep.subr.bf16.mxu0 %v11304_v4 }
  0x7d   : > { %9715 = vmatmul.mubr.msk.bf16.gmra.mrb[16].mxu0 %vm1155_vm1, %v1094_v38 }
  0x7e   : > { %1293 = vmatprep.mubr.bf16.mxu0 %v12866_v2 }
  0x85   : > { %9716 = vmatmul.mubr.msk.bf16.gmra.mrb[20].mxu0 %vm1155_vm1, %v1095_v41 }
  0x86   : > { %1303 = vmatprep.mubr.bf16.mxu0 %v12866_v2 }
  0x8d   : > { %9717 = vmatmul.mubr.msk.bf16.gmra.mrb[24].mxu0 %vm1155_vm1, %v1096_v44 }
  0x8e   : > { %1313 = vmatprep.mubr.bf16.mxu0 %v12866_v2 }
  0x95   : > { %9718 = vmatmul.mubr.msk.bf16.gmra.mrb[28].mxu0 %vm1155_vm1, %v1097_v47 }
  0x96   : > { %1323 = vmatprep.mubr.bf16.mxu0 %v12866_v2 }
  0x9d   : > { %9719 = vmatmul.mubr.msk.bf16.gmra.mrb[32].mxu0 %vm1155_vm1, %v1098_v50 }
  0x9e   : > { %1333 = vmatprep.mubr.bf16.mxu0 %v12866_v2 }
  0xa5   : > { %9720 = vmatmul.mubr.msk.bf16.gmra.mrb[36].mxu0 %vm1155_vm1, %v1099_v53 }
  0xa6   : > { %1343 = vmatprep.mubr.bf16.mxu0 %v12866_v2 }
  0xad   : > { %9721 = vmatmul.mubr.msk.bf16.gmra.mrb[40].mxu0 %vm1155_vm1, %v1100_v56 }
  0xae   : > { %1353 = vmatprep.mubr.bf16.mxu0 %v12866_v2 }
  0xb5   : > { %9722 = vmatmul.mubr.msk.bf16.gmra.mrb[44].mxu0 %vm1155_vm1, %v1101_v59 }
  0xb6   : > { %1363 = vmatprep.mubr.bf16.mxu0 %v12866_v2 }
  0xbd   : > { %9723 = vmatmul.mubr.msk.bf16.gmra.mrb[48].mxu0 %vm1155_vm1, %v1102_v62 }
  0xbe   : > { %1373 = vmatprep.mubr.bf16.mxu0 %v12866_v2 }
  0xc5   : > { %9724 = vmatmul.mubr.msk.bf16.gmra.mrb[52].mxu0 %vm1155_vm1, %v1103_v1 }
  0xc6   : > { %1383 = vmatprep.mubr.bf16.mxu0 %v12866_v2 }
  0xcd   : > { %9725 = vmatmul.mubr.msk.bf16.gmra.mrb[56].mxu0 %vm1155_vm1, %v1104_v7 }
  0xce   : > { %1393 = vmatprep.mubr.bf16.mxu0 %v12866_v2 }
  0xd5   : > { %9726 = vmatmul.mubr.msk.bf16.gmra.mrb[60].mxu0 %vm1155_vm1, %v1105_v10 }
 0x130   : > { %v1245_v18 = vpop.f32.mrb[0].mxu0 }
 0x131   : > { %v1246_v19 = vadd.f32 %v1245_v18, %v13185_v16  ;;  %v1247_v20 = vpop.f32.mrb[1].mxu0 }
 0x132   : > { %v13192_v21 = vadd.f32 %v1247_v20, %v13188_v17  ;;  %v1249_v22 = vpop.f32.mrb[2].mxu0 }
 0x133   : > { %v1468_v23 = vmin.f32 %v1246_v19, 0.0  ;;  %v1250_v24 = vadd.f32 %v1249_v22, %v13185_v16  ;;  %v1251_v25 = vpop.f32.mrb[3].mxu0  ;;  %vm1404_vm2 = vcmp.gt.f32.partialorder %v1246_v19, 0.0 }
 0x134   : > { %v1469_v26 = vmin.f32 %v13192_v21, 0.0  ;;  %v13197_v27 = vadd.f32 %v1251_v25, %v13188_v17  ;;  %vm1405_vm3 = vcmp.gt.f32.partialorder %v13192_v21, 0.0  ;;  %v11302_v25 = vld [vmem:[%s17605_s3] ss:$8 sps:$4 sm:$0xff]  }
 0x135   : > { %v1532_v28 = vmul.f32 1.442695, %v1468_v23  ;;  %v1470_v29 = vmin.f32 %v1250_v24, 0.0  ;;  %vm1406_vm4 = vcmp.gt.f32.partialorder %v1250_v24, 0.0 }
 0x136   : > { %v1534_v30 = vmul.f32 1.442695, %v1469_v26  ;;  %v1471_v31 = vmin.f32 %v13197_v27, 0.0  ;;  %vm1407_vm5 = vcmp.gt.f32.partialorder %v13197_v27, 0.0 }
 0x137   : > { %11587 = vpow2.f32 %v1532_v28  ;;  %v1536_v32 = vmul.f32 1.442695, %v1470_v29 }
 0x138   : > { %11589 = vpow2.f32 %v1534_v30  ;;  %v1538_v33 = vmul.f32 1.442695, %v1471_v31  ;;  %v1255_v34 = vpop.f32.mrb[4].mxu0 }
 0x139   : > { %11591 = vpow2.f32 %v1536_v32  ;;  %v13201_v35 = vadd.f32 %v1255_v34, %v13185_v16  ;;  %v1257_v36 = vpop.f32.mrb[5].mxu0 }
 0x13a   : > { %11593 = vpow2.f32 %v1538_v33  ;;  %v13204_v37 = vadd.f32 %v1257_v36, %v13188_v17  ;;  %v1259_v38 = vpop.f32.mrb[6].mxu0 }
 0x13b   : > { %v1472_v39 = vmin.f32 %v13201_v35, 0.0  ;;  %v13208_v40 = vadd.f32 %v1259_v38, %v13185_v16  ;;  %v1261_v41 = vpop.f32.mrb[7].mxu0  ;;  %vm1408_vm6 = vcmp.gt.f32.partialorder %v13201_v35, 0.0 }
 0x13c   : > { %v1473_v42 = vmin.f32 %v13204_v37, 0.0  ;;  %v13212_v43 = vadd.f32 %v1261_v41, %v13188_v17  ;;  %vm1409_vm7 = vcmp.gt.f32.partialorder %v13204_v37, 0.0 }
 0x13d   : > { %v1540_v44 = vmul.f32 1.442695, %v1472_v39  ;;  %v1474_v45 = vmin.f32 %v13208_v40, 0.0  ;;  %vm1410_vm8 = vcmp.gt.f32.partialorder %v13208_v40, 0.0 }
 0x13e   : > { %v1542_v46 = vmul.f32 1.442695, %v1473_v42  ;;  %v1475_v47 = vmin.f32 %v13212_v43, 0.0  ;;  %vm1411_vm9 = vcmp.gt.f32.partialorder %v13212_v43, 0.0 }
 0x13f   : > { %11595 = vpow2.f32 %v1540_v44  ;;  %v1544_v48 = vmul.f32 1.442695, %v1474_v45  ;;  %v11305_v45 = vld [vmem:[%s17605_s3 + $0x10] ss:$8 sps:$4 sm:$0xff]  }
 0x140   : > { %11597 = vpow2.f32 %v1542_v46  ;;  %v1546_v49 = vmul.f32 1.442695, %v1475_v47  ;;  %v1265_v50 = vpop.f32.mrb[8].mxu0 }
 0x141   : > { %v11588_v51 = vpop.eup %11587  ;;  %11599 = vpow2.f32 %v1544_v48  ;;  %v13217_v52 = vadd.f32 %v1265_v50, %v13185_v16  ;;  %v1267_v53 = vpop.f32.mrb[9].mxu0  ;;  %v11310_v50 = vld [vmem:[%s17605_s3 + $0x24] ss:$8 sps:$4 sm:$0xff]  }
 0x142   : > { %v11590_v54 = vpop.eup %11589  ;;  %v9727_v55 = vadd.f32 -1.0, %v11588_v51  ;;  %11601 = vpow2.f32 %v1546_v49  ;;  %v13220_v56 = vadd.f32 %v1267_v53, %v13188_v17  ;;  %v1269_v57 = vpop.f32.mrb[10].mxu0 }
 0x143   : > { %v11592_v58 = vpop.eup %11591  ;;  %v1476_v59 = vmin.f32 %v13217_v52, 0.0  ;;  %v13225_v60 = vadd.f32 %v1269_v57, %v13185_v16  ;;  %v1271_v61 = vpop.f32.mrb[11].mxu0  ;;  %v9728_v62 = vadd.f32 -1.0, %v11590_v54  ;;  %vm1412_vm10 = vcmp.gt.f32.partialorder %v13217_v52, 0.0 }
 0x144   : > { %v11594_v63 = vpop.eup %11593  ;;  %v9729_v0 = vadd.f32 -1.0, %v11592_v58  ;;  %v1477_v1 = vmin.f32 %v13220_v56, 0.0  ;;  %v13229_v3 = vadd.f32 %v1271_v61, %v13188_v17  ;;  %v1724_v5 = vsel %vm1404_vm2, %v1246_v19, %v9727_v55 }
 0x145   : > { %v1548_v6 = vmul.f32 1.442695, %v1476_v59  ;;  %v1478_v7 = vmin.f32 %v13225_v60, 0.0  ;;  %v9730_v8 = vadd.f32 -1.0, %v11594_v63  ;;  %v1725_v12 = vsel %vm1405_vm3, %v13192_v21, %v9728_v62  ;;  %v11307_v21 = vld [vmem:[%s17605_s3 + $0x14] ss:$8 sps:$4 sm:$0xff]  }
 0x146   : > { %v1726_v9 = vsel %vm1406_vm4, %v1250_v24, %v9729_v0  ;;  %v1550_v10 = vmul.f32 1.442695, %v1477_v1  ;;  %v1479_v11 = vmin.f32 %v13229_v3, 0.0  ;;  %v11308_v63 = vld [vmem:[%s17605_s3 + $0x20] ss:$8 sps:$4 sm:$0xff]   ;;  %vm1413_vm11 = vcmp.gt.f32.partialorder %v13220_v56, 0.0 }
 0x147   : > { %v1821_v14 = vpack.c.bf16 %v1726_v9, %v1724_v5  ;;  %11603 = vpow2.f32 %v1548_v6  ;;  %v1552_v18 = vmul.f32 1.442695, %v1478_v7  ;;  %v1727_v19 = vsel %vm1407_vm5, %v13197_v27, %v9730_v8 }
 0x148   : > { %11605 = vpow2.f32 %v1550_v10  ;;  %v1554_v20 = vmul.f32 1.442695, %v1479_v11  ;;  %v1275_v22 = vpop.f32.mrb[12].mxu0  ;;  %v1822_v23 = vpack.c.bf16 %v1727_v19, %v1725_v12  ;;  %vm1415_vm12 = vcmp.gt.f32.partialorder %v13229_v3, 0.0 }
 0x149   : > { %v11596_v24 = vpop.eup %11595  ;;  %11607 = vpow2.f32 %v1552_v18  ;;  %v13242_v26 = vadd.f32 %v1275_v22, %v13185_v16  ;;  %v1277_v28 = vpop.f32.mrb[13].mxu0  ;;  %vm1414_vm13 = vcmp.gt.f32.partialorder %v13225_v60, 0.0 }
 0x14a   : > { %v11598_v29 = vpop.eup %11597  ;;  %11609 = vpow2.f32 %v1554_v20  ;;  %v13247_v30 = vadd.f32 %v1277_v28, %v13188_v17  ;;  %v1279_v27 = vpop.f32.mrb[14].mxu0  ;;  %1987 = vmatprep.mubr.bf16.mxu0 %v1822_v23  ;;  %v9731_v31 = vadd.f32 -1.0, %v11596_v24 }
 0x14b   : > { %v11600_v32 = vpop.eup %11599  ;;  %v1480_v33 = vmin.f32 %v13242_v26, 0.0  ;;  %v13252_v34 = vadd.f32 %v1279_v27, %v13185_v16  ;;  %v1281_v36 = vpop.f32.mrb[15].mxu0  ;;  %1988 = vmatmul.mubr.bf16.vlgmr.msra.gmra.mrb[64].mxu0 %v1821_v14  ;;  %v9732_v38 = vadd.f32 -1.0, %v11598_v29  ;;  %vm1416_vm14 = vcmp.gt.f32.partialorder %v13242_v26, 0.0 }
 0x14c   : > { %v11602_v39 = vpop.eup %11601  ;;  %v1481_v41 = vmin.f32 %v13247_v30, 0.0  ;;  %v13257_v42 = vadd.f32 %v1281_v36, %v13188_v17  ;;  %v9733_v44 = vadd.f32 -1.0, %v11600_v32  ;;  %2433 = vmatpush1.bf16.msra.mxu0 %v11302_v25  ;;  %v1728_v49 = vsel %vm1408_vm6, %v13201_v35, %v9731_v31 }
 0x14d   : > { %v1556_v46 = vmul.f32 1.442695, %v1480_v33  ;;  %v1482_v47 = vmin.f32 %v13252_v34, 0.0  ;;  %v9734_v48 = vadd.f32 -1.0, %v11602_v39  ;;  %2434 = vmatprep.subr.bf16.mxu0 %v11307_v21  ;;  %v1729_v54 = vsel %vm1409_vm7, %v13204_v37, %v9732_v38 }
 0x14e   : > { %v1558_v51 = vmul.f32 1.442695, %v1481_v41  ;;  %v1483_v53 = vmin.f32 %v13257_v42, 0.0  ;;  %v1730_v55 = vsel %vm1410_vm8, %v13208_v40, %v9733_v44  ;;  %vm1417_vm15 = vcmp.gt.f32.partialorder %v13247_v30, 0.0 }
 0x14f   : > { %11611 = vpow2.f32 %v1556_v46  ;;  %v1560_v57 = vmul.f32 1.442695, %v1482_v47  ;;  %v1731_v35 = vsel %vm1411_vm9, %v13212_v43, %v9734_v48  ;;  %v1823_v58 = vpack.c.bf16 %v1730_v55, %v1728_v49 }
 0x150   : > { %11613 = vpow2.f32 %v1558_v51  ;;  %v1562_v59 = vmul.f32 1.442695, %v1483_v53  ;;  %v1285_v61 = vpop.f32.mrb[16].mxu0  ;;  %v1824_v62 = vpack.c.bf16 %v1731_v35, %v1729_v54  ;;  %2435 = vmatpush1.bf16.msra.mxu0 %v11305_v45  ;;  %vm1419_vm0 = vcmp.gt.f32.partialorder %v13257_v42, 0.0 }
 0x151   : > { %v11604_v0 = vpop.eup %11603  ;;  %11615 = vpow2.f32 %v1560_v57  ;;  %v13278_v37 = vadd.f32 %v1285_v61, %v13185_v16  ;;  %v1287_v1 = vpop.f32.mrb[17].mxu0  ;;  %2436 = vmatprep.subr.bf16.mxu0 %v11310_v50  ;;  %vm1418_vm1 = vcmp.gt.f32.partialorder %v13252_v34, 0.0 }
 0x152   : > { %v11606_v40 = vpop.eup %11605  ;;  %11617 = vpow2.f32 %v1562_v59  ;;  %v13282_v43 = vadd.f32 %v1287_v1, %v13188_v17  ;;  %v1289_v4 = vpop.f32.mrb[18].mxu0  ;;  %1995 = vmatprep.mubr.bf16.mxu0 %v1824_v62  ;;  %v9735_v5 = vadd.f32 -1.0, %v11604_v0 }
 0x153   : > { %v11608_v6 = vpop.eup %11607  ;;  %v1484_v7 = vmin.f32 %v13278_v37, 0.0  ;;  %v13287_v8 = vadd.f32 %v1289_v4, %v13185_v16  ;;  %v1291_v9 = vpop.f32.mrb[19].mxu0  ;;  %1996 = vmatmul.mubr.bf16.gmra.mrb[68].mxu0 %v1823_v58  ;;  %v9736_v10 = vadd.f32 -1.0, %v11606_v40  ;;  %vm1420_vm2 = vcmp.gt.f32.partialorder %v13278_v37, 0.0 }
 0x154   : > { %v11610_v11 = vpop.eup %11609  ;;  %v1485_v12 = vmin.f32 %v13282_v43, 0.0  ;;  %v13292_v14 = vadd.f32 %v1291_v9, %v13188_v17  ;;  %v9737_v18 = vadd.f32 -1.0, %v11608_v6  ;;  %2437 = vmatpush1.bf16.msra.mxu0 %v11308_v63  ;;  %v1732_v23 = vsel %vm1412_vm10, %v13217_v52, %v9735_v5 }
 0x155   : > { %v1564_v19 = vmul.f32 1.442695, %v1484_v7  ;;  %v1486_v20 = vmin.f32 %v13287_v8, 0.0  ;;  %v9738_v22 = vadd.f32 -1.0, %v11610_v11  ;;  %v1733_v28 = vsel %vm1413_vm11, %v13220_v56, %v9736_v10 }
 0x156   : > { %v1566_v25 = vmul.f32 1.442695, %v1485_v12  ;;  %v1487_v24 = vmin.f32 %v13292_v14, 0.0  ;;  %v1734_v21 = vsel %vm1414_vm13, %v13225_v60, %v9737_v18  ;;  %vm1421_vm3 = vcmp.gt.f32.partialorder %v13282_v43, 0.0 }
 0x157   : > { %11619 = vpow2.f32 %v1564_v19  ;;  %v1568_v29 = vmul.f32 1.442695, %v1486_v20  ;;  %v1735_v27 = vsel %vm1415_vm12, %v13229_v3, %v9738_v22  ;;  %v1825_v31 = vpack.c.bf16 %v1734_v21, %v1732_v23 }
 0x158   : > { %11621 = vpow2.f32 %v1566_v25  ;;  %v1570_v32 = vmul.f32 1.442695, %v1487_v24  ;;  %v1295_v33 = vpop.f32.mrb[20].mxu0  ;;  %v1826_v52 = vpack.c.bf16 %v1735_v27, %v1733_v28  ;;  %vm1423_vm4 = vcmp.gt.f32.partialorder %v13292_v14, 0.0 }
 0x159   : > { %v11612_v36 = vpop.eup %11611  ;;  %11623 = vpow2.f32 %v1568_v29  ;;  %v13308_v38 = vadd.f32 %v1295_v33, %v13185_v16  ;;  %v1297_v39 = vpop.f32.mrb[21].mxu0  ;;  %vm1422_vm5 = vcmp.gt.f32.partialorder %v13287_v8, 0.0 }
 0x15a   : > { %v11614_v56 = vpop.eup %11613  ;;  %11625 = vpow2.f32 %v1570_v32  ;;  %v13312_v60 = vadd.f32 %v1297_v39, %v13188_v17  ;;  %v1299_v41 = vpop.f32.mrb[22].mxu0  ;;  %2003 = vmatprep.mubr.bf16.mxu0 %v1826_v52  ;;  %v9739_v3 = vadd.f32 -1.0, %v11612_v36 }
 0x15b   : > { %v11616_v44 = vpop.eup %11615  ;;  %v1488_v45 = vmin.f32 %v13308_v38, 0.0  ;;  %v13317_v46 = vadd.f32 %v1299_v41, %v13185_v16  ;;  %v1301_v47 = vpop.f32.mrb[23].mxu0  ;;  %2004 = vmatmul.mubr.bf16.gmra.mrb[72].mxu0 %v1825_v31  ;;  %v9740_v48 = vadd.f32 -1.0, %v11614_v56  ;;  %vm1424_vm6 = vcmp.gt.f32.partialorder %v13308_v38, 0.0 }
 0x15c   : > { %v11618_v49 = vpop.eup %11617  ;;  %v1489_v50 = vmin.f32 %v13312_v60, 0.0  ;;  %v13322_v51 = vadd.f32 %v1301_v47, %v13188_v17  ;;  %v9741_v53 = vadd.f32 -1.0, %v11616_v44  ;;  %v1736_v35 = vsel %vm1416_vm14, %v13242_v26, %v9739_v3 }
 0x15d   : > { %v1572_v54 = vmul.f32 1.442695, %v1488_v45  ;;  %v1490_v55 = vmin.f32 %v13317_v46, 0.0  ;;  %v9742_v57 = vadd.f32 -1.0, %v11618_v49  ;;  %v1737_v61 = vsel %vm1417_vm15, %v13247_v30, %v9740_v48 }
 0x15e   : > { %v1574_v58 = vmul.f32 1.442695, %v1489_v50  ;;  %v1491_v59 = vmin.f32 %v13322_v51, 0.0  ;;  %v1738_v62 = vsel %vm1418_vm1, %v13252_v34, %v9741_v53  ;;  %vm1425_vm7 = vcmp.gt.f32.partialorder %v13312_v60, 0.0 }
 0x15f   : > { %11627 = vpow2.f32 %v1572_v54  ;;  %v1576_v63 = vmul.f32 1.442695, %v1490_v55  ;;  %v1739_v0 = vsel %vm1419_vm0, %v13257_v42, %v9742_v57  ;;  %v1827_v1 = vpack.c.bf16 %v1738_v62, %v1736_v35 }
 0x160   : > { %v1578_v40 = vmul.f32 1.442695, %v1491_v59  ;;  %v1305_v4 = vpop.f32.mrb[24].mxu0  ;;  %v1828_v5 = vpack.c.bf16 %v1739_v0, %v1737_v61  ;;  %11629 = vpow2.f32 %v1574_v58  ;;  %vm1427_vm8 = vcmp.gt.f32.partialorder %v13322_v51, 0.0 }
 0x161   : > { %v11620_v26 = vpop.eup %11619  ;;  %11631 = vpow2.f32 %v1576_v63  ;;  %v13338_v6 = vadd.f32 %v1305_v4, %v13185_v16  ;;  %v1307_v7 = vpop.f32.mrb[25].mxu0  ;;  %vm1426_vm9 = vcmp.gt.f32.partialorder %v13317_v46, 0.0 }
 0x162   : > { %v11622_v30 = vpop.eup %11621  ;;  %v13342_v34 = vadd.f32 %v1307_v7, %v13188_v17  ;;  %v1309_v9 = vpop.f32.mrb[26].mxu0  ;;  %2011 = vmatprep.mubr.bf16.mxu0 %v1828_v5  ;;  %v9743_v42 = vadd.f32 -1.0, %v11620_v26  ;;  %11633 = vpow2.f32 %v1578_v40 }
 0x163   : > { %v11624_v10 = vpop.eup %11623  ;;  %v1492_v11 = vmin.f32 %v13338_v6, 0.0  ;;  %v13347_v12 = vadd.f32 %v1309_v9, %v13185_v16  ;;  %v1311_v18 = vpop.f32.mrb[27].mxu0  ;;  %2012 = vmatmul.mubr.bf16.gmra.mrb[76].mxu0 %v1827_v1  ;;  %v9744_v19 = vadd.f32 -1.0, %v11622_v30  ;;  %vm1428_vm10 = vcmp.gt.f32.partialorder %v13338_v6, 0.0 }
 0x164   : > { %v11626_v20 = vpop.eup %11625  ;;  %v1493_v22 = vmin.f32 %v13342_v34, 0.0  ;;  %v13352_v23 = vadd.f32 %v1311_v18, %v13188_v17  ;;  %v9745_v25 = vadd.f32 -1.0, %v11624_v10  ;;  %v1740_v29 = vsel %vm1420_vm2, %v13278_v37, %v9743_v42 }
 0x165   : > { %v1580_v24 = vmul.f32 1.442695, %v1492_v11  ;;  %v1494_v28 = vmin.f32 %v13347_v12, 0.0  ;;  %v9746_v21 = vadd.f32 -1.0, %v11626_v20  ;;  %v1741_v32 = vsel %vm1421_vm3, %v13282_v43, %v9744_v19 }
 0x166   : > { %v1582_v27 = vmul.f32 1.442695, %v1493_v22  ;;  %v1495_v31 = vmin.f32 %v13352_v23, 0.0  ;;  %v1742_v33 = vsel %vm1422_vm5, %v13287_v8, %v9745_v25  ;;  %vm1429_vm11 = vcmp.gt.f32.partialorder %v13342_v34, 0.0 }
 0x167   : > { %11635 = vpow2.f32 %v1580_v24  ;;  %v1584_v52 = vmul.f32 1.442695, %v1494_v28  ;;  %v1743_v36 = vsel %vm1423_vm4, %v13292_v14, %v9746_v21  ;;  %v1829_v39 = vpack.c.bf16 %v1742_v33, %v1740_v29 }
 0x168   : > { %11637 = vpow2.f32 %v1582_v27  ;;  %v1586_v56 = vmul.f32 1.442695, %v1495_v31  ;;  %v1315_v41 = vpop.f32.mrb[28].mxu0  ;;  %v1830_v37 = vpack.c.bf16 %v1743_v36, %v1741_v32  ;;  %vm1431_vm12 = vcmp.gt.f32.partialorder %v13352_v23, 0.0 }
 0x169   : > { %v11628_v3 = vpop.eup %11627  ;;  %11639 = vpow2.f32 %v1584_v52  ;;  %v13368_v44 = vadd.f32 %v1315_v41, %v13185_v16  ;;  %v1317_v45 = vpop.f32.mrb[29].mxu0  ;;  %vm1430_vm13 = vcmp.gt.f32.partialorder %v13347_v12, 0.0 }
 0x16a   : > { %v11630_v43 = vpop.eup %11629  ;;  %11641 = vpow2.f32 %v1586_v56  ;;  %v13372_v8 = vadd.f32 %v1317_v45, %v13188_v17  ;;  %v1319_v47 = vpop.f32.mrb[30].mxu0  ;;  %2019 = vmatprep.mubr.bf16.mxu0 %v1830_v37  ;;  %v9747_v14 = vadd.f32 -1.0, %v11628_v3 }
 0x16b   : > { %v11632_v48 = vpop.eup %11631  ;;  %v1496_v49 = vmin.f32 %v13368_v44, 0.0  ;;  %v13377_v50 = vadd.f32 %v1319_v47, %v13185_v16  ;;  %v1321_v53 = vpop.f32.mrb[31].mxu0  ;;  %2020 = vmatmul.mubr.bf16.gmra.mrb[80].mxu0 %v1829_v39  ;;  %v9748_v54 = vadd.f32 -1.0, %v11630_v43  ;;  %vm1432_vm14 = vcmp.gt.f32.partialorder %v13368_v44, 0.0 }
 0x16c   : > { %v11634_v55 = vpop.eup %11633  ;;  %v1497_v57 = vmin.f32 %v13372_v8, 0.0  ;;  %v13382_v35 = vadd.f32 %v1321_v53, %v13188_v17  ;;  %v9749_v58 = vadd.f32 -1.0, %v11632_v48  ;;  %2464 = vmatprep.mubr.bf16.mxu0 %v12866_v2  ;;  %v1744_v63 = vsel %vm1424_vm6, %v13308_v38, %v9747_v14 }
 0x16d   : > { %v1588_v59 = vmul.f32 1.442695, %v1496_v49  ;;  %v1498_v61 = vmin.f32 %v13377_v50, 0.0  ;;  %v9750_v62 = vadd.f32 -1.0, %v11634_v55  ;;  %v1745_v40 = vsel %vm1425_vm7, %v13312_v60, %v9748_v54 }
 0x16e   : > { %v1590_v0 = vmul.f32 1.442695, %v1497_v57  ;;  %v1499_v1 = vmin.f32 %v13382_v35, 0.0  ;;  %v1746_v4 = vsel %vm1426_vm9, %v13317_v46, %v9749_v58  ;;  %vm1433_vm15 = vcmp.gt.f32.partialorder %v13372_v8, 0.0 }
 0x16f   : > { %11643 = vpow2.f32 %v1588_v59  ;;  %v1592_v5 = vmul.f32 1.442695, %v1498_v61  ;;  %v1747_v26 = vsel %vm1427_vm8, %v13322_v51, %v9750_v62  ;;  %v1831_v7 = vpack.c.bf16 %v1746_v4, %v1744_v63 }
 0x170   : > { %11645 = vpow2.f32 %v1590_v0  ;;  %v1594_v30 = vmul.f32 1.442695, %v1499_v1  ;;  %v1325_v9 = vpop.f32.mrb[32].mxu0  ;;  %v1832_v38 = vpack.c.bf16 %v1747_v26, %v1745_v40  ;;  %vm1435_vm0 = vcmp.gt.f32.partialorder %v13382_v35, 0.0 }
 0x171   : > { %v11636_v42 = vpop.eup %11635  ;;  %11647 = vpow2.f32 %v1592_v5  ;;  %v13399_v10 = vadd.f32 %v1325_v9, %v13185_v16  ;;  %v1327_v11 = vpop.f32.mrb[33].mxu0  ;;  %vm1434_vm1 = vcmp.gt.f32.partialorder %v13377_v50, 0.0 }
 0x172   : > { %v11638_v60 = vpop.eup %11637  ;;  %11649 = vpow2.f32 %v1594_v30  ;;  %v13403_v46 = vadd.f32 %v1327_v11, %v13188_v17  ;;  %v1329_v18 = vpop.f32.mrb[34].mxu0  ;;  %2027 = vmatprep.mubr.bf16.mxu1 %v1832_v38  ;;  %v9751_v51 = vadd.f32 -1.0, %v11636_v42 }
 0x173   : > { %v11640_v19 = vpop.eup %11639  ;;  %v1500_v20 = vmin.f32 %v13399_v10, 0.0  ;;  %v13408_v22 = vadd.f32 %v1329_v18, %v13185_v16  ;;  %v1331_v25 = vpop.f32.mrb[35].mxu0  ;;  %2028 = vmatmul.mubr.bf16.vlgmr.msra.gmra.mrb[0].mxu1 %v1831_v7  ;;  %v9752_v24 = vadd.f32 -1.0, %v11638_v60  ;;  %vm1436_vm2 = vcmp.gt.f32.partialorder %v13399_v10, 0.0 }
 0x174   : > { %v11642_v28 = vpop.eup %11641  ;;  %v1501_v21 = vmin.f32 %v13403_v46, 0.0  ;;  %v13413_v29 = vadd.f32 %v1331_v25, %v13188_v17  ;;  %v9753_v27 = vadd.f32 -1.0, %v11640_v19  ;;  %v1748_v52 = vsel %vm1428_vm10, %v13338_v6, %v9751_v51 }
 0x175   : > { %v1596_v31 = vmul.f32 1.442695, %v1500_v20  ;;  %v1502_v32 = vmin.f32 %v13408_v22, 0.0  ;;  %v9754_v33 = vadd.f32 -1.0, %v11642_v28  ;;  %v1749_v56 = vsel %vm1429_vm11, %v13342_v34, %v9752_v24 }
 0x176   : > { %v1598_v36 = vmul.f32 1.442695, %v1501_v21  ;;  %v1503_v39 = vmin.f32 %v13413_v29, 0.0  ;;  %v1750_v41 = vsel %vm1430_vm13, %v13347_v12, %v9753_v27  ;;  %vm1437_vm3 = vcmp.gt.f32.partialorder %v13403_v46, 0.0 }
 0x177   : > { %11651 = vpow2.f32 %v1596_v31  ;;  %v1600_v37 = vmul.f32 1.442695, %v1502_v32  ;;  %v1751_v3 = vsel %vm1431_vm12, %v13352_v23, %v9754_v33  ;;  %v1833_v45 = vpack.c.bf16 %v1750_v41, %v1748_v52 }
 0x178   : > { %11653 = vpow2.f32 %v1598_v36  ;;  %v1602_v43 = vmul.f32 1.442695, %v1503_v39  ;;  %v1335_v47 = vpop.f32.mrb[36].mxu0  ;;  %v1834_v6 = vpack.c.bf16 %v1751_v3, %v1749_v56  ;;  %vm1439_vm4 = vcmp.gt.f32.partialorder %v13413_v29, 0.0 }
 0x179   : > { %v11644_v14 = vpop.eup %11643  ;;  %11655 = vpow2.f32 %v1600_v37  ;;  %v13429_v48 = vadd.f32 %v1335_v47, %v13185_v16  ;;  %v1337_v49 = vpop.f32.mrb[37].mxu0  ;;  %vm1438_vm5 = vcmp.gt.f32.partialorder %v13408_v22, 0.0 }
 0x17a   : > { %v11646_v34 = vpop.eup %11645  ;;  %11657 = vpow2.f32 %v1602_v43  ;;  %v13433_v12 = vadd.f32 %v1337_v49, %v13188_v17  ;;  %v1339_v53 = vpop.f32.mrb[38].mxu0  ;;  %2035 = vmatprep.mubr.bf16.mxu1 %v1834_v6  ;;  %v9755_v23 = vadd.f32 -1.0, %v11644_v14 }
 0x17b   : > { %v11648_v54 = vpop.eup %11647  ;;  %v1504_v55 = vmin.f32 %v13429_v48, 0.0  ;;  %v13438_v57 = vadd.f32 %v1339_v53, %v13185_v16  ;;  %v1341_v58 = vpop.f32.mrb[39].mxu0  ;;  %2036 = vmatmul.mubr.bf16.gmra.mrb[4].mxu1 %v1833_v45  ;;  %v9756_v59 = vadd.f32 -1.0, %v11646_v34  ;;  %vm1440_vm6 = vcmp.gt.f32.partialorder %v13429_v48, 0.0 }
 0x17c   : > { %v11650_v61 = vpop.eup %11649  ;;  %v1505_v62 = vmin.f32 %v13433_v12, 0.0  ;;  %v13443_v63 = vadd.f32 %v1341_v58, %v13188_v17  ;;  %v9757_v0 = vadd.f32 -1.0, %v11648_v54  ;;  %v1752_v5 = vsel %vm1432_vm14, %v13368_v44, %v9755_v23 }
 0x17d   : > { %v1604_v1 = vmul.f32 1.442695, %v1504_v55  ;;  %v1506_v40 = vmin.f32 %v13438_v57, 0.0  ;;  %v9758_v4 = vadd.f32 -1.0, %v11650_v61  ;;  %v1753_v30 = vsel %vm1433_vm15, %v13372_v8, %v9756_v59 }
 0x17e   : > { %v1606_v26 = vmul.f32 1.442695, %v1505_v62  ;;  %v1507_v7 = vmin.f32 %v13443_v63, 0.0  ;;  %v1754_v9 = vsel %vm1434_vm1, %v13377_v50, %v9757_v0  ;;  %vm1441_vm7 = vcmp.gt.f32.partialorder %v13433_v12, 0.0 }
 0x17f   : > { %11659 = vpow2.f32 %v1604_v1  ;;  %v1608_v38 = vmul.f32 1.442695, %v1506_v40  ;;  %v1755_v42 = vsel %vm1435_vm0, %v13382_v35, %v9758_v4  ;;  %v1835_v11 = vpack.c.bf16 %v1754_v9, %v1752_v5 }
 0x180   : > { %11661 = vpow2.f32 %v1606_v26  ;;  %v1610_v60 = vmul.f32 1.442695, %v1507_v7  ;;  %v1345_v18 = vpop.f32.mrb[40].mxu0  ;;  %v1836_v44 = vpack.c.bf16 %v1755_v42, %v1753_v30  ;;  %vm1443_vm8 = vcmp.gt.f32.partialorder %v13443_v63, 0.0 }
 0x181   : > { %v11652_v51 = vpop.eup %11651  ;;  %11663 = vpow2.f32 %v1608_v38  ;;  %v13459_v19 = vadd.f32 %v1345_v18, %v13185_v16  ;;  %v1347_v20 = vpop.f32.mrb[41].mxu0  ;;  %vm1442_vm9 = vcmp.gt.f32.partialorder %v13438_v57, 0.0 }
 0x182   : > { %v11654_v8 = vpop.eup %11653  ;;  %11665 = vpow2.f32 %v1610_v60  ;;  %v13463_v50 = vadd.f32 %v1347_v20, %v13188_v17  ;;  %v1349_v25 = vpop.f32.mrb[42].mxu0  ;;  %2043 = vmatprep.mubr.bf16.mxu1 %v1836_v44  ;;  %v9759_v35 = vadd.f32 -1.0, %v11652_v51 }
 0x183   : > { %v11656_v24 = vpop.eup %11655  ;;  %v1508_v28 = vmin.f32 %v13459_v19, 0.0  ;;  %v13468_v21 = vadd.f32 %v1349_v25, %v13185_v16  ;;  %v1351_v27 = vpop.f32.mrb[43].mxu0  ;;  %2044 = vmatmul.mubr.bf16.gmra.mrb[8].mxu1 %v1835_v11  ;;  %v9760_v31 = vadd.f32 -1.0, %v11654_v8  ;;  %vm1444_vm10 = vcmp.gt.f32.partialorder %v13459_v19, 0.0 }
 0x184   : > { %v11658_v32 = vpop.eup %11657  ;;  %v1509_v33 = vmin.f32 %v13463_v50, 0.0  ;;  %v13473_v52 = vadd.f32 %v1351_v27, %v13188_v17  ;;  %v9761_v36 = vadd.f32 -1.0, %v11656_v24  ;;  %v1756_v37 = vsel %vm1436_vm2, %v13399_v10, %v9759_v35 }
 0x185   : > { %v1612_v39 = vmul.f32 1.442695, %v1508_v28  ;;  %v1510_v56 = vmin.f32 %v13468_v21, 0.0  ;;  %v9762_v41 = vadd.f32 -1.0, %v11658_v32  ;;  %v1757_v43 = vsel %vm1437_vm3, %v13403_v46, %v9760_v31 }
 0x186   : > { %v1614_v3 = vmul.f32 1.442695, %v1509_v33  ;;  %v1511_v45 = vmin.f32 %v13473_v52, 0.0  ;;  %v1758_v47 = vsel %vm1438_vm5, %v13408_v22, %v9761_v36  ;;  %vm1445_vm11 = vcmp.gt.f32.partialorder %v13463_v50, 0.0 }
 0x187   : > { %11667 = vpow2.f32 %v1612_v39  ;;  %v1616_v6 = vmul.f32 1.442695, %v1510_v56  ;;  %v1759_v14 = vsel %vm1439_vm4, %v13413_v29, %v9762_v41  ;;  %v1837_v49 = vpack.c.bf16 %v1758_v47, %v1756_v37 }
 0x188   : > { %11669 = vpow2.f32 %v1614_v3  ;;  %v1618_v34 = vmul.f32 1.442695, %v1511_v45  ;;  %v1355_v53 = vpop.f32.mrb[44].mxu0  ;;  %v1838_v10 = vpack.c.bf16 %v1759_v14, %v1757_v43  ;;  %vm1447_vm12 = vcmp.gt.f32.partialorder %v13473_v52, 0.0 }
 0x189   : > { %v11660_v23 = vpop.eup %11659  ;;  %11671 = vpow2.f32 %v1616_v6  ;;  %v13489_v54 = vadd.f32 %v1355_v53, %v13185_v16  ;;  %v1357_v55 = vpop.f32.mrb[45].mxu0  ;;  %vm1446_vm13 = vcmp.gt.f32.partialorder %v13468_v21, 0.0 }
 0x18a   : > { %v11662_v46 = vpop.eup %11661  ;;  %11673 = vpow2.f32 %v1618_v34  ;;  %v13493_v22 = vadd.f32 %v1357_v55, %v13188_v17  ;;  %v1359_v58 = vpop.f32.mrb[46].mxu0  ;;  %2051 = vmatprep.mubr.bf16.mxu1 %v1838_v10  ;;  %v9763_v29 = vadd.f32 -1.0, %v11660_v23 }
 0x18b   : > { %v11664_v59 = vpop.eup %11663  ;;  %v1512_v61 = vmin.f32 %v13489_v54, 0.0  ;;  %v13498_v62 = vadd.f32 %v1359_v58, %v13185_v16  ;;  %v1361_v0 = vpop.f32.mrb[47].mxu0  ;;  %2052 = vmatmul.mubr.bf16.gmra.mrb[12].mxu1 %v1837_v49  ;;  %v9764_v1 = vadd.f32 -1.0, %v11662_v46  ;;  %vm1448_vm14 = vcmp.gt.f32.partialorder %v13489_v54, 0.0 }
 0x18c   : > { %v11666_v40 = vpop.eup %11665  ;;  %v1513_v4 = vmin.f32 %v13493_v22, 0.0  ;;  %v13503_v5 = vadd.f32 %v1361_v0, %v13188_v17  ;;  %v9765_v26 = vadd.f32 -1.0, %v11664_v59  ;;  %v1760_v38 = vsel %vm1440_vm6, %v13429_v48, %v9763_v29 }
 0x18d   : > { %v1620_v7 = vmul.f32 1.442695, %v1512_v61  ;;  %v1514_v30 = vmin.f32 %v13498_v62, 0.0  ;;  %v9766_v9 = vadd.f32 -1.0, %v11666_v40  ;;  %v1761_v60 = vsel %vm1441_vm7, %v13433_v12, %v9764_v1 }
 0x18e   : > { %v1622_v42 = vmul.f32 1.442695, %v1513_v4  ;;  %v1515_v11 = vmin.f32 %v13503_v5, 0.0  ;;  %v1762_v18 = vsel %vm1442_vm9, %v13438_v57, %v9765_v26  ;;  %vm1449_vm15 = vcmp.gt.f32.partialorder %v13493_v22, 0.0 }
 0x18f   : > { %11675 = vpow2.f32 %v1620_v7  ;;  %v1624_v44 = vmul.f32 1.442695, %v1514_v30  ;;  %v1763_v51 = vsel %vm1443_vm8, %v13443_v63, %v9766_v9  ;;  %v1839_v20 = vpack.c.bf16 %v1762_v18, %v1760_v38 }
 0x190   : > { %11677 = vpow2.f32 %v1622_v42  ;;  %v1626_v8 = vmul.f32 1.442695, %v1515_v11  ;;  %v1365_v25 = vpop.f32.mrb[48].mxu0  ;;  %v1840_v48 = vpack.c.bf16 %v1763_v51, %v1761_v60  ;;  %vm1451_vm0 = vcmp.gt.f32.partialorder %v13503_v5, 0.0 }
 0x191   : > { %v11668_v35 = vpop.eup %11667  ;;  %11679 = vpow2.f32 %v1624_v44  ;;  %v13519_v24 = vadd.f32 %v1365_v25, %v13185_v16  ;;  %v1367_v28 = vpop.f32.mrb[49].mxu0  ;;  %vm1450_vm1 = vcmp.gt.f32.partialorder %v13498_v62, 0.0 }
 0x192   : > { %v11670_v12 = vpop.eup %11669  ;;  %11681 = vpow2.f32 %v1626_v8  ;;  %v13523_v57 = vadd.f32 %v1367_v28, %v13188_v17  ;;  %v1369_v27 = vpop.f32.mrb[50].mxu0  ;;  %2059 = vmatprep.mubr.bf16.mxu1 %v1840_v48  ;;  %v9767_v63 = vadd.f32 -1.0, %v11668_v35 }
 0x193   : > { %v11672_v31 = vpop.eup %11671  ;;  %v1516_v32 = vmin.f32 %v13519_v24, 0.0  ;;  %v13528_v33 = vadd.f32 %v1369_v27, %v13185_v16  ;;  %v1371_v36 = vpop.f32.mrb[51].mxu0  ;;  %2060 = vmatmul.mubr.bf16.gmra.mrb[16].mxu1 %v1839_v20  ;;  %v9768_v39 = vadd.f32 -1.0, %v11670_v12  ;;  %vm1452_vm2 = vcmp.gt.f32.partialorder %v13519_v24, 0.0 }
 0x194   : > { %v11674_v56 = vpop.eup %11673  ;;  %v1517_v41 = vmin.f32 %v13523_v57, 0.0  ;;  %v13533_v37 = vadd.f32 %v1371_v36, %v13188_v17  ;;  %v9769_v3 = vadd.f32 -1.0, %v11672_v31  ;;  %v1764_v6 = vsel %vm1444_vm10, %v13459_v19, %v9767_v63 }
 0x195   : > { %v1628_v45 = vmul.f32 1.442695, %v1516_v32  ;;  %v1518_v43 = vmin.f32 %v13528_v33, 0.0  ;;  %v9770_v47 = vadd.f32 -1.0, %v11674_v56  ;;  %v1765_v34 = vsel %vm1445_vm11, %v13463_v50, %v9768_v39 }
 0x196   : > { %v1630_v14 = vmul.f32 1.442695, %v1517_v41  ;;  %v1519_v49 = vmin.f32 %v13533_v37, 0.0  ;;  %v1766_v53 = vsel %vm1446_vm13, %v13468_v21, %v9769_v3  ;;  %vm1453_vm3 = vcmp.gt.f32.partialorder %v13523_v57, 0.0 }
 0x197   : > { %11683 = vpow2.f32 %v1628_v45  ;;  %v1632_v10 = vmul.f32 1.442695, %v1518_v43  ;;  %v1767_v23 = vsel %vm1447_vm12, %v13473_v52, %v9770_v47  ;;  %v1841_v55 = vpack.c.bf16 %v1766_v53, %v1764_v6 }
 0x198   : > { %11685 = vpow2.f32 %v1630_v14  ;;  %v1634_v46 = vmul.f32 1.442695, %v1519_v49  ;;  %v1375_v58 = vpop.f32.mrb[52].mxu0  ;;  %v1842_v19 = vpack.c.bf16 %v1767_v23, %v1765_v34  ;;  %vm1455_vm4 = vcmp.gt.f32.partialorder %v13533_v37, 0.0 }
 0x199   : > { %v11676_v29 = vpop.eup %11675  ;;  %11687 = vpow2.f32 %v1632_v10  ;;  %v13549_v59 = vadd.f32 %v1375_v58, %v13185_v16  ;;  %v1377_v61 = vpop.f32.mrb[53].mxu0  ;;  %vm1454_vm5 = vcmp.gt.f32.partialorder %v13528_v33, 0.0 }
 0x19a   : > { %v11678_v50 = vpop.eup %11677  ;;  %11689 = vpow2.f32 %v1634_v46  ;;  %v13553_v21 = vadd.f32 %v1377_v61, %v13188_v17  ;;  %v1379_v0 = vpop.f32.mrb[54].mxu0  ;;  %2067 = vmatprep.mubr.bf16.mxu1 %v1842_v19  ;;  %v9771_v52 = vadd.f32 -1.0, %v11676_v29 }
 0x19b   : > { %v11680_v1 = vpop.eup %11679  ;;  %v1520_v40 = vmin.f32 %v13549_v59, 0.0  ;;  %v13558_v4 = vadd.f32 %v1379_v0, %v13185_v16  ;;  %v1381_v26 = vpop.f32.mrb[55].mxu0  ;;  %2068 = vmatmul.mubr.bf16.gmra.mrb[20].mxu1 %v1841_v55  ;;  %v9772_v7 = vadd.f32 -1.0, %v11678_v50  ;;  %vm1456_vm6 = vcmp.gt.f32.partialorder %v13549_v59, 0.0 }
 0x19c   : > { %v11682_v30 = vpop.eup %11681  ;;  %v1521_v9 = vmin.f32 %v13553_v21, 0.0  ;;  %v13563_v38 = vadd.f32 %v1381_v26, %v13188_v17  ;;  %v9773_v42 = vadd.f32 -1.0, %v11680_v1  ;;  %v1768_v44 = vsel %vm1448_vm14, %v13489_v54, %v9771_v52  ;;  %v11313_v52 = vld [vmem:[%s17605_s3 + $0x34] ss:$8 sps:$4 sm:$0xff]  }
 0x19d   : > { %v1636_v11 = vmul.f32 1.442695, %v1520_v40  ;;  %v1522_v60 = vmin.f32 %v13558_v4, 0.0  ;;  %v9774_v18 = vadd.f32 -1.0, %v11682_v30  ;;  %v1769_v8 = vsel %vm1449_vm15, %v13493_v22, %v9772_v7  ;;  %2438 = vmatprep.subr.bf16.mxu0 %v11313_v52 }
 0x19e   : > { %v1638_v51 = vmul.f32 1.442695, %v1521_v9  ;;  %v1523_v20 = vmin.f32 %v13563_v38, 0.0  ;;  %v1770_v25 = vsel %vm1450_vm1, %v13498_v62, %v9773_v42  ;;  %vm1457_vm7 = vcmp.gt.f32.partialorder %v13553_v21, 0.0 }
 0x19f   : > { %11691 = vpow2.f32 %v1636_v11  ;;  %v1640_v48 = vmul.f32 1.442695, %v1522_v60  ;;  %v1771_v35 = vsel %vm1451_vm0, %v13503_v5, %v9774_v18  ;;  %v1843_v28 = vpack.c.bf16 %v1770_v25, %v1768_v44  ;;  %v11316_v25 = vld [vmem:[%s17605_s3 + $0x44] ss:$8 sps:$4 sm:$0xff]  }
 0x1a0   : > { %11693 = vpow2.f32 %v1638_v51  ;;  %v1642_v12 = vmul.f32 1.442695, %v1523_v20  ;;  %v1385_v27 = vpop.f32.mrb[56].mxu0  ;;  %v1844_v54 = vpack.c.bf16 %v1771_v35, %v1769_v8  ;;  %vm1459_vm8 = vcmp.gt.f32.partialorder %v13563_v38, 0.0 }
 0x1a1   : > { %v11684_v63 = vpop.eup %11683  ;;  %11695 = vpow2.f32 %v1640_v48  ;;  %v13579_v31 = vadd.f32 %v1385_v27, %v13185_v16  ;;  %v1387_v32 = vpop.f32.mrb[57].mxu0  ;;  %vm1458_vm9 = vcmp.gt.f32.partialorder %v13558_v4, 0.0 }
 0x1a2   : > { %v11686_v22 = vpop.eup %11685  ;;  %11697 = vpow2.f32 %v1642_v12  ;;  %v13583_v62 = vadd.f32 %v1387_v32, %v13188_v17  ;;  %v1389_v36 = vpop.f32.mrb[58].mxu0  ;;  %2075 = vmatprep.mubr.bf16.mxu1 %v1844_v54  ;;  %v9775_v5 = vadd.f32 -1.0, %v11684_v63  ;;  %v11314_v12 = vld [vmem:[%s17605_s3 + $0x40] ss:$8 sps:$4 sm:$0xff]  }
 0x1a3   : > { %v11688_v39 = vpop.eup %11687  ;;  %v1524_v56 = vmin.f32 %v13579_v31, 0.0  ;;  %v13588_v41 = vadd.f32 %v1389_v36, %v13185_v16  ;;  %v1391_v3 = vpop.f32.mrb[59].mxu0  ;;  %2076 = vmatmul.mubr.bf16.gmra.mrb[24].mxu1 %v1843_v28  ;;  %v9776_v45 = vadd.f32 -1.0, %v11686_v22  ;;  %vm1460_vm10 = vcmp.gt.f32.partialorder %v13579_v31, 0.0 }
 0x1a4   : > { %v11690_v43 = vpop.eup %11689  ;;  %v1525_v47 = vmin.f32 %v13583_v62, 0.0  ;;  %v13593_v6 = vadd.f32 %v1391_v3, %v13188_v17  ;;  %v9777_v14 = vadd.f32 -1.0, %v11688_v39  ;;  %v1772_v10 = vsel %vm1452_vm2, %v13519_v24, %v9775_v5  ;;  %v11319_v39 = vld [vmem:[%s17605_s3 + $0x54] ss:$8 sps:$4 sm:$0xff]   ;;  %v11317_v3 = vld [vmem:[%s17605_s3 + $0x50] ss:$8 sps:$4 sm:$0xff]  }
 0x1a5   : > { %v1644_v49 = vmul.f32 1.442695, %v1524_v56  ;;  %v1526_v34 = vmin.f32 %v13588_v41, 0.0  ;;  %v9778_v53 = vadd.f32 -1.0, %v11690_v43  ;;  %v1773_v46 = vsel %vm1453_vm3, %v13523_v57, %v9776_v45 }
 0x1a6   : > { %v1646_v23 = vmul.f32 1.442695, %v1525_v47  ;;  %v1527_v55 = vmin.f32 %v13593_v6, 0.0  ;;  %v1774_v58 = vsel %vm1454_vm5, %v13528_v33, %v9777_v14  ;;  %v11311_v33 = vld [vmem:[%s17605_s3 + $0x30] ss:$8 sps:$4 sm:$0xff]   ;;  %vm1462_vm11 = vcmp.gt.f32.partialorder %v13588_v41, 0.0 }
 0x1a7   : > { %11699 = vpow2.f32 %v1644_v49  ;;  %v1648_v19 = vmul.f32 1.442695, %v1526_v34  ;;  %v1775_v29 = vsel %vm1455_vm4, %v13533_v37, %v9778_v53  ;;  %v1845_v61 = vpack.c.bf16 %v1774_v58, %v1772_v10  ;;  %2439 = vmatpush1.bf16.msra.mxu0 %v11311_v33  ;;  %v11322_v14 = vld [vmem:[%s17605_s3 + $0x64] ss:$8 sps:$4 sm:$0xff]   ;;  %v11320_v34 = vld [vmem:[%s17605_s3 + $0x60] ss:$8 sps:$4 sm:$0xff]  }
 0x1a8   : > { %11701 = vpow2.f32 %v1646_v23  ;;  %v1650_v50 = vmul.f32 1.442695, %v1527_v55  ;;  %v1395_v24 = vpop.f32.mrb[60].mxu0  ;;  %v1846_v0 = vpack.c.bf16 %v1775_v29, %v1773_v46  ;;  %2440 = vmatprep.subr.bf16.mxu0 %v11316_v25  ;;  %vm1461_vm12 = vcmp.gt.f32.partialorder %v13583_v62, 0.0 }
 0x1a9   : > { %v11692_v1 = vpop.eup %11691  ;;  %11703 = vpow2.f32 %v1648_v19  ;;  %v13610_v40 = vadd.f32 %v1395_v24, %v13185_v16  ;;  %v1397_v57 = vpop.f32.mrb[61].mxu0  ;;  %vm1463_vm13 = vcmp.gt.f32.partialorder %v13593_v6, 0.0  ;;  %v11325_v19 = vld [vmem:[%s17605_s3 + $0x74] ss:$8 sps:$4 sm:$0xff]  }
 0x1aa   : > { %v11694_v26 = vpop.eup %11693  ;;  %11705 = vpow2.f32 %v1650_v50  ;;  %v13615_v7 = vadd.f32 %v1397_v57, %v13188_v17  ;;  %v1399_v37 = vpop.f32.mrb[62].mxu0  ;;  %2083 = vmatprep.mubr.bf16.mxu1 %v1846_v0  ;;  %v9779_v30 = vadd.f32 -1.0, %v11692_v1 }
 0x1ab   : > { %v11696_v9 = vpop.eup %11695  ;;  %v1528_v42 = vmin.f32 %v13610_v40, 0.0  ;;  %v13620_v11 = vadd.f32 %v1399_v37, %v13185_v16  ;;  %v1401_v60 = vpop.f32.mrb[63].mxu0  ;;  %2084 = vmatmul.mubr.bf16.gmra.mrb[28].mxu1 %v1845_v61  ;;  %v9780_v18 = vadd.f32 -1.0, %v11694_v26  ;;  %2441 = vmatpush1.bf16.msra.mxu0 %v11314_v12  ;;  %v11323_v61 = vld [vmem:[%s17605_s3 + $0x70] ss:$8 sps:$4 sm:$0xff]   ;;  %vm1464_vm14 = vcmp.gt.f32.partialorder %v13610_v40, 0.0 }
 0x1ac   : > { %v11698_v44 = vpop.eup %11697  ;;  %v1529_v51 = vmin.f32 %v13615_v7, 0.0  ;;  %v13625_v20 = vadd.f32 %v1401_v60, %v13188_v17  ;;  %v9781_v8 = vadd.f32 -1.0, %v11696_v9  ;;  %v1776_v28 = vsel %vm1456_vm6, %v13549_v59, %v9779_v30  ;;  %2442 = vmatprep.subr.bf16.mxu0 %v11319_v39  ;;  %v13665_v9 = vld [vmem:[%s12909_s29] ss:$0 sm:$0xff]  ;;  %s17616_s3 = sld [smem:[#allocation17_spill]] }
 0x1ad   : > { %v1652_v48 = vmul.f32 1.442695, %v1528_v42  ;;  %v1530_v16 = vmin.f32 %v13620_v11, 0.0  ;;  %v9782_v35 = vadd.f32 -1.0, %v11698_v44  ;;  %v1777_v17 = vsel %vm1457_vm7, %v13553_v21, %v9780_v18 }
 0x1ae   : > { %v1654_v27 = vmul.f32 1.442695, %v1529_v51  ;;  %v1531_v54 = vmin.f32 %v13625_v20, 0.0  ;;  %v1778_v63 = vsel %vm1458_vm9, %v13558_v4, %v9781_v8  ;;  %vm1466_vm15 = vcmp.gt.f32.partialorder %v13620_v11, 0.0 }
 0x1af   : > { %11707 = vpow2.f32 %v1652_v48  ;;  %v1656_v32 = vmul.f32 1.442695, %v1530_v16  ;;  %v1779_v22 = vsel %vm1459_vm8, %v13563_v38, %v9782_v35  ;;  %v1847_v36 = vpack.c.bf16 %v1778_v63, %v1776_v28  ;;  %2443 = vmatpush1.bf16.msra.mxu0 %v11317_v3 }
 0x1b0   : > { %11709 = vpow2.f32 %v1654_v27  ;;  %v1658_v59 = vmul.f32 1.442695, %v1531_v54  ;;  %v1848_v5 = vpack.c.bf16 %v1779_v22, %v1777_v17  ;;  %2444 = vmatprep.subr.bf16.mxu0 %v11322_v14  ;;  %vm1465_vm0 = vcmp.gt.f32.partialorder %v13615_v7, 0.0 }
 0x1b1   : > { %v11700_v56 = vpop.eup %11699  ;;  %11711 = vpow2.f32 %v1656_v32  ;;  %vm1467_vm1 = vcmp.gt.f32.partialorder %v13625_v20, 0.0 }
 0x1b2   : > { %v11702_v21 = vpop.eup %11701  ;;  %11713 = vpow2.f32 %v1658_v59  ;;  %2091 = vmatprep.mubr.bf16.mxu1 %v1848_v5  ;;  %v9783_v4 = vadd.f32 -1.0, %v11700_v56 }
 0x1b3   : > { %v11704_v45 = vpop.eup %11703  ;;  %2092 = vmatmul.mubr.bf16.gmra.mrb[32].mxu1 %v1847_v36  ;;  %v9784_v43 = vadd.f32 -1.0, %v11702_v21  ;;  %2445 = vmatpush1.bf16.msra.mxu0 %v11320_v34 }
 0x1b4   : > { %v11706_v38 = vpop.eup %11705  ;;  %v9785_v47 = vadd.f32 -1.0, %v11704_v45  ;;  %v1780_v53 = vsel %vm1460_vm10, %v13579_v31, %v9783_v4  ;;  %2446 = vmatprep.subr.bf16.mxu0 %v11325_v19  ;;  %v11330_v19 = vld [vmem:[%s12924_s14 + $0x50] sm:$0xff]  }
 0x1b5   : > { %v9786_v49 = vadd.f32 -1.0, %v11706_v38  ;;  %v1781_v23 = vsel %vm1461_vm12, %v13583_v62, %v9784_v43  ;;  %v11326_v43 = vld [vmem:[%s12924_s14 + $0x40] sm:$0xff]  }
 0x1b6   : > { %v1782_v10 = vsel %vm1462_vm11, %v13588_v41, %v9785_v47  ;;  %v11327_v38 = vld [vmem:[%s12924_s14] sm:$0xff]   ;;  %v11328_v47 = vld [vmem:[%s12924_s14 + $0x48] sm:$0xff]   ;;  %10720 = vmatprep.subr.bf16.mxu1 %v11326_v43 }
 0x1b7   : > { %v1783_v55 = vsel %vm1463_vm13, %v13593_v6, %v9786_v49  ;;  %v1849_v46 = vpack.c.bf16 %v1782_v10, %v1780_v53  ;;  %2447 = vmatpush1.bf16.msra.mxu0 %v11323_v61  ;;  %10721 = vmatpush3.bf16.msra.mxu1 %v11327_v38 }
 0x1b8   : > { %v1850_v58 = vpack.c.bf16 %v1783_v55, %v1781_v23  ;;  %v11329_v23 = vld [vmem:[%s12924_s14 + $0x8] sm:$0xff]   ;;  %10722 = vmatprep.subr.bf16.mxu1 %v11328_v47 }
 0x1b9   : > { %v11708_v29 = vpop.eup %11707 }
 0x1ba   : > { %v11710_v50 = vpop.eup %11709  ;;  %2099 = vmatprep.mubr.bf16.mxu1 %v1850_v58  ;;  %v9787_v24 = vadd.f32 -1.0, %v11708_v29 }
 0x1bb   : > { %v11712_v0 = vpop.eup %11711  ;;  %2100 = vmatmul.mubr.bf16.gmra.mrb[36].mxu1 %v1849_v46  ;;  %v9788_v31 = vadd.f32 -1.0, %v11710_v50 }
 0x1bc   : > { %v11714_v41 = vpop.eup %11713  ;;  %v9789_v52 = vadd.f32 -1.0, %v11712_v0  ;;  %v1784_v6 = vsel %vm1464_vm14, %v13610_v40, %v9787_v24  ;;  %10723 = vmatpush3.bf16.msra.mxu1 %v11329_v23 }
 0x1bd   : > { %v9790_v62 = vadd.f32 -1.0, %v11714_v41  ;;  %v1785_v57 = vsel %vm1465_vm0, %v13615_v7, %v9788_v31  ;;  %10724 = vmatprep.subr.bf16.mxu1 %v11330_v19 }
 0x1be   : > { %v1786_v1 = vsel %vm1466_vm15, %v13620_v11, %v9789_v52 }
 0x1bf   : > { %v1787_v33 = vsel %vm1467_vm1, %v13625_v20, %v9790_v62  ;;  %v1851_v26 = vpack.c.bf16 %v1786_v1, %v1784_v6  ;;  %v11331_v62 = vld [vmem:[%s12924_s14 + $0x10] sm:$0xff]  }
 0x1c0   : > { %v1852_v37 = vpack.c.bf16 %v1787_v33, %v1785_v57  ;;  %v11332_v33 = vld [vmem:[%s12924_s14 + $0x58] sm:$0xff]   ;;  %10725 = vmatpush3.bf16.msra.mxu1 %v11331_v62 }
 0x1c1   : > { %10726 = vmatprep.subr.bf16.mxu1 %v11332_v33 }
 0x1c2   : > { %2107 = vmatprep.mubr.bf16.mxu1 %v1852_v37 }
 0x1c3   : > { %2108 = vmatmul.mubr.bf16.gmra.mrb[40].mxu1 %v1851_v26 }
 0x21e   : > { %v10624_v30 = vpop.f32.mrb[64].mxu0 }
 0x21f   : > { %v10625_v42 = vpop.f32.mrb[65].mxu0 }
 0x220   : > { %v10626_v60 = vadd.f32 %v10625_v42, %v10624_v30  ;;  %v10627_v18 = vpop.f32.mrb[66].mxu0 }
 0x221   : > { %v10628_v44 = vpop.f32.mrb[67].mxu0 }
 0x222   : > { %v1990_v51 = vadd.f32 %v10626_v60, %v13665_v9  ;;  %v10629_v40 = vadd.f32 %v10628_v44, %v10627_v18  ;;  %v11333_v18 = vld [vmem:[%s12924_s14 + $0x18] sm:$0xff]  }
 0x223   : > { %10727 = vmatpush3.bf16.msra.mxu1 %v11333_v18 }
 0x224   : > { %v2148_v8 = vmin.f32 %v1990_v51, 0.0  ;;  %v1993_v11 = vadd.f32 %v10629_v40, %v13665_v9  ;;  %vm2116_vm2 = vcmp.gt.f32.partialorder %v1990_v51, 0.0 }
 0x226   : > { %v2180_v7 = vmul.f32 1.442695, %v2148_v8  ;;  %v2149_v25 = vmin.f32 %v1993_v11, 0.0  ;;  %v10630_v20 = vpop.f32.mrb[68].mxu0  ;;  %vm2117_vm3 = vcmp.gt.f32.partialorder %v1993_v11, 0.0  ;;  %v11334_v8 = vld [vmem:[%s12924_s14 + $0x60] sm:$0xff]  }
 0x227   : > { %v10631_v48 = vpop.f32.mrb[69].mxu0  ;;  %10728 = vmatprep.subr.bf16.mxu1 %v11334_v8 }
 0x228   : > { %11715 = vpow2.f32 %v2180_v7  ;;  %v2182_v16 = vmul.f32 1.442695, %v2149_v25  ;;  %v10632_v35 = vadd.f32 %v10631_v48, %v10630_v20  ;;  %v10633_v28 = vpop.f32.mrb[70].mxu0 }
 0x229   : > { %v10634_v12 = vpop.f32.mrb[71].mxu0 }
 0x22a   : > { %11717 = vpow2.f32 %v2182_v16  ;;  %v13670_v27 = vadd.f32 %v10632_v35, %v13665_v9  ;;  %v10635_v54 = vadd.f32 %v10634_v12, %v10633_v28  ;;  %v11335_v12 = vld [vmem:[%s12924_s14 + $0x20] sm:$0xff]  }
 0x22b   : > { %10729 = vmatpush3.bf16.msra.mxu1 %v11335_v12 }
 0x22c   : > { %v2150_v17 = vmin.f32 %v13670_v27, 0.0  ;;  %v13674_v63 = vadd.f32 %v10635_v54, %v13665_v9  ;;  %vm2118_vm4 = vcmp.gt.f32.partialorder %v13670_v27, 0.0 }
 0x22e   : > { %v2184_v32 = vmul.f32 1.442695, %v2150_v17  ;;  %v2151_v22 = vmin.f32 %v13674_v63, 0.0  ;;  %v10636_v36 = vpop.f32.mrb[72].mxu0  ;;  %vm2119_vm5 = vcmp.gt.f32.partialorder %v13674_v63, 0.0 }
 0x22f   : > { %v10637_v59 = vpop.f32.mrb[73].mxu0 }
 0x230   : > { %11719 = vpow2.f32 %v2184_v32  ;;  %v2186_v5 = vmul.f32 1.442695, %v2151_v22  ;;  %v10638_v39 = vadd.f32 %v10637_v59, %v10636_v36  ;;  %v10639_v56 = vpop.f32.mrb[74].mxu0 }
 0x231   : > { %v10640_v3 = vpop.f32.mrb[75].mxu0 }
 0x232   : > { %v11716_v21 = vpop.eup %11715  ;;  %11721 = vpow2.f32 %v2186_v5  ;;  %v13678_v4 = vadd.f32 %v10638_v39, %v13665_v9  ;;  %v10641_v45 = vadd.f32 %v10640_v3, %v10639_v56  ;;  %v11337_v39 = vld [vmem:[%s12924_s14 + $0x28] sm:$0xff]  }
 0x233   : > { %v9808_v14 = vadd.f32 -1.0, %v11716_v21 }
 0x234   : > { %v11718_v49 = vpop.eup %11717  ;;  %v2152_v34 = vmin.f32 %v13678_v4, 0.0  ;;  %v13685_v53 = vadd.f32 %v10641_v45, %v13665_v9  ;;  %vm2120_vm6 = vcmp.gt.f32.partialorder %v13678_v4, 0.0 }
 0x235   : > { %v9809_v10 = vadd.f32 -1.0, %v11718_v49  ;;  %v2276_v29 = vsel %vm2116_vm2, %v1990_v51, %v9808_v14 }
 0x236   : > { %v2188_v55 = vmul.f32 1.442695, %v2152_v34  ;;  %v2153_v46 = vmin.f32 %v13685_v53, 0.0  ;;  %v10642_v58 = vpop.f32.mrb[76].mxu0  ;;  %vm2121_vm7 = vcmp.gt.f32.partialorder %v13685_v53, 0.0 }
 0x237   : > { %v2277_v61 = vsel %vm2117_vm3, %v1993_v11, %v9809_v10  ;;  %v10643_v50 = vpop.f32.mrb[77].mxu0 }
 0x238   : > { %v2325_v24 = vpack.c.bf16 %v2277_v61, %v2276_v29  ;;  %11723 = vpow2.f32 %v2188_v55  ;;  %v2190_v0 = vmul.f32 1.442695, %v2153_v46  ;;  %v10644_v31 = vadd.f32 %v10643_v50, %v10642_v58  ;;  %v10645_v41 = vpop.f32.mrb[78].mxu0 }
 0x239   : > { %v10646_v52 = vpop.f32.mrb[79].mxu0 }
 0x23a   : > { %v11720_v6 = vpop.eup %11719  ;;  %11725 = vpow2.f32 %v2190_v0  ;;  %v13692_v1 = vadd.f32 %v10644_v31, %v13665_v9  ;;  %v10647_v57 = vadd.f32 %v10646_v52, %v10645_v41  ;;  %2465 = vmatmul.mubr.bf16.vlgmr.msra.gmra.mrb[84].mxu0 %v2325_v24 }
 0x23b   : > { %2474 = vmatprep.mubr.bf16.mxu0 %v12866_v2  ;;  %v9810_v26 = vadd.f32 -1.0, %v11720_v6 }
 0x23c   : > { %v11722_v37 = vpop.eup %11721  ;;  %v2154_v30 = vmin.f32 %v13692_v1, 0.0  ;;  %v13698_v42 = vadd.f32 %v10647_v57, %v13665_v9  ;;  %vm2122_vm8 = vcmp.gt.f32.partialorder %v13692_v1, 0.0 }
 0x23d   : > { %v9811_v60 = vadd.f32 -1.0, %v11722_v37  ;;  %v2278_v7 = vsel %vm2118_vm4, %v13670_v27, %v9810_v26  ;;  %v11336_v27 = vld [vmem:[%s12924_s14 + $0x68] sm:$0xff]  }
 0x23e   : > { %v2192_v44 = vmul.f32 1.442695, %v2154_v30  ;;  %v2155_v51 = vmin.f32 %v13698_v42, 0.0  ;;  %v10648_v40 = vpop.f32.mrb[80].mxu0  ;;  %10730 = vmatprep.subr.bf16.mxu1 %v11336_v27  ;;  %vm2123_vm9 = vcmp.gt.f32.partialorder %v13698_v42, 0.0 }
 0x23f   : > { %v10649_v11 = vpop.f32.mrb[81].mxu0  ;;  %v2279_v25 = vsel %vm2119_vm5, %v13674_v63, %v9811_v60  ;;  %10731 = vmatpush3.bf16.msra.mxu1 %v11337_v39 }
 0x240   : > { %11727 = vpow2.f32 %v2192_v44  ;;  %v2194_v20 = vmul.f32 1.442695, %v2155_v51  ;;  %v10650_v48 = vadd.f32 %v10649_v11, %v10648_v40  ;;  %v10651_v16 = vpop.f32.mrb[82].mxu0  ;;  %v2326_v35 = vpack.c.bf16 %v2279_v25, %v2278_v7 }
 0x241   : > { %v10652_v28 = vpop.f32.mrb[83].mxu0 }
 0x242   : > { %v11724_v54 = vpop.eup %11723  ;;  %11729 = vpow2.f32 %v2194_v20  ;;  %v13709_v17 = vadd.f32 %v10650_v48, %v13665_v9  ;;  %v10653_v32 = vadd.f32 %v10652_v28, %v10651_v16  ;;  %2475 = vmatmul.mubr.bf16.gmra.mrb[88].mxu0 %v2326_v35 }
 0x243   : > { %2484 = vmatprep.mubr.bf16.mxu0 %v12866_v2  ;;  %v9812_v63 = vadd.f32 -1.0, %v11724_v54 }
 0x244   : > { %v11726_v22 = vpop.eup %11725  ;;  %v2156_v36 = vmin.f32 %v13709_v17, 0.0  ;;  %v13715_v59 = vadd.f32 %v10653_v32, %v13665_v9  ;;  %vm2124_vm10 = vcmp.gt.f32.partialorder %v13709_v17, 0.0 }
 0x245   : > { %v9813_v5 = vadd.f32 -1.0, %v11726_v22  ;;  %v2280_v43 = vsel %vm2120_vm6, %v13678_v4, %v9812_v63 }
 0x246   : > { %v2196_v56 = vmul.f32 1.442695, %v2156_v36  ;;  %v2157_v3 = vmin.f32 %v13715_v59, 0.0  ;;  %v10654_v21 = vpop.f32.mrb[0].mxu1  ;;  %vm2125_vm11 = vcmp.gt.f32.partialorder %v13715_v59, 0.0 }
 0x247   : > { %v10655_v45 = vpop.f32.mrb[1].mxu1  ;;  %v2281_v38 = vsel %vm2121_vm7, %v13685_v53, %v9813_v5 }
 0x248   : > { %11731 = vpow2.f32 %v2196_v56  ;;  %v2198_v47 = vmul.f32 1.442695, %v2157_v3  ;;  %v10656_v14 = vadd.f32 %v10655_v45, %v10654_v21  ;;  %v10657_v49 = vpop.f32.mrb[2].mxu1  ;;  %v2327_v34 = vpack.c.bf16 %v2281_v38, %v2280_v43 }
 0x249   : > { %v10658_v10 = vpop.f32.mrb[3].mxu1 }
 0x24a   : > { %v11728_v23 = vpop.eup %11727  ;;  %11733 = vpow2.f32 %v2198_v47  ;;  %v13724_v55 = vadd.f32 %v10656_v14, %v13665_v9  ;;  %v10659_v46 = vadd.f32 %v10658_v10, %v10657_v49  ;;  %2485 = vmatmul.mubr.bf16.gmra.mrb[92].mxu0 %v2327_v34 }
 0x24b   : > { %2494 = vmatprep.mubr.bf16.mxu0 %v12866_v2  ;;  %v9814_v58 = vadd.f32 -1.0, %v11728_v23 }
 0x24c   : > { %v11730_v4 = vpop.eup %11729  ;;  %v2158_v53 = vmin.f32 %v13724_v55, 0.0  ;;  %v2033_v19 = vadd.f32 %v10659_v46, %v13665_v9  ;;  %vm2126_vm12 = vcmp.gt.f32.partialorder %v13724_v55, 0.0 }
 0x24d   : > { %v9815_v29 = vadd.f32 -1.0, %v11730_v4  ;;  %v2282_v31 = vsel %vm2122_vm8, %v13692_v1, %v9814_v58 }
 0x24e   : > { %v2200_v61 = vmul.f32 1.442695, %v2158_v53  ;;  %v2159_v50 = vmin.f32 %v2033_v19, 0.0  ;;  %v10660_v24 = vpop.f32.mrb[4].mxu1  ;;  %vm2127_vm13 = vcmp.gt.f32.partialorder %v2033_v19, 0.0 }
 0x24f   : > { %v10661_v0 = vpop.f32.mrb[5].mxu1  ;;  %v2283_v41 = vsel %vm2123_vm9, %v13698_v42, %v9815_v29 }
 0x250   : > { %11735 = vpow2.f32 %v2200_v61  ;;  %v2202_v52 = vmul.f32 1.442695, %v2159_v50  ;;  %v10662_v62 = vadd.f32 %v10661_v0, %v10660_v24  ;;  %v10663_v6 = vpop.f32.mrb[6].mxu1  ;;  %v2328_v57 = vpack.c.bf16 %v2283_v41, %v2282_v31 }
 0x251   : > { %v10664_v33 = vpop.f32.mrb[7].mxu1 }
 0x252   : > { %v11732_v26 = vpop.eup %11731  ;;  %11737 = vpow2.f32 %v2202_v52  ;;  %v13734_v37 = vadd.f32 %v10662_v62, %v13665_v9  ;;  %v10665_v30 = vadd.f32 %v10664_v33, %v10663_v6  ;;  %2495 = vmatmul.mubr.bf16.gmra.mrb[96].mxu0 %v2328_v57 }
 0x253   : > { %2504 = vmatprep.mubr.bf16.mxu0 %v12866_v2  ;;  %v9816_v60 = vadd.f32 -1.0, %v11732_v26 }
 0x254   : > { %v11734_v18 = vpop.eup %11733  ;;  %v2160_v1 = vmin.f32 %v13734_v37, 0.0  ;;  %v2041_v42 = vadd.f32 %v10665_v30, %v13665_v9  ;;  %vm2128_vm14 = vcmp.gt.f32.partialorder %v13734_v37, 0.0 }
 0x255   : > { %v9817_v44 = vadd.f32 -1.0, %v11734_v18  ;;  %v2284_v7 = vsel %vm2124_vm10, %v13709_v17, %v9816_v60 }
 0x256   : > { %v2204_v51 = vmul.f32 1.442695, %v2160_v1  ;;  %v2161_v40 = vmin.f32 %v2041_v42, 0.0  ;;  %v10666_v8 = vpop.f32.mrb[8].mxu1  ;;  %vm2129_vm15 = vcmp.gt.f32.partialorder %v2041_v42, 0.0 }
 0x257   : > { %v10667_v11 = vpop.f32.mrb[9].mxu1  ;;  %v2285_v25 = vsel %vm2125_vm11, %v13715_v59, %v9817_v44 }
 0x258   : > { %11739 = vpow2.f32 %v2204_v51  ;;  %v2206_v20 = vmul.f32 1.442695, %v2161_v40  ;;  %v10668_v48 = vadd.f32 %v10667_v11, %v10666_v8  ;;  %v10669_v16 = vpop.f32.mrb[10].mxu1  ;;  %v2329_v35 = vpack.c.bf16 %v2285_v25, %v2284_v7 }
 0x259   : > { %v10670_v28 = vpop.f32.mrb[11].mxu1 }
 0x25a   : > { %v11736_v12 = vpop.eup %11735  ;;  %11741 = vpow2.f32 %v2206_v20  ;;  %v13744_v54 = vadd.f32 %v10668_v48, %v13665_v9  ;;  %v10671_v32 = vadd.f32 %v10670_v28, %v10669_v16  ;;  %2505 = vmatmul.mubr.bf16.gmra.mrb[100].mxu0 %v2329_v35 }
 0x25b   : > { %2514 = vmatprep.mubr.bf16.mxu0 %v12866_v2  ;;  %v9818_v27 = vadd.f32 -1.0, %v11736_v12 }
 0x25c   : > { %v11738_v63 = vpop.eup %11737  ;;  %v2162_v17 = vmin.f32 %v13744_v54, 0.0  ;;  %v2049_v22 = vadd.f32 %v10671_v32, %v13665_v9  ;;  %vm2130_vm0 = vcmp.gt.f32.partialorder %v13744_v54, 0.0 }
 0x25d   : > { %v9819_v36 = vadd.f32 -1.0, %v11738_v63  ;;  %v2286_v3 = vsel %vm2126_vm12, %v13724_v55, %v9818_v27 }
 0x25e   : > { %v2208_v59 = vmul.f32 1.442695, %v2162_v17  ;;  %v2163_v5 = vmin.f32 %v2049_v22, 0.0  ;;  %v10672_v39 = vpop.f32.mrb[12].mxu1  ;;  %vm2131_vm1 = vcmp.gt.f32.partialorder %v2049_v22, 0.0 }
 0x25f   : > { %v10673_v56 = vpop.f32.mrb[13].mxu1  ;;  %v2287_v21 = vsel %vm2127_vm13, %v2033_v19, %v9819_v36 }
 0x260   : > { %11743 = vpow2.f32 %v2208_v59  ;;  %v2210_v45 = vmul.f32 1.442695, %v2163_v5  ;;  %v10674_v43 = vadd.f32 %v10673_v56, %v10672_v39  ;;  %v10675_v38 = vpop.f32.mrb[14].mxu1  ;;  %v2330_v47 = vpack.c.bf16 %v2287_v21, %v2286_v3 }
 0x261   : > { %v10676_v14 = vpop.f32.mrb[15].mxu1 }
 0x262   : > { %v11740_v49 = vpop.eup %11739  ;;  %11745 = vpow2.f32 %v2210_v45  ;;  %v13752_v34 = vadd.f32 %v10674_v43, %v13665_v9  ;;  %v10677_v10 = vadd.f32 %v10676_v14, %v10675_v38  ;;  %2515 = vmatmul.mubr.bf16.gmra.mrb[104].mxu0 %v2330_v47 }
 0x263   : > { %2524 = vmatprep.mubr.bf16.mxu0 %v12866_v2  ;;  %v9820_v23 = vadd.f32 -1.0, %v11740_v49 }
 0x264   : > { %v11742_v46 = vpop.eup %11741  ;;  %v2164_v55 = vmin.f32 %v13752_v34, 0.0  ;;  %v2057_v58 = vadd.f32 %v10677_v10, %v13665_v9  ;;  %vm2132_vm2 = vcmp.gt.f32.partialorder %v13752_v34, 0.0 }
 0x265   : > { %v9821_v4 = vadd.f32 -1.0, %v11742_v46  ;;  %v2288_v50 = vsel %vm2128_vm14, %v13734_v37, %v9820_v23 }
 0x266   : > { %v2212_v53 = vmul.f32 1.442695, %v2164_v55  ;;  %v2165_v19 = vmin.f32 %v2057_v58, 0.0  ;;  %v10678_v29 = vpop.f32.mrb[16].mxu1  ;;  %vm2133_vm3 = vcmp.gt.f32.partialorder %v2057_v58, 0.0 }
 0x267   : > { %v10679_v61 = vpop.f32.mrb[17].mxu1  ;;  %v2289_v24 = vsel %vm2129_vm15, %v2041_v42, %v9821_v4 }
 0x268   : > { %11747 = vpow2.f32 %v2212_v53  ;;  %v2214_v0 = vmul.f32 1.442695, %v2165_v19  ;;  %v10680_v31 = vadd.f32 %v10679_v61, %v10678_v29  ;;  %v10681_v41 = vpop.f32.mrb[18].mxu1  ;;  %v2331_v52 = vpack.c.bf16 %v2289_v24, %v2288_v50 }
 0x269   : > { %v10682_v62 = vpop.f32.mrb[19].mxu1 }
 0x26a   : > { %v11744_v6 = vpop.eup %11743  ;;  %11749 = vpow2.f32 %v2214_v0  ;;  %v13760_v57 = vadd.f32 %v10680_v31, %v13665_v9  ;;  %v10683_v33 = vadd.f32 %v10682_v62, %v10681_v41  ;;  %2525 = vmatmul.mubr.bf16.gmra.mrb[108].mxu0 %v2331_v52 }
 0x26b   : > { %2534 = vmatprep.mubr.bf16.mxu0 %v12866_v2  ;;  %v9822_v26 = vadd.f32 -1.0, %v11744_v6 }
 0x26c   : > { %v11746_v30 = vpop.eup %11745  ;;  %v2166_v37 = vmin.f32 %v13760_v57, 0.0  ;;  %v2065_v60 = vadd.f32 %v10683_v33, %v13665_v9  ;;  %vm2134_vm4 = vcmp.gt.f32.partialorder %v13760_v57, 0.0 }
 0x26d   : > { %v9823_v18 = vadd.f32 -1.0, %v11746_v30  ;;  %v2290_v40 = vsel %vm2130_vm0, %v13744_v54, %v9822_v26 }
 0x26e   : > { %v2216_v1 = vmul.f32 1.442695, %v2166_v37  ;;  %v2167_v42 = vmin.f32 %v2065_v60, 0.0  ;;  %v10684_v44 = vpop.f32.mrb[20].mxu1  ;;  %vm2135_vm5 = vcmp.gt.f32.partialorder %v2065_v60, 0.0 }
 0x26f   : > { %v10685_v51 = vpop.f32.mrb[21].mxu1  ;;  %v2291_v8 = vsel %vm2131_vm1, %v2049_v22, %v9823_v18 }
 0x270   : > { %11751 = vpow2.f32 %v2216_v1  ;;  %v2218_v11 = vmul.f32 1.442695, %v2167_v42  ;;  %v10686_v7 = vadd.f32 %v10685_v51, %v10684_v44  ;;  %v10687_v25 = vpop.f32.mrb[22].mxu1  ;;  %v2332_v20 = vpack.c.bf16 %v2291_v8, %v2290_v40 }
 0x271   : > { %v10688_v48 = vpop.f32.mrb[23].mxu1 }
 0x272   : > { %v11748_v16 = vpop.eup %11747  ;;  %11753 = vpow2.f32 %v2218_v11  ;;  %v13768_v35 = vadd.f32 %v10686_v7, %v13665_v9  ;;  %v10689_v28 = vadd.f32 %v10688_v48, %v10687_v25  ;;  %2535 = vmatmul.mubr.bf16.gmra.mrb[112].mxu0 %v2332_v20 }
 0x273   : > { %2544 = vmatprep.mubr.bf16.mxu0 %v12866_v2  ;;  %v9824_v12 = vadd.f32 -1.0, %v11748_v16 }
 0x274   : > { %v11750_v32 = vpop.eup %11749  ;;  %v2168_v54 = vmin.f32 %v13768_v35, 0.0  ;;  %v2073_v27 = vadd.f32 %v10689_v28, %v13665_v9  ;;  %vm2136_vm6 = vcmp.gt.f32.partialorder %v13768_v35, 0.0 }
 0x275   : > { %v9825_v63 = vadd.f32 -1.0, %v11750_v32  ;;  %v2292_v5 = vsel %vm2132_vm2, %v13752_v34, %v9824_v12 }
 0x276   : > { %v2220_v17 = vmul.f32 1.442695, %v2168_v54  ;;  %v2169_v22 = vmin.f32 %v2073_v27, 0.0  ;;  %v10690_v36 = vpop.f32.mrb[24].mxu1  ;;  %vm2137_vm7 = vcmp.gt.f32.partialorder %v2073_v27, 0.0 }
 0x277   : > { %v10691_v59 = vpop.f32.mrb[25].mxu1  ;;  %v2293_v39 = vsel %vm2133_vm3, %v2057_v58, %v9825_v63 }
 0x278   : > { %11755 = vpow2.f32 %v2220_v17  ;;  %v2222_v56 = vmul.f32 1.442695, %v2169_v22  ;;  %v10692_v3 = vadd.f32 %v10691_v59, %v10690_v36  ;;  %v10693_v21 = vpop.f32.mrb[26].mxu1  ;;  %v2333_v45 = vpack.c.bf16 %v2293_v39, %v2292_v5 }
 0x279   : > { %v10694_v43 = vpop.f32.mrb[27].mxu1 }
 0x27a   : > { %v11752_v38 = vpop.eup %11751  ;;  %11757 = vpow2.f32 %v2222_v56  ;;  %v13776_v47 = vadd.f32 %v10692_v3, %v13665_v9  ;;  %v10695_v14 = vadd.f32 %v10694_v43, %v10693_v21  ;;  %2545 = vmatmul.mubr.bf16.gmra.mrb[116].mxu0 %v2333_v45 }
 0x27b   : > { %2554 = vmatprep.mubr.bf16.mxu0 %v12866_v2  ;;  %v9826_v49 = vadd.f32 -1.0, %v11752_v38 }
 0x27c   : > { %v11754_v10 = vpop.eup %11753  ;;  %v2170_v34 = vmin.f32 %v13776_v47, 0.0  ;;  %v2081_v23 = vadd.f32 %v10695_v14, %v13665_v9  ;;  %vm2138_vm8 = vcmp.gt.f32.partialorder %v13776_v47, 0.0 }
 0x27d   : > { %v9827_v46 = vadd.f32 -1.0, %v11754_v10  ;;  %v2294_v19 = vsel %vm2134_vm4, %v13760_v57, %v9826_v49 }
 0x27e   : > { %v2224_v55 = vmul.f32 1.442695, %v2170_v34  ;;  %v2171_v58 = vmin.f32 %v2081_v23, 0.0  ;;  %v10696_v4 = vpop.f32.mrb[28].mxu1  ;;  %vm2139_vm9 = vcmp.gt.f32.partialorder %v2081_v23, 0.0 }
 0x27f   : > { %v10697_v53 = vpop.f32.mrb[29].mxu1  ;;  %v2295_v29 = vsel %vm2135_vm5, %v2065_v60, %v9827_v46 }
 0x280   : > { %11759 = vpow2.f32 %v2224_v55  ;;  %v2226_v61 = vmul.f32 1.442695, %v2171_v58  ;;  %v10698_v50 = vadd.f32 %v10697_v53, %v10696_v4  ;;  %v10699_v24 = vpop.f32.mrb[30].mxu1  ;;  %v2334_v0 = vpack.c.bf16 %v2295_v29, %v2294_v19 }
 0x281   : > { %v10700_v31 = vpop.f32.mrb[31].mxu1 }
 0x282   : > { %v11756_v41 = vpop.eup %11755  ;;  %11761 = vpow2.f32 %v2226_v61  ;;  %v13784_v52 = vadd.f32 %v10698_v50, %v13665_v9  ;;  %v10701_v62 = vadd.f32 %v10700_v31, %v10699_v24  ;;  %2555 = vmatmul.mubr.bf16.gmra.mrb[120].mxu0 %v2334_v0 }
 0x283   : > { %2564 = vmatprep.mubr.bf16.mxu0 %v12866_v2  ;;  %v9828_v6 = vadd.f32 -1.0, %v11756_v41 }
 0x284   : > { %v11758_v33 = vpop.eup %11757  ;;  %v2172_v57 = vmin.f32 %v13784_v52, 0.0  ;;  %v2089_v26 = vadd.f32 %v10701_v62, %v13665_v9  ;;  %vm2140_vm10 = vcmp.gt.f32.partialorder %v13784_v52, 0.0 }
 0x285   : > { %v9829_v30 = vadd.f32 -1.0, %v11758_v33  ;;  %v2296_v42 = vsel %vm2136_vm6, %v13768_v35, %v9828_v6 }
 0x286   : > { %v2228_v37 = vmul.f32 1.442695, %v2172_v57  ;;  %v2173_v60 = vmin.f32 %v2089_v26, 0.0  ;;  %v10702_v18 = vpop.f32.mrb[32].mxu1  ;;  %vm2141_vm11 = vcmp.gt.f32.partialorder %v2089_v26, 0.0 }
 0x287   : > { %v10703_v1 = vpop.f32.mrb[33].mxu1  ;;  %v2297_v44 = vsel %vm2137_vm7, %v2073_v27, %v9829_v30 }
 0x288   : > { %11763 = vpow2.f32 %v2228_v37  ;;  %v2230_v51 = vmul.f32 1.442695, %v2173_v60  ;;  %v10704_v40 = vadd.f32 %v10703_v1, %v10702_v18  ;;  %v10705_v8 = vpop.f32.mrb[34].mxu1  ;;  %v2335_v11 = vpack.c.bf16 %v2297_v44, %v2296_v42  ;;  %v11338_v42 = vld [vmem:[%s12924_s14 + $0x70] sm:$0xff]  }
 0x289   : > { %v10706_v7 = vpop.f32.mrb[35].mxu1  ;;  %v11339_v44 = vld [vmem:[%s12924_s14 + $0x30] sm:$0xff]   ;;  %10732 = vmatprep.subr.bf16.mxu1 %v11338_v42 }
 0x28a   : > { %v11760_v25 = vpop.eup %11759  ;;  %11765 = vpow2.f32 %v2230_v51  ;;  %v13792_v20 = vadd.f32 %v10704_v40, %v13665_v9  ;;  %v10707_v48 = vadd.f32 %v10706_v7, %v10705_v8  ;;  %2565 = vmatmul.mubr.bf16.gmra.mrb[124].mxu0 %v2335_v11  ;;  %v11340_v40 = vld [vmem:[%s12924_s14 + $0x78] sm:$0xff]   ;;  %10733 = vmatpush3.bf16.msra.mxu1 %v11339_v44 }
 0x28b   : > { %2574 = vmatprep.mubr.bf16.mxu0 %v12866_v2  ;;  %v9830_v16 = vadd.f32 -1.0, %v11760_v25  ;;  %v11341_v11 = vld [vmem:[%s12924_s14 + $0x38] sm:$0xff]   ;;  %10734 = vmatprep.subr.bf16.mxu1 %v11340_v40 }
 0x28c   : > { %v11762_v28 = vpop.eup %11761  ;;  %v2174_v35 = vmin.f32 %v13792_v20, 0.0  ;;  %v2097_v12 = vadd.f32 %v10707_v48, %v13665_v9  ;;  %vm2142_vm12 = vcmp.gt.f32.partialorder %v13792_v20, 0.0 }
 0x28d   : > { %v9831_v32 = vadd.f32 -1.0, %v11762_v28  ;;  %v2298_v22 = vsel %vm2138_vm8, %v13776_v47, %v9830_v16 }
 0x28e   : > { %v2232_v54 = vmul.f32 1.442695, %v2174_v35  ;;  %v2175_v27 = vmin.f32 %v2097_v12, 0.0  ;;  %v10708_v63 = vpop.f32.mrb[36].mxu1  ;;  %vm2143_vm13 = vcmp.gt.f32.partialorder %v2097_v12, 0.0  ;;  %10735 = vmatpush3.bf16.msra.mxu1 %v11341_v11  ;;  %v11344_v11 = vld [vmem:[%s12934_s24 + $0x10] sm:$0xff]  }
 0x28f   : > { %v10709_v17 = vpop.f32.mrb[37].mxu1  ;;  %v2299_v36 = vsel %vm2139_vm9, %v2081_v23, %v9831_v32 }
 0x290   : > { %11767 = vpow2.f32 %v2232_v54  ;;  %v2234_v59 = vmul.f32 1.442695, %v2175_v27  ;;  %v10710_v5 = vadd.f32 %v10709_v17, %v10708_v63  ;;  %v10711_v39 = vpop.f32.mrb[38].mxu1  ;;  %v2336_v56 = vpack.c.bf16 %v2299_v36, %v2298_v22  ;;  %v2324_v27 = vld [vmem:[%s17609_s8] sm:$0x3] }
 0x291   : > { %v10712_v3 = vpop.f32.mrb[39].mxu1  ;;  %v13817_v63 = vrot.slane %v2324_v27, %v13179_v13  ;;  %v13820_v17 = vrot.slane %v2324_v27, %v13182_v15 }
 0x292   : > { %v11764_v21 = vpop.eup %11763  ;;  %11769 = vpow2.f32 %v2234_v59  ;;  %v2102_v45 = vadd.f32 %v10710_v5, %v13665_v9  ;;  %v10713_v43 = vadd.f32 %v10712_v3, %v10711_v39  ;;  %2575 = vmatmul.mubr.bf16.gmra.mrb[128].mxu0 %v2336_v56 }
 0x293   : > { %2584 = vmatprep.mubr.bf16.mxu0 %v12866_v2  ;;  %v9832_v38 = vadd.f32 -1.0, %v11764_v21 }
 0x294   : > { %v11766_v14 = vpop.eup %11765  ;;  %v2176_v49 = vmin.f32 %v2102_v45, 0.0  ;;  %v2105_v47 = vadd.f32 %v10713_v43, %v13665_v9  ;;  %vm2144_vm14 = vcmp.gt.f32.partialorder %v2102_v45, 0.0 }
 0x295   : > { %v9833_v10 = vadd.f32 -1.0, %v11766_v14  ;;  %v2300_v58 = vsel %vm2140_vm10, %v13784_v52, %v9832_v38 }
 0x296   : > { %v2236_v34 = vmul.f32 1.442695, %v2176_v49  ;;  %v2177_v23 = vmin.f32 %v2105_v47, 0.0  ;;  %v10714_v46 = vpop.f32.mrb[40].mxu1  ;;  %vm2145_vm15 = vcmp.gt.f32.partialorder %v2105_v47, 0.0 }
 0x297   : > { %v10715_v55 = vpop.f32.mrb[41].mxu1  ;;  %v2301_v4 = vsel %vm2141_vm11, %v2089_v26, %v9833_v10 }
 0x298   : > { %11771 = vpow2.f32 %v2236_v34  ;;  %v2238_v53 = vmul.f32 1.442695, %v2177_v23  ;;  %v10716_v19 = vadd.f32 %v10715_v55, %v10714_v46  ;;  %v10717_v29 = vpop.f32.mrb[42].mxu1  ;;  %v2337_v61 = vpack.c.bf16 %v2301_v4, %v2300_v58 }
 0x299   : > { %v10718_v50 = vpop.f32.mrb[43].mxu1 }
 0x29a   : > { %v11768_v24 = vpop.eup %11767  ;;  %11773 = vpow2.f32 %v2238_v53  ;;  %v2110_v0 = vadd.f32 %v10716_v19, %v13665_v9  ;;  %v10719_v31 = vadd.f32 %v10718_v50, %v10717_v29  ;;  %2585 = vmatmul.mubr.bf16.gmra.mrb[132].mxu0 %v2337_v61  ;;  %v11342_v61 = vld [vmem:[%s12934_s24] sm:$0xff]  }
 0x29b   : > { %2594 = vmatprep.mubr.bf16.mxu0 %v12866_v2  ;;  %v9834_v41 = vadd.f32 -1.0, %v11768_v24  ;;  %11076 = vmatprep.subr.bf16.mxu0 %v11342_v61 }
 0x29c   : > { %v11770_v62 = vpop.eup %11769  ;;  %v2178_v6 = vmin.f32 %v2110_v0, 0.0  ;;  %v2113_v52 = vadd.f32 %v10719_v31, %v13665_v9  ;;  %vm2146_vm0 = vcmp.gt.f32.partialorder %v2110_v0, 0.0  ;;  %11077 = vmatpush3.bf16.msra.mxu0 %v11342_v61 }
 0x29d   : > { %v9835_v33 = vadd.f32 -1.0, %v11770_v62  ;;  %v2302_v30 = vsel %vm2142_vm12, %v13792_v20, %v9834_v41 }
 0x29e   : > { %v2240_v57 = vmul.f32 1.442695, %v2178_v6  ;;  %v2179_v26 = vmin.f32 %v2113_v52, 0.0  ;;  %vm2147_vm1 = vcmp.gt.f32.partialorder %v2113_v52, 0.0 }
 0x29f   : > { %v2303_v37 = vsel %vm2143_vm13, %v2097_v12, %v9835_v33 }
 0x2a0   : > { %11775 = vpow2.f32 %v2240_v57  ;;  %v2242_v60 = vmul.f32 1.442695, %v2179_v26  ;;  %v2338_v18 = vpack.c.bf16 %v2303_v37, %v2302_v30 }
 0x2a2   : > { %v11772_v1 = vpop.eup %11771  ;;  %11777 = vpow2.f32 %v2242_v60  ;;  %2595 = vmatmul.mubr.bf16.gmra.mrb[136].mxu0 %v2338_v18 }
 0x2a3   : > { %2604 = vmatprep.mubr.bf16.mxu0 %v12866_v2  ;;  %v9836_v9 = vadd.f32 -1.0, %v11772_v1 }
 0x2a4   : > { %v11774_v51 = vpop.eup %11773 }
 0x2a5   : > { %v9837_v8 = vadd.f32 -1.0, %v11774_v51  ;;  %v2304_v7 = vsel %vm2144_vm14, %v2102_v45, %v9836_v9 }
 0x2a7   : > { %v2305_v25 = vsel %vm2145_vm15, %v2105_v47, %v9837_v8  ;;  %v11343_v8 = vld [vmem:[%s12934_s24 + $0x8] sm:$0xff]  }
 0x2a8   : > { %v2339_v20 = vpack.c.bf16 %v2305_v25, %v2304_v7  ;;  %11078 = vmatprep.subr.bf16.mxu0 %v11343_v8 }
 0x2a9   : > { %11079 = vmatpush3.bf16.msra.mxu0 %v11343_v8 }
 0x2aa   : > { %v11776_v48 = vpop.eup %11775  ;;  %2605 = vmatmul.mubr.bf16.gmra.mrb[140].mxu0 %v2339_v20  ;;  %11080 = vmatprep.subr.bf16.mxu0 %v11344_v11 }
 0x2ab   : > { %2614 = vmatprep.mubr.bf16.mxu0 %v12866_v2  ;;  %v9838_v16 = vadd.f32 -1.0, %v11776_v48 }
 0x2ac   : > { %v11778_v28 = vpop.eup %11777 }
 0x2ad   : > { %v9839_v35 = vadd.f32 -1.0, %v11778_v28  ;;  %v2306_v12 = vsel %vm2146_vm0, %v2110_v0, %v9838_v16  ;;  %11081 = vmatpush3.bf16.msra.mxu0 %v11344_v11 }
 0x2af   : > { %v2307_v32 = vsel %vm2147_vm1, %v2113_v52, %v9839_v35 }
 0x2b0   : > { %v2340_v54 = vpack.c.bf16 %v2307_v32, %v2306_v12 }
 0x2b2   : > { %2615 = vmatmul.mubr.bf16.gmra.mrb[144].mxu0 %v2340_v54 }
 0x30d   : > { %v2466_v22 = vpop.f32.mrb[84].mxu0 }
 0x30e   : > { %v13823_v36 = vadd.f32 %v2466_v22, %v13817_v63  ;;  %v2468_v59 = vpop.f32.mrb[85].mxu0 }
 0x30f   : > { %v13826_v5 = vadd.f32 %v2468_v59, %v13820_v17  ;;  %v2470_v39 = vpop.f32.mrb[86].mxu0 }
 0x310   : > { %v2689_v56 = vmin.f32 %v13823_v36, 0.0  ;;  %v13830_v3 = vadd.f32 %v2470_v39, %v13817_v63  ;;  %v2472_v21 = vpop.f32.mrb[87].mxu0  ;;  %vm2625_vm2 = vcmp.gt.f32.partialorder %v13823_v36, 0.0 }
 0x311   : > { %v2690_v45 = vmin.f32 %v13826_v5, 0.0  ;;  %v13834_v43 = vadd.f32 %v2472_v21, %v13820_v17  ;;  %vm2626_vm3 = vcmp.gt.f32.partialorder %v13826_v5, 0.0 }
 0x312   : > { %v2753_v38 = vmul.f32 1.442695, %v2689_v56  ;;  %v2691_v14 = vmin.f32 %v13830_v3, 0.0  ;;  %vm2627_vm4 = vcmp.gt.f32.partialorder %v13830_v3, 0.0 }
 0x313   : > { %v2755_v49 = vmul.f32 1.442695, %v2690_v45  ;;  %v2692_v47 = vmin.f32 %v13834_v43, 0.0  ;;  %vm2628_vm5 = vcmp.gt.f32.partialorder %v13834_v43, 0.0 }
 0x314   : > { %11779 = vpow2.f32 %v2753_v38  ;;  %v2757_v10 = vmul.f32 1.442695, %v2691_v14 }
 0x315   : > { %11781 = vpow2.f32 %v2755_v49  ;;  %v2759_v34 = vmul.f32 1.442695, %v2692_v47  ;;  %v2476_v23 = vpop.f32.mrb[88].mxu0 }
 0x316   : > { %11783 = vpow2.f32 %v2757_v10  ;;  %v13839_v46 = vadd.f32 %v2476_v23, %v13817_v63  ;;  %v2478_v55 = vpop.f32.mrb[89].mxu0 }
 0x317   : > { %11785 = vpow2.f32 %v2759_v34  ;;  %v13842_v58 = vadd.f32 %v2478_v55, %v13820_v17  ;;  %v2480_v4 = vpop.f32.mrb[90].mxu0 }
 0x318   : > { %v2693_v53 = vmin.f32 %v13839_v46, 0.0  ;;  %v13846_v19 = vadd.f32 %v2480_v4, %v13817_v63  ;;  %v2482_v29 = vpop.f32.mrb[91].mxu0  ;;  %vm2629_vm6 = vcmp.gt.f32.partialorder %v13839_v46, 0.0 }
 0x319   : > { %v2694_v50 = vmin.f32 %v13842_v58, 0.0  ;;  %v13851_v24 = vadd.f32 %v2482_v29, %v13820_v17  ;;  %vm2630_vm7 = vcmp.gt.f32.partialorder %v13842_v58, 0.0 }
 0x31a   : > { %v2761_v0 = vmul.f32 1.442695, %v2693_v53  ;;  %v2695_v31 = vmin.f32 %v13846_v19, 0.0  ;;  %vm2631_vm8 = vcmp.gt.f32.partialorder %v13846_v19, 0.0 }
 0x31b   : > { %v2763_v41 = vmul.f32 1.442695, %v2694_v50  ;;  %v2696_v62 = vmin.f32 %v13851_v24, 0.0  ;;  %vm2632_vm9 = vcmp.gt.f32.partialorder %v13851_v24, 0.0 }
 0x31c   : > { %11787 = vpow2.f32 %v2761_v0  ;;  %v2765_v6 = vmul.f32 1.442695, %v2695_v31 }
 0x31d   : > { %11789 = vpow2.f32 %v2763_v41  ;;  %v2767_v52 = vmul.f32 1.442695, %v2696_v62  ;;  %v2486_v33 = vpop.f32.mrb[92].mxu0 }
 0x31e   : > { %v11780_v57 = vpop.eup %11779  ;;  %11791 = vpow2.f32 %v2765_v6  ;;  %v13857_v26 = vadd.f32 %v2486_v33, %v13817_v63  ;;  %v2488_v30 = vpop.f32.mrb[93].mxu0 }
 0x31f   : > { %v11782_v37 = vpop.eup %11781  ;;  %v9856_v60 = vadd.f32 -1.0, %v11780_v57  ;;  %11793 = vpow2.f32 %v2767_v52  ;;  %v13860_v18 = vadd.f32 %v2488_v30, %v13820_v17  ;;  %v2490_v1 = vpop.f32.mrb[94].mxu0 }
 0x320   : > { %v11784_v42 = vpop.eup %11783  ;;  %v2697_v9 = vmin.f32 %v13857_v26, 0.0  ;;  %v13866_v44 = vadd.f32 %v2490_v1, %v13817_v63  ;;  %v2492_v51 = vpop.f32.mrb[95].mxu0  ;;  %v9857_v40 = vadd.f32 -1.0, %v11782_v37  ;;  %vm2633_vm10 = vcmp.gt.f32.partialorder %v13857_v26, 0.0 }
 0x321   : > { %v11786_v7 = vpop.eup %11785  ;;  %v9858_v25 = vadd.f32 -1.0, %v11784_v42  ;;  %v2698_v20 = vmin.f32 %v13860_v18, 0.0  ;;  %v13872_v48 = vadd.f32 %v2492_v51, %v13820_v17  ;;  %v2945_v16 = vsel %vm2625_vm2, %v13823_v36, %v9856_v60 }
 0x322   : > { %v2769_v28 = vmul.f32 1.442695, %v2697_v9  ;;  %v2699_v35 = vmin.f32 %v13866_v44, 0.0  ;;  %v9859_v12 = vadd.f32 -1.0, %v11786_v7  ;;  %v2946_v22 = vsel %vm2626_vm3, %v13826_v5, %v9857_v40 }
 0x323   : > { %v2947_v32 = vsel %vm2627_vm4, %v13830_v3, %v9858_v25  ;;  %v2771_v54 = vmul.f32 1.442695, %v2698_v20  ;;  %v2700_v27 = vmin.f32 %v13872_v48, 0.0  ;;  %vm2634_vm11 = vcmp.gt.f32.partialorder %v13860_v18, 0.0 }
 0x324   : > { %v3042_v59 = vpack.c.bf16 %v2947_v32, %v2945_v16  ;;  %11795 = vpow2.f32 %v2769_v28  ;;  %v2773_v36 = vmul.f32 1.442695, %v2699_v35  ;;  %v2948_v39 = vsel %vm2628_vm5, %v13834_v43, %v9859_v12 }
 0x325   : > { %11797 = vpow2.f32 %v2771_v54  ;;  %v2775_v56 = vmul.f32 1.442695, %v2700_v27  ;;  %v2496_v21 = vpop.f32.mrb[96].mxu0  ;;  %v3043_v45 = vpack.c.bf16 %v2948_v39, %v2946_v22  ;;  %vm2636_vm12 = vcmp.gt.f32.partialorder %v13872_v48, 0.0 }
 0x326   : > { %v11788_v38 = vpop.eup %11787  ;;  %11799 = vpow2.f32 %v2773_v36  ;;  %v13888_v3 = vadd.f32 %v2496_v21, %v13817_v63  ;;  %v2498_v14 = vpop.f32.mrb[97].mxu0  ;;  %vm2635_vm13 = vcmp.gt.f32.partialorder %v13866_v44, 0.0 }
 0x327   : > { %v11790_v5 = vpop.eup %11789  ;;  %11801 = vpow2.f32 %v2775_v56  ;;  %v13892_v49 = vadd.f32 %v2498_v14, %v13820_v17  ;;  %v2500_v47 = vpop.f32.mrb[98].mxu0  ;;  %3208 = vmatprep.mubr.bf16.mxu1 %v3043_v45  ;;  %v9860_v43 = vadd.f32 -1.0, %v11788_v38 }
 0x328   : > { %v11792_v10 = vpop.eup %11791  ;;  %v2701_v34 = vmin.f32 %v13888_v3, 0.0  ;;  %v13897_v23 = vadd.f32 %v2500_v47, %v13817_v63  ;;  %v2502_v55 = vpop.f32.mrb[99].mxu0  ;;  %3209 = vmatmul.mubr.bf16.vlgmr.msra.gmra.mrb[44].mxu1 %v3042_v59  ;;  %v9861_v4 = vadd.f32 -1.0, %v11790_v5  ;;  %vm2637_vm14 = vcmp.gt.f32.partialorder %v13888_v3, 0.0 }
 0x329   : > { %v11794_v53 = vpop.eup %11793  ;;  %v2702_v29 = vmin.f32 %v13892_v49, 0.0  ;;  %v13902_v61 = vadd.f32 %v2502_v55, %v13820_v17  ;;  %v9862_v50 = vadd.f32 -1.0, %v11792_v10  ;;  %v2949_v62 = vsel %vm2629_vm6, %v13839_v46, %v9860_v43 }
 0x32a   : > { %v2777_v0 = vmul.f32 1.442695, %v2701_v34  ;;  %v2703_v31 = vmin.f32 %v13897_v23, 0.0  ;;  %v9863_v41 = vadd.f32 -1.0, %v11794_v53  ;;  %v2950_v33 = vsel %vm2630_vm7, %v13842_v58, %v9861_v4 }
 0x32b   : > { %v2779_v6 = vmul.f32 1.442695, %v2702_v29  ;;  %v2704_v52 = vmin.f32 %v13902_v61, 0.0  ;;  %v2951_v57 = vsel %vm2631_vm8, %v13846_v19, %v9862_v50  ;;  %vm2638_vm15 = vcmp.gt.f32.partialorder %v13892_v49, 0.0 }
 0x32c   : > { %11803 = vpow2.f32 %v2777_v0  ;;  %v2781_v30 = vmul.f32 1.442695, %v2703_v31  ;;  %v2952_v37 = vsel %vm2632_vm9, %v13851_v24, %v9863_v41  ;;  %v3044_v60 = vpack.c.bf16 %v2951_v57, %v2949_v62 }
 0x32d   : > { %11805 = vpow2.f32 %v2779_v6  ;;  %v2783_v1 = vmul.f32 1.442695, %v2704_v52  ;;  %v2506_v42 = vpop.f32.mrb[100].mxu0  ;;  %v3045_v9 = vpack.c.bf16 %v2952_v37, %v2950_v33  ;;  %vm2640_vm0 = vcmp.gt.f32.partialorder %v13902_v61, 0.0 }
 0x32e   : > { %v11796_v51 = vpop.eup %11795  ;;  %11807 = vpow2.f32 %v2781_v30  ;;  %v13916_v46 = vadd.f32 %v2506_v42, %v13817_v63  ;;  %v2508_v40 = vpop.f32.mrb[101].mxu0  ;;  %vm2639_vm1 = vcmp.gt.f32.partialorder %v13897_v23, 0.0 }
 0x32f   : > { %v11798_v58 = vpop.eup %11797  ;;  %11809 = vpow2.f32 %v2783_v1  ;;  %v13920_v19 = vadd.f32 %v2508_v40, %v13820_v17  ;;  %v2510_v8 = vpop.f32.mrb[102].mxu0  ;;  %3216 = vmatprep.mubr.bf16.mxu1 %v3045_v9  ;;  %v9864_v24 = vadd.f32 -1.0, %v11796_v51 }
 0x330   : > { %v11800_v11 = vpop.eup %11799  ;;  %v2705_v7 = vmin.f32 %v13916_v46, 0.0  ;;  %v13925_v25 = vadd.f32 %v2510_v8, %v13817_v63  ;;  %v2512_v20 = vpop.f32.mrb[103].mxu0  ;;  %3217 = vmatmul.mubr.bf16.gmra.mrb[48].mxu1 %v3044_v60  ;;  %v9865_v16 = vadd.f32 -1.0, %v11798_v58  ;;  %vm2641_vm2 = vcmp.gt.f32.partialorder %v13916_v46, 0.0 }
 0x331   : > { %v11802_v28 = vpop.eup %11801  ;;  %v2706_v35 = vmin.f32 %v13920_v19, 0.0  ;;  %v13930_v12 = vadd.f32 %v2512_v20, %v13820_v17  ;;  %v9866_v32 = vadd.f32 -1.0, %v11800_v11  ;;  %v2953_v59 = vsel %vm2633_vm10, %v13857_v26, %v9864_v24 }
 0x332   : > { %v2785_v54 = vmul.f32 1.442695, %v2705_v7  ;;  %v2707_v27 = vmin.f32 %v13925_v25, 0.0  ;;  %v9867_v22 = vadd.f32 -1.0, %v11802_v28  ;;  %v2954_v56 = vsel %vm2634_vm11, %v13860_v18, %v9865_v16 }
 0x333   : > { %v2787_v36 = vmul.f32 1.442695, %v2706_v35  ;;  %v2708_v39 = vmin.f32 %v13930_v12, 0.0  ;;  %v2955_v21 = vsel %vm2635_vm13, %v13866_v44, %v9866_v32  ;;  %vm2642_vm3 = vcmp.gt.f32.partialorder %v13920_v19, 0.0 }
 0x334   : > { %11811 = vpow2.f32 %v2785_v54  ;;  %v2789_v45 = vmul.f32 1.442695, %v2707_v27  ;;  %v2956_v38 = vsel %vm2636_vm12, %v13872_v48, %v9867_v22  ;;  %v3046_v14 = vpack.c.bf16 %v2955_v21, %v2953_v59 }
 0x335   : > { %11813 = vpow2.f32 %v2787_v36  ;;  %v2791_v5 = vmul.f32 1.442695, %v2708_v39  ;;  %v2516_v47 = vpop.f32.mrb[104].mxu0  ;;  %v3047_v26 = vpack.c.bf16 %v2956_v38, %v2954_v56  ;;  %vm2644_vm4 = vcmp.gt.f32.partialorder %v13930_v12, 0.0 }
 0x336   : > { %v11804_v43 = vpop.eup %11803  ;;  %11815 = vpow2.f32 %v2789_v45  ;;  %v13946_v10 = vadd.f32 %v2516_v47, %v13817_v63  ;;  %v2518_v34 = vpop.f32.mrb[105].mxu0  ;;  %vm2643_vm5 = vcmp.gt.f32.partialorder %v13925_v25, 0.0 }
 0x337   : > { %v11806_v18 = vpop.eup %11805  ;;  %11817 = vpow2.f32 %v2791_v5  ;;  %v13950_v44 = vadd.f32 %v2518_v34, %v13820_v17  ;;  %v2520_v55 = vpop.f32.mrb[106].mxu0  ;;  %3224 = vmatprep.mubr.bf16.mxu1 %v3047_v26  ;;  %v9868_v48 = vadd.f32 -1.0, %v11804_v43 }
 0x338   : > { %v11808_v4 = vpop.eup %11807  ;;  %v2709_v53 = vmin.f32 %v13946_v10, 0.0  ;;  %v13955_v29 = vadd.f32 %v2520_v55, %v13817_v63  ;;  %v2522_v50 = vpop.f32.mrb[107].mxu0  ;;  %3225 = vmatmul.mubr.bf16.gmra.mrb[52].mxu1 %v3046_v14  ;;  %v9869_v0 = vadd.f32 -1.0, %v11806_v18  ;;  %vm2645_vm6 = vcmp.gt.f32.partialorder %v13946_v10, 0.0 }
 0x339   : > { %v11810_v31 = vpop.eup %11809  ;;  %v2710_v41 = vmin.f32 %v13950_v44, 0.0  ;;  %v13960_v62 = vadd.f32 %v2522_v50, %v13820_v17  ;;  %v9870_v6 = vadd.f32 -1.0, %v11808_v4  ;;  %v2957_v30 = vsel %vm2637_vm14, %v13888_v3, %v9868_v48 }
 0x33a   : > { %v2793_v52 = vmul.f32 1.442695, %v2709_v53  ;;  %v2711_v33 = vmin.f32 %v13955_v29, 0.0  ;;  %v9871_v57 = vadd.f32 -1.0, %v11810_v31  ;;  %v2958_v1 = vsel %vm2638_vm15, %v13892_v49, %v9869_v0 }
 0x33b   : > { %v2795_v37 = vmul.f32 1.442695, %v2710_v41  ;;  %v2712_v60 = vmin.f32 %v13960_v62, 0.0  ;;  %v2959_v42 = vsel %vm2639_vm1, %v13897_v23, %v9870_v6  ;;  %vm2646_vm7 = vcmp.gt.f32.partialorder %v13950_v44, 0.0 }
 0x33c   : > { %11819 = vpow2.f32 %v2793_v52  ;;  %v2797_v9 = vmul.f32 1.442695, %v2711_v33  ;;  %v2960_v51 = vsel %vm2640_vm0, %v13902_v61, %v9871_v57  ;;  %v3048_v40 = vpack.c.bf16 %v2959_v42, %v2957_v30 }
 0x33d   : > { %11821 = vpow2.f32 %v2795_v37  ;;  %v2799_v58 = vmul.f32 1.442695, %v2712_v60  ;;  %v2526_v8 = vpop.f32.mrb[108].mxu0  ;;  %v3049_v3 = vpack.c.bf16 %v2960_v51, %v2958_v1  ;;  %vm2648_vm8 = vcmp.gt.f32.partialorder %v13960_v62, 0.0 }
 0x33e   : > { %v11812_v24 = vpop.eup %11811  ;;  %11823 = vpow2.f32 %v2797_v9  ;;  %v13976_v11 = vadd.f32 %v2526_v8, %v13817_v63  ;;  %v2528_v7 = vpop.f32.mrb[109].mxu0  ;;  %vm2647_vm9 = vcmp.gt.f32.partialorder %v13955_v29, 0.0 }
 0x33f   : > { %v11814_v49 = vpop.eup %11813  ;;  %11825 = vpow2.f32 %v2799_v58  ;;  %v13980_v23 = vadd.f32 %v2528_v7, %v13820_v17  ;;  %v2530_v20 = vpop.f32.mrb[110].mxu0  ;;  %3232 = vmatprep.mubr.bf16.mxu1 %v3049_v3  ;;  %v9872_v61 = vadd.f32 -1.0, %v11812_v24 }
 0x340   : > { %v11816_v16 = vpop.eup %11815  ;;  %v2713_v28 = vmin.f32 %v13976_v11, 0.0  ;;  %v13985_v35 = vadd.f32 %v2530_v20, %v13817_v63  ;;  %v2532_v32 = vpop.f32.mrb[111].mxu0  ;;  %3233 = vmatmul.mubr.bf16.gmra.mrb[56].mxu1 %v3048_v40  ;;  %v9873_v54 = vadd.f32 -1.0, %v11814_v49  ;;  %vm2649_vm10 = vcmp.gt.f32.partialorder %v13976_v11, 0.0 }
 0x341   : > { %v11818_v27 = vpop.eup %11817  ;;  %v2714_v22 = vmin.f32 %v13980_v23, 0.0  ;;  %v13990_v59 = vadd.f32 %v2532_v32, %v13820_v17  ;;  %v9874_v36 = vadd.f32 -1.0, %v11816_v16  ;;  %v2961_v45 = vsel %vm2641_vm2, %v13916_v46, %v9872_v61 }
 0x342   : > { %v2801_v39 = vmul.f32 1.442695, %v2713_v28  ;;  %v2715_v56 = vmin.f32 %v13985_v35, 0.0  ;;  %v9875_v21 = vadd.f32 -1.0, %v11818_v27  ;;  %v2962_v5 = vsel %vm2642_vm3, %v13920_v19, %v9873_v54 }
 0x343   : > { %v2803_v38 = vmul.f32 1.442695, %v2714_v22  ;;  %v2716_v14 = vmin.f32 %v13990_v59, 0.0  ;;  %v2963_v47 = vsel %vm2643_vm5, %v13925_v25, %v9874_v36  ;;  %vm2650_vm11 = vcmp.gt.f32.partialorder %v13980_v23, 0.0 }
 0x344   : > { %11827 = vpow2.f32 %v2801_v39  ;;  %v2805_v26 = vmul.f32 1.442695, %v2715_v56  ;;  %v2964_v43 = vsel %vm2644_vm4, %v13930_v12, %v9875_v21  ;;  %v3050_v34 = vpack.c.bf16 %v2963_v47, %v2961_v45 }
 0x345   : > { %11829 = vpow2.f32 %v2803_v38  ;;  %v2807_v18 = vmul.f32 1.442695, %v2716_v14  ;;  %v2536_v55 = vpop.f32.mrb[112].mxu0  ;;  %v3051_v46 = vpack.c.bf16 %v2964_v43, %v2962_v5  ;;  %vm2652_vm12 = vcmp.gt.f32.partialorder %v13990_v59, 0.0 }
 0x346   : > { %v11820_v48 = vpop.eup %11819  ;;  %11831 = vpow2.f32 %v2805_v26  ;;  %v14006_v4 = vadd.f32 %v2536_v55, %v13817_v63  ;;  %v2538_v53 = vpop.f32.mrb[113].mxu0  ;;  %vm2651_vm13 = vcmp.gt.f32.partialorder %v13985_v35, 0.0 }
 0x347   : > { %v11822_v19 = vpop.eup %11821  ;;  %11833 = vpow2.f32 %v2807_v18  ;;  %v14010_v25 = vadd.f32 %v2538_v53, %v13820_v17  ;;  %v2540_v50 = vpop.f32.mrb[114].mxu0  ;;  %3240 = vmatprep.mubr.bf16.mxu1 %v3051_v46  ;;  %v9876_v12 = vadd.f32 -1.0, %v11820_v48 }
 0x348   : > { %v11824_v0 = vpop.eup %11823  ;;  %v2717_v31 = vmin.f32 %v14006_v4, 0.0  ;;  %v14015_v41 = vadd.f32 %v2540_v50, %v13817_v63  ;;  %v2542_v6 = vpop.f32.mrb[115].mxu0  ;;  %3241 = vmatmul.mubr.bf16.gmra.mrb[60].mxu1 %v3050_v34  ;;  %v9877_v52 = vadd.f32 -1.0, %v11822_v19  ;;  %vm2653_vm14 = vcmp.gt.f32.partialorder %v14006_v4, 0.0 }
 0x349   : > { %v11826_v33 = vpop.eup %11825  ;;  %v2718_v57 = vmin.f32 %v14010_v25, 0.0  ;;  %v14020_v30 = vadd.f32 %v2542_v6, %v13820_v17  ;;  %v9878_v37 = vadd.f32 -1.0, %v11824_v0  ;;  %v2965_v9 = vsel %vm2645_vm6, %v13946_v10, %v9876_v12 }
 0x34a   : > { %v2809_v60 = vmul.f32 1.442695, %v2717_v31  ;;  %v2719_v1 = vmin.f32 %v14015_v41, 0.0  ;;  %v9879_v42 = vadd.f32 -1.0, %v11826_v33  ;;  %v2966_v58 = vsel %vm2646_vm7, %v13950_v44, %v9877_v52 }
 0x34b   : > { %v2811_v51 = vmul.f32 1.442695, %v2718_v57  ;;  %v2720_v40 = vmin.f32 %v14020_v30, 0.0  ;;  %v2967_v8 = vsel %vm2647_vm9, %v13955_v29, %v9878_v37  ;;  %vm2654_vm15 = vcmp.gt.f32.partialorder %v14010_v25, 0.0 }
 0x34c   : > { %11835 = vpow2.f32 %v2809_v60  ;;  %v2813_v3 = vmul.f32 1.442695, %v2719_v1  ;;  %v2968_v24 = vsel %vm2648_vm8, %v13960_v62, %v9879_v42  ;;  %v3052_v7 = vpack.c.bf16 %v2967_v8, %v2965_v9 }
 0x34d   : > { %11837 = vpow2.f32 %v2811_v51  ;;  %v2815_v49 = vmul.f32 1.442695, %v2720_v40  ;;  %v2546_v20 = vpop.f32.mrb[116].mxu0  ;;  %v3053_v10 = vpack.c.bf16 %v2968_v24, %v2966_v58  ;;  %vm2656_vm0 = vcmp.gt.f32.partialorder %v14020_v30, 0.0 }
 0x34e   : > { %v11828_v61 = vpop.eup %11827  ;;  %11839 = vpow2.f32 %v2813_v3  ;;  %v14036_v16 = vadd.f32 %v2546_v20, %v13817_v63  ;;  %v2548_v28 = vpop.f32.mrb[117].mxu0  ;;  %vm2655_vm1 = vcmp.gt.f32.partialorder %v14015_v41, 0.0 }
 0x34f   : > { %v11830_v44 = vpop.eup %11829  ;;  %11841 = vpow2.f32 %v2815_v49  ;;  %v14040_v29 = vadd.f32 %v2548_v28, %v13820_v17  ;;  %v2550_v32 = vpop.f32.mrb[118].mxu0  ;;  %3248 = vmatprep.mubr.bf16.mxu1 %v3053_v10  ;;  %v9880_v62 = vadd.f32 -1.0, %v11828_v61 }
 0x350   : > { %v11832_v54 = vpop.eup %11831  ;;  %v2721_v27 = vmin.f32 %v14036_v16, 0.0  ;;  %v14045_v22 = vadd.f32 %v2550_v32, %v13817_v63  ;;  %v2552_v36 = vpop.f32.mrb[119].mxu0  ;;  %3249 = vmatmul.mubr.bf16.gmra.mrb[64].mxu1 %v3052_v7  ;;  %v9881_v39 = vadd.f32 -1.0, %v11830_v44  ;;  %vm2657_vm2 = vcmp.gt.f32.partialorder %v14036_v16, 0.0 }
 0x351   : > { %v11834_v56 = vpop.eup %11833  ;;  %v2722_v21 = vmin.f32 %v14040_v29, 0.0  ;;  %v14050_v45 = vadd.f32 %v2552_v36, %v13820_v17  ;;  %v9882_v38 = vadd.f32 -1.0, %v11832_v54  ;;  %v2969_v26 = vsel %vm2649_vm10, %v13976_v11, %v9880_v62 }
 0x352   : > { %v2817_v14 = vmul.f32 1.442695, %v2721_v27  ;;  %v2723_v5 = vmin.f32 %v14045_v22, 0.0  ;;  %v9883_v47 = vadd.f32 -1.0, %v11834_v56  ;;  %v2970_v18 = vsel %vm2650_vm11, %v13980_v23, %v9881_v39 }
 0x353   : > { %v2819_v43 = vmul.f32 1.442695, %v2722_v21  ;;  %v2724_v34 = vmin.f32 %v14050_v45, 0.0  ;;  %v2971_v55 = vsel %vm2651_vm13, %v13985_v35, %v9882_v38  ;;  %vm2658_vm3 = vcmp.gt.f32.partialorder %v14040_v29, 0.0 }
 0x354   : > { %11843 = vpow2.f32 %v2817_v14  ;;  %v2821_v46 = vmul.f32 1.442695, %v2723_v5  ;;  %v2972_v48 = vsel %vm2652_vm12, %v13990_v59, %v9883_v47  ;;  %v3054_v53 = vpack.c.bf16 %v2971_v55, %v2969_v26 }
 0x355   : > { %11845 = vpow2.f32 %v2819_v43  ;;  %v2823_v19 = vmul.f32 1.442695, %v2724_v34  ;;  %v2556_v50 = vpop.f32.mrb[120].mxu0  ;;  %v3055_v11 = vpack.c.bf16 %v2972_v48, %v2970_v18  ;;  %vm2660_vm4 = vcmp.gt.f32.partialorder %v14050_v45, 0.0 }
 0x356   : > { %v11836_v12 = vpop.eup %11835  ;;  %11847 = vpow2.f32 %v2821_v46  ;;  %v14066_v0 = vadd.f32 %v2556_v50, %v13817_v63  ;;  %v2558_v31 = vpop.f32.mrb[121].mxu0  ;;  %vm2659_vm5 = vcmp.gt.f32.partialorder %v14045_v22, 0.0 }
 0x357   : > { %v11838_v23 = vpop.eup %11837  ;;  %11849 = vpow2.f32 %v2823_v19  ;;  %v14070_v35 = vadd.f32 %v2558_v31, %v13820_v17  ;;  %v2560_v6 = vpop.f32.mrb[122].mxu0  ;;  %3256 = vmatprep.mubr.bf16.mxu1 %v3055_v11  ;;  %v9884_v59 = vadd.f32 -1.0, %v11836_v12 }
 0x358   : > { %v11840_v52 = vpop.eup %11839  ;;  %v2725_v33 = vmin.f32 %v14066_v0, 0.0  ;;  %v14075_v57 = vadd.f32 %v2560_v6, %v13817_v63  ;;  %v2562_v37 = vpop.f32.mrb[123].mxu0  ;;  %3257 = vmatmul.mubr.bf16.gmra.mrb[68].mxu1 %v3054_v53  ;;  %v9885_v60 = vadd.f32 -1.0, %v11838_v23  ;;  %vm2661_vm6 = vcmp.gt.f32.partialorder %v14066_v0, 0.0 }
 0x359   : > { %v11842_v1 = vpop.eup %11841  ;;  %v2726_v42 = vmin.f32 %v14070_v35, 0.0  ;;  %v14080_v9 = vadd.f32 %v2562_v37, %v13820_v17  ;;  %v9886_v51 = vadd.f32 -1.0, %v11840_v52  ;;  %v2973_v3 = vsel %vm2653_vm14, %v14006_v4, %v9884_v59 }
 0x35a   : > { %v2825_v40 = vmul.f32 1.442695, %v2725_v33  ;;  %v2727_v58 = vmin.f32 %v14075_v57, 0.0  ;;  %v9887_v8 = vadd.f32 -1.0, %v11842_v1  ;;  %v2974_v49 = vsel %vm2654_vm15, %v14010_v25, %v9885_v60 }
 0x35b   : > { %v2827_v24 = vmul.f32 1.442695, %v2726_v42  ;;  %v2728_v7 = vmin.f32 %v14080_v9, 0.0  ;;  %v2975_v20 = vsel %vm2655_vm1, %v14015_v41, %v9886_v51  ;;  %vm2662_vm7 = vcmp.gt.f32.partialorder %v14070_v35, 0.0 }
 0x35c   : > { %11851 = vpow2.f32 %v2825_v40  ;;  %v2829_v10 = vmul.f32 1.442695, %v2727_v58  ;;  %v2976_v61 = vsel %vm2656_vm0, %v14020_v30, %v9887_v8  ;;  %v3056_v28 = vpack.c.bf16 %v2975_v20, %v2973_v3 }
 0x35d   : > { %11853 = vpow2.f32 %v2827_v24  ;;  %v2831_v44 = vmul.f32 1.442695, %v2728_v7  ;;  %v2566_v32 = vpop.f32.mrb[124].mxu0  ;;  %v3057_v4 = vpack.c.bf16 %v2976_v61, %v2974_v49  ;;  %vm2664_vm8 = vcmp.gt.f32.partialorder %v14080_v9, 0.0 }
 0x35e   : > { %v11844_v62 = vpop.eup %11843  ;;  %11855 = vpow2.f32 %v2829_v10  ;;  %v14096_v54 = vadd.f32 %v2566_v32, %v13817_v63  ;;  %v2568_v27 = vpop.f32.mrb[125].mxu0  ;;  %vm2663_vm9 = vcmp.gt.f32.partialorder %v14075_v57, 0.0 }
 0x35f   : > { %v11846_v25 = vpop.eup %11845  ;;  %11857 = vpow2.f32 %v2831_v44  ;;  %v14100_v41 = vadd.f32 %v2568_v27, %v13820_v17  ;;  %v2570_v36 = vpop.f32.mrb[126].mxu0  ;;  %3264 = vmatprep.mubr.bf16.mxu1 %v3057_v4  ;;  %v9888_v30 = vadd.f32 -1.0, %v11844_v62 }
 0x360   : > { %v11848_v39 = vpop.eup %11847  ;;  %v2729_v56 = vmin.f32 %v14096_v54, 0.0  ;;  %v14105_v21 = vadd.f32 %v2570_v36, %v13817_v63  ;;  %v2572_v38 = vpop.f32.mrb[127].mxu0  ;;  %3265 = vmatmul.mubr.bf16.gmra.mrb[72].mxu1 %v3056_v28  ;;  %v9889_v14 = vadd.f32 -1.0, %v11846_v25  ;;  %vm2665_vm10 = vcmp.gt.f32.partialorder %v14096_v54, 0.0 }
 0x361   : > { %v11850_v5 = vpop.eup %11849  ;;  %v2730_v47 = vmin.f32 %v14100_v41, 0.0  ;;  %v14110_v26 = vadd.f32 %v2572_v38, %v13820_v17  ;;  %v9890_v43 = vadd.f32 -1.0, %v11848_v39  ;;  %v2977_v46 = vsel %vm2657_vm2, %v14036_v16, %v9888_v30 }
 0x362   : > { %v2833_v34 = vmul.f32 1.442695, %v2729_v56  ;;  %v2731_v18 = vmin.f32 %v14105_v21, 0.0  ;;  %v9891_v55 = vadd.f32 -1.0, %v11850_v5  ;;  %v2978_v19 = vsel %vm2658_vm3, %v14040_v29, %v9889_v14 }
 0x363   : > { %v2835_v48 = vmul.f32 1.442695, %v2730_v47  ;;  %v2732_v53 = vmin.f32 %v14110_v26, 0.0  ;;  %v2979_v50 = vsel %vm2659_vm5, %v14045_v22, %v9890_v43  ;;  %vm2666_vm11 = vcmp.gt.f32.partialorder %v14100_v41, 0.0 }
 0x364   : > { %11859 = vpow2.f32 %v2833_v34  ;;  %v2837_v11 = vmul.f32 1.442695, %v2731_v18  ;;  %v2980_v12 = vsel %vm2660_vm4, %v14050_v45, %v9891_v55  ;;  %v3058_v31 = vpack.c.bf16 %v2979_v50, %v2977_v46 }
 0x365   : > { %11861 = vpow2.f32 %v2835_v48  ;;  %v2839_v23 = vmul.f32 1.442695, %v2732_v53  ;;  %v2576_v6 = vpop.f32.mrb[128].mxu0  ;;  %v3059_v16 = vpack.c.bf16 %v2980_v12, %v2978_v19  ;;  %vm2668_vm12 = vcmp.gt.f32.partialorder %v14110_v26, 0.0 }
 0x366   : > { %v11852_v59 = vpop.eup %11851  ;;  %11863 = vpow2.f32 %v2837_v11  ;;  %v14126_v52 = vadd.f32 %v2576_v6, %v13817_v63  ;;  %v2578_v33 = vpop.f32.mrb[129].mxu0  ;;  %vm2667_vm13 = vcmp.gt.f32.partialorder %v14105_v21, 0.0 }
 0x367   : > { %v11854_v29 = vpop.eup %11853  ;;  %11865 = vpow2.f32 %v2839_v23  ;;  %v14130_v22 = vadd.f32 %v2578_v33, %v13820_v17  ;;  %v2580_v37 = vpop.f32.mrb[130].mxu0  ;;  %3272 = vmatprep.mubr.bf16.mxu1 %v3059_v16  ;;  %v9892_v45 = vadd.f32 -1.0, %v11852_v59 }
 0x368   : > { %v11856_v60 = vpop.eup %11855  ;;  %v2733_v1 = vmin.f32 %v14126_v52, 0.0  ;;  %v14135_v42 = vadd.f32 %v2580_v37, %v13817_v63  ;;  %v2582_v51 = vpop.f32.mrb[131].mxu0  ;;  %3273 = vmatmul.mubr.bf16.gmra.mrb[76].mxu1 %v3058_v31  ;;  %v9893_v40 = vadd.f32 -1.0, %v11854_v29  ;;  %vm2669_vm14 = vcmp.gt.f32.partialorder %v14126_v52, 0.0 }
 0x369   : > { %v11858_v58 = vpop.eup %11857  ;;  %v2734_v8 = vmin.f32 %v14130_v22, 0.0  ;;  %v14140_v3 = vadd.f32 %v2582_v51, %v13820_v17  ;;  %v9894_v24 = vadd.f32 -1.0, %v11856_v60  ;;  %v2981_v10 = vsel %vm2661_vm6, %v14066_v0, %v9892_v45 }
 0x36a   : > { %v2841_v7 = vmul.f32 1.442695, %v2733_v1  ;;  %v2735_v49 = vmin.f32 %v14135_v42, 0.0  ;;  %v9895_v20 = vadd.f32 -1.0, %v11858_v58  ;;  %v2982_v44 = vsel %vm2662_vm7, %v14070_v35, %v9893_v40 }
 0x36b   : > { %v2843_v61 = vmul.f32 1.442695, %v2734_v8  ;;  %v2736_v28 = vmin.f32 %v14140_v3, 0.0  ;;  %v2983_v32 = vsel %vm2663_vm9, %v14075_v57, %v9894_v24  ;;  %vm2670_vm15 = vcmp.gt.f32.partialorder %v14130_v22, 0.0 }
 0x36c   : > { %11867 = vpow2.f32 %v2841_v7  ;;  %v2845_v4 = vmul.f32 1.442695, %v2735_v49  ;;  %v2984_v62 = vsel %vm2664_vm8, %v14080_v9, %v9895_v20  ;;  %v3060_v27 = vpack.c.bf16 %v2983_v32, %v2981_v10 }
 0x36d   : > { %11869 = vpow2.f32 %v2843_v61  ;;  %v2847_v25 = vmul.f32 1.442695, %v2736_v28  ;;  %v2586_v36 = vpop.f32.mrb[132].mxu0  ;;  %v3061_v0 = vpack.c.bf16 %v2984_v62, %v2982_v44  ;;  %vm2672_vm0 = vcmp.gt.f32.partialorder %v14140_v3, 0.0 }
 0x36e   : > { %v11860_v30 = vpop.eup %11859  ;;  %11871 = vpow2.f32 %v2845_v4  ;;  %v14156_v39 = vadd.f32 %v2586_v36, %v13817_v63  ;;  %v2588_v56 = vpop.f32.mrb[133].mxu0  ;;  %vm2671_vm1 = vcmp.gt.f32.partialorder %v14135_v42, 0.0 }
 0x36f   : > { %v11862_v35 = vpop.eup %11861  ;;  %11873 = vpow2.f32 %v2847_v25  ;;  %v14160_v57 = vadd.f32 %v2588_v56, %v13820_v17  ;;  %v2590_v38 = vpop.f32.mrb[134].mxu0  ;;  %3280 = vmatprep.mubr.bf16.mxu1 %v3061_v0  ;;  %v9896_v9 = vadd.f32 -1.0, %v11860_v30 }
 0x370   : > { %v11864_v14 = vpop.eup %11863  ;;  %v2737_v5 = vmin.f32 %v14156_v39, 0.0  ;;  %v14165_v47 = vadd.f32 %v2590_v38, %v13817_v63  ;;  %v2592_v43 = vpop.f32.mrb[135].mxu0  ;;  %3281 = vmatmul.mubr.bf16.gmra.mrb[80].mxu1 %v3060_v27  ;;  %v9897_v34 = vadd.f32 -1.0, %v11862_v35  ;;  %vm2673_vm2 = vcmp.gt.f32.partialorder %v14156_v39, 0.0 }
 0x371   : > { %v11866_v18 = vpop.eup %11865  ;;  %v2738_v55 = vmin.f32 %v14160_v57, 0.0  ;;  %v14170_v46 = vadd.f32 %v2592_v43, %v13820_v17  ;;  %v9898_v48 = vadd.f32 -1.0, %v11864_v14  ;;  %v2985_v11 = vsel %vm2665_vm10, %v14096_v54, %v9896_v9 }
 0x372   : > { %v2849_v53 = vmul.f32 1.442695, %v2737_v5  ;;  %v2739_v19 = vmin.f32 %v14165_v47, 0.0  ;;  %v9899_v50 = vadd.f32 -1.0, %v11866_v18  ;;  %v2986_v23 = vsel %vm2666_vm11, %v14100_v41, %v9897_v34 }
 0x373   : > { %v2851_v12 = vmul.f32 1.442695, %v2738_v55  ;;  %v2740_v31 = vmin.f32 %v14170_v46, 0.0  ;;  %v2987_v6 = vsel %vm2667_vm13, %v14105_v21, %v9898_v48  ;;  %vm2674_vm3 = vcmp.gt.f32.partialorder %v14160_v57, 0.0 }
 0x374   : > { %11875 = vpow2.f32 %v2849_v53  ;;  %v2853_v16 = vmul.f32 1.442695, %v2739_v19  ;;  %v2988_v59 = vsel %vm2668_vm12, %v14110_v26, %v9899_v50  ;;  %v3062_v33 = vpack.c.bf16 %v2987_v6, %v2985_v11 }
 0x375   : > { %11877 = vpow2.f32 %v2851_v12  ;;  %v2855_v29 = vmul.f32 1.442695, %v2740_v31  ;;  %v2596_v37 = vpop.f32.mrb[136].mxu0  ;;  %v3063_v54 = vpack.c.bf16 %v2988_v59, %v2986_v23  ;;  %vm2676_vm4 = vcmp.gt.f32.partialorder %v14170_v46, 0.0 }
 0x376   : > { %v11868_v45 = vpop.eup %11867  ;;  %11879 = vpow2.f32 %v2853_v16  ;;  %v14186_v60 = vadd.f32 %v2596_v37, %v13817_v63  ;;  %v2598_v1 = vpop.f32.mrb[137].mxu0  ;;  %vm2675_vm5 = vcmp.gt.f32.partialorder %v14165_v47, 0.0 }
 0x377   : > { %v11870_v41 = vpop.eup %11869  ;;  %11881 = vpow2.f32 %v2855_v29  ;;  %v14190_v21 = vadd.f32 %v2598_v1, %v13820_v17  ;;  %v2600_v51 = vpop.f32.mrb[138].mxu0  ;;  %3288 = vmatprep.mubr.bf16.mxu1 %v3063_v54  ;;  %v9900_v26 = vadd.f32 -1.0, %v11868_v45 }
 0x378   : > { %v11872_v40 = vpop.eup %11871  ;;  %v2741_v58 = vmin.f32 %v14186_v60, 0.0  ;;  %v14195_v8 = vadd.f32 %v2600_v51, %v13817_v63  ;;  %v2602_v24 = vpop.f32.mrb[139].mxu0  ;;  %3289 = vmatmul.mubr.bf16.gmra.mrb[84].mxu1 %v3062_v33  ;;  %v9901_v7 = vadd.f32 -1.0, %v11870_v41  ;;  %vm2677_vm6 = vcmp.gt.f32.partialorder %v14186_v60, 0.0 }
 0x379   : > { %v11874_v49 = vpop.eup %11873  ;;  %v2742_v20 = vmin.f32 %v14190_v21, 0.0  ;;  %v14200_v10 = vadd.f32 %v2602_v24, %v13820_v17  ;;  %v9902_v61 = vadd.f32 -1.0, %v11872_v40  ;;  %v2989_v4 = vsel %vm2669_vm14, %v14126_v52, %v9900_v26 }
 0x37a   : > { %v2857_v28 = vmul.f32 1.442695, %v2741_v58  ;;  %v2743_v44 = vmin.f32 %v14195_v8, 0.0  ;;  %v9903_v32 = vadd.f32 -1.0, %v11874_v49  ;;  %v2990_v25 = vsel %vm2670_vm15, %v14130_v22, %v9901_v7  ;;  %v11345_v7 = vld [vmem:[%s12934_s24 + $0x18] sm:$0xff]  }
 0x37b   : > { %v2859_v62 = vmul.f32 1.442695, %v2742_v20  ;;  %v2744_v27 = vmin.f32 %v14200_v10, 0.0  ;;  %v2991_v36 = vsel %vm2671_vm1, %v14135_v42, %v9902_v61  ;;  %vm2678_vm7 = vcmp.gt.f32.partialorder %v14190_v21, 0.0  ;;  %11082 = vmatprep.subr.bf16.mxu0 %v11345_v7 }
 0x37c   : > { %11883 = vpow2.f32 %v2857_v28  ;;  %v2861_v0 = vmul.f32 1.442695, %v2743_v44  ;;  %v2992_v30 = vsel %vm2672_vm0, %v14140_v3, %v9903_v32  ;;  %v3064_v56 = vpack.c.bf16 %v2991_v36, %v2989_v4  ;;  %11083 = vmatpush3.bf16.msra.mxu0 %v11345_v7 }
 0x37d   : > { %11885 = vpow2.f32 %v2859_v62  ;;  %v2863_v35 = vmul.f32 1.442695, %v2744_v27  ;;  %v2606_v38 = vpop.f32.mrb[140].mxu0  ;;  %v3065_v52 = vpack.c.bf16 %v2992_v30, %v2990_v25  ;;  %vm2680_vm8 = vcmp.gt.f32.partialorder %v14200_v10, 0.0 }
 0x37e   : > { %v11876_v9 = vpop.eup %11875  ;;  %11887 = vpow2.f32 %v2861_v0  ;;  %v14216_v14 = vadd.f32 %v2606_v38, %v13817_v63  ;;  %v2608_v5 = vpop.f32.mrb[141].mxu0  ;;  %vm2679_vm9 = vcmp.gt.f32.partialorder %v14195_v8, 0.0 }
 0x37f   : > { %v11878_v22 = vpop.eup %11877  ;;  %11889 = vpow2.f32 %v2863_v35  ;;  %v14220_v42 = vadd.f32 %v2608_v5, %v13820_v17  ;;  %v2610_v43 = vpop.f32.mrb[142].mxu0  ;;  %3296 = vmatprep.mubr.bf16.mxu1 %v3065_v52  ;;  %v9904_v3 = vadd.f32 -1.0, %v11876_v9 }
 0x380   : > { %v11880_v34 = vpop.eup %11879  ;;  %v2745_v18 = vmin.f32 %v14216_v14, 0.0  ;;  %v14225_v55 = vadd.f32 %v2610_v43, %v13817_v63  ;;  %v2612_v48 = vpop.f32.mrb[143].mxu0  ;;  %3297 = vmatmul.mubr.bf16.gmra.mrb[88].mxu1 %v3064_v56  ;;  %v9905_v53 = vadd.f32 -1.0, %v11878_v22  ;;  %vm2681_vm10 = vcmp.gt.f32.partialorder %v14216_v14, 0.0 }
 0x381   : > { %v11882_v19 = vpop.eup %11881  ;;  %v2746_v50 = vmin.f32 %v14220_v42, 0.0  ;;  %v14230_v11 = vadd.f32 %v2612_v48, %v13820_v17  ;;  %v9906_v12 = vadd.f32 -1.0, %v11880_v34  ;;  %v2993_v16 = vsel %vm2673_vm2, %v14156_v39, %v9904_v3 }
 0x382   : > { %v2865_v31 = vmul.f32 1.442695, %v2745_v18  ;;  %v2747_v23 = vmin.f32 %v14225_v55, 0.0  ;;  %v9907_v6 = vadd.f32 -1.0, %v11882_v19  ;;  %v2994_v29 = vsel %vm2674_vm3, %v14160_v57, %v9905_v53 }
 0x383   : > { %v2867_v59 = vmul.f32 1.442695, %v2746_v50  ;;  %v2748_v33 = vmin.f32 %v14230_v11, 0.0  ;;  %v2995_v37 = vsel %vm2675_vm5, %v14165_v47, %v9906_v12  ;;  %vm2683_vm11 = vcmp.gt.f32.partialorder %v14225_v55, 0.0 }
 0x384   : > { %11891 = vpow2.f32 %v2865_v31  ;;  %v2869_v54 = vmul.f32 1.442695, %v2747_v23  ;;  %v2996_v45 = vsel %vm2676_vm4, %v14170_v46, %v9907_v6  ;;  %v3066_v1 = vpack.c.bf16 %v2995_v37, %v2993_v16 }
 0x385   : > { %11893 = vpow2.f32 %v2867_v59  ;;  %v2871_v41 = vmul.f32 1.442695, %v2748_v33  ;;  %v2616_v39 = vpop.f32.mrb[144].mxu0  ;;  %v3067_v51 = vpack.c.bf16 %v2996_v45, %v2994_v29  ;;  %vm2682_vm12 = vcmp.gt.f32.partialorder %v14220_v42, 0.0 }
 0x386   : > { %v11884_v26 = vpop.eup %11883  ;;  %11895 = vpow2.f32 %v2869_v54  ;;  %v14246_v40 = vadd.f32 %v2616_v39, %v13817_v63  ;;  %v2618_v57 = vpop.f32.mrb[145].mxu0  ;;  %vm2684_vm13 = vcmp.gt.f32.partialorder %v14230_v11, 0.0  ;;  %v14289_v39 = vld [vmem:[%s12929_s19] ss:$0 sm:$0xff]  ;;  %vm3886_vm2 = vcmask 1043456  }
 0x387   : > { %v11886_v47 = vpop.eup %11885  ;;  %11897 = vpow2.f32 %v2871_v41  ;;  %v14250_v58 = vadd.f32 %v2618_v57, %v13820_v17  ;;  %v2620_v46 = vpop.f32.mrb[146].mxu0  ;;  %3304 = vmatprep.mubr.bf16.mxu1 %v3067_v51  ;;  %v9908_v24 = vadd.f32 -1.0, %v11884_v26  ;;  %vm3584_vm5 = vcmask 523264  }
 0x388   : > { %v11888_v49 = vpop.eup %11887  ;;  %v2749_v20 = vmin.f32 %v14246_v40, 0.0  ;;  %v14256_v61 = vadd.f32 %v2620_v46, %v13817_v63  ;;  %v2622_v28 = vpop.f32.mrb[147].mxu0  ;;  %3305 = vmatmul.mubr.bf16.gmra.mrb[92].mxu1 %v3066_v1  ;;  %v9909_v44 = vadd.f32 -1.0, %v11886_v47  ;;  %vm2685_vm14 = vcmp.gt.f32.partialorder %v14246_v40, 0.0 }
 0x389   : > { %v11890_v32 = vpop.eup %11889  ;;  %v2750_v4 = vmin.f32 %v14250_v58, 0.0  ;;  %v2623_v62 = vadd.f32 %v2622_v28, %v13820_v17  ;;  %v9910_v27 = vadd.f32 -1.0, %v11888_v49  ;;  %v2997_v63 = vsel %vm2677_vm6, %v14186_v60, %v9908_v24  ;;  %v3798_v24 = vld [vmem:[%s17610_s12] sm:$0xff] }
 0x38a   : > { %v2873_v25 = vmul.f32 1.442695, %v2749_v20  ;;  %v2751_v36 = vmin.f32 %v14256_v61, 0.0  ;;  %v9911_v0 = vadd.f32 -1.0, %v11890_v32  ;;  %v2998_v35 = vsel %vm2678_vm7, %v14190_v21, %v9909_v44 }
 0x38b   : > { %v2875_v30 = vmul.f32 1.442695, %v2750_v4  ;;  %v2752_v56 = vmin.f32 %v2623_v62, 0.0  ;;  %v2999_v17 = vsel %vm2679_vm9, %v14195_v8, %v9910_v27  ;;  %vm2687_vm15 = vcmp.gt.f32.partialorder %v14256_v61, 0.0 }
 0x38c   : > { %11899 = vpow2.f32 %v2873_v25  ;;  %v2877_v38 = vmul.f32 1.442695, %v2751_v36  ;;  %v3000_v52 = vsel %vm2680_vm8, %v14200_v10, %v9911_v0  ;;  %v3068_v9 = vpack.c.bf16 %v2999_v17, %v2997_v63 }
 0x38d   : > { %11901 = vpow2.f32 %v2875_v30  ;;  %v2879_v5 = vmul.f32 1.442695, %v2752_v56  ;;  %v3069_v22 = vpack.c.bf16 %v3000_v52, %v2998_v35  ;;  %vm2686_vm0 = vcmp.gt.f32.partialorder %v14250_v58, 0.0 }
 0x38e   : > { %v11892_v60 = vpop.eup %11891  ;;  %11903 = vpow2.f32 %v2877_v38  ;;  %vm2688_vm1 = vcmp.gt.f32.partialorder %v2623_v62, 0.0  ;;  %v9990_v7 = vcombine.low %v3798_v24, %v3798_v24 }
 0x38f   : > { %v11894_v43 = vpop.eup %11893  ;;  %11905 = vpow2.f32 %v2879_v5  ;;  %3312 = vmatprep.mubr.bf16.mxu1 %v3069_v22  ;;  %v9912_v3 = vadd.f32 -1.0, %v11892_v60 }
 0x390   : > { %v11896_v34 = vpop.eup %11895  ;;  %3313 = vmatmul.mubr.bf16.gmra.mrb[96].mxu1 %v3068_v9  ;;  %v9913_v21 = vadd.f32 -1.0, %v11894_v43 }
 0x391   : > { %v11898_v8 = vpop.eup %11897  ;;  %v9914_v18 = vadd.f32 -1.0, %v11896_v34  ;;  %v3001_v10 = vsel %vm2681_vm10, %v14216_v14, %v9912_v3 }
 0x392   : > { %v9915_v48 = vadd.f32 -1.0, %v11898_v8  ;;  %v3002_v19 = vsel %vm2682_vm12, %v14220_v42, %v9913_v21 }
 0x393   : > { %v3003_v53 = vsel %vm2683_vm11, %v14225_v55, %v9914_v18 }
 0x394   : > { %v3004_v50 = vsel %vm2684_vm13, %v14230_v11, %v9915_v48  ;;  %v3070_v12 = vpack.c.bf16 %v3003_v53, %v3001_v10 }
 0x395   : > { %v3071_v31 = vpack.c.bf16 %v3004_v50, %v3002_v19 }
 0x396   : > { %v11900_v23 = vpop.eup %11899 }
 0x397   : > { %v11902_v6 = vpop.eup %11901  ;;  %3320 = vmatprep.mubr.bf16.mxu1 %v3071_v31  ;;  %v9916_v16 = vadd.f32 -1.0, %v11900_v23 }
 0x398   : > { %v11904_v59 = vpop.eup %11903  ;;  %3321 = vmatmul.mubr.bf16.gmra.mrb[100].mxu1 %v3070_v12  ;;  %v9917_v33 = vadd.f32 -1.0, %v11902_v6 }
 0x399   : > { %v11906_v29 = vpop.eup %11905  ;;  %v9918_v37 = vadd.f32 -1.0, %v11904_v59  ;;  %v3005_v14 = vsel %vm2685_vm14, %v14246_v40, %v9916_v16 }
 0x39a   : > { %v9919_v54 = vadd.f32 -1.0, %v11906_v29  ;;  %v3006_v55 = vsel %vm2686_vm0, %v14250_v58, %v9917_v33  ;;  %v9991_v58 = vcombine.high %v3798_v24, %v3798_v24 }
 0x39b   : > { %v3007_v42 = vsel %vm2687_vm15, %v14256_v61, %v9918_v37  ;;  %v3888_v61 = vsel %vm3886_vm2, %v9990_v7, 0 }
 0x39c   : > { %v3008_v11 = vsel %vm2688_vm1, %v2623_v62, %v9919_v54  ;;  %v3072_v45 = vpack.c.bf16 %v3007_v42, %v3005_v14  ;;  %9992 = vmatprep.subr.msk.bf16.mxu1 %vm3886_vm2, %v9991_v58 }
 0x39d   : > { %v3073_v1 = vpack.c.bf16 %v3008_v11, %v3006_v55  ;;  %3894 = vmatpush1.bf16.msra.mxu1 %v3888_v61 }
 0x39f   : > { %3328 = vmatprep.mubr.bf16.mxu1 %v3073_v1 }
 0x3a0   : > { %3329 = vmatmul.mubr.bf16.gmra.mrb[104].mxu1 %v3072_v45 }
 0x3a1   : > { %3925 = vmatprep.mubr.bf16.mxu1 %v12866_v2 }
 0x3fb   : > { %v10736_v41 = vpop.f32.mrb[44].mxu1 }
 0x3fc   : > { %v10737_v51 = vpop.f32.mrb[45].mxu1 }
 0x3fd   : > { %v10738_v26 = vadd.f32 %v10737_v51, %v10736_v41  ;;  %v10739_v57 = vpop.f32.mrb[46].mxu1 }
 0x3fe   : > { %v10740_v47 = vpop.f32.mrb[47].mxu1 }
 0x3ff   : > { %v3211_v40 = vadd.f32 %v10738_v26, %v14289_v39  ;;  %v10741_v46 = vadd.f32 %v10740_v47, %v10739_v57 }
 0x401   : > { %v3369_v49 = vmin.f32 %v3211_v40, 0.0  ;;  %v3214_v20 = vadd.f32 %v10741_v46, %v14289_v39  ;;  %vm3337_vm3 = vcmp.gt.f32.partialorder %v3211_v40, 0.0 }
 0x403   : > { %v3401_v28 = vmul.f32 1.442695, %v3369_v49  ;;  %v3370_v44 = vmin.f32 %v3214_v20, 0.0  ;;  %v10742_v32 = vpop.f32.mrb[48].mxu1  ;;  %vm3338_vm4 = vcmp.gt.f32.partialorder %v3214_v20, 0.0 }
 0x404   : > { %v10743_v4 = vpop.f32.mrb[49].mxu1 }
 0x405   : > { %11907 = vpow2.f32 %v3401_v28  ;;  %v3403_v62 = vmul.f32 1.442695, %v3370_v44  ;;  %v10744_v27 = vadd.f32 %v10743_v4, %v10742_v32  ;;  %v10745_v25 = vpop.f32.mrb[50].mxu1 }
 0x406   : > { %v10746_v36 = vpop.f32.mrb[51].mxu1 }
 0x407   : > { %11909 = vpow2.f32 %v3403_v62  ;;  %v3219_v0 = vadd.f32 %v10744_v27, %v14289_v39  ;;  %v10747_v63 = vadd.f32 %v10746_v36, %v10745_v25 }
 0x409   : > { %v3371_v30 = vmin.f32 %v3219_v0, 0.0  ;;  %v3222_v56 = vadd.f32 %v10747_v63, %v14289_v39  ;;  %vm3339_vm6 = vcmp.gt.f32.partialorder %v3219_v0, 0.0 }
 0x40b   : > { %v3405_v35 = vmul.f32 1.442695, %v3371_v30  ;;  %v3372_v17 = vmin.f32 %v3222_v56, 0.0  ;;  %v10748_v38 = vpop.f32.mrb[52].mxu1  ;;  %vm3340_vm7 = vcmp.gt.f32.partialorder %v3222_v56, 0.0 }
 0x40c   : > { %v10749_v52 = vpop.f32.mrb[53].mxu1 }
 0x40d   : > { %11911 = vpow2.f32 %v3405_v35  ;;  %v3407_v9 = vmul.f32 1.442695, %v3372_v17  ;;  %v10750_v5 = vadd.f32 %v10749_v52, %v10748_v38  ;;  %v10751_v22 = vpop.f32.mrb[54].mxu1 }
 0x40e   : > { %v10752_v60 = vpop.f32.mrb[55].mxu1 }
 0x40f   : > { %v11908_v43 = vpop.eup %11907  ;;  %11913 = vpow2.f32 %v3407_v9  ;;  %v14297_v3 = vadd.f32 %v10750_v5, %v14289_v39  ;;  %v10753_v34 = vadd.f32 %v10752_v60, %v10751_v22 }
 0x410   : > { %v9937_v21 = vadd.f32 -1.0, %v11908_v43 }
 0x411   : > { %v11910_v8 = vpop.eup %11909  ;;  %v3373_v18 = vmin.f32 %v14297_v3, 0.0  ;;  %v3230_v48 = vadd.f32 %v10753_v34, %v14289_v39  ;;  %vm3341_vm8 = vcmp.gt.f32.partialorder %v14297_v3, 0.0 }
 0x412   : > { %v9938_v10 = vadd.f32 -1.0, %v11910_v8  ;;  %v3497_v31 = vsel %vm3337_vm3, %v3211_v40, %v9937_v21 }
 0x413   : > { %v3409_v53 = vmul.f32 1.442695, %v3373_v18  ;;  %v3374_v19 = vmin.f32 %v3230_v48, 0.0  ;;  %v10754_v50 = vpop.f32.mrb[56].mxu1  ;;  %vm3342_vm9 = vcmp.gt.f32.partialorder %v3230_v48, 0.0 }
 0x414   : > { %v10755_v12 = vpop.f32.mrb[57].mxu1  ;;  %v3498_v23 = vsel %vm3338_vm4, %v3214_v20, %v9938_v10 }
 0x415   : > { %11915 = vpow2.f32 %v3409_v53  ;;  %v3411_v6 = vmul.f32 1.442695, %v3374_v19  ;;  %v10756_v16 = vadd.f32 %v10755_v12, %v10754_v50  ;;  %v10757_v59 = vpop.f32.mrb[58].mxu1  ;;  %v3538_v33 = vpack.c.bf16 %v3498_v23, %v3497_v31 }
 0x416   : > { %v10758_v29 = vpop.f32.mrb[59].mxu1 }
 0x417   : > { %v11912_v37 = vpop.eup %11911  ;;  %11917 = vpow2.f32 %v3411_v6  ;;  %v14302_v54 = vadd.f32 %v10756_v16, %v14289_v39  ;;  %v10759_v14 = vadd.f32 %v10758_v29, %v10757_v59  ;;  %11084 = vmatprep.mubr.msk.bf16.mxu0 %vm3584_vm5, %v3538_v33 }
 0x418   : > { %v9939_v42 = vadd.f32 -1.0, %v11912_v37 }
 0x419   : > { %v11914_v55 = vpop.eup %11913  ;;  %v3375_v11 = vmin.f32 %v14302_v54, 0.0  ;;  %v3238_v45 = vadd.f32 %v10759_v14, %v14289_v39  ;;  %vm3343_vm10 = vcmp.gt.f32.partialorder %v14302_v54, 0.0 }
 0x41a   : > { %v9940_v1 = vadd.f32 -1.0, %v11914_v55  ;;  %v3499_v57 = vsel %vm3339_vm6, %v3219_v0, %v9939_v42 }
 0x41b   : > { %v3413_v41 = vmul.f32 1.442695, %v3375_v11  ;;  %v3376_v51 = vmin.f32 %v3238_v45, 0.0  ;;  %v10760_v26 = vpop.f32.mrb[60].mxu1  ;;  %vm3344_vm11 = vcmp.gt.f32.partialorder %v3238_v45, 0.0 }
 0x41c   : > { %v3500_v47 = vsel %vm3340_vm7, %v3222_v56, %v9940_v1  ;;  %v10761_v40 = vpop.f32.mrb[61].mxu1 }
 0x41d   : > { %v3539_v46 = vpack.c.bf16 %v3500_v47, %v3499_v57  ;;  %11919 = vpow2.f32 %v3413_v41  ;;  %v3415_v24 = vmul.f32 1.442695, %v3376_v51  ;;  %v10762_v58 = vadd.f32 %v10761_v40, %v10760_v26  ;;  %v10763_v7 = vpop.f32.mrb[62].mxu1 }
 0x41e   : > { %v10764_v49 = vpop.f32.mrb[63].mxu1 }
 0x41f   : > { %v11916_v20 = vpop.eup %11915  ;;  %11921 = vpow2.f32 %v3415_v24  ;;  %v14308_v61 = vadd.f32 %v10762_v58, %v14289_v39  ;;  %v10765_v28 = vadd.f32 %v10764_v49, %v10763_v7  ;;  %11085 = vmatmul.mubr.msk.bf16.vlgmr.msra.gmra.mrb[148].mxu0 %vm3584_vm5, %v3539_v46 }
 0x420   : > { %v9941_v44 = vadd.f32 -1.0, %v11916_v20 }
 0x421   : > { %v11918_v32 = vpop.eup %11917  ;;  %v3377_v4 = vmin.f32 %v14308_v61, 0.0  ;;  %v3246_v62 = vadd.f32 %v10765_v28, %v14289_v39  ;;  %vm3345_vm12 = vcmp.gt.f32.partialorder %v14308_v61, 0.0 }
 0x422   : > { %v9942_v27 = vadd.f32 -1.0, %v11918_v32  ;;  %v3501_v30 = vsel %vm3341_vm8, %v14297_v3, %v9941_v44 }
 0x423   : > { %v3417_v25 = vmul.f32 1.442695, %v3377_v4  ;;  %v3378_v36 = vmin.f32 %v3246_v62, 0.0  ;;  %v10766_v0 = vpop.f32.mrb[64].mxu1  ;;  %vm3346_vm13 = vcmp.gt.f32.partialorder %v3246_v62, 0.0 }
 0x424   : > { %v10767_v63 = vpop.f32.mrb[65].mxu1  ;;  %v3502_v56 = vsel %vm3342_vm9, %v3230_v48, %v9942_v27 }
 0x425   : > { %11923 = vpow2.f32 %v3417_v25  ;;  %v3419_v35 = vmul.f32 1.442695, %v3378_v36  ;;  %v10768_v17 = vadd.f32 %v10767_v63, %v10766_v0  ;;  %v10769_v38 = vpop.f32.mrb[66].mxu1  ;;  %v3540_v52 = vpack.c.bf16 %v3502_v56, %v3501_v30 }
 0x426   : > { %v10770_v9 = vpop.f32.mrb[67].mxu1 }
 0x427   : > { %v11920_v5 = vpop.eup %11919  ;;  %11925 = vpow2.f32 %v3419_v35  ;;  %v14316_v22 = vadd.f32 %v10768_v17, %v14289_v39  ;;  %v10771_v60 = vadd.f32 %v10770_v9, %v10769_v38  ;;  %11088 = vmatprep.mubr.msk.bf16.mxu0 %vm3584_vm5, %v3540_v52 }
 0x428   : > { %v9943_v43 = vadd.f32 -1.0, %v11920_v5 }
 0x429   : > { %v11922_v34 = vpop.eup %11921  ;;  %v3379_v21 = vmin.f32 %v14316_v22, 0.0  ;;  %v3254_v3 = vadd.f32 %v10771_v60, %v14289_v39  ;;  %vm3347_vm14 = vcmp.gt.f32.partialorder %v14316_v22, 0.0 }
 0x42a   : > { %v9944_v8 = vadd.f32 -1.0, %v11922_v34  ;;  %v3503_v19 = vsel %vm3343_vm10, %v14302_v54, %v9943_v43 }
 0x42b   : > { %v3421_v18 = vmul.f32 1.442695, %v3379_v21  ;;  %v3380_v48 = vmin.f32 %v3254_v3, 0.0  ;;  %v10772_v10 = vpop.f32.mrb[68].mxu1  ;;  %vm3348_vm15 = vcmp.gt.f32.partialorder %v3254_v3, 0.0 }
 0x42c   : > { %v10773_v53 = vpop.f32.mrb[69].mxu1  ;;  %v3504_v50 = vsel %vm3344_vm11, %v3238_v45, %v9944_v8 }
 0x42d   : > { %11927 = vpow2.f32 %v3421_v18  ;;  %v3423_v12 = vmul.f32 1.442695, %v3380_v48  ;;  %v10774_v31 = vadd.f32 %v10773_v53, %v10772_v10  ;;  %v10775_v23 = vpop.f32.mrb[70].mxu1  ;;  %v3541_v6 = vpack.c.bf16 %v3504_v50, %v3503_v19 }
 0x42e   : > { %v10776_v16 = vpop.f32.mrb[71].mxu1 }
 0x42f   : > { %v11924_v59 = vpop.eup %11923  ;;  %11929 = vpow2.f32 %v3423_v12  ;;  %v14324_v33 = vadd.f32 %v10774_v31, %v14289_v39  ;;  %v10777_v29 = vadd.f32 %v10776_v16, %v10775_v23  ;;  %11089 = vmatmul.mubr.msk.bf16.gmra.mrb[152].mxu0 %vm3584_vm5, %v3541_v6 }
 0x430   : > { %v9945_v37 = vadd.f32 -1.0, %v11924_v59 }
 0x431   : > { %v11926_v14 = vpop.eup %11925  ;;  %v3381_v42 = vmin.f32 %v14324_v33, 0.0  ;;  %v3262_v54 = vadd.f32 %v10777_v29, %v14289_v39  ;;  %vm3349_vm0 = vcmp.gt.f32.partialorder %v14324_v33, 0.0 }
 0x432   : > { %v9946_v55 = vadd.f32 -1.0, %v11926_v14  ;;  %v3505_v51 = vsel %vm3345_vm12, %v14308_v61, %v9945_v37 }
 0x433   : > { %v3425_v11 = vmul.f32 1.442695, %v3381_v42  ;;  %v3382_v45 = vmin.f32 %v3262_v54, 0.0  ;;  %v10778_v1 = vpop.f32.mrb[72].mxu1  ;;  %vm3350_vm1 = vcmp.gt.f32.partialorder %v3262_v54, 0.0 }
 0x434   : > { %v10779_v41 = vpop.f32.mrb[73].mxu1  ;;  %v3506_v26 = vsel %vm3346_vm13, %v3246_v62, %v9946_v55 }
 0x435   : > { %11931 = vpow2.f32 %v3425_v11  ;;  %v3427_v57 = vmul.f32 1.442695, %v3382_v45  ;;  %v10780_v47 = vadd.f32 %v10779_v41, %v10778_v1  ;;  %v10781_v40 = vpop.f32.mrb[74].mxu1  ;;  %v3542_v46 = vpack.c.bf16 %v3506_v26, %v3505_v51 }
 0x436   : > { %v10782_v24 = vpop.f32.mrb[75].mxu1 }
 0x437   : > { %v11928_v58 = vpop.eup %11927  ;;  %11933 = vpow2.f32 %v3427_v57  ;;  %v14332_v7 = vadd.f32 %v10780_v47, %v14289_v39  ;;  %v10783_v49 = vadd.f32 %v10782_v24, %v10781_v40  ;;  %11092 = vmatprep.mubr.msk.bf16.mxu0 %vm3584_vm5, %v3542_v46 }
 0x438   : > { %v9947_v20 = vadd.f32 -1.0, %v11928_v58 }
 0x439   : > { %v11930_v28 = vpop.eup %11929  ;;  %v3383_v44 = vmin.f32 %v14332_v7, 0.0  ;;  %v3270_v61 = vadd.f32 %v10783_v49, %v14289_v39  ;;  %vm3351_vm2 = vcmp.gt.f32.partialorder %v14332_v7, 0.0 }
 0x43a   : > { %v9948_v32 = vadd.f32 -1.0, %v11930_v28  ;;  %v3507_v36 = vsel %vm3347_vm14, %v14316_v22, %v9947_v20 }
 0x43b   : > { %v3429_v4 = vmul.f32 1.442695, %v3383_v44  ;;  %v3384_v62 = vmin.f32 %v3270_v61, 0.0  ;;  %v10784_v27 = vpop.f32.mrb[76].mxu1  ;;  %vm3352_vm3 = vcmp.gt.f32.partialorder %v3270_v61, 0.0 }
 0x43c   : > { %v10785_v25 = vpop.f32.mrb[77].mxu1  ;;  %v3508_v0 = vsel %vm3348_vm15, %v3254_v3, %v9948_v32 }
 0x43d   : > { %11935 = vpow2.f32 %v3429_v4  ;;  %v3431_v63 = vmul.f32 1.442695, %v3384_v62  ;;  %v10786_v30 = vadd.f32 %v10785_v25, %v10784_v27  ;;  %v10787_v56 = vpop.f32.mrb[78].mxu1  ;;  %v3543_v35 = vpack.c.bf16 %v3508_v0, %v3507_v36 }
 0x43e   : > { %v10788_v17 = vpop.f32.mrb[79].mxu1 }
 0x43f   : > { %v11932_v38 = vpop.eup %11931  ;;  %11937 = vpow2.f32 %v3431_v63  ;;  %v14340_v52 = vadd.f32 %v10786_v30, %v14289_v39  ;;  %v10789_v9 = vadd.f32 %v10788_v17, %v10787_v56  ;;  %11093 = vmatmul.mubr.msk.bf16.gmra.mrb[156].mxu0 %vm3584_vm5, %v3543_v35 }
 0x440   : > { %v9949_v5 = vadd.f32 -1.0, %v11932_v38 }
 0x441   : > { %v11934_v60 = vpop.eup %11933  ;;  %v3385_v43 = vmin.f32 %v14340_v52, 0.0  ;;  %v3278_v22 = vadd.f32 %v10789_v9, %v14289_v39  ;;  %vm3353_vm4 = vcmp.gt.f32.partialorder %v14340_v52, 0.0 }
 0x442   : > { %v9950_v34 = vadd.f32 -1.0, %v11934_v60  ;;  %v3509_v48 = vsel %vm3349_vm0, %v14324_v33, %v9949_v5 }
 0x443   : > { %v3433_v21 = vmul.f32 1.442695, %v3385_v43  ;;  %v3386_v3 = vmin.f32 %v3278_v22, 0.0  ;;  %v10790_v8 = vpop.f32.mrb[80].mxu1  ;;  %vm3354_vm6 = vcmp.gt.f32.partialorder %v3278_v22, 0.0 }
 0x444   : > { %v10791_v18 = vpop.f32.mrb[81].mxu1  ;;  %v3510_v10 = vsel %vm3350_vm1, %v3262_v54, %v9950_v34 }
 0x445   : > { %11939 = vpow2.f32 %v3433_v21  ;;  %v3435_v53 = vmul.f32 1.442695, %v3386_v3  ;;  %v10792_v19 = vadd.f32 %v10791_v18, %v10790_v8  ;;  %v10793_v50 = vpop.f32.mrb[82].mxu1  ;;  %v3544_v12 = vpack.c.bf16 %v3510_v10, %v3509_v48 }
 0x446   : > { %v10794_v31 = vpop.f32.mrb[83].mxu1 }
 0x447   : > { %v11936_v23 = vpop.eup %11935  ;;  %11941 = vpow2.f32 %v3435_v53  ;;  %v14348_v6 = vadd.f32 %v10792_v19, %v14289_v39  ;;  %v10795_v16 = vadd.f32 %v10794_v31, %v10793_v50  ;;  %11096 = vmatprep.mubr.msk.bf16.mxu0 %vm3584_vm5, %v3544_v12 }
 0x448   : > { %v9951_v59 = vadd.f32 -1.0, %v11936_v23 }
 0x449   : > { %v11938_v29 = vpop.eup %11937  ;;  %v3387_v37 = vmin.f32 %v14348_v6, 0.0  ;;  %v3286_v33 = vadd.f32 %v10795_v16, %v14289_v39  ;;  %vm3355_vm7 = vcmp.gt.f32.partialorder %v14348_v6, 0.0 }
 0x44a   : > { %v9952_v14 = vadd.f32 -1.0, %v11938_v29  ;;  %v3511_v45 = vsel %vm3351_vm2, %v14332_v7, %v9951_v59 }
 0x44b   : > { %v3437_v42 = vmul.f32 1.442695, %v3387_v37  ;;  %v3388_v54 = vmin.f32 %v3286_v33, 0.0  ;;  %v10796_v55 = vpop.f32.mrb[84].mxu1  ;;  %vm3356_vm8 = vcmp.gt.f32.partialorder %v3286_v33, 0.0 }
 0x44c   : > { %v10797_v11 = vpop.f32.mrb[85].mxu1  ;;  %v3512_v1 = vsel %vm3352_vm3, %v3270_v61, %v9952_v14 }
 0x44d   : > { %11943 = vpow2.f32 %v3437_v42  ;;  %v3439_v41 = vmul.f32 1.442695, %v3388_v54  ;;  %v10798_v51 = vadd.f32 %v10797_v11, %v10796_v55  ;;  %v10799_v26 = vpop.f32.mrb[86].mxu1  ;;  %v3545_v57 = vpack.c.bf16 %v3512_v1, %v3511_v45 }
 0x44e   : > { %v10800_v47 = vpop.f32.mrb[87].mxu1 }
 0x44f   : > { %v11940_v40 = vpop.eup %11939  ;;  %11945 = vpow2.f32 %v3439_v41  ;;  %v14356_v46 = vadd.f32 %v10798_v51, %v14289_v39  ;;  %v10801_v24 = vadd.f32 %v10800_v47, %v10799_v26  ;;  %11097 = vmatmul.mubr.msk.bf16.gmra.mrb[160].mxu0 %vm3584_vm5, %v3545_v57 }
 0x450   : > { %v9953_v58 = vadd.f32 -1.0, %v11940_v40 }
 0x451   : > { %v11942_v49 = vpop.eup %11941  ;;  %v3389_v20 = vmin.f32 %v14356_v46, 0.0  ;;  %v3294_v7 = vadd.f32 %v10801_v24, %v14289_v39  ;;  %vm3357_vm9 = vcmp.gt.f32.partialorder %v14356_v46, 0.0 }
 0x452   : > { %v9954_v28 = vadd.f32 -1.0, %v11942_v49  ;;  %v3513_v62 = vsel %vm3353_vm4, %v14340_v52, %v9953_v58 }
 0x453   : > { %v3441_v44 = vmul.f32 1.442695, %v3389_v20  ;;  %v3390_v61 = vmin.f32 %v3294_v7, 0.0  ;;  %v10802_v32 = vpop.f32.mrb[88].mxu1  ;;  %vm3358_vm10 = vcmp.gt.f32.partialorder %v3294_v7, 0.0 }
 0x454   : > { %v10803_v4 = vpop.f32.mrb[89].mxu1  ;;  %v3514_v27 = vsel %vm3354_vm6, %v3278_v22, %v9954_v28  ;;  %vm3837_vm6 = vcmask 64512  }
 0x455   : > { %11947 = vpow2.f32 %v3441_v44  ;;  %v3443_v25 = vmul.f32 1.442695, %v3390_v61  ;;  %v10804_v36 = vadd.f32 %v10803_v4, %v10802_v32  ;;  %v10805_v0 = vpop.f32.mrb[90].mxu1  ;;  %v3546_v63 = vpack.c.bf16 %v3514_v27, %v3513_v62 }
 0x456   : > { %v10806_v30 = vpop.f32.mrb[91].mxu1 }
 0x457   : > { %v11944_v56 = vpop.eup %11943  ;;  %11949 = vpow2.f32 %v3443_v25  ;;  %v14364_v35 = vadd.f32 %v10804_v36, %v14289_v39  ;;  %v10807_v17 = vadd.f32 %v10806_v30, %v10805_v0  ;;  %11100 = vmatprep.mubr.msk.bf16.mxu0 %vm3584_vm5, %v3546_v63 }
 0x458   : > { %v9955_v38 = vadd.f32 -1.0, %v11944_v56 }
 0x459   : > { %v11946_v9 = vpop.eup %11945  ;;  %v3391_v5 = vmin.f32 %v14364_v35, 0.0  ;;  %v3302_v52 = vadd.f32 %v10807_v17, %v14289_v39  ;;  %vm3359_vm11 = vcmp.gt.f32.partialorder %v14364_v35, 0.0 }
 0x45a   : > { %v9956_v60 = vadd.f32 -1.0, %v11946_v9  ;;  %v3515_v3 = vsel %vm3355_vm7, %v14348_v6, %v9955_v38  ;;  %vm4104_vm7 = vcmask 244736  }
 0x45b   : > { %v3445_v43 = vmul.f32 1.442695, %v3391_v5  ;;  %v3392_v22 = vmin.f32 %v3302_v52, 0.0  ;;  %v10808_v34 = vpop.f32.mrb[92].mxu1  ;;  %vm3360_vm12 = vcmp.gt.f32.partialorder %v3302_v52, 0.0 }
 0x45c   : > { %v10809_v21 = vpop.f32.mrb[93].mxu1  ;;  %v3516_v8 = vsel %vm3356_vm8, %v3286_v33, %v9956_v60 }
 0x45d   : > { %11951 = vpow2.f32 %v3445_v43  ;;  %v3447_v18 = vmul.f32 1.442695, %v3392_v22  ;;  %v10810_v48 = vadd.f32 %v10809_v21, %v10808_v34  ;;  %v10811_v10 = vpop.f32.mrb[94].mxu1  ;;  %v3547_v53 = vpack.c.bf16 %v3516_v8, %v3515_v3 }
 0x45e   : > { %v10812_v19 = vpop.f32.mrb[95].mxu1 }
 0x45f   : > { %v11948_v50 = vpop.eup %11947  ;;  %11953 = vpow2.f32 %v3447_v18  ;;  %v14372_v12 = vadd.f32 %v10810_v48, %v14289_v39  ;;  %v10813_v31 = vadd.f32 %v10812_v19, %v10811_v10  ;;  %11101 = vmatmul.mubr.msk.bf16.gmra.mrb[164].mxu0 %vm3584_vm5, %v3547_v53 }
 0x460   : > { %v9957_v23 = vadd.f32 -1.0, %v11948_v50 }
 0x461   : > { %v11950_v16 = vpop.eup %11949  ;;  %v3393_v59 = vmin.f32 %v14372_v12, 0.0  ;;  %v3310_v6 = vadd.f32 %v10813_v31, %v14289_v39  ;;  %vm3361_vm13 = vcmp.gt.f32.partialorder %v14372_v12, 0.0  ;;  %v11350_v31 = vld [vmem:[%s17604_s6 + $0x4] ss:$8 sps:$4 sm:$0xff]  }
 0x462   : > { %v9958_v29 = vadd.f32 -1.0, %v11950_v16  ;;  %v3517_v54 = vsel %vm3357_vm9, %v14356_v46, %v9957_v23  ;;  %4160 = vmatprep.subr.bf16.mxu1 %v11350_v31 }
 0x463   : > { %v3449_v37 = vmul.f32 1.442695, %v3393_v59  ;;  %v3394_v33 = vmin.f32 %v3310_v6, 0.0  ;;  %v10814_v14 = vpop.f32.mrb[96].mxu1  ;;  %vm3362_vm14 = vcmp.gt.f32.partialorder %v3310_v6, 0.0 }
 0x464   : > { %v10815_v42 = vpop.f32.mrb[97].mxu1  ;;  %v3518_v55 = vsel %vm3358_vm10, %v3294_v7, %v9958_v29 }
 0x465   : > { %11955 = vpow2.f32 %v3449_v37  ;;  %v3451_v11 = vmul.f32 1.442695, %v3394_v33  ;;  %v10816_v45 = vadd.f32 %v10815_v42, %v10814_v14  ;;  %v10817_v1 = vpop.f32.mrb[98].mxu1  ;;  %v3548_v41 = vpack.c.bf16 %v3518_v55, %v3517_v54 }
 0x466   : > { %v10818_v51 = vpop.f32.mrb[99].mxu1 }
 0x467   : > { %v11952_v26 = vpop.eup %11951  ;;  %11957 = vpow2.f32 %v3451_v11  ;;  %v14380_v57 = vadd.f32 %v10816_v45, %v14289_v39  ;;  %v10819_v47 = vadd.f32 %v10818_v51, %v10817_v1  ;;  %11104 = vmatprep.mubr.msk.bf16.mxu0 %vm3584_vm5, %v3548_v41 }
 0x468   : > { %v9959_v40 = vadd.f32 -1.0, %v11952_v26 }
 0x469   : > { %v11954_v24 = vpop.eup %11953  ;;  %v3395_v58 = vmin.f32 %v14380_v57, 0.0  ;;  %v3318_v46 = vadd.f32 %v10819_v47, %v14289_v39  ;;  %vm3363_vm15 = vcmp.gt.f32.partialorder %v14380_v57, 0.0 }
 0x46a   : > { %v9960_v49 = vadd.f32 -1.0, %v11954_v24  ;;  %v3519_v61 = vsel %vm3359_vm11, %v14364_v35, %v9959_v40 }
 0x46b   : > { %v3453_v20 = vmul.f32 1.442695, %v3395_v58  ;;  %v3396_v7 = vmin.f32 %v3318_v46, 0.0  ;;  %v10820_v28 = vpop.f32.mrb[100].mxu1  ;;  %vm3364_vm0 = vcmp.gt.f32.partialorder %v3318_v46, 0.0 }
 0x46c   : > { %v10821_v44 = vpop.f32.mrb[101].mxu1  ;;  %v3520_v32 = vsel %vm3360_vm12, %v3302_v52, %v9960_v49  ;;  %v14402_v49 = vld [vmem:[%s12939_s30] ss:$0 sm:$0xff] }
 0x46d   : > { %11959 = vpow2.f32 %v3453_v20  ;;  %v3455_v4 = vmul.f32 1.442695, %v3396_v7  ;;  %v10822_v62 = vadd.f32 %v10821_v44, %v10820_v28  ;;  %v10823_v27 = vpop.f32.mrb[102].mxu1  ;;  %v3549_v25 = vpack.c.bf16 %v3520_v32, %v3519_v61 }
 0x46e   : > { %v10824_v36 = vpop.f32.mrb[103].mxu1 }
 0x46f   : > { %v11956_v0 = vpop.eup %11955  ;;  %11961 = vpow2.f32 %v3455_v4  ;;  %v3323_v63 = vadd.f32 %v10822_v62, %v14289_v39  ;;  %v10825_v30 = vadd.f32 %v10824_v36, %v10823_v27  ;;  %11105 = vmatmul.mubr.msk.bf16.gmra.mrb[168].mxu0 %vm3584_vm5, %v3549_v25  ;;  %v11348_v27 = vld [vmem:[%s17604_s6] ss:$8 sps:$4 sm:$0xff]   ;;  %v11351_v36 = vld [vmem:[%s17604_s6 + $0x14] ss:$8 sps:$4 sm:$0x7f]  }
 0x470   : > { %v9961_v56 = vadd.f32 -1.0, %v11956_v0  ;;  %v11353_v0 = vld [vmem:[%s17604_s6 + $0x10] ss:$8 sps:$4 sm:$0x7f]   ;;  %s15454_s6 = scalar_lea.vmem %s17618_s5, %s13095_s1  ;;  %s17620_s5 = sld [smem:[#allocation19_spill]] }
 0x471   : > { %v11958_v17 = vpop.eup %11957  ;;  %v3397_v38 = vmin.f32 %v3323_v63, 0.0  ;;  %v3326_v9 = vadd.f32 %v10825_v30, %v14289_v39  ;;  %vm3365_vm1 = vcmp.gt.f32.partialorder %v3323_v63, 0.0  ;;  %s17622_s1 = sld [smem:[#allocation26_spill]] }
 0x472   : > { %v9962_v35 = vadd.f32 -1.0, %v11958_v17  ;;  %v3521_v22 = vsel %vm3361_vm13, %v14372_v12, %v9961_v56 }
 0x473   : > { %v3457_v5 = vmul.f32 1.442695, %v3397_v38  ;;  %v3398_v52 = vmin.f32 %v3326_v9, 0.0  ;;  %v10826_v60 = vpop.f32.mrb[104].mxu1  ;;  %vm3366_vm2 = vcmp.gt.f32.partialorder %v3326_v9, 0.0 }
 0x474   : > { %v10827_v43 = vpop.f32.mrb[105].mxu1  ;;  %v3522_v34 = vsel %vm3362_vm14, %v3310_v6, %v9962_v35 }
 0x475   : > { %11963 = vpow2.f32 %v3457_v5  ;;  %v3459_v21 = vmul.f32 1.442695, %v3398_v52  ;;  %v10828_v3 = vadd.f32 %v10827_v43, %v10826_v60  ;;  %v10829_v8 = vpop.f32.mrb[106].mxu1  ;;  %v3550_v18 = vpack.c.bf16 %v3522_v34, %v3521_v22 }
 0x476   : > { %v10830_v48 = vpop.f32.mrb[107].mxu1 }
 0x477   : > { %v11960_v10 = vpop.eup %11959  ;;  %11965 = vpow2.f32 %v3459_v21  ;;  %v3331_v53 = vadd.f32 %v10828_v3, %v14289_v39  ;;  %v10831_v19 = vadd.f32 %v10830_v48, %v10829_v8  ;;  %11108 = vmatprep.mubr.msk.bf16.mxu0 %vm3584_vm5, %v3550_v18 }
 0x478   : > { %v9963_v50 = vadd.f32 -1.0, %v11960_v10 }
 0x479   : > { %v11962_v23 = vpop.eup %11961  ;;  %v3399_v16 = vmin.f32 %v3331_v53, 0.0  ;;  %v3334_v12 = vadd.f32 %v10831_v19, %v14289_v39  ;;  %vm3367_vm3 = vcmp.gt.f32.partialorder %v3331_v53, 0.0 }
 0x47a   : > { %v9964_v59 = vadd.f32 -1.0, %v11962_v23  ;;  %v3523_v37 = vsel %vm3363_vm15, %v14380_v57, %v9963_v50 }
 0x47b   : > { %v3461_v6 = vmul.f32 1.442695, %v3399_v16  ;;  %v3400_v29 = vmin.f32 %v3334_v12, 0.0  ;;  %vm3368_vm4 = vcmp.gt.f32.partialorder %v3334_v12, 0.0 }
 0x47c   : > { %v3524_v33 = vsel %vm3364_vm0, %v3318_v46, %v9964_v59 }
 0x47d   : > { %11967 = vpow2.f32 %v3461_v6  ;;  %v3463_v14 = vmul.f32 1.442695, %v3400_v29  ;;  %v3551_v42 = vpack.c.bf16 %v3524_v33, %v3523_v37 }
 0x47f   : > { %v11964_v54 = vpop.eup %11963  ;;  %11969 = vpow2.f32 %v3463_v14  ;;  %11109 = vmatmul.mubr.msk.bf16.gmra.mrb[172].mxu0 %vm3584_vm5, %v3551_v42 }
 0x480   : > { %v9965_v55 = vadd.f32 -1.0, %v11964_v54 }
 0x481   : > { %v11966_v11 = vpop.eup %11965 }
 0x482   : > { %v9966_v39 = vadd.f32 -1.0, %v11966_v11  ;;  %v3525_v45 = vsel %vm3365_vm1, %v3323_v63, %v9965_v55 }
 0x484   : > { %v3526_v1 = vsel %vm3366_vm2, %v3326_v9, %v9966_v39 }
 0x485   : > { %v3552_v41 = vpack.c.bf16 %v3526_v1, %v3525_v45 }
 0x487   : > { %v11968_v51 = vpop.eup %11967  ;;  %11112 = vmatprep.mubr.msk.bf16.mxu0 %vm3584_vm5, %v3552_v41 }
 0x488   : > { %v9967_v26 = vadd.f32 -1.0, %v11968_v51 }
 0x489   : > { %v11970_v57 = vpop.eup %11969 }
 0x48a   : > { %v9968_v47 = vadd.f32 -1.0, %v11970_v57  ;;  %v3527_v40 = vsel %vm3367_vm3, %v3331_v53, %v9967_v26 }
 0x48c   : > { %v3528_v24 = vsel %vm3368_vm4, %v3334_v12, %v9968_v47 }
 0x48d   : > { %v3553_v58 = vpack.c.bf16 %v3528_v24, %v3527_v40 }
 0x48f   : > { %11113 = vmatmul.mubr.msk.bf16.gmra.mrb[176].mxu0 %vm3584_vm5, %v3553_v58  ;;  %vm4153_vm5 = vcmask 1046528  }
 0x490   : > { %v4155_v63 = vsel %vm4153_vm5, %v11353_v0, 0 }
 0x4f2   : > { %v11086_v46 = vpop.f32.mrb[148].mxu0 }
 0x4f3   : > { %v3667_v20 = vpop.f32.mrb[149].mxu0  ;;  %v3676_v28 = vadd.f32 %v11086_v46, %v14402_v49 }
 0x4f4   : > { %v11087_v7 = vpop.f32.mrb[150].mxu0  ;;  %v3668_v32 = vadd.f32 %v14402_v49, %v3667_v20 }
 0x4f5   : > { %v3679_v44 = vadd.f32 %v11087_v7, %v14402_v49  ;;  %v3670_v61 = vpop.f32.mrb[151].mxu0 }
 0x4f6   : > { %v3671_v4 = vadd.f32 %v14402_v49, %v3670_v61 }
 0x4f7   : > { %v3817_v62 = vpack.c.bf16 %v3679_v44, %v3676_v28 }
 0x4f8   : > { %v3816_v25 = vpack.c.bf16 %v3671_v4, %v3668_v32 }
 0x4fa   : > { %9993 = vmatmul.mubr.msk.bf16.vlgmr.msra.gmra.mrb[108].mxu1 %vm3837_vm6, %v3816_v25 }
 0x4fb   : > { %4161 = vmatpush1.bf16.msra.mxu1 %v11348_v27  ;;  %3935 = vmatprep.mubr.bf16.mxu1 %v12866_v2 }
 0x4fc   : > { %10013 = vmatprep.subr.msk.bf16.mxu1 %vm4153_vm5, %v11351_v36 }
 0x4ff   : > { %4163 = vmatpush1.bf16.msra.mxu1 %v4155_v63 }
 0x502   : > { %v11090_v30 = vpop.f32.mrb[152].mxu0  ;;  %9994 = vmatmul.mubr.msk.bf16.gmra.mrb[112].mxu1 %vm3837_vm6, %v3817_v62 }
 0x503   : > { %v3683_v56 = vpop.f32.mrb[153].mxu0  ;;  %3945 = vmatprep.mubr.bf16.mxu1 %v12866_v2  ;;  %v3692_v38 = vadd.f32 %v11090_v30, %v14402_v49 }
 0x504   : > { %v11091_v17 = vpop.f32.mrb[154].mxu0  ;;  %v3684_v5 = vadd.f32 %v14402_v49, %v3683_v56 }
 0x505   : > { %v3695_v9 = vadd.f32 %v11091_v17, %v14402_v49  ;;  %v3686_v35 = vpop.f32.mrb[155].mxu0 }
 0x506   : > { %v3687_v52 = vadd.f32 %v14402_v49, %v3686_v35 }
 0x507   : > { %v3819_v60 = vpack.c.bf16 %v3695_v9, %v3692_v38 }
 0x508   : > { %v3818_v43 = vpack.c.bf16 %v3687_v52, %v3684_v5 }
 0x50a   : > { %9995 = vmatmul.mubr.msk.bf16.gmra.mrb[116].mxu1 %vm3837_vm6, %v3818_v43 }
 0x50b   : > { %3955 = vmatprep.mubr.bf16.mxu1 %v12866_v2 }
 0x512   : > { %v11094_v22 = vpop.f32.mrb[156].mxu0  ;;  %9996 = vmatmul.mubr.msk.bf16.gmra.mrb[120].mxu1 %vm3837_vm6, %v3819_v60 }
 0x513   : > { %v3699_v34 = vpop.f32.mrb[157].mxu0  ;;  %3965 = vmatprep.mubr.bf16.mxu1 %v12866_v2  ;;  %v3708_v3 = vadd.f32 %v11094_v22, %v14402_v49  ;;  %v11354_v22 = vld [vmem:[%s17612_s10] ss:$8 sps:$4 sm:$0xff]  }
 0x514   : > { %v11095_v21 = vpop.f32.mrb[158].mxu0  ;;  %v3700_v48 = vadd.f32 %v14402_v49, %v3699_v34  ;;  %v11356_v34 = vld [vmem:[%s17612_s10 + $0x4] ss:$8 sps:$4 sm:$0xff]  }
 0x515   : > { %v3711_v8 = vadd.f32 %v11095_v21, %v14402_v49  ;;  %v3702_v18 = vpop.f32.mrb[159].mxu0  ;;  %v1050_v21 = vld [vmem:[%s14471_s18 + $0x8] sm:$0xff]  ;;  %5048 = vmatprep.subr.bf16.mxu0 %v11356_v34  ;;  %v11387_v34 = vld [vmem:[%s17612_s10 + $0xb0] ss:$8 sps:$4 sm:$0xff]  }
 0x516   : > { %v3703_v10 = vadd.f32 %v14402_v49, %v3702_v18  ;;  %5049 = vmatpush1.bf16.msra.mxu0 %v11354_v22  ;;  %v11389_v22 = vld [vmem:[%s17612_s10 + $0xb4] ss:$8 sps:$4 sm:$0xff]  }
 0x517   : > { %v3821_v53 = vpack.c.bf16 %v3711_v8, %v3708_v3  ;;  %v11359_v3 = vld [vmem:[%s17612_s10 + $0x14] ss:$8 sps:$4 sm:$0xff]   ;;  %v11357_v8 = vld [vmem:[%s17612_s10 + $0x10] ss:$8 sps:$4 sm:$0xff]  }
 0x518   : > { %v3820_v19 = vpack.c.bf16 %v3703_v10, %v3700_v48  ;;  %5050 = vmatprep.subr.bf16.mxu0 %v11359_v3  ;;  %v11362_v48 = vld [vmem:[%s17612_s10 + $0x24] ss:$8 sps:$4 sm:$0xff]   ;;  %v11360_v10 = vld [vmem:[%s17612_s10 + $0x20] ss:$8 sps:$4 sm:$0xff]   ;;  %v1076_v3 = vld [vmem:[%s14471_s18 + $0xd8] sm:$0xff] }
 0x51a   : > { %9997 = vmatmul.mubr.msk.bf16.gmra.mrb[124].mxu1 %vm3837_vm6, %v3820_v19  ;;  %5051 = vmatpush1.bf16.msra.mxu0 %v11357_v8  ;;  %v1051_v19 = vld [vmem:[%s14471_s18 + $0x10] sm:$0xff]  ;;  %v11390_v8 = vld [vmem:[%s17612_s10 + $0xc0] ss:$8 sps:$4 sm:$0xff]  }
 0x51b   : > { %3975 = vmatprep.mubr.bf16.mxu1 %v12866_v2  ;;  %5052 = vmatprep.subr.bf16.mxu0 %v11362_v48  ;;  %v11395_v48 = vld [vmem:[%s17612_s10 + $0xd4] ss:$8 sps:$4 sm:$0xff]  }
 0x51e   : > { %5053 = vmatpush1.bf16.msra.mxu0 %v11360_v10  ;;  %v11393_v10 = vld [vmem:[%s17612_s10 + $0xd0] ss:$8 sps:$4 sm:$0xff]  }
 0x522   : > { %v11098_v50 = vpop.f32.mrb[160].mxu0  ;;  %9998 = vmatmul.mubr.msk.bf16.gmra.mrb[128].mxu1 %vm3837_vm6, %v3821_v53  ;;  %v11365_v53 = vld [vmem:[%s17612_s10 + $0x34] ss:$8 sps:$4 sm:$0xff]  }
 0x523   : > { %v3715_v31 = vpop.f32.mrb[161].mxu0  ;;  %3985 = vmatprep.mubr.bf16.mxu1 %v12866_v2  ;;  %v3724_v16 = vadd.f32 %v11098_v50, %v14402_v49  ;;  %v1052_v50 = vld [vmem:[%s14471_s18 + $0x18] sm:$0xff]  ;;  %5054 = vmatprep.subr.bf16.mxu0 %v11365_v53  ;;  %v11398_v53 = vld [vmem:[%s17612_s10 + $0xe4] ss:$8 sps:$4 sm:$0xff]  }
 0x524   : > { %v11099_v23 = vpop.f32.mrb[162].mxu0  ;;  %v3716_v6 = vadd.f32 %v14402_v49, %v3715_v31  ;;  %v11363_v31 = vld [vmem:[%s17612_s10 + $0x30] ss:$8 sps:$4 sm:$0xff]  }
 0x525   : > { %v3727_v12 = vadd.f32 %v11099_v23, %v14402_v49  ;;  %v3718_v59 = vpop.f32.mrb[163].mxu0  ;;  %v3801_v23 = vpack.c.bf16 %v1052_v50, %v1051_v19  ;;  %5055 = vmatpush1.bf16.msra.mxu0 %v11363_v31  ;;  %v1077_v19 = vld [vmem:[%s14471_s18 + $0xe0] sm:$0xff]  ;;  %v1078_v50 = vld [vmem:[%s14471_s18 + $0xe8] sm:$0xff] }
 0x526   : > { %v3719_v29 = vadd.f32 %v14402_v49, %v3718_v59  ;;  %v11371_v59 = vld [vmem:[%s17612_s10 + $0x54] ss:$8 sps:$4 sm:$0xff]   ;;  %v11396_v31 = vld [vmem:[%s17612_s10 + $0xe0] ss:$8 sps:$4 sm:$0xff]  }
 0x527   : > { %v3823_v37 = vpack.c.bf16 %v3727_v12, %v3724_v16  ;;  %v11368_v16 = vld [vmem:[%s17612_s10 + $0x44] ss:$8 sps:$4 sm:$0xff]   ;;  %v11366_v12 = vld [vmem:[%s17612_s10 + $0x40] ss:$8 sps:$4 sm:$0xff]  }
 0x528   : > { %v3822_v33 = vpack.c.bf16 %v3719_v29, %v3716_v6  ;;  %5056 = vmatprep.subr.bf16.mxu0 %v11368_v16  ;;  %v1053_v6 = vld [vmem:[%s14471_s18 + $0x20] sm:$0xff]  ;;  %v1054_v29 = vld [vmem:[%s14471_s18 + $0x28] sm:$0xff]  ;;  %v11401_v16 = vld [vmem:[%s17612_s10 + $0xf4] ss:$8 sps:$4 sm:$0xff]  }
 0x529   : > { %5057 = vmatpush1.bf16.msra.mxu0 %v11366_v12  ;;  %v11399_v12 = vld [vmem:[%s17612_s10 + $0xf0] ss:$8 sps:$4 sm:$0xff]  }
 0x52a   : > { %9999 = vmatmul.mubr.msk.bf16.gmra.mrb[132].mxu1 %vm3837_vm6, %v3822_v33  ;;  %v3802_v33 = vpack.c.bf16 %v1054_v29, %v1053_v6  ;;  %5058 = vmatprep.subr.bf16.mxu0 %v11371_v59  ;;  %v1079_v59 = vld [vmem:[%s14471_s18 + $0xf0] sm:$0xff]  ;;  %v1080_v6 = vld [vmem:[%s14471_s18 + $0xf8] sm:$0xff] }
 0x52b   : > { %3995 = vmatprep.mubr.bf16.mxu1 %v12866_v2  ;;  %v3815_v29 = vpack.c.bf16 %v1080_v6, %v1079_v59 }
 0x532   : > { %v11102_v14 = vpop.f32.mrb[164].mxu0  ;;  %10000 = vmatmul.mubr.msk.bf16.gmra.mrb[136].mxu1 %vm3837_vm6, %v3823_v37  ;;  %v11369_v37 = vld [vmem:[%s17612_s10 + $0x50] ss:$8 sps:$4 sm:$0xff]  }
 0x533   : > { %v3731_v42 = vpop.f32.mrb[165].mxu0  ;;  %4005 = vmatprep.mubr.bf16.mxu1 %v12866_v2  ;;  %v3740_v55 = vadd.f32 %v11102_v14, %v14402_v49  ;;  %v11374_v14 = vld [vmem:[%s17612_s10 + $0x64] ss:$8 sps:$4 sm:$0xff]   ;;  %5059 = vmatpush1.bf16.msra.mxu0 %v11369_v37  ;;  %v3799_v37 = vld [vmem:[%s17613_s7] sm:$0x3]  ;;  %s17615_s7 = sld [smem:[#allocation22_spill]] }
 0x534   : > { %v11103_v54 = vpop.f32.mrb[166].mxu0  ;;  %v3732_v45 = vadd.f32 %v14402_v49, %v3731_v42  ;;  %v11372_v42 = vld [vmem:[%s17612_s10 + $0x60] ss:$8 sps:$4 sm:$0xff]   ;;  %5060 = vmatprep.subr.bf16.mxu0 %v11374_v14  ;;  %v14575_v14 = vrot.slane %v3799_v37, %v13182_v15 }
 0x535   : > { %v3743_v11 = vadd.f32 %v11103_v54, %v14402_v49  ;;  %v3734_v39 = vpop.f32.mrb[167].mxu0  ;;  %v11377_v54 = vld [vmem:[%s17612_s10 + $0x74] ss:$8 sps:$4 sm:$0xff]  }
 0x536   : > { %v3735_v1 = vadd.f32 %v14402_v49, %v3734_v39  ;;  %v11375_v39 = vld [vmem:[%s17612_s10 + $0x70] ss:$8 sps:$4 sm:$0xff]  }
 0x537   : > { %v3825_v41 = vpack.c.bf16 %v3743_v11, %v3740_v55  ;;  %v1055_v55 = vld [vmem:[%s14471_s18 + $0x30] sm:$0xff]  ;;  %v1056_v11 = vld [vmem:[%s14471_s18 + $0x38] sm:$0xff]  ;;  %5061 = vmatpush1.bf16.msra.mxu0 %v11372_v42 }
 0x538   : > { %v3824_v51 = vpack.c.bf16 %v3735_v1, %v3732_v45  ;;  %v3803_v45 = vpack.c.bf16 %v1056_v11, %v1055_v55  ;;  %5062 = vmatprep.subr.bf16.mxu0 %v11377_v54  ;;  %v11380_v1 = vld [vmem:[%s17612_s10 + $0x84] ss:$8 sps:$4 sm:$0xff]  }
 0x53a   : > { %10001 = vmatmul.mubr.msk.bf16.gmra.mrb[140].mxu1 %vm3837_vm6, %v3824_v51  ;;  %v11383_v51 = vld [vmem:[%s17612_s10 + $0x94] ss:$8 sps:$4 sm:$0xff]  }
 0x53b   : > { %4015 = vmatprep.mubr.bf16.mxu1 %v12866_v2  ;;  %5063 = vmatpush1.bf16.msra.mxu0 %v11375_v39 }
 0x53c   : > { %5064 = vmatprep.subr.bf16.mxu0 %v11380_v1 }
 0x542   : > { %v11106_v26 = vpop.f32.mrb[168].mxu0  ;;  %10002 = vmatmul.mubr.msk.bf16.gmra.mrb[144].mxu1 %vm3837_vm6, %v3825_v41  ;;  %v11378_v41 = vld [vmem:[%s17612_s10 + $0x80] ss:$8 sps:$4 sm:$0xff]  }
 0x543   : > { %v3747_v57 = vpop.f32.mrb[169].mxu0  ;;  %4025 = vmatprep.mubr.bf16.mxu1 %v12866_v2  ;;  %v3756_v40 = vadd.f32 %v11106_v26, %v14402_v49  ;;  %v1057_v26 = vld [vmem:[%s14471_s18 + $0x40] sm:$0xff]  ;;  %5065 = vmatpush1.bf16.msra.mxu0 %v11378_v41 }
 0x544   : > { %v11107_v47 = vpop.f32.mrb[170].mxu0  ;;  %v3748_v46 = vadd.f32 %v14402_v49, %v3747_v57  ;;  %v1058_v57 = vld [vmem:[%s14471_s18 + $0x48] sm:$0xff]  ;;  %5066 = vmatprep.subr.bf16.mxu0 %v11383_v51 }
 0x545   : > { %v3759_v24 = vadd.f32 %v11107_v47, %v14402_v49  ;;  %v3750_v58 = vpop.f32.mrb[171].mxu0  ;;  %v11381_v47 = vld [vmem:[%s17612_s10 + $0x90] ss:$8 sps:$4 sm:$0xff]  }
 0x546   : > { %v3751_v20 = vadd.f32 %v14402_v49, %v3750_v58  ;;  %v1060_v58 = vld [vmem:[%s14471_s18 + $0x58] sm:$0xff] }
 0x547   : > { %v3827_v7 = vpack.c.bf16 %v3759_v24, %v3756_v40  ;;  %v3804_v40 = vpack.c.bf16 %v1058_v57, %v1057_v26  ;;  %5067 = vmatpush1.bf16.msra.mxu0 %v11381_v47  ;;  %v1059_v24 = vld [vmem:[%s14471_s18 + $0x50] sm:$0xff] }
 0x548   : > { %v3826_v28 = vpack.c.bf16 %v3751_v20, %v3748_v46  ;;  %v3805_v46 = vpack.c.bf16 %v1060_v58, %v1059_v24  ;;  %v1061_v20 = vld [vmem:[%s14471_s18 + $0x60] sm:$0xff] }
 0x54a   : > { %10003 = vmatmul.mubr.msk.bf16.gmra.mrb[148].mxu1 %vm3837_vm6, %v3826_v28 }
 0x54b   : > { %4035 = vmatprep.mubr.bf16.mxu1 %v12866_v2 }
 0x552   : > { %v11110_v44 = vpop.f32.mrb[172].mxu0  ;;  %10004 = vmatmul.mubr.msk.bf16.gmra.mrb[152].mxu1 %vm3837_vm6, %v3827_v7  ;;  %v1062_v7 = vld [vmem:[%s14471_s18 + $0x68] sm:$0xff] }
 0x553   : > { %v3763_v61 = vpop.f32.mrb[173].mxu0  ;;  %4045 = vmatprep.mubr.bf16.mxu1 %v12866_v2  ;;  %v3772_v4 = vadd.f32 %v11110_v44, %v14402_v49  ;;  %v3806_v28 = vpack.c.bf16 %v1062_v7, %v1061_v20  ;;  %v1063_v44 = vld [vmem:[%s14471_s18 + $0x70] sm:$0xff] }
 0x554   : > { %v11111_v32 = vpop.f32.mrb[174].mxu0  ;;  %v3764_v25 = vadd.f32 %v14402_v49, %v3763_v61  ;;  %v1064_v61 = vld [vmem:[%s14471_s18 + $0x78] sm:$0xff] }
 0x555   : > { %v3775_v62 = vadd.f32 %v11111_v32, %v14402_v49  ;;  %v3766_v27 = vpop.f32.mrb[175].mxu0  ;;  %v3807_v32 = vpack.c.bf16 %v1064_v61, %v1063_v44 }
 0x556   : > { %v3767_v36 = vadd.f32 %v14402_v49, %v3766_v27 }
 0x557   : > { %v3829_v0 = vpack.c.bf16 %v3775_v62, %v3772_v4  ;;  %v1065_v4 = vld [vmem:[%s14471_s18 + $0x80] sm:$0xff]  ;;  %v1066_v62 = vld [vmem:[%s14471_s18 + $0x88] sm:$0xff] }
 0x558   : > { %v3828_v63 = vpack.c.bf16 %v3767_v36, %v3764_v25  ;;  %v3808_v27 = vpack.c.bf16 %v1066_v62, %v1065_v4  ;;  %v1067_v25 = vld [vmem:[%s14471_s18 + $0x90] sm:$0xff]  ;;  %v1068_v36 = vld [vmem:[%s14471_s18 + $0x98] sm:$0xff] }
 0x55a   : > { %10005 = vmatmul.mubr.msk.bf16.gmra.mrb[156].mxu1 %vm3837_vm6, %v3828_v63  ;;  %v1069_v63 = vld [vmem:[%s14471_s18 + $0xa0] sm:$0xff] }
 0x55b   : > { %4055 = vmatprep.mubr.bf16.mxu1 %v12866_v2 }
 0x562   : > { %v11114_v30 = vpop.f32.mrb[176].mxu0  ;;  %10006 = vmatmul.mubr.msk.bf16.gmra.mrb[160].mxu1 %vm3837_vm6, %v3829_v0  ;;  %v3809_v0 = vpack.c.bf16 %v1068_v36, %v1067_v25 }
 0x563   : > { %v3779_v56 = vpop.f32.mrb[177].mxu0  ;;  %4065 = vmatprep.mubr.bf16.mxu1 %v12866_v2  ;;  %v3788_v38 = vadd.f32 %v11114_v30, %v14402_v49  ;;  %v1070_v30 = vld [vmem:[%s14471_s18 + $0xa8] sm:$0xff] }
 0x564   : > { %v11115_v17 = vpop.f32.mrb[178].mxu0  ;;  %v3780_v5 = vadd.f32 %v14402_v49, %v3779_v56  ;;  %v3810_v56 = vpack.c.bf16 %v1070_v30, %v1069_v63 }
 0x565   : > { %v3791_v9 = vadd.f32 %v11115_v17, %v14402_v49  ;;  %v3782_v35 = vpop.f32.mrb[179].mxu0  ;;  %v1071_v17 = vld [vmem:[%s14471_s18 + $0xb0] sm:$0xff] }
 0x566   : > { %v3783_v52 = vadd.f32 %v14402_v49, %v3782_v35  ;;  %v1049_v49 = vld [vmem:[%s14471_s18] sm:$0xff] }
 0x567   : > { %v3831_v60 = vpack.c.bf16 %v3791_v9, %v3788_v38  ;;  %v3800_v18 = vpack.c.bf16 %v1050_v21, %v1049_v49  ;;  %v1072_v38 = vld [vmem:[%s14471_s18 + $0xb8] sm:$0xff]  ;;  %v11386_v35 = vld [vmem:[%s17612_s10 + $0xa4] ss:$8 sps:$4 sm:$0xff]   ;;  %v1075_v21 = vld [vmem:[%s14471_s18 + $0xd0] sm:$0xff] }
 0x568   : > { %v3830_v43 = vpack.c.bf16 %v3783_v52, %v3780_v5  ;;  %v3811_v9 = vpack.c.bf16 %v1072_v38, %v1071_v17  ;;  %v1073_v5 = vld [vmem:[%s14471_s18 + $0xc0] sm:$0xff]  ;;  %v1074_v52 = vld [vmem:[%s14471_s18 + $0xc8] sm:$0xff]  ;;  %5068 = vmatprep.subr.bf16.mxu0 %v11386_v35  ;;  %s17614_s18 = sld [smem:[#allocation18_spill]] }
 0x569   : > { %v11392_v49 = vld [vmem:[%s17612_s10 + $0xc4] ss:$8 sps:$4 sm:$0xff]  }
 0x56a   : > { %10007 = vmatmul.mubr.msk.bf16.gmra.mrb[164].mxu1 %vm3837_vm6, %v3830_v43  ;;  %v3812_v43 = vpack.c.bf16 %v1074_v52, %v1073_v5 }
 0x56b   : > { %4075 = vmatprep.mubr.bf16.mxu1 %v12866_v2 }
 0x56e   : > { %v11404_v17 = vld [vmem:[%s17614_s18 + $0x4] ss:$8 sps:$4 sm:$0xff]  }
 0x572   : > { %10008 = vmatmul.mubr.msk.bf16.gmra.mrb[168].mxu1 %vm3837_vm6, %v3831_v60  ;;  %v11384_v60 = vld [vmem:[%s17612_s10 + $0xa0] ss:$8 sps:$4 sm:$0xff]  }
 0x573   : > { %4192 = vmatprep.mubr.bf16.mxu1 %v12866_v2  ;;  %5069 = vmatpush1.bf16.msra.mxu0 %v11384_v60 }
 0x574   : > { %5070 = vmatprep.subr.bf16.mxu0 %v11389_v22 }
 0x577   : > { %5071 = vmatpush1.bf16.msra.mxu0 %v11387_v34 }
 0x578   : > { %5072 = vmatprep.subr.bf16.mxu0 %v11392_v49 }
 0x57a   : > { %10014 = vmatmul.mubr.msk.bf16.vlgmr.msra.gmra.mrb[108].mxu1 %vm4104_vm7, %v3800_v18  ;;  %v3813_v18 = vpack.c.bf16 %v1076_v3, %v1075_v21 }
 0x57b   : > { %4202 = vmatprep.mubr.bf16.mxu1 %v12866_v2  ;;  %5073 = vmatpush1.bf16.msra.mxu0 %v11390_v8 }
 0x57c   : > { %5074 = vmatprep.subr.bf16.mxu0 %v11395_v48 }
 0x57f   : > { %5075 = vmatpush1.bf16.msra.mxu0 %v11393_v10 }
 0x580   : > { %5076 = vmatprep.subr.bf16.mxu0 %v11398_v53 }
 0x582   : > { %10015 = vmatmul.mubr.msk.bf16.gmra.mrb[112].mxu1 %vm4104_vm7, %v3801_v23  ;;  %v3814_v23 = vpack.c.bf16 %v1078_v50, %v1077_v19 }
 0x583   : > { %4212 = vmatprep.mubr.bf16.mxu1 %v12866_v2  ;;  %5077 = vmatpush1.bf16.msra.mxu0 %v11396_v31 }
 0x584   : > { %5078 = vmatprep.subr.bf16.mxu0 %v11401_v16 }
 0x587   : > { %5079 = vmatpush1.bf16.msra.mxu0 %v11399_v12 }
 0x588   : > { %5861 = vmatprep.subr.bf16.mxu0 %v11404_v17 }
 0x58a   : > { %10016 = vmatmul.mubr.msk.bf16.gmra.mrb[116].mxu1 %vm4104_vm7, %v3802_v33  ;;  %v14572_v33 = vrot.slane %v3799_v37, %v13179_v13 }
 0x58b   : > { %4222 = vmatprep.mubr.bf16.mxu1 %v12866_v2 }
 0x592   : > { %10017 = vmatmul.mubr.msk.bf16.gmra.mrb[120].mxu1 %vm4104_vm7, %v3803_v45 }
 0x593   : > { %4232 = vmatprep.mubr.bf16.mxu1 %v12866_v2 }
 0x59a   : > { %10018 = vmatmul.mubr.msk.bf16.gmra.mrb[124].mxu1 %vm4104_vm7, %v3804_v40 }
 0x59b   : > { %4242 = vmatprep.mubr.bf16.mxu1 %v12866_v2 }
 0x5a2   : > { %10019 = vmatmul.mubr.msk.bf16.gmra.mrb[128].mxu1 %vm4104_vm7, %v3805_v46 }
 0x5a3   : > { %4252 = vmatprep.mubr.bf16.mxu1 %v12866_v2 }
 0x5aa   : > { %10020 = vmatmul.mubr.msk.bf16.gmra.mrb[132].mxu1 %vm4104_vm7, %v3806_v28 }
 0x5ab   : > { %4262 = vmatprep.mubr.bf16.mxu1 %v12866_v2 }
 0x5b2   : > { %10021 = vmatmul.mubr.msk.bf16.gmra.mrb[136].mxu1 %vm4104_vm7, %v3807_v32 }
 0x5b3   : > { %4272 = vmatprep.mubr.bf16.mxu1 %v12866_v2 }
 0x5ba   : > { %10022 = vmatmul.mubr.msk.bf16.gmra.mrb[140].mxu1 %vm4104_vm7, %v3808_v27 }
 0x5bb   : > { %4282 = vmatprep.mubr.bf16.mxu1 %v12866_v2 }
 0x5c2   : > { %10023 = vmatmul.mubr.msk.bf16.gmra.mrb[144].mxu1 %vm4104_vm7, %v3809_v0 }
 0x5c3   : > { %4292 = vmatprep.mubr.bf16.mxu1 %v12866_v2 }
 0x5ca   : > { %10024 = vmatmul.mubr.msk.bf16.gmra.mrb[148].mxu1 %vm4104_vm7, %v3810_v56 }
 0x5cb   : > { %4302 = vmatprep.mubr.bf16.mxu1 %v12866_v2 }
 0x5d2   : > { %10025 = vmatmul.mubr.msk.bf16.gmra.mrb[152].mxu1 %vm4104_vm7, %v3811_v9 }
 0x5d3   : > { %4312 = vmatprep.mubr.bf16.mxu1 %v12866_v2 }
 0x5da   : > { %10026 = vmatmul.mubr.msk.bf16.gmra.mrb[156].mxu1 %vm4104_vm7, %v3812_v43 }
 0x5db   : > { %4322 = vmatprep.mubr.bf16.mxu1 %v12866_v2 }
 0x5e2   : > { %10027 = vmatmul.mubr.msk.bf16.gmra.mrb[160].mxu1 %vm4104_vm7, %v3813_v18 }
 0x5e3   : > { %4332 = vmatprep.mubr.bf16.mxu1 %v12866_v2 }
 0x5ea   : > { %10028 = vmatmul.mubr.msk.bf16.gmra.mrb[164].mxu1 %vm4104_vm7, %v3814_v23 }
 0x5eb   : > { %4342 = vmatprep.mubr.bf16.mxu1 %v12866_v2 }
 0x5f2   : > { %10029 = vmatmul.mubr.msk.bf16.gmra.mrb[168].mxu1 %vm4104_vm7, %v3815_v29 }
 0x64d   : > { %v4194_v42 = vpop.f32.mrb[108].mxu1 }
 0x64e   : > { %v4364_v54 = vadd.f32 %v14572_v33, %v4194_v42  ;;  %v4196_v55 = vpop.f32.mrb[109].mxu1 }
 0x64f   : > { %v14579_v11 = vadd.f32 %v14575_v14, %v4196_v55  ;;  %v4198_v39 = vpop.f32.mrb[110].mxu1 }
 0x650   : > { %v4492_v45 = vmin.f32 %v4364_v54, 0.0  ;;  %v4366_v1 = vadd.f32 %v14572_v33, %v4198_v39  ;;  %v4200_v41 = vpop.f32.mrb[111].mxu1  ;;  %vm4428_vm8 = vcmp.gt.f32.partialorder %v4364_v54, 0.0 }
 0x651   : > { %v4493_v51 = vmin.f32 %v14579_v11, 0.0  ;;  %v14584_v26 = vadd.f32 %v14575_v14, %v4200_v41  ;;  %vm4429_vm9 = vcmp.gt.f32.partialorder %v14579_v11, 0.0 }
 0x652   : > { %v4556_v57 = vmul.f32 1.442695, %v4492_v45  ;;  %v4494_v47 = vmin.f32 %v4366_v1, 0.0  ;;  %vm4430_vm10 = vcmp.gt.f32.partialorder %v4366_v1, 0.0  ;;  %v11402_v45 = vld [vmem:[%s17614_s18] ss:$8 sps:$4 sm:$0xff]  }
 0x653   : > { %v4558_v40 = vmul.f32 1.442695, %v4493_v51  ;;  %v4495_v24 = vmin.f32 %v14584_v26, 0.0  ;;  %vm4431_vm11 = vcmp.gt.f32.partialorder %v14584_v26, 0.0 }
 0x654   : > { %11971 = vpow2.f32 %v4556_v57  ;;  %v4560_v58 = vmul.f32 1.442695, %v4494_v47  ;;  %v11407_v57 = vld [vmem:[%s17614_s18 + $0x14] ss:$8 sps:$4 sm:$0xff]  }
 0x655   : > { %11973 = vpow2.f32 %v4558_v40  ;;  %v4562_v46 = vmul.f32 1.442695, %v4495_v24  ;;  %v4204_v20 = vpop.f32.mrb[112].mxu1 }
 0x656   : > { %11975 = vpow2.f32 %v4560_v58  ;;  %v14588_v7 = vadd.f32 %v14572_v33, %v4204_v20  ;;  %v4206_v28 = vpop.f32.mrb[113].mxu1 }
 0x657   : > { %11977 = vpow2.f32 %v4562_v46  ;;  %v14591_v44 = vadd.f32 %v14575_v14, %v4206_v28  ;;  %v4208_v61 = vpop.f32.mrb[114].mxu1 }
 0x658   : > { %v4496_v32 = vmin.f32 %v14588_v7, 0.0  ;;  %v14595_v4 = vadd.f32 %v14572_v33, %v4208_v61  ;;  %v4210_v62 = vpop.f32.mrb[115].mxu1  ;;  %vm4432_vm12 = vcmp.gt.f32.partialorder %v14588_v7, 0.0 }
 0x659   : > { %v4497_v27 = vmin.f32 %v14591_v44, 0.0  ;;  %v14599_v25 = vadd.f32 %v14575_v14, %v4210_v62  ;;  %vm4433_vm13 = vcmp.gt.f32.partialorder %v14591_v44, 0.0 }
 0x65a   : > { %v4564_v36 = vmul.f32 1.442695, %v4496_v32  ;;  %v4498_v0 = vmin.f32 %v14595_v4, 0.0  ;;  %vm4434_vm14 = vcmp.gt.f32.partialorder %v14595_v4, 0.0 }
 0x65b   : > { %v4566_v63 = vmul.f32 1.442695, %v4497_v27  ;;  %v4499_v30 = vmin.f32 %v14599_v25, 0.0  ;;  %vm4435_vm15 = vcmp.gt.f32.partialorder %v14599_v25, 0.0 }
 0x65c   : > { %11979 = vpow2.f32 %v4564_v36  ;;  %v4568_v56 = vmul.f32 1.442695, %v4498_v0  ;;  %v11405_v36 = vld [vmem:[%s17614_s18 + $0x10] ss:$8 sps:$4 sm:$0xff]  }
 0x65d   : > { %11981 = vpow2.f32 %v4566_v63  ;;  %v4570_v38 = vmul.f32 1.442695, %v4499_v30  ;;  %v4214_v9 = vpop.f32.mrb[116].mxu1 }
 0x65e   : > { %v11972_v35 = vpop.eup %11971  ;;  %11983 = vpow2.f32 %v4568_v56  ;;  %v14605_v5 = vadd.f32 %v14572_v33, %v4214_v9  ;;  %v4216_v52 = vpop.f32.mrb[117].mxu1  ;;  %v11410_v56 = vld [vmem:[%s17614_s18 + $0x24] ss:$8 sps:$4 sm:$0xff]  }
 0x65f   : > { %v11974_v60 = vpop.eup %11973  ;;  %v10030_v43 = vadd.f32 -1.0, %v11972_v35  ;;  %11985 = vpow2.f32 %v4570_v38  ;;  %v14608_v22 = vadd.f32 %v14575_v14, %v4216_v52  ;;  %v4218_v34 = vpop.f32.mrb[118].mxu1 }
 0x660   : > { %v11976_v49 = vpop.eup %11975  ;;  %v10031_v21 = vadd.f32 -1.0, %v11974_v60  ;;  %v4500_v3 = vmin.f32 %v14605_v5, 0.0  ;;  %v14613_v8 = vadd.f32 %v14572_v33, %v4218_v34  ;;  %v4220_v18 = vpop.f32.mrb[119].mxu1  ;;  %vm4436_vm1 = vcmp.gt.f32.partialorder %v14605_v5, 0.0 }
 0x661   : > { %v11978_v48 = vpop.eup %11977  ;;  %v10032_v10 = vadd.f32 -1.0, %v11976_v49  ;;  %v4501_v53 = vmin.f32 %v14608_v22, 0.0  ;;  %v4748_v19 = vsel %vm4428_vm8, %v4364_v54, %v10030_v43  ;;  %v14620_v59 = vadd.f32 %v14575_v14, %v4220_v18 }
 0x662   : > { %v10033_v50 = vadd.f32 -1.0, %v11978_v48  ;;  %v4572_v31 = vmul.f32 1.442695, %v4500_v3  ;;  %v4502_v23 = vmin.f32 %v14613_v8, 0.0  ;;  %v4749_v6 = vsel %vm4429_vm9, %v14579_v11, %v10031_v21 }
 0x663   : > { %v4750_v16 = vsel %vm4430_vm10, %v4366_v1, %v10032_v10  ;;  %v4574_v12 = vmul.f32 1.442695, %v4501_v53  ;;  %v4503_v54 = vmin.f32 %v14620_v59, 0.0  ;;  %vm4438_vm0 = vcmp.gt.f32.partialorder %v14613_v8, 0.0 }
 0x664   : > { %v4845_v29 = vpack.c.bf16 %v4750_v16, %v4748_v19  ;;  %11987 = vpow2.f32 %v4572_v31  ;;  %v4576_v37 = vmul.f32 1.442695, %v4502_v23  ;;  %v4751_v42 = vsel %vm4431_vm11, %v14584_v26, %v10033_v50 }
 0x665   : > { %11989 = vpow2.f32 %v4574_v12  ;;  %v4224_v55 = vpop.f32.mrb[120].mxu1  ;;  %v4846_v39 = vpack.c.bf16 %v4751_v42, %v4749_v6  ;;  %v4578_v11 = vmul.f32 1.442695, %v4503_v54  ;;  %vm4437_vm2 = vcmp.gt.f32.partialorder %v14608_v22, 0.0 }
 0x666   : > { %v11980_v1 = vpop.eup %11979  ;;  %11991 = vpow2.f32 %v4576_v37  ;;  %v14629_v41 = vadd.f32 %v14572_v33, %v4224_v55  ;;  %v4226_v51 = vpop.f32.mrb[121].mxu1  ;;  %v11411_v37 = vld [vmem:[%s17614_s18 + $0x30] ss:$8 sps:$4 sm:$0xff]   ;;  %vm4439_vm3 = vcmp.gt.f32.partialorder %v14620_v59, 0.0 }
 0x667   : > { %v11982_v47 = vpop.eup %11981  ;;  %v14635_v26 = vadd.f32 %v14575_v14, %v4226_v51  ;;  %v4228_v40 = vpop.f32.mrb[122].mxu1  ;;  %5080 = vmatprep.mubr.bf16.mxu0 %v4846_v39  ;;  %v10034_v32 = vadd.f32 -1.0, %v11980_v1  ;;  %11993 = vpow2.f32 %v4578_v11 }
 0x668   : > { %v11984_v24 = vpop.eup %11983  ;;  %v10035_v58 = vadd.f32 -1.0, %v11982_v47  ;;  %v4504_v46 = vmin.f32 %v14629_v41, 0.0  ;;  %v14640_v20 = vadd.f32 %v14572_v33, %v4228_v40  ;;  %v4230_v28 = vpop.f32.mrb[123].mxu1  ;;  %5081 = vmatmul.mubr.bf16.vlgmr.msra.gmra.mrb[180].mxu0 %v4845_v29  ;;  %vm4440_vm6 = vcmp.gt.f32.partialorder %v14629_v41, 0.0 }
 0x669   : > { %v11986_v61 = vpop.eup %11985  ;;  %v10036_v62 = vadd.f32 -1.0, %v11984_v24  ;;  %v4505_v27 = vmin.f32 %v14635_v26, 0.0  ;;  %5862 = vmatpush1.bf16.msra.mxu0 %v11402_v45  ;;  %v14648_v38 = vadd.f32 %v14575_v14, %v4230_v28  ;;  %v4752_v21 = vsel %vm4432_vm12, %v14588_v7, %v10034_v32  ;;  %v11416_v45 = vld [vmem:[%s17614_s18 + $0x44] ss:$8 sps:$4 sm:$0xff]   ;;  %v11414_v28 = vld [vmem:[%s17614_s18 + $0x40] ss:$8 sps:$4 sm:$0xff]  }
 0x66a   : > { %v10037_v0 = vadd.f32 -1.0, %v11986_v61  ;;  %v4580_v63 = vmul.f32 1.442695, %v4504_v46  ;;  %v4506_v30 = vmin.f32 %v14640_v20, 0.0  ;;  %5863 = vmatprep.subr.bf16.mxu0 %v11407_v57  ;;  %v4753_v9 = vsel %vm4433_vm13, %v14591_v44, %v10035_v58  ;;  %v11408_v44 = vld [vmem:[%s17614_s18 + $0x20] ss:$8 sps:$4 sm:$0xff]  }
 0x66b   : > { %v4582_v17 = vmul.f32 1.442695, %v4505_v27  ;;  %v4754_v60 = vsel %vm4434_vm14, %v14595_v4, %v10036_v62  ;;  %v4507_v43 = vmin.f32 %v14648_v38, 0.0  ;;  %v11413_v4 = vld [vmem:[%s17614_s18 + $0x34] ss:$8 sps:$4 sm:$0xff]   ;;  %vm4442_vm4 = vcmp.gt.f32.partialorder %v14640_v20, 0.0 }
 0x66c   : > { %11995 = vpow2.f32 %v4580_v63  ;;  %v4584_v35 = vmul.f32 1.442695, %v4506_v30  ;;  %v4755_v52 = vsel %vm4435_vm15, %v14599_v25, %v10037_v0  ;;  %v4847_v48 = vpack.c.bf16 %v4754_v60, %v4752_v21  ;;  %v11419_v27 = vld [vmem:[%s17614_s18 + $0x54] ss:$8 sps:$4 sm:$0xff]  }
 0x66d   : > { %11997 = vpow2.f32 %v4582_v17  ;;  %v4234_v34 = vpop.f32.mrb[124].mxu1  ;;  %v4848_v49 = vpack.c.bf16 %v4755_v52, %v4753_v9  ;;  %5864 = vmatpush1.bf16.msra.mxu0 %v11405_v36  ;;  %v4586_v53 = vmul.f32 1.442695, %v4507_v43  ;;  %v11417_v43 = vld [vmem:[%s17614_s18 + $0x50] ss:$8 sps:$4 sm:$0xff]   ;;  %vm4441_vm5 = vcmp.gt.f32.partialorder %v14635_v26, 0.0 }
 0x66e   : > { %v11988_v3 = vpop.eup %11987  ;;  %11999 = vpow2.f32 %v4584_v35  ;;  %v14663_v18 = vadd.f32 %v14572_v33, %v4234_v34  ;;  %v4236_v25 = vpop.f32.mrb[125].mxu1  ;;  %5865 = vmatprep.subr.bf16.mxu0 %v11410_v56  ;;  %vm4443_vm7 = vcmp.gt.f32.partialorder %v14648_v38, 0.0 }
 0x66f   : > { %v11990_v10 = vpop.eup %11989  ;;  %v14667_v19 = vadd.f32 %v14575_v14, %v4236_v25  ;;  %v4238_v50 = vpop.f32.mrb[126].mxu1  ;;  %5090 = vmatprep.mubr.bf16.mxu0 %v4848_v49  ;;  %v10038_v31 = vadd.f32 -1.0, %v11988_v3  ;;  %12001 = vpow2.f32 %v4586_v53  ;;  %v11422_v3 = vld [vmem:[%s17614_s18 + $0x64] ss:$8 sps:$4 sm:$0xff]  }
 0x670   : > { %v11992_v7 = vpop.eup %11991  ;;  %v4508_v23 = vmin.f32 %v14663_v18, 0.0  ;;  %v14671_v16 = vadd.f32 %v14572_v33, %v4238_v50  ;;  %v4240_v12 = vpop.f32.mrb[127].mxu1  ;;  %5091 = vmatmul.mubr.bf16.gmra.mrb[184].mxu0 %v4847_v48  ;;  %v10039_v42 = vadd.f32 -1.0, %v11990_v10  ;;  %vm4444_vm9 = vcmp.gt.f32.partialorder %v14663_v18, 0.0 }
 0x671   : > { %v10040_v6 = vadd.f32 -1.0, %v11992_v7  ;;  %v4509_v29 = vmin.f32 %v14667_v19, 0.0  ;;  %5866 = vmatpush1.bf16.msra.mxu0 %v11408_v44  ;;  %v14678_v39 = vadd.f32 %v14575_v14, %v4240_v12  ;;  %v11994_v1 = vpop.eup %11993  ;;  %v4756_v40 = vsel %vm4436_vm1, %v14605_v5, %v10038_v31  ;;  %v11420_v12 = vld [vmem:[%s17614_s18 + $0x60] ss:$8 sps:$4 sm:$0xff]  }
 0x672   : > { %v4588_v54 = vmul.f32 1.442695, %v4508_v23  ;;  %v4510_v55 = vmin.f32 %v14671_v16, 0.0  ;;  %5867 = vmatprep.subr.bf16.mxu0 %v11413_v4  ;;  %v10041_v47 = vadd.f32 -1.0, %v11994_v1  ;;  %v4757_v62 = vsel %vm4437_vm2, %v14608_v22, %v10039_v42  ;;  %v11425_v42 = vld [vmem:[%s17614_s18 + $0x74] ss:$8 sps:$4 sm:$0xff]  }
 0x673   : > { %v4590_v51 = vmul.f32 1.442695, %v4509_v29  ;;  %v4758_v57 = vsel %vm4438_vm0, %v14613_v8, %v10040_v6  ;;  %v4511_v24 = vmin.f32 %v14678_v39, 0.0  ;;  %vm4446_vm8 = vcmp.gt.f32.partialorder %v14671_v16, 0.0 }
 0x674   : > { %12003 = vpow2.f32 %v4588_v54  ;;  %v4592_v11 = vmul.f32 1.442695, %v4510_v55  ;;  %v4849_v46 = vpack.c.bf16 %v4758_v57, %v4756_v40  ;;  %v4759_v5 = vsel %vm4439_vm3, %v14620_v59, %v10041_v47 }
 0x675   : > { %12005 = vpow2.f32 %v4590_v51  ;;  %v4244_v58 = vpop.f32.mrb[128].mxu1  ;;  %5868 = vmatpush1.bf16.msra.mxu0 %v11411_v37  ;;  %v4594_v0 = vmul.f32 1.442695, %v4511_v24  ;;  %v4850_v56 = vpack.c.bf16 %v4759_v5, %v4757_v62  ;;  %v11428_v62 = vld [vmem:[%s17614_s18 + $0x84] ss:$8 sps:$4 sm:$0xff]   ;;  %vm4445_vm10 = vcmp.gt.f32.partialorder %v14667_v19, 0.0 }
 0x676   : > { %v11996_v61 = vpop.eup %11995  ;;  %12007 = vpow2.f32 %v4592_v11  ;;  %v14691_v32 = vadd.f32 %v14572_v33, %v4244_v58  ;;  %v4246_v8 = vpop.f32.mrb[129].mxu1  ;;  %5869 = vmatprep.subr.bf16.mxu0 %v11416_v45  ;;  %v11423_v58 = vld [vmem:[%s17614_s18 + $0x70] ss:$8 sps:$4 sm:$0xff]   ;;  %vm4447_vm11 = vcmp.gt.f32.partialorder %v14678_v39, 0.0 }
 0x677   : > { %v11998_v36 = vpop.eup %11997  ;;  %v14699_v63 = vadd.f32 %v14575_v14, %v4246_v8  ;;  %v4248_v30 = vpop.f32.mrb[130].mxu1  ;;  %v10042_v9 = vadd.f32 -1.0, %v11996_v61  ;;  %12009 = vpow2.f32 %v4594_v0  ;;  %5100 = vmatprep.mubr.bf16.mxu0 %v4850_v56 }
 0x678   : > { %v12000_v17 = vpop.eup %11999  ;;  %v4512_v35 = vmin.f32 %v14691_v32, 0.0  ;;  %v14703_v52 = vadd.f32 %v14572_v33, %v4248_v30  ;;  %v4250_v22 = vpop.f32.mrb[131].mxu1  ;;  %v10043_v34 = vadd.f32 -1.0, %v11998_v36  ;;  %5101 = vmatmul.mubr.bf16.gmra.mrb[188].mxu0 %v4849_v46  ;;  %vm4448_vm13 = vcmp.gt.f32.partialorder %v14691_v32, 0.0 }
 0x679   : > { %v10044_v59 = vadd.f32 -1.0, %v12000_v17  ;;  %v4513_v60 = vmin.f32 %v14699_v63, 0.0  ;;  %5870 = vmatpush1.bf16.msra.mxu0 %v11414_v28  ;;  %v14710_v44 = vadd.f32 %v14575_v14, %v4250_v22  ;;  %v12002_v25 = vpop.eup %12001  ;;  %v4760_v50 = vsel %vm4440_vm6, %v14629_v41, %v10042_v9  ;;  %v11426_v22 = vld [vmem:[%s17614_s18 + $0x80] ss:$8 sps:$4 sm:$0xff]  }
 0x67a   : > { %v4596_v49 = vmul.f32 1.442695, %v4512_v35  ;;  %v4514_v21 = vmin.f32 %v14703_v52, 0.0  ;;  %5871 = vmatprep.subr.bf16.mxu0 %v11419_v27  ;;  %v10045_v10 = vadd.f32 -1.0, %v12002_v25  ;;  %v4761_v37 = vsel %vm4441_vm5, %v14635_v26, %v10043_v34  ;;  %v11431_v34 = vld [vmem:[%s17614_s18 + $0x94] ss:$8 sps:$4 sm:$0xff]  }
 0x67b   : > { %v4598_v48 = vmul.f32 1.442695, %v4513_v60  ;;  %v4762_v4 = vsel %vm4442_vm4, %v14640_v20, %v10044_v59  ;;  %v4515_v7 = vmin.f32 %v14710_v44, 0.0  ;;  %vm4450_vm12 = vcmp.gt.f32.partialorder %v14703_v52, 0.0 }
 0x67c   : > { %12011 = vpow2.f32 %v4596_v49  ;;  %v4600_v53 = vmul.f32 1.442695, %v4514_v21  ;;  %v4851_v23 = vpack.c.bf16 %v4762_v4, %v4760_v50  ;;  %v4763_v41 = vsel %vm4443_vm7, %v14648_v38, %v10045_v10 }
 0x67d   : > { %12013 = vpow2.f32 %v4598_v48  ;;  %v4254_v31 = vpop.f32.mrb[132].mxu1  ;;  %5872 = vmatpush1.bf16.msra.mxu0 %v11417_v43  ;;  %v4602_v55 = vmul.f32 1.442695, %v4515_v7  ;;  %v4852_v51 = vpack.c.bf16 %v4763_v41, %v4761_v37  ;;  %v11434_v37 = vld [vmem:[%s17614_s18 + $0xa4] ss:$8 sps:$4 sm:$0xff]   ;;  %vm4449_vm14 = vcmp.gt.f32.partialorder %v14699_v63, 0.0 }
 0x67e   : > { %v12004_v6 = vpop.eup %12003  ;;  %12015 = vpow2.f32 %v4600_v53  ;;  %v14723_v29 = vadd.f32 %v14572_v33, %v4254_v31  ;;  %v4256_v20 = vpop.f32.mrb[133].mxu1  ;;  %5873 = vmatprep.subr.bf16.mxu0 %v11422_v3  ;;  %v11429_v31 = vld [vmem:[%s17614_s18 + $0x90] ss:$8 sps:$4 sm:$0xff]   ;;  %vm4451_vm15 = vcmp.gt.f32.partialorder %v14710_v44, 0.0 }
 0x67f   : > { %v12006_v54 = vpop.eup %12005  ;;  %v14731_v45 = vadd.f32 %v14575_v14, %v4256_v20  ;;  %v4258_v1 = vpop.f32.mrb[134].mxu1  ;;  %v10046_v47 = vadd.f32 -1.0, %v12004_v6  ;;  %12017 = vpow2.f32 %v4602_v55  ;;  %5110 = vmatprep.mubr.bf16.mxu0 %v4852_v51 }
 0x680   : > { %v12008_v57 = vpop.eup %12007  ;;  %v4516_v11 = vmin.f32 %v14723_v29, 0.0  ;;  %v14735_v40 = vadd.f32 %v14572_v33, %v4258_v1  ;;  %v4260_v26 = vpop.f32.mrb[135].mxu1  ;;  %v10047_v46 = vadd.f32 -1.0, %v12006_v54  ;;  %5111 = vmatmul.mubr.bf16.gmra.mrb[192].mxu0 %v4851_v23  ;;  %vm4452_vm1 = vcmp.gt.f32.partialorder %v14723_v29, 0.0 }
 0x681   : > { %v10048_v38 = vadd.f32 -1.0, %v12008_v57  ;;  %v4517_v24 = vmin.f32 %v14731_v45, 0.0  ;;  %5874 = vmatpush1.bf16.msra.mxu0 %v11420_v12  ;;  %v14742_v8 = vadd.f32 %v14575_v14, %v4260_v26  ;;  %v12010_v5 = vpop.eup %12009  ;;  %v4764_v56 = vsel %vm4444_vm9, %v14663_v18, %v10046_v47  ;;  %v11432_v26 = vld [vmem:[%s17614_s18 + $0xa0] ss:$8 sps:$4 sm:$0xff]  }
 0x682   : > { %v4604_v28 = vmul.f32 1.442695, %v4516_v11  ;;  %v4518_v61 = vmin.f32 %v14735_v40, 0.0  ;;  %5875 = vmatprep.subr.bf16.mxu0 %v11425_v42  ;;  %v10049_v0 = vadd.f32 -1.0, %v12010_v5  ;;  %v4765_v43 = vsel %vm4445_vm10, %v14667_v19, %v10047_v46  ;;  %v11437_v46 = vld [vmem:[%s17614_s18 + $0xb4] ss:$8 sps:$4 sm:$0xff]  }
 0x683   : > { %v4606_v27 = vmul.f32 1.442695, %v4517_v24  ;;  %v4766_v36 = vsel %vm4446_vm8, %v14671_v16, %v10048_v38  ;;  %v4519_v17 = vmin.f32 %v14742_v8, 0.0  ;;  %vm4454_vm0 = vcmp.gt.f32.partialorder %v14735_v40, 0.0 }
 0x684   : > { %12019 = vpow2.f32 %v4604_v28  ;;  %v4608_v30 = vmul.f32 1.442695, %v4518_v61  ;;  %v4853_v35 = vpack.c.bf16 %v4766_v36, %v4764_v56  ;;  %v4767_v18 = vsel %vm4447_vm11, %v14678_v39, %v10049_v0 }
 0x685   : > { %12021 = vpow2.f32 %v4606_v27  ;;  %v4264_v9 = vpop.f32.mrb[136].mxu1  ;;  %5876 = vmatpush1.bf16.msra.mxu0 %v11423_v58  ;;  %v4610_v21 = vmul.f32 1.442695, %v4519_v17  ;;  %v4854_v48 = vpack.c.bf16 %v4767_v18, %v4765_v43  ;;  %v11440_v43 = vld [vmem:[%s17614_s18 + $0xc4] ss:$8 sps:$4 sm:$0xff]   ;;  %vm4453_vm2 = vcmp.gt.f32.partialorder %v14731_v45, 0.0 }
 0x686   : > { %v12012_v59 = vpop.eup %12011  ;;  %12023 = vpow2.f32 %v4608_v30  ;;  %v14755_v60 = vadd.f32 %v14572_v33, %v4264_v9  ;;  %v4266_v16 = vpop.f32.mrb[137].mxu1  ;;  %5877 = vmatprep.subr.bf16.mxu0 %v11428_v62  ;;  %v11435_v9 = vld [vmem:[%s17614_s18 + $0xb0] ss:$8 sps:$4 sm:$0xff]   ;;  %vm4455_vm3 = vcmp.gt.f32.partialorder %v14742_v8, 0.0 }
 0x687   : > { %v12014_v49 = vpop.eup %12013  ;;  %v14763_v3 = vadd.f32 %v14575_v14, %v4266_v16  ;;  %v4268_v25 = vpop.f32.mrb[138].mxu1  ;;  %v10050_v10 = vadd.f32 -1.0, %v12012_v59  ;;  %12025 = vpow2.f32 %v4610_v21  ;;  %5120 = vmatprep.mubr.bf16.mxu0 %v4854_v48 }
 0x688   : > { %v12016_v4 = vpop.eup %12015  ;;  %v4520_v53 = vmin.f32 %v14755_v60, 0.0  ;;  %v14767_v50 = vadd.f32 %v14572_v33, %v4268_v25  ;;  %v4270_v19 = vpop.f32.mrb[139].mxu1  ;;  %v10051_v23 = vadd.f32 -1.0, %v12014_v49  ;;  %5121 = vmatmul.mubr.bf16.gmra.mrb[196].mxu0 %v4853_v35  ;;  %vm4456_vm6 = vcmp.gt.f32.partialorder %v14755_v60, 0.0 }
 0x689   : > { %v10052_v39 = vadd.f32 -1.0, %v12016_v4  ;;  %v4521_v7 = vmin.f32 %v14763_v3, 0.0  ;;  %5878 = vmatpush1.bf16.msra.mxu0 %v11426_v22  ;;  %v14774_v20 = vadd.f32 %v14575_v14, %v4270_v19  ;;  %v12018_v41 = vpop.eup %12017  ;;  %v4768_v51 = vsel %vm4448_vm13, %v14691_v32, %v10050_v10  ;;  %v11438_v19 = vld [vmem:[%s17614_s18 + $0xc0] ss:$8 sps:$4 sm:$0xff]  }
 0x68a   : > { %v4612_v12 = vmul.f32 1.442695, %v4520_v53  ;;  %v4522_v6 = vmin.f32 %v14767_v50, 0.0  ;;  %5879 = vmatprep.subr.bf16.mxu0 %v11431_v34  ;;  %v10053_v55 = vadd.f32 -1.0, %v12018_v41  ;;  %v4769_v58 = vsel %vm4449_vm14, %v14699_v63, %v10051_v23 }
 0x68b   : > { %v4614_v42 = vmul.f32 1.442695, %v4521_v7  ;;  %v4770_v54 = vsel %vm4450_vm12, %v14703_v52, %v10052_v39  ;;  %v4523_v57 = vmin.f32 %v14774_v20, 0.0  ;;  %vm4458_vm4 = vcmp.gt.f32.partialorder %v14767_v50, 0.0 }
 0x68c   : > { %12027 = vpow2.f32 %v4612_v12  ;;  %v4616_v1 = vmul.f32 1.442695, %v4522_v6  ;;  %v4855_v11 = vpack.c.bf16 %v4770_v54, %v4768_v51  ;;  %v4771_v32 = vsel %vm4451_vm15, %v14710_v44, %v10053_v55 }
 0x68d   : > { %12029 = vpow2.f32 %v4614_v42  ;;  %v4274_v47 = vpop.f32.mrb[140].mxu1  ;;  %5880 = vmatpush1.bf16.msra.mxu0 %v11429_v31  ;;  %v4618_v61 = vmul.f32 1.442695, %v4523_v57  ;;  %v4856_v27 = vpack.c.bf16 %v4771_v32, %v4769_v58  ;;  %vm4457_vm5 = vcmp.gt.f32.partialorder %v14763_v3, 0.0 }
 0x68e   : > { %v12020_v38 = vpop.eup %12019  ;;  %12031 = vpow2.f32 %v4616_v1  ;;  %v14787_v24 = vadd.f32 %v14572_v33, %v4274_v47  ;;  %v4276_v52 = vpop.f32.mrb[141].mxu1  ;;  %5881 = vmatprep.subr.bf16.mxu0 %v11434_v37  ;;  %vm4459_vm7 = vcmp.gt.f32.partialorder %v14774_v20, 0.0 }
 0x68f   : > { %v12022_v28 = vpop.eup %12021  ;;  %v14795_v62 = vadd.f32 %v14575_v14, %v4276_v52  ;;  %v4278_v5 = vpop.f32.mrb[142].mxu1  ;;  %v10054_v0 = vadd.f32 -1.0, %v12020_v38  ;;  %12033 = vpow2.f32 %v4618_v61  ;;  %5130 = vmatprep.mubr.bf16.mxu0 %v4856_v27 }
 0x690   : > { %v12024_v36 = vpop.eup %12023  ;;  %v4524_v30 = vmin.f32 %v14787_v24, 0.0  ;;  %v14799_v56 = vadd.f32 %v14572_v33, %v4278_v5  ;;  %v4280_v63 = vpop.f32.mrb[143].mxu1  ;;  %v10055_v35 = vadd.f32 -1.0, %v12022_v28  ;;  %5131 = vmatmul.mubr.bf16.gmra.mrb[200].mxu0 %v4855_v11  ;;  %vm4460_vm9 = vcmp.gt.f32.partialorder %v14787_v24, 0.0 }
 0x691   : > { %v10056_v44 = vadd.f32 -1.0, %v12024_v36  ;;  %v4525_v17 = vmin.f32 %v14795_v62, 0.0  ;;  %5882 = vmatpush1.bf16.msra.mxu0 %v11432_v26  ;;  %v14806_v16 = vadd.f32 %v14575_v14, %v4280_v63  ;;  %v12026_v18 = vpop.eup %12025  ;;  %v4772_v48 = vsel %vm4452_vm1, %v14723_v29, %v10054_v0 }
 0x692   : > { %v4620_v22 = vmul.f32 1.442695, %v4524_v30  ;;  %v4526_v59 = vmin.f32 %v14799_v56, 0.0  ;;  %5883 = vmatprep.subr.bf16.mxu0 %v11437_v46  ;;  %v10057_v21 = vadd.f32 -1.0, %v12026_v18  ;;  %v4773_v31 = vsel %vm4453_vm2, %v14731_v45, %v10055_v35 }
 0x693   : > { %v4622_v34 = vmul.f32 1.442695, %v4525_v17  ;;  %v4774_v49 = vsel %vm4454_vm0, %v14735_v40, %v10056_v44  ;;  %v4527_v4 = vmin.f32 %v14806_v16, 0.0  ;;  %vm4462_vm8 = vcmp.gt.f32.partialorder %v14799_v56, 0.0 }
 0x694   : > { %12035 = vpow2.f32 %v4620_v22  ;;  %v4624_v25 = vmul.f32 1.442695, %v4526_v59  ;;  %v4857_v53 = vpack.c.bf16 %v4774_v49, %v4772_v48  ;;  %v4775_v29 = vsel %vm4455_vm3, %v14742_v8, %v10057_v21 }
 0x695   : > { %12037 = vpow2.f32 %v4622_v34  ;;  %v4284_v10 = vpop.f32.mrb[144].mxu1  ;;  %5884 = vmatpush1.bf16.msra.mxu0 %v11435_v9  ;;  %v4626_v12 = vmul.f32 1.442695, %v4527_v4  ;;  %v4858_v41 = vpack.c.bf16 %v4775_v29, %v4773_v31  ;;  %vm4461_vm10 = vcmp.gt.f32.partialorder %v14795_v62, 0.0 }
 0x696   : > { %v12028_v39 = vpop.eup %12027  ;;  %12039 = vpow2.f32 %v4624_v25  ;;  %v14819_v7 = vadd.f32 %v14572_v33, %v4284_v10  ;;  %v4286_v40 = vpop.f32.mrb[145].mxu1  ;;  %5885 = vmatprep.subr.bf16.mxu0 %v11440_v43  ;;  %vm4463_vm11 = vcmp.gt.f32.partialorder %v14806_v16, 0.0 }
 0x697   : > { %v12030_v23 = vpop.eup %12029  ;;  %v14826_v6 = vadd.f32 %v14575_v14, %v4286_v40  ;;  %v4288_v37 = vpop.f32.mrb[146].mxu1  ;;  %v10058_v54 = vadd.f32 -1.0, %v12028_v39  ;;  %12041 = vpow2.f32 %v4626_v12  ;;  %5140 = vmatprep.mubr.bf16.mxu0 %v4858_v41 }
 0x698   : > { %v12032_v42 = vpop.eup %12031  ;;  %v4528_v55 = vmin.f32 %v14819_v7, 0.0  ;;  %v14830_v1 = vadd.f32 %v14572_v33, %v4288_v37  ;;  %v4290_v51 = vpop.f32.mrb[147].mxu1  ;;  %v10059_v57 = vadd.f32 -1.0, %v12030_v23  ;;  %5141 = vmatmul.mubr.bf16.gmra.mrb[204].mxu0 %v4857_v53  ;;  %vm4464_vm13 = vcmp.gt.f32.partialorder %v14819_v7, 0.0 }
 0x699   : > { %v10060_v45 = vadd.f32 -1.0, %v12032_v42  ;;  %v4529_v8 = vmin.f32 %v14826_v6, 0.0  ;;  %5886 = vmatpush1.bf16.msra.mxu0 %v11438_v19  ;;  %v14836_v26 = vadd.f32 %v14575_v14, %v4290_v51  ;;  %v12034_v38 = vpop.eup %12033  ;;  %v4776_v28 = vsel %vm4456_vm6, %v14755_v60, %v10058_v54 }
 0x69a   : > { %v4628_v47 = vmul.f32 1.442695, %v4528_v55  ;;  %v4530_v11 = vmin.f32 %v14830_v1, 0.0  ;;  %v10061_v32 = vadd.f32 -1.0, %v12034_v38  ;;  %vm4466_vm12 = vcmp.gt.f32.partialorder %v14830_v1, 0.0 }
 0x69b   : > { %v4630_v52 = vmul.f32 1.442695, %v4529_v8  ;;  %v4778_v58 = vsel %vm4458_vm4, %v14767_v50, %v10060_v45  ;;  %v4531_v61 = vmin.f32 %v14836_v26, 0.0  ;;  %v4777_v50 = vsel %vm4457_vm5, %v14763_v3, %v10059_v57 }
 0x69c   : > { %12043 = vpow2.f32 %v4628_v47  ;;  %v4632_v46 = vmul.f32 1.442695, %v4530_v11  ;;  %v4859_v27 = vpack.c.bf16 %v4778_v58, %v4776_v28  ;;  %v4779_v63 = vsel %vm4459_vm7, %v14774_v20, %v10061_v32 }
 0x69d   : > { %12045 = vpow2.f32 %v4630_v52  ;;  %v4294_v5 = vpop.f32.mrb[148].mxu1  ;;  %v4634_v44 = vmul.f32 1.442695, %v4531_v61  ;;  %v4860_v35 = vpack.c.bf16 %v4779_v63, %v4777_v50  ;;  %vm4465_vm14 = vcmp.gt.f32.partialorder %v14826_v6, 0.0 }
 0x69e   : > { %v12036_v36 = vpop.eup %12035  ;;  %12047 = vpow2.f32 %v4632_v46  ;;  %v14845_v0 = vadd.f32 %v14572_v33, %v4294_v5  ;;  %v4296_v30 = vpop.f32.mrb[149].mxu1  ;;  %vm4467_vm15 = vcmp.gt.f32.partialorder %v14836_v26, 0.0 }
 0x69f   : > { %v12038_v60 = vpop.eup %12037  ;;  %v14852_v17 = vadd.f32 %v14575_v14, %v4296_v30  ;;  %v4298_v9 = vpop.f32.mrb[150].mxu1  ;;  %v10062_v59 = vadd.f32 -1.0, %v12036_v36  ;;  %12049 = vpow2.f32 %v4634_v44  ;;  %5150 = vmatprep.mubr.bf16.mxu0 %v4860_v35 }
 0x6a0   : > { %v12040_v22 = vpop.eup %12039  ;;  %v4532_v43 = vmin.f32 %v14845_v0, 0.0  ;;  %v14856_v18 = vadd.f32 %v14572_v33, %v4298_v9  ;;  %v4300_v34 = vpop.f32.mrb[151].mxu1  ;;  %v10063_v49 = vadd.f32 -1.0, %v12038_v60  ;;  %5151 = vmatmul.mubr.bf16.gmra.mrb[208].mxu0 %v4859_v27  ;;  %vm4468_vm1 = vcmp.gt.f32.partialorder %v14845_v0, 0.0 }
 0x6a1   : > { %v10064_v3 = vadd.f32 -1.0, %v12040_v22  ;;  %v4533_v20 = vmin.f32 %v14852_v17, 0.0  ;;  %v14862_v48 = vadd.f32 %v14575_v14, %v4300_v34  ;;  %v12042_v4 = vpop.eup %12041  ;;  %v4780_v40 = vsel %vm4460_vm9, %v14787_v24, %v10062_v59 }
 0x6a2   : > { %v4636_v21 = vmul.f32 1.442695, %v4532_v43  ;;  %v4534_v25 = vmin.f32 %v14856_v18, 0.0  ;;  %v10065_v19 = vadd.f32 -1.0, %v12042_v4  ;;  %vm4470_vm0 = vcmp.gt.f32.partialorder %v14856_v18, 0.0 }
 0x6a3   : > { %v4638_v10 = vmul.f32 1.442695, %v4533_v20  ;;  %v4782_v53 = vsel %vm4462_vm8, %v14799_v56, %v10064_v3  ;;  %v4535_v31 = vmin.f32 %v14862_v48, 0.0  ;;  %v4781_v56 = vsel %vm4461_vm10, %v14795_v62, %v10063_v49 }
 0x6a4   : > { %12051 = vpow2.f32 %v4636_v21  ;;  %v4640_v39 = vmul.f32 1.442695, %v4534_v25  ;;  %v4861_v23 = vpack.c.bf16 %v4782_v53, %v4780_v40  ;;  %v4783_v42 = vsel %vm4463_vm11, %v14806_v16, %v10065_v19 }
 0x6a5   : > { %12053 = vpow2.f32 %v4638_v10  ;;  %v4304_v29 = vpop.f32.mrb[152].mxu1  ;;  %v4642_v54 = vmul.f32 1.442695, %v4535_v31  ;;  %v4862_v45 = vpack.c.bf16 %v4783_v42, %v4781_v56  ;;  %vm4469_vm2 = vcmp.gt.f32.partialorder %v14852_v17, 0.0 }
 0x6a6   : > { %v12044_v12 = vpop.eup %12043  ;;  %12055 = vpow2.f32 %v4640_v39  ;;  %v14871_v37 = vadd.f32 %v14572_v33, %v4304_v29  ;;  %v4306_v41 = vpop.f32.mrb[153].mxu1  ;;  %vm4471_vm3 = vcmp.gt.f32.partialorder %v14862_v48, 0.0 }
 0x6a7   : > { %v12046_v24 = vpop.eup %12045  ;;  %v14878_v55 = vadd.f32 %v14575_v14, %v4306_v41  ;;  %v4308_v51 = vpop.f32.mrb[154].mxu1  ;;  %v10066_v57 = vadd.f32 -1.0, %v12044_v12  ;;  %12057 = vpow2.f32 %v4642_v54  ;;  %5160 = vmatprep.mubr.bf16.mxu0 %v4862_v45 }
 0x6a8   : > { %v12048_v8 = vpop.eup %12047  ;;  %v4536_v47 = vmin.f32 %v14871_v37, 0.0  ;;  %v14882_v11 = vadd.f32 %v14572_v33, %v4308_v51  ;;  %v4310_v38 = vpop.f32.mrb[155].mxu1  ;;  %v10067_v52 = vadd.f32 -1.0, %v12046_v24  ;;  %5161 = vmatmul.mubr.bf16.gmra.mrb[212].mxu0 %v4861_v23  ;;  %vm4472_vm6 = vcmp.gt.f32.partialorder %v14871_v37, 0.0 }
 0x6a9   : > { %v10068_v62 = vadd.f32 -1.0, %v12048_v8  ;;  %v4537_v16 = vmin.f32 %v14878_v55, 0.0  ;;  %v14888_v46 = vadd.f32 %v14575_v14, %v4310_v38  ;;  %v12050_v28 = vpop.eup %12049  ;;  %v4784_v30 = vsel %vm4464_vm13, %v14819_v7, %v10066_v57 }
 0x6aa   : > { %v4644_v58 = vmul.f32 1.442695, %v4536_v47  ;;  %v4538_v32 = vmin.f32 %v14882_v11, 0.0  ;;  %v10069_v27 = vadd.f32 -1.0, %v12050_v28  ;;  %vm4474_vm4 = vcmp.gt.f32.partialorder %v14882_v11, 0.0 }
 0x6ab   : > { %v4646_v61 = vmul.f32 1.442695, %v4537_v16  ;;  %v4786_v5 = vsel %vm4466_vm12, %v14830_v1, %v10068_v62  ;;  %v4539_v50 = vmin.f32 %v14888_v46, 0.0  ;;  %v4785_v1 = vsel %vm4465_vm14, %v14826_v6, %v10067_v52 }
 0x6ac   : > { %12059 = vpow2.f32 %v4644_v58  ;;  %v4648_v36 = vmul.f32 1.442695, %v4538_v32  ;;  %v4863_v60 = vpack.c.bf16 %v4786_v5, %v4784_v30  ;;  %v4787_v22 = vsel %vm4467_vm15, %v14836_v26, %v10069_v27 }
 0x6ad   : > { %12061 = vpow2.f32 %v4646_v61  ;;  %v4314_v63 = vpop.f32.mrb[156].mxu1  ;;  %v4650_v59 = vmul.f32 1.442695, %v4539_v50  ;;  %v4864_v3 = vpack.c.bf16 %v4787_v22, %v4785_v1  ;;  %vm4473_vm5 = vcmp.gt.f32.partialorder %v14878_v55, 0.0 }
 0x6ae   : > { %v12052_v44 = vpop.eup %12051  ;;  %12063 = vpow2.f32 %v4648_v36  ;;  %v14897_v9 = vadd.f32 %v14572_v33, %v4314_v63  ;;  %v4316_v35 = vpop.f32.mrb[157].mxu1  ;;  %vm4475_vm7 = vcmp.gt.f32.partialorder %v14888_v46, 0.0 }
 0x6af   : > { %v12054_v7 = vpop.eup %12053  ;;  %v14904_v43 = vadd.f32 %v14575_v14, %v4316_v35  ;;  %v4318_v34 = vpop.f32.mrb[158].mxu1  ;;  %v10070_v49 = vadd.f32 -1.0, %v12052_v44  ;;  %12065 = vpow2.f32 %v4650_v59  ;;  %5170 = vmatprep.mubr.bf16.mxu0 %v4864_v3 }
 0x6b0   : > { %v12056_v20 = vpop.eup %12055  ;;  %v4540_v21 = vmin.f32 %v14897_v9, 0.0  ;;  %v14908_v25 = vadd.f32 %v14572_v33, %v4318_v34  ;;  %v4320_v4 = vpop.f32.mrb[159].mxu1  ;;  %v10071_v10 = vadd.f32 -1.0, %v12054_v7  ;;  %5171 = vmatmul.mubr.bf16.gmra.mrb[216].mxu0 %v4863_v60  ;;  %vm4476_vm9 = vcmp.gt.f32.partialorder %v14897_v9, 0.0 }
 0x6b1   : > { %v10072_v6 = vadd.f32 -1.0, %v12056_v20  ;;  %v4541_v26 = vmin.f32 %v14904_v43, 0.0  ;;  %v14914_v39 = vadd.f32 %v14575_v14, %v4320_v4  ;;  %v12058_v40 = vpop.eup %12057  ;;  %v4788_v41 = vsel %vm4468_vm1, %v14845_v0, %v10070_v49 }
 0x6b2   : > { %v4652_v53 = vmul.f32 1.442695, %v4540_v21  ;;  %v4542_v19 = vmin.f32 %v14908_v25, 0.0  ;;  %v10073_v23 = vadd.f32 -1.0, %v12058_v40  ;;  %vm4478_vm8 = vcmp.gt.f32.partialorder %v14908_v25, 0.0 }
 0x6b3   : > { %v4654_v31 = vmul.f32 1.442695, %v4541_v26  ;;  %v4790_v29 = vsel %vm4470_vm0, %v14856_v18, %v10072_v6  ;;  %v4543_v56 = vmin.f32 %v14914_v39, 0.0  ;;  %v4789_v18 = vsel %vm4469_vm2, %v14852_v17, %v10071_v10 }
 0x6b4   : > { %12067 = vpow2.f32 %v4652_v53  ;;  %v4656_v12 = vmul.f32 1.442695, %v4542_v19  ;;  %v4865_v24 = vpack.c.bf16 %v4790_v29, %v4788_v41  ;;  %v4791_v8 = vsel %vm4471_vm3, %v14862_v48, %v10073_v23 }
 0x6b5   : > { %12069 = vpow2.f32 %v4654_v31  ;;  %v4324_v42 = vpop.f32.mrb[160].mxu1  ;;  %v4658_v57 = vmul.f32 1.442695, %v4543_v56  ;;  %v4866_v62 = vpack.c.bf16 %v4791_v8, %v4789_v18  ;;  %vm4477_vm10 = vcmp.gt.f32.partialorder %v14904_v43, 0.0 }
 0x6b6   : > { %v12060_v54 = vpop.eup %12059  ;;  %12071 = vpow2.f32 %v4656_v12  ;;  %v14923_v51 = vadd.f32 %v14572_v33, %v4324_v42  ;;  %v4326_v45 = vpop.f32.mrb[161].mxu1  ;;  %vm4479_vm11 = vcmp.gt.f32.partialorder %v14914_v39, 0.0 }
 0x6b7   : > { %v12062_v0 = vpop.eup %12061  ;;  %v14930_v47 = vadd.f32 %v14575_v14, %v4326_v45  ;;  %v4328_v38 = vpop.f32.mrb[162].mxu1  ;;  %v10074_v52 = vadd.f32 -1.0, %v12060_v54  ;;  %12073 = vpow2.f32 %v4658_v57  ;;  %5180 = vmatprep.mubr.bf16.mxu0 %v4866_v62 }
 0x6b8   : > { %v12064_v16 = vpop.eup %12063  ;;  %v4544_v58 = vmin.f32 %v14923_v51, 0.0  ;;  %v14934_v32 = vadd.f32 %v14572_v33, %v4328_v38  ;;  %v4330_v28 = vpop.f32.mrb[163].mxu1  ;;  %v10075_v61 = vadd.f32 -1.0, %v12062_v0  ;;  %5181 = vmatmul.mubr.bf16.gmra.mrb[220].mxu0 %v4865_v24  ;;  %vm4480_vm13 = vcmp.gt.f32.partialorder %v14923_v51, 0.0 }
 0x6b9   : > { %v10076_v17 = vadd.f32 -1.0, %v12064_v16  ;;  %v4545_v48 = vmin.f32 %v14930_v47, 0.0  ;;  %v14940_v36 = vadd.f32 %v14575_v14, %v4330_v28  ;;  %v12066_v30 = vpop.eup %12065  ;;  %v4792_v35 = vsel %vm4472_vm6, %v14871_v37, %v10074_v52 }
 0x6ba   : > { %v4660_v5 = vmul.f32 1.442695, %v4544_v58  ;;  %v4546_v27 = vmin.f32 %v14934_v32, 0.0  ;;  %v10077_v60 = vadd.f32 -1.0, %v12066_v30  ;;  %vm4482_vm12 = vcmp.gt.f32.partialorder %v14934_v32, 0.0 }
 0x6bb   : > { %v4662_v50 = vmul.f32 1.442695, %v4545_v48  ;;  %v4794_v63 = vsel %vm4474_vm4, %v14882_v11, %v10076_v17  ;;  %v4547_v1 = vmin.f32 %v14940_v36, 0.0  ;;  %v4793_v11 = vsel %vm4473_vm5, %v14878_v55, %v10075_v61 }
 0x6bc   : > { %12075 = vpow2.f32 %v4660_v5  ;;  %v4664_v44 = vmul.f32 1.442695, %v4546_v27  ;;  %v4867_v7 = vpack.c.bf16 %v4794_v63, %v4792_v35  ;;  %v4795_v20 = vsel %vm4475_vm7, %v14888_v46, %v10077_v60 }
 0x6bd   : > { %12077 = vpow2.f32 %v4662_v50  ;;  %v4334_v22 = vpop.f32.mrb[164].mxu1  ;;  %v4666_v49 = vmul.f32 1.442695, %v4547_v1  ;;  %v4868_v6 = vpack.c.bf16 %v4795_v20, %v4793_v11  ;;  %vm4481_vm14 = vcmp.gt.f32.partialorder %v14930_v47, 0.0  ;;  %v11441_v20 = vld [vmem:[%s17614_s18 + $0xd0] ss:$8 sps:$4 sm:$0xff]  }
 0x6be   : > { %v12068_v59 = vpop.eup %12067  ;;  %12079 = vpow2.f32 %v4664_v44  ;;  %v14949_v34 = vadd.f32 %v14572_v33, %v4334_v22  ;;  %v4336_v3 = vpop.f32.mrb[165].mxu1  ;;  %vm4483_vm15 = vcmp.gt.f32.partialorder %v14940_v36, 0.0 }
 0x6bf   : > { %v12070_v37 = vpop.eup %12069  ;;  %v14956_v21 = vadd.f32 %v14575_v14, %v4336_v3  ;;  %v4338_v4 = vpop.f32.mrb[166].mxu1  ;;  %v10078_v10 = vadd.f32 -1.0, %v12068_v59  ;;  %12081 = vpow2.f32 %v4666_v49  ;;  %5190 = vmatprep.mubr.bf16.mxu0 %v4868_v6  ;;  %v11443_v3 = vld [vmem:[%s17614_s18 + $0xd4] ss:$8 sps:$4 sm:$0xff]  }
 0x6c0   : > { %v12072_v26 = vpop.eup %12071  ;;  %v4548_v53 = vmin.f32 %v14949_v34, 0.0  ;;  %v14960_v19 = vadd.f32 %v14572_v33, %v4338_v4  ;;  %v4340_v40 = vpop.f32.mrb[167].mxu1  ;;  %v10079_v31 = vadd.f32 -1.0, %v12070_v37  ;;  %5191 = vmatmul.mubr.bf16.gmra.mrb[224].mxu0 %v4867_v7  ;;  %5887 = vmatprep.subr.bf16.mxu0 %v11443_v3  ;;  %vm4484_vm0 = vcmp.gt.f32.partialorder %v14949_v34, 0.0 }
 0x6c1   : > { %v10080_v55 = vadd.f32 -1.0, %v12072_v26  ;;  %v4549_v46 = vmin.f32 %v14956_v21, 0.0  ;;  %v14966_v12 = vadd.f32 %v14575_v14, %v4340_v40  ;;  %v12074_v41 = vpop.eup %12073  ;;  %v4796_v45 = vsel %vm4476_vm9, %v14897_v9, %v10078_v10  ;;  %5888 = vmatpush1.bf16.msra.mxu0 %v11441_v20 }
 0x6c2   : > { %v4668_v29 = vmul.f32 1.442695, %v4548_v53  ;;  %v4550_v23 = vmin.f32 %v14960_v19, 0.0  ;;  %v10081_v24 = vadd.f32 -1.0, %v12074_v41  ;;  %v11446_v53 = vld [vmem:[%s17614_s18 + $0xe4] ss:$8 sps:$4 sm:$0xff]  }
 0x6c3   : > { %v4670_v56 = vmul.f32 1.442695, %v4549_v46  ;;  %v4798_v42 = vsel %vm4478_vm8, %v14908_v25, %v10080_v55  ;;  %v4551_v18 = vmin.f32 %v14966_v12, 0.0  ;;  %v4797_v25 = vsel %vm4477_vm10, %v14904_v43, %v10079_v31  ;;  %v11444_v55 = vld [vmem:[%s17614_s18 + $0xe0] ss:$8 sps:$4 sm:$0xff]   ;;  %5889 = vmatprep.subr.bf16.mxu0 %v11446_v53 }
 0x6c4   : > { %12083 = vpow2.f32 %v4668_v29  ;;  %v4672_v54 = vmul.f32 1.442695, %v4550_v23  ;;  %v4869_v0 = vpack.c.bf16 %v4798_v42, %v4796_v45  ;;  %v4799_v16 = vsel %vm4479_vm11, %v14914_v39, %v10081_v24  ;;  %v11449_v41 = vld [vmem:[%s17614_s18 + $0xf4] ss:$8 sps:$4 sm:$0xff]  }
 0x6c5   : > { %12085 = vpow2.f32 %v4670_v56  ;;  %v4344_v8 = vpop.f32.mrb[168].mxu1  ;;  %v4674_v52 = vmul.f32 1.442695, %v4551_v18  ;;  %v4870_v17 = vpack.c.bf16 %v4799_v16, %v4797_v25  ;;  %vm4486_vm1 = vcmp.gt.f32.partialorder %v14960_v19, 0.0  ;;  %5890 = vmatpush1.bf16.msra.mxu0 %v11444_v55  ;;  %v11447_v56 = vld [vmem:[%s17614_s18 + $0xf0] ss:$8 sps:$4 sm:$0xff]  }
 0x6c6   : > { %v12076_v57 = vpop.eup %12075  ;;  %12087 = vpow2.f32 %v4672_v54  ;;  %v14975_v38 = vadd.f32 %v14572_v33, %v4344_v8  ;;  %v4346_v62 = vpop.f32.mrb[169].mxu1  ;;  %vm4485_vm2 = vcmp.gt.f32.partialorder %v14956_v21, 0.0  ;;  %vm4487_vm3 = vcmp.gt.f32.partialorder %v14966_v12, 0.0  ;;  %5891 = vmatprep.subr.bf16.mxu0 %v11449_v41 }
 0x6c7   : > { %v12078_v9 = vpop.eup %12077  ;;  %v14982_v58 = vadd.f32 %v14575_v14, %v4346_v62  ;;  %v4348_v28 = vpop.f32.mrb[170].mxu1  ;;  %v10082_v61 = vadd.f32 -1.0, %v12076_v57  ;;  %12089 = vpow2.f32 %v4674_v52  ;;  %5200 = vmatprep.mubr.bf16.mxu0 %v4870_v17  ;;  %v4844_v17 = vld [vmem:[%s17616_s3] sm:$0x3]  ;;  %s17617_s3 = sld [smem:[#allocation20_spill]] }
 0x6c8   : > { %v12080_v48 = vpop.eup %12079  ;;  %v4552_v5 = vmin.f32 %v14975_v38, 0.0  ;;  %v14986_v27 = vadd.f32 %v14572_v33, %v4348_v28  ;;  %v4350_v30 = vpop.f32.mrb[171].mxu1  ;;  %v10083_v50 = vadd.f32 -1.0, %v12078_v9  ;;  %5201 = vmatmul.mubr.bf16.gmra.mrb[228].mxu0 %v4869_v0  ;;  %vm4488_vm4 = vcmp.gt.f32.partialorder %v14975_v38, 0.0  ;;  %v11452_v28 = vld [vmem:[%s17615_s7 + $0x4] ss:$8 sps:$4 sm:$0xff]  }
 0x6c9   : > { %v10084_v43 = vadd.f32 -1.0, %v12080_v48  ;;  %v4553_v39 = vmin.f32 %v14982_v58, 0.0  ;;  %v14992_v44 = vadd.f32 %v14575_v14, %v4350_v30  ;;  %v12082_v33 = vpop.eup %12081  ;;  %v4800_v59 = vsel %vm4480_vm13, %v14923_v51, %v10082_v61  ;;  %5892 = vmatpush1.bf16.msra.mxu0 %v11447_v56 }
 0x6ca   : > { %v4676_v63 = vmul.f32 1.442695, %v4552_v5  ;;  %v4554_v60 = vmin.f32 %v14986_v27, 0.0  ;;  %v10085_v22 = vadd.f32 -1.0, %v12082_v33  ;;  %v4801_v49 = vsel %vm4481_vm14, %v14930_v47, %v10083_v50  ;;  %6943 = vmatprep.subr.bf16.mxu0 %v11452_v28 }
 0x6cb   : > { %v4678_v35 = vmul.f32 1.442695, %v4553_v39  ;;  %v4802_v1 = vsel %vm4482_vm12, %v14934_v32, %v10084_v43  ;;  %v4555_v14 = vmin.f32 %v14992_v44, 0.0  ;;  %vm4490_vm6 = vcmp.gt.f32.partialorder %v14986_v27, 0.0 }
 0x6cc   : > { %12091 = vpow2.f32 %v4676_v63  ;;  %v4680_v7 = vmul.f32 1.442695, %v4554_v60  ;;  %v4871_v11 = vpack.c.bf16 %v4802_v1, %v4800_v59  ;;  %v4803_v32 = vsel %vm4483_vm15, %v14940_v36, %v10085_v22 }
 0x6cd   : > { %12093 = vpow2.f32 %v4678_v35  ;;  %v4682_v51 = vmul.f32 1.442695, %v4555_v14  ;;  %v4872_v26 = vpack.c.bf16 %v4803_v32, %v4801_v49  ;;  %vm4489_vm5 = vcmp.gt.f32.partialorder %v14982_v58, 0.0 }
 0x6ce   : > { %v12084_v37 = vpop.eup %12083  ;;  %12095 = vpow2.f32 %v4680_v7  ;;  %vm4491_vm7 = vcmp.gt.f32.partialorder %v14992_v44, 0.0  ;;  %v15030_v48 = vrot.slane %v4844_v17, %v13182_v15 }
 0x6cf   : > { %v12086_v4 = vpop.eup %12085  ;;  %v10086_v6 = vadd.f32 -1.0, %v12084_v37  ;;  %12097 = vpow2.f32 %v4682_v51  ;;  %5210 = vmatprep.mubr.bf16.mxu0 %v4872_v26 }
 0x6d0   : > { %v12088_v10 = vpop.eup %12087  ;;  %v10087_v46 = vadd.f32 -1.0, %v12086_v4  ;;  %5211 = vmatmul.mubr.bf16.gmra.mrb[232].mxu0 %v4871_v11 }
 0x6d1   : > { %v10088_v40 = vadd.f32 -1.0, %v12088_v10  ;;  %v12090_v47 = vpop.eup %12089  ;;  %v4804_v36 = vsel %vm4484_vm0, %v14949_v34, %v10086_v6 }
 0x6d2   : > { %v10089_v29 = vadd.f32 -1.0, %v12090_v47  ;;  %v4805_v24 = vsel %vm4485_vm2, %v14956_v21, %v10087_v46 }
 0x6d3   : > { %v4806_v31 = vsel %vm4486_vm1, %v14960_v19, %v10088_v40 }
 0x6d4   : > { %v4873_v23 = vpack.c.bf16 %v4806_v31, %v4804_v36  ;;  %v4807_v54 = vsel %vm4487_vm3, %v14966_v12, %v10089_v29  ;;  %v11459_v29 = vld [vmem:[%s17617_s3 + $0x40] sm:$0xff]  }
 0x6d5   : > { %v4874_v34 = vpack.c.bf16 %v4807_v54, %v4805_v24  ;;  %10852 = vmatprep.subr.bf16.mxu1 %v11459_v29  ;;  %v11458_v29 = vld [vmem:[%s17615_s7 + $0x24] ss:$8 sps:$4 sm:$0xff]  }
 0x6d6   : > { %v12092_v42 = vpop.eup %12091 }
 0x6d7   : > { %v12094_v45 = vpop.eup %12093  ;;  %v10090_v18 = vadd.f32 -1.0, %v12092_v42  ;;  %5220 = vmatprep.mubr.bf16.mxu0 %v4874_v34 }
 0x6d8   : > { %v12096_v19 = vpop.eup %12095  ;;  %v10091_v0 = vadd.f32 -1.0, %v12094_v45  ;;  %5221 = vmatmul.mubr.bf16.gmra.mrb[236].mxu0 %v4873_v23  ;;  %v11460_v23 = vld [vmem:[%s17617_s3] sm:$0xff]  }
 0x6d9   : > { %v10092_v8 = vadd.f32 -1.0, %v12096_v19  ;;  %v12098_v57 = vpop.eup %12097  ;;  %v4808_v21 = vsel %vm4488_vm4, %v14975_v38, %v10090_v18  ;;  %v15027_v38 = vrot.slane %v4844_v17, %v13179_v13  ;;  %10853 = vmatpush3.bf16.msra.mxu1 %v11460_v23 }
 0x6da   : > { %v10093_v62 = vadd.f32 -1.0, %v12098_v57  ;;  %v4809_v16 = vsel %vm4489_vm5, %v14982_v58, %v10091_v0 }
 0x6db   : > { %v4810_v12 = vsel %vm4490_vm6, %v14986_v27, %v10092_v8 }
 0x6dc   : > { %v4875_v25 = vpack.c.bf16 %v4810_v12, %v4808_v21  ;;  %v4811_v9 = vsel %vm4491_vm7, %v14992_v44, %v10093_v62 }
 0x6dd   : > { %v4876_v52 = vpack.c.bf16 %v4811_v9, %v4809_v16 }
 0x6df   : > { %5230 = vmatprep.mubr.bf16.mxu0 %v4876_v52 }
 0x6e0   : > { %5231 = vmatmul.mubr.bf16.gmra.mrb[240].mxu0 %v4875_v25 }
 0x73b   : > { %v5082_v61 = vpop.f32.mrb[180].mxu0 }
 0x73c   : > { %v5083_v5 = vadd.f32 %v5082_v61, %v15027_v38  ;;  %v5084_v27 = vpop.f32.mrb[181].mxu0  ;;  %v11461_v61 = vld [vmem:[%s17617_s3 + $0x48] sm:$0xff]  }
 0x73d   : > { %v15034_v58 = vadd.f32 %v5084_v27, %v15030_v48  ;;  %v5086_v30 = vpop.f32.mrb[182].mxu0  ;;  %10854 = vmatprep.subr.bf16.mxu1 %v11461_v61 }
 0x73e   : > { %v5305_v43 = vmin.f32 %v5083_v5, 0.0  ;;  %v5087_v39 = vadd.f32 %v5086_v30, %v15027_v38  ;;  %v5088_v50 = vpop.f32.mrb[183].mxu0  ;;  %vm5241_vm8 = vcmp.gt.f32.partialorder %v5083_v5, 0.0 }
 0x73f   : > { %v5306_v63 = vmin.f32 %v15034_v58, 0.0  ;;  %v15039_v60 = vadd.f32 %v5088_v50, %v15030_v48  ;;  %vm5242_vm10 = vcmp.gt.f32.partialorder %v15034_v58, 0.0 }
 0x740   : > { %v5369_v44 = vmul.f32 1.442695, %v5305_v43  ;;  %v5307_v33 = vmin.f32 %v5087_v39, 0.0  ;;  %vm5243_vm9 = vcmp.gt.f32.partialorder %v5087_v39, 0.0 }
 0x741   : > { %v5371_v35 = vmul.f32 1.442695, %v5306_v63  ;;  %v5308_v1 = vmin.f32 %v15039_v60, 0.0  ;;  %vm5244_vm11 = vcmp.gt.f32.partialorder %v15039_v60, 0.0 }
 0x742   : > { %12099 = vpow2.f32 %v5369_v44  ;;  %v5373_v22 = vmul.f32 1.442695, %v5307_v33 }
 0x743   : > { %12101 = vpow2.f32 %v5371_v35  ;;  %v5375_v7 = vmul.f32 1.442695, %v5308_v1  ;;  %v5092_v59 = vpop.f32.mrb[184].mxu0  ;;  %v11450_v35 = vld [vmem:[%s17615_s7] ss:$8 sps:$4 sm:$0xff]  }
 0x744   : > { %12103 = vpow2.f32 %v5373_v22  ;;  %v15043_v3 = vadd.f32 %v5092_v59, %v15027_v38  ;;  %v5094_v14 = vpop.f32.mrb[185].mxu0 }
 0x745   : > { %12105 = vpow2.f32 %v5375_v7  ;;  %v15046_v11 = vadd.f32 %v5094_v14, %v15030_v48  ;;  %v5096_v20 = vpop.f32.mrb[186].mxu0  ;;  %v11455_v14 = vld [vmem:[%s17615_s7 + $0x14] ss:$8 sps:$4 sm:$0xff]  }
 0x746   : > { %v5309_v37 = vmin.f32 %v15043_v3, 0.0  ;;  %v15050_v49 = vadd.f32 %v5096_v20, %v15027_v38  ;;  %v5098_v32 = vpop.f32.mrb[187].mxu0  ;;  %vm5245_vm12 = vcmp.gt.f32.partialorder %v15043_v3, 0.0 }
 0x747   : > { %v5310_v4 = vmin.f32 %v15046_v11, 0.0  ;;  %v15054_v6 = vadd.f32 %v5098_v32, %v15030_v48  ;;  %vm5246_vm13 = vcmp.gt.f32.partialorder %v15046_v11, 0.0 }
 0x748   : > { %v5377_v51 = vmul.f32 1.442695, %v5309_v37  ;;  %v5311_v26 = vmin.f32 %v15050_v49, 0.0  ;;  %vm5247_vm15 = vcmp.gt.f32.partialorder %v15050_v49, 0.0 }
 0x749   : > { %v5379_v10 = vmul.f32 1.442695, %v5310_v4  ;;  %v5312_v53 = vmin.f32 %v15054_v6, 0.0  ;;  %vm5248_vm14 = vcmp.gt.f32.partialorder %v15054_v6, 0.0 }
 0x74a   : > { %12107 = vpow2.f32 %v5377_v51  ;;  %v5381_v40 = vmul.f32 1.442695, %v5311_v26 }
 0x74b   : > { %12109 = vpow2.f32 %v5379_v10  ;;  %v5383_v55 = vmul.f32 1.442695, %v5312_v53  ;;  %v5102_v31 = vpop.f32.mrb[188].mxu0 }
 0x74c   : > { %v12100_v46 = vpop.eup %12099  ;;  %12111 = vpow2.f32 %v5381_v40  ;;  %v15061_v56 = vadd.f32 %v5102_v31, %v15027_v38  ;;  %v5104_v42 = vpop.f32.mrb[189].mxu0 }
 0x74d   : > { %v12102_v47 = vpop.eup %12101  ;;  %v10126_v36 = vadd.f32 -1.0, %v12100_v46  ;;  %12113 = vpow2.f32 %v5383_v55  ;;  %v15064_v45 = vadd.f32 %v5104_v42, %v15030_v48  ;;  %v5106_v18 = vpop.f32.mrb[190].mxu0  ;;  %v11453_v55 = vld [vmem:[%s17615_s7 + $0x10] ss:$8 sps:$4 sm:$0xff]  }
 0x74e   : > { %v12104_v41 = vpop.eup %12103  ;;  %v10127_v34 = vadd.f32 -1.0, %v12102_v47  ;;  %v5313_v8 = vmin.f32 %v15061_v56, 0.0  ;;  %v15068_v0 = vadd.f32 %v5106_v18, %v15027_v38  ;;  %v5108_v57 = vpop.f32.mrb[191].mxu0  ;;  %vm5249_vm0 = vcmp.gt.f32.partialorder %v15061_v56, 0.0 }
 0x74f   : > { %v12106_v24 = vpop.eup %12105  ;;  %v10128_v54 = vadd.f32 -1.0, %v12104_v41  ;;  %v5561_v21 = vsel %vm5241_vm8, %v5083_v5, %v10126_v36  ;;  %v5314_v62 = vmin.f32 %v15064_v45, 0.0  ;;  %v15072_v25 = vadd.f32 %v5108_v57, %v15030_v48  ;;  %v11462_v5 = vld [vmem:[%s17617_s3 + $0x8] sm:$0xff]  }
 0x750   : > { %v10129_v19 = vadd.f32 -1.0, %v12106_v24  ;;  %v5385_v9 = vmul.f32 1.442695, %v5313_v8  ;;  %v5315_v52 = vmin.f32 %v15068_v0, 0.0  ;;  %v5562_v43 = vsel %vm5242_vm10, %v15034_v58, %v10127_v34  ;;  %10855 = vmatpush3.bf16.msra.mxu1 %v11462_v5 }
 0x751   : > { %v5563_v12 = vsel %vm5243_vm9, %v5087_v39, %v10128_v54  ;;  %v5387_v28 = vmul.f32 1.442695, %v5314_v62  ;;  %v5316_v17 = vmin.f32 %v15072_v25, 0.0  ;;  %vm5250_vm1 = vcmp.gt.f32.partialorder %v15064_v45, 0.0 }
 0x752   : > { %v5658_v16 = vpack.c.bf16 %v5563_v12, %v5561_v21  ;;  %12115 = vpow2.f32 %v5385_v9  ;;  %v5389_v30 = vmul.f32 1.442695, %v5315_v52  ;;  %v5564_v39 = vsel %vm5244_vm11, %v15039_v60, %v10129_v19  ;;  %v11456_v19 = vld [vmem:[%s17615_s7 + $0x20] ss:$8 sps:$4 sm:$0xff]  }
 0x753   : > { %12117 = vpow2.f32 %v5387_v28  ;;  %v5391_v63 = vmul.f32 1.442695, %v5316_v17  ;;  %v5112_v44 = vpop.f32.mrb[192].mxu0  ;;  %v5659_v33 = vpack.c.bf16 %v5564_v39, %v5562_v43  ;;  %vm5251_vm2 = vcmp.gt.f32.partialorder %v15068_v0, 0.0 }
 0x754   : > { %v12108_v27 = vpop.eup %12107  ;;  %12119 = vpow2.f32 %v5389_v30  ;;  %v15084_v7 = vadd.f32 %v5112_v44, %v15027_v38  ;;  %v5114_v59 = vpop.f32.mrb[193].mxu0  ;;  %vm5252_vm3 = vcmp.gt.f32.partialorder %v15072_v25, 0.0 }
 0x755   : > { %v12110_v50 = vpop.eup %12109  ;;  %v10130_v58 = vadd.f32 -1.0, %v12108_v27  ;;  %12121 = vpow2.f32 %v5391_v63  ;;  %v15089_v60 = vadd.f32 %v5114_v59, %v15030_v48  ;;  %v5116_v37 = vpop.f32.mrb[194].mxu0  ;;  %5893 = vmatprep.mubr.bf16.mxu0 %v5659_v33 }
 0x756   : > { %v12112_v1 = vpop.eup %12111  ;;  %v10131_v22 = vadd.f32 -1.0, %v12110_v50  ;;  %v5317_v51 = vmin.f32 %v15084_v7, 0.0  ;;  %v15093_v26 = vadd.f32 %v5116_v37, %v15027_v38  ;;  %v5118_v10 = vpop.f32.mrb[195].mxu0  ;;  %5894 = vmatmul.mubr.bf16.vlgmr.msra.gmra.mrb[244].mxu0 %v5658_v16  ;;  %vm5253_vm4 = vcmp.gt.f32.partialorder %v15084_v7, 0.0 }
 0x757   : > { %v12114_v20 = vpop.eup %12113  ;;  %v10132_v32 = vadd.f32 -1.0, %v12112_v1  ;;  %v5318_v53 = vmin.f32 %v15089_v60, 0.0  ;;  %v15099_v40 = vadd.f32 %v5118_v10, %v15030_v48  ;;  %6944 = vmatpush1.bf16.msra.mxu0 %v11450_v35  ;;  %v5565_v54 = vsel %vm5245_vm12, %v15043_v3, %v10130_v58  ;;  %v11463_v35 = vld [vmem:[%s17617_s3 + $0x50] sm:$0xff]  }
 0x758   : > { %v10133_v4 = vadd.f32 -1.0, %v12114_v20  ;;  %v5393_v46 = vmul.f32 1.442695, %v5317_v51  ;;  %v5319_v47 = vmin.f32 %v15093_v26, 0.0  ;;  %v5566_v36 = vsel %vm5246_vm13, %v15046_v11, %v10131_v22  ;;  %6945 = vmatprep.subr.bf16.mxu0 %v11455_v14  ;;  %v11464_v1 = vld [vmem:[%s17617_s3 + $0x10] sm:$0xff]   ;;  %10856 = vmatprep.subr.bf16.mxu1 %v11463_v35 }
 0x759   : > { %v5395_v23 = vmul.f32 1.442695, %v5318_v53  ;;  %v5320_v41 = vmin.f32 %v15099_v40, 0.0  ;;  %v5567_v18 = vsel %vm5247_vm15, %v15050_v49, %v10132_v32  ;;  %10857 = vmatpush3.bf16.msra.mxu1 %v11464_v1  ;;  %vm5254_vm6 = vcmp.gt.f32.partialorder %v15089_v60, 0.0 }
 0x75a   : > { %v5568_v31 = vsel %vm5248_vm14, %v15054_v6, %v10133_v4  ;;  %12123 = vpow2.f32 %v5393_v46  ;;  %v5397_v24 = vmul.f32 1.442695, %v5319_v47  ;;  %v5660_v34 = vpack.c.bf16 %v5567_v18, %v5565_v54 }
 0x75b   : > { %v5661_v42 = vpack.c.bf16 %v5568_v31, %v5566_v36  ;;  %12125 = vpow2.f32 %v5395_v23  ;;  %v5399_v11 = vmul.f32 1.442695, %v5320_v41  ;;  %v5122_v6 = vpop.f32.mrb[196].mxu0  ;;  %6946 = vmatpush1.bf16.msra.mxu0 %v11453_v55  ;;  %vm5255_vm5 = vcmp.gt.f32.partialorder %v15093_v26, 0.0 }
 0x75c   : > { %v12116_v8 = vpop.eup %12115  ;;  %12127 = vpow2.f32 %v5397_v24  ;;  %v15114_v57 = vadd.f32 %v5122_v6, %v15027_v38  ;;  %v5124_v21 = vpop.f32.mrb[197].mxu0  ;;  %6947 = vmatprep.subr.bf16.mxu0 %v11458_v29  ;;  %vm5256_vm7 = vcmp.gt.f32.partialorder %v15099_v40, 0.0 }
 0x75d   : > { %5903 = vmatprep.mubr.bf16.mxu0 %v5661_v42  ;;  %v12118_v12 = vpop.eup %12117  ;;  %12129 = vpow2.f32 %v5399_v11  ;;  %v15118_v3 = vadd.f32 %v5124_v21, %v15030_v48  ;;  %v5126_v49 = vpop.f32.mrb[198].mxu0  ;;  %v10134_v16 = vadd.f32 -1.0, %v12116_v8 }
 0x75e   : > { %v12120_v62 = vpop.eup %12119  ;;  %v10135_v9 = vadd.f32 -1.0, %v12118_v12  ;;  %v5321_v52 = vmin.f32 %v15114_v57, 0.0  ;;  %v15122_v28 = vadd.f32 %v5126_v49, %v15027_v38  ;;  %v5128_v17 = vpop.f32.mrb[199].mxu0  ;;  %5904 = vmatmul.mubr.bf16.gmra.mrb[248].mxu0 %v5660_v34  ;;  %vm5257_vm8 = vcmp.gt.f32.partialorder %v15114_v57, 0.0 }
 0x75f   : > { %v12122_v61 = vpop.eup %12121  ;;  %v10136_v5 = vadd.f32 -1.0, %v12120_v62  ;;  %v5322_v27 = vmin.f32 %v15118_v3, 0.0  ;;  %v15127_v30 = vadd.f32 %v5128_v17, %v15030_v48  ;;  %6948 = vmatpush1.bf16.msra.mxu0 %v11456_v19  ;;  %v5569_v14 = vsel %vm5249_vm0, %v15061_v56, %v10134_v16 }
 0x760   : > { %v10137_v43 = vadd.f32 -1.0, %v12122_v61  ;;  %v5401_v39 = vmul.f32 1.442695, %v5321_v52  ;;  %v5323_v50 = vmin.f32 %v15122_v28, 0.0  ;;  %v5570_v33 = vsel %vm5250_vm1, %v15064_v45, %v10135_v9 }
 0x761   : > { %v5403_v63 = vmul.f32 1.442695, %v5322_v27  ;;  %v5324_v44 = vmin.f32 %v15127_v30, 0.0  ;;  %v5571_v32 = vsel %vm5251_vm2, %v15068_v0, %v10136_v5  ;;  %vm5258_vm9 = vcmp.gt.f32.partialorder %v15118_v3, 0.0 }
 0x762   : > { %12131 = vpow2.f32 %v5401_v39  ;;  %v5405_v22 = vmul.f32 1.442695, %v5323_v50  ;;  %v5572_v59 = vsel %vm5252_vm3, %v15072_v25, %v10137_v43  ;;  %v5662_v25 = vpack.c.bf16 %v5571_v32, %v5569_v14  ;;  %v11466_v32 = vld [vmem:[%s17617_s3 + $0x18] sm:$0xff]  }
 0x763   : > { %12133 = vpow2.f32 %v5403_v63  ;;  %v5407_v20 = vmul.f32 1.442695, %v5324_v44  ;;  %v5132_v58 = vpop.f32.mrb[200].mxu0  ;;  %v5663_v37 = vpack.c.bf16 %v5572_v59, %v5570_v33  ;;  %vm5259_vm10 = vcmp.gt.f32.partialorder %v15122_v28, 0.0 }
 0x764   : > { %v12124_v45 = vpop.eup %12123  ;;  %12135 = vpow2.f32 %v5405_v22  ;;  %v15144_v4 = vadd.f32 %v5132_v58, %v15027_v38  ;;  %v5134_v51 = vpop.f32.mrb[201].mxu0  ;;  %vm5260_vm11 = vcmp.gt.f32.partialorder %v15127_v30, 0.0 }
 0x765   : > { %v12126_v10 = vpop.eup %12125  ;;  %v10138_v56 = vadd.f32 -1.0, %v12124_v45  ;;  %12137 = vpow2.f32 %v5407_v20  ;;  %v15148_v53 = vadd.f32 %v5134_v51, %v15030_v48  ;;  %v5136_v55 = vpop.f32.mrb[202].mxu0  ;;  %5913 = vmatprep.mubr.bf16.mxu0 %v5663_v37  ;;  %v11465_v37 = vld [vmem:[%s17617_s3 + $0x58] sm:$0xff]  }
 0x766   : > { %v12128_v0 = vpop.eup %12127  ;;  %v10139_v46 = vadd.f32 -1.0, %v12126_v10  ;;  %v5325_v47 = vmin.f32 %v15144_v4, 0.0  ;;  %v15153_v36 = vadd.f32 %v5136_v55, %v15027_v38  ;;  %v5138_v31 = vpop.f32.mrb[203].mxu0  ;;  %5914 = vmatmul.mubr.bf16.gmra.mrb[252].mxu0 %v5662_v25  ;;  %10858 = vmatprep.subr.bf16.mxu1 %v11465_v37  ;;  %vm5261_vm12 = vcmp.gt.f32.partialorder %v15144_v4, 0.0 }
 0x767   : > { %v12130_v29 = vpop.eup %12129  ;;  %v10140_v23 = vadd.f32 -1.0, %v12128_v0  ;;  %v5326_v41 = vmin.f32 %v15148_v53, 0.0  ;;  %v5573_v42 = vsel %vm5253_vm4, %v15084_v7, %v10138_v56  ;;  %v15164_v34 = vadd.f32 %v5138_v31, %v15030_v48  ;;  %10859 = vmatpush3.bf16.msra.mxu1 %v11466_v32 }
 0x768   : > { %v10141_v24 = vadd.f32 -1.0, %v12130_v29  ;;  %v5409_v54 = vmul.f32 1.442695, %v5325_v47  ;;  %v5327_v18 = vmin.f32 %v15153_v36, 0.0  ;;  %v5574_v19 = vsel %vm5254_vm6, %v15089_v60, %v10139_v46 }
 0x769   : > { %v5575_v11 = vsel %vm5255_vm5, %v15093_v26, %v10140_v23  ;;  %v5411_v6 = vmul.f32 1.442695, %v5326_v41  ;;  %v5328_v7 = vmin.f32 %v15164_v34, 0.0  ;;  %vm5263_vm13 = vcmp.gt.f32.partialorder %v15153_v36, 0.0 }
 0x76a   : > { %v5664_v8 = vpack.c.bf16 %v5575_v11, %v5573_v42  ;;  %12139 = vpow2.f32 %v5409_v54  ;;  %v5413_v21 = vmul.f32 1.442695, %v5327_v18  ;;  %v5576_v12 = vsel %vm5256_vm7, %v15099_v40, %v10141_v24 }
 0x76b   : > { %12141 = vpow2.f32 %v5411_v6  ;;  %v5142_v49 = vpop.f32.mrb[204].mxu0  ;;  %v5665_v62 = vpack.c.bf16 %v5576_v12, %v5574_v19  ;;  %v5415_v17 = vmul.f32 1.442695, %v5328_v7  ;;  %vm5262_vm14 = vcmp.gt.f32.partialorder %v15148_v53, 0.0 }
 0x76c   : > { %v12132_v16 = vpop.eup %12131  ;;  %12143 = vpow2.f32 %v5413_v21  ;;  %v15172_v26 = vadd.f32 %v5142_v49, %v15027_v38  ;;  %v5144_v9 = vpop.f32.mrb[205].mxu0  ;;  %vm5264_vm15 = vcmp.gt.f32.partialorder %v15164_v34, 0.0 }
 0x76d   : > { %v12134_v52 = vpop.eup %12133  ;;  %v10142_v60 = vadd.f32 -1.0, %v12132_v16  ;;  %v15176_v61 = vadd.f32 %v5144_v9, %v15030_v48  ;;  %v5146_v40 = vpop.f32.mrb[206].mxu0  ;;  %5923 = vmatprep.mubr.bf16.mxu0 %v5665_v62  ;;  %12145 = vpow2.f32 %v5415_v17 }
 0x76e   : > { %v12136_v5 = vpop.eup %12135  ;;  %v10143_v27 = vadd.f32 -1.0, %v12134_v52  ;;  %v5329_v43 = vmin.f32 %v15172_v26, 0.0  ;;  %v15181_v39 = vadd.f32 %v5146_v40, %v15027_v38  ;;  %v5148_v50 = vpop.f32.mrb[207].mxu0  ;;  %5924 = vmatmul.mubr.bf16.gmra.mrb[0].mxu0 %v5664_v8  ;;  %vm5265_vm0 = vcmp.gt.f32.partialorder %v15172_v26, 0.0 }
 0x76f   : > { %v12138_v63 = vpop.eup %12137  ;;  %v10144_v44 = vadd.f32 -1.0, %v12136_v5  ;;  %v5577_v33 = vsel %vm5257_vm8, %v15114_v57, %v10142_v60  ;;  %v5330_v22 = vmin.f32 %v15176_v61, 0.0  ;;  %v15192_v20 = vadd.f32 %v5148_v50, %v15030_v48 }
 0x770   : > { %v10145_v35 = vadd.f32 -1.0, %v12138_v63  ;;  %v5417_v1 = vmul.f32 1.442695, %v5329_v43  ;;  %v5331_v14 = vmin.f32 %v15181_v39, 0.0  ;;  %v5578_v58 = vsel %vm5258_vm9, %v15118_v3, %v10143_v27 }
 0x771   : > { %v5579_v59 = vsel %vm5259_vm10, %v15122_v28, %v10144_v44  ;;  %v5419_v57 = vmul.f32 1.442695, %v5330_v22  ;;  %v5332_v10 = vmin.f32 %v15192_v20, 0.0  ;;  %vm5266_vm1 = vcmp.gt.f32.partialorder %v15176_v61, 0.0 }
 0x772   : > { %v5666_v45 = vpack.c.bf16 %v5579_v59, %v5577_v33  ;;  %12147 = vpow2.f32 %v5417_v1  ;;  %v5580_v51 = vsel %vm5260_vm11, %v15127_v30, %v10145_v35  ;;  %v5421_v25 = vmul.f32 1.442695, %v5331_v14 }
 0x773   : > { %v5152_v28 = vpop.f32.mrb[208].mxu0  ;;  %v5667_v56 = vpack.c.bf16 %v5580_v51, %v5578_v58  ;;  %12149 = vpow2.f32 %v5419_v57  ;;  %v5423_v31 = vmul.f32 1.442695, %v5332_v10  ;;  %vm5267_vm2 = vcmp.gt.f32.partialorder %v15181_v39, 0.0  ;;  %v11467_v51 = vld [vmem:[%s17617_s3 + $0x60] sm:$0xff]  }
 0x774   : > { %v12140_v55 = vpop.eup %12139  ;;  %v15202_v0 = vadd.f32 %v5152_v28, %v15027_v38  ;;  %v5154_v46 = vpop.f32.mrb[209].mxu0  ;;  %12151 = vpow2.f32 %v5421_v25  ;;  %v11468_v25 = vld [vmem:[%s17617_s3 + $0x20] sm:$0xff]   ;;  %vm5268_vm3 = vcmp.gt.f32.partialorder %v15192_v20, 0.0  ;;  %10860 = vmatprep.subr.bf16.mxu1 %v11467_v51 }
 0x775   : > { %v12142_v3 = vpop.eup %12141  ;;  %v10146_v47 = vadd.f32 -1.0, %v12140_v55  ;;  %v15205_v29 = vadd.f32 %v5154_v46, %v15030_v48  ;;  %v5156_v30 = vpop.f32.mrb[210].mxu0  ;;  %5933 = vmatprep.mubr.bf16.mxu0 %v5667_v56  ;;  %12153 = vpow2.f32 %v5423_v31  ;;  %10861 = vmatpush3.bf16.msra.mxu1 %v11468_v25 }
 0x776   : > { %v12144_v23 = vpop.eup %12143  ;;  %v5333_v41 = vmin.f32 %v15202_v0, 0.0  ;;  %v15209_v42 = vadd.f32 %v5156_v30, %v15027_v38  ;;  %v5158_v24 = vpop.f32.mrb[211].mxu0  ;;  %5934 = vmatmul.mubr.bf16.gmra.mrb[4].mxu0 %v5666_v45  ;;  %v10147_v18 = vadd.f32 -1.0, %v12142_v3  ;;  %vm5269_vm4 = vcmp.gt.f32.partialorder %v15202_v0, 0.0 }
 0x777   : > { %v10148_v54 = vadd.f32 -1.0, %v12144_v23  ;;  %v5334_v6 = vmin.f32 %v15205_v29, 0.0  ;;  %v12146_v8 = vpop.eup %12145  ;;  %v5581_v21 = vsel %vm5261_vm12, %v15144_v4, %v10146_v47  ;;  %v15218_v7 = vadd.f32 %v5158_v24, %v15030_v48 }
 0x778   : > { %v5425_v11 = vmul.f32 1.442695, %v5333_v41  ;;  %v5335_v19 = vmin.f32 %v15209_v42, 0.0  ;;  %v10149_v62 = vadd.f32 -1.0, %v12146_v8  ;;  %v5582_v40 = vsel %vm5262_vm14, %v15148_v53, %v10147_v18 }
 0x779   : > { %v5583_v12 = vsel %vm5263_vm13, %v15153_v36, %v10148_v54  ;;  %v5427_v16 = vmul.f32 1.442695, %v5334_v6  ;;  %v5336_v52 = vmin.f32 %v15218_v7, 0.0  ;;  %vm5270_vm6 = vcmp.gt.f32.partialorder %v15205_v29, 0.0 }
 0x77a   : > { %v5668_v49 = vpack.c.bf16 %v5583_v12, %v5581_v21  ;;  %12155 = vpow2.f32 %v5425_v11  ;;  %v5429_v9 = vmul.f32 1.442695, %v5335_v19  ;;  %v5584_v5 = vsel %vm5264_vm15, %v15164_v34, %v10149_v62 }
 0x77b   : > { %v5162_v60 = vpop.f32.mrb[212].mxu0  ;;  %12157 = vpow2.f32 %v5427_v16  ;;  %v5431_v43 = vmul.f32 1.442695, %v5336_v52  ;;  %v5669_v1 = vpack.c.bf16 %v5584_v5, %v5582_v40  ;;  %vm5271_vm5 = vcmp.gt.f32.partialorder %v15209_v42, 0.0 }
 0x77c   : > { %v12148_v17 = vpop.eup %12147  ;;  %v15224_v4 = vadd.f32 %v5162_v60, %v15027_v38  ;;  %v5164_v36 = vpop.f32.mrb[213].mxu0  ;;  %12159 = vpow2.f32 %v5429_v9  ;;  %vm5272_vm7 = vcmp.gt.f32.partialorder %v15218_v7, 0.0 }
 0x77d   : > { %v10150_v27 = vadd.f32 -1.0, %v12148_v17  ;;  %v15229_v50 = vadd.f32 %v5164_v36, %v15030_v48  ;;  %v5166_v63 = vpop.f32.mrb[214].mxu0  ;;  %v12150_v44 = vpop.eup %12149  ;;  %12161 = vpow2.f32 %v5431_v43  ;;  %5943 = vmatprep.mubr.bf16.mxu0 %v5669_v1 }
 0x77e   : > { %v5337_v33 = vmin.f32 %v15224_v4, 0.0  ;;  %v15233_v35 = vadd.f32 %v5166_v63, %v15027_v38  ;;  %v5168_v22 = vpop.f32.mrb[215].mxu0  ;;  %v12152_v59 = vpop.eup %12151  ;;  %v10151_v53 = vadd.f32 -1.0, %v12150_v44  ;;  %5944 = vmatmul.mubr.bf16.gmra.mrb[8].mxu0 %v5668_v49  ;;  %vm5273_vm8 = vcmp.gt.f32.partialorder %v15224_v4, 0.0 }
 0x77f   : > { %v10152_v34 = vadd.f32 -1.0, %v12152_v59  ;;  %v5338_v58 = vmin.f32 %v15229_v50, 0.0  ;;  %v12154_v37 = vpop.eup %12153  ;;  %v5585_v32 = vsel %vm5265_vm0, %v15172_v26, %v10150_v27  ;;  %v15242_v57 = vadd.f32 %v5168_v22, %v15030_v48 }
 0x780   : > { %v5433_v14 = vmul.f32 1.442695, %v5337_v33  ;;  %v5339_v45 = vmin.f32 %v15233_v35, 0.0  ;;  %v10153_v28 = vadd.f32 -1.0, %v12154_v37  ;;  %vm5274_vm9 = vcmp.gt.f32.partialorder %v15229_v50, 0.0 }
 0x781   : > { %v5587_v10 = vsel %vm5267_vm2, %v15181_v39, %v10152_v34  ;;  %v5435_v56 = vmul.f32 1.442695, %v5338_v58  ;;  %v5340_v26 = vmin.f32 %v15242_v57, 0.0  ;;  %v5586_v39 = vsel %vm5266_vm1, %v15176_v61, %v10151_v53 }
 0x782   : > { %12163 = vpow2.f32 %v5433_v14  ;;  %v5670_v55 = vpack.c.bf16 %v5587_v10, %v5585_v32  ;;  %v5437_v46 = vmul.f32 1.442695, %v5339_v45  ;;  %v5588_v23 = vsel %vm5268_vm3, %v15192_v20, %v10153_v28 }
 0x783   : > { %v5172_v3 = vpop.f32.mrb[216].mxu0  ;;  %12165 = vpow2.f32 %v5435_v56  ;;  %v5439_v24 = vmul.f32 1.442695, %v5340_v26  ;;  %v5671_v8 = vpack.c.bf16 %v5588_v23, %v5586_v39  ;;  %vm5275_vm10 = vcmp.gt.f32.partialorder %v15233_v35, 0.0  ;;  %v11469_v26 = vld [vmem:[%s17617_s3 + $0x68] sm:$0xff]  }
 0x784   : > { %v12156_v47 = vpop.eup %12155  ;;  %v15250_v31 = vadd.f32 %v5172_v3, %v15027_v38  ;;  %v5174_v30 = vpop.f32.mrb[217].mxu0  ;;  %12167 = vpow2.f32 %v5437_v46  ;;  %v11470_v3 = vld [vmem:[%s17617_s3 + $0x28] sm:$0xff]   ;;  %vm5276_vm11 = vcmp.gt.f32.partialorder %v15242_v57, 0.0  ;;  %10862 = vmatprep.subr.bf16.mxu1 %v11469_v26 }
 0x785   : > { %v10154_v41 = vadd.f32 -1.0, %v12156_v47  ;;  %v15257_v54 = vadd.f32 %v5174_v30, %v15030_v48  ;;  %v5176_v18 = vpop.f32.mrb[218].mxu0  ;;  %v12158_v11 = vpop.eup %12157  ;;  %12169 = vpow2.f32 %v5439_v24  ;;  %5953 = vmatprep.mubr.bf16.mxu0 %v5671_v8  ;;  %10863 = vmatpush3.bf16.msra.mxu1 %v11470_v3 }
 0x786   : > { %v5341_v6 = vmin.f32 %v15250_v31, 0.0  ;;  %v15261_v19 = vadd.f32 %v5176_v18, %v15027_v38  ;;  %v5178_v21 = vpop.f32.mrb[219].mxu0  ;;  %v12160_v12 = vpop.eup %12159  ;;  %v10155_v61 = vadd.f32 -1.0, %v12158_v11  ;;  %5954 = vmatmul.mubr.bf16.gmra.mrb[12].mxu0 %v5670_v55  ;;  %vm5277_vm12 = vcmp.gt.f32.partialorder %v15250_v31, 0.0 }
 0x787   : > { %v10156_v20 = vadd.f32 -1.0, %v12160_v12  ;;  %v5342_v62 = vmin.f32 %v15257_v54, 0.0  ;;  %v12162_v16 = vpop.eup %12161  ;;  %v5589_v9 = vsel %vm5269_vm4, %v15202_v0, %v10154_v41  ;;  %v15270_v60 = vadd.f32 %v5178_v21, %v15030_v48 }
 0x788   : > { %v5441_v49 = vmul.f32 1.442695, %v5341_v6  ;;  %v5343_v52 = vmin.f32 %v15261_v19, 0.0  ;;  %v10157_v36 = vadd.f32 -1.0, %v12162_v16  ;;  %vm5278_vm13 = vcmp.gt.f32.partialorder %v15257_v54, 0.0 }
 0x789   : > { %v5591_v17 = vsel %vm5271_vm5, %v15209_v42, %v10156_v20  ;;  %v5443_v40 = vmul.f32 1.442695, %v5342_v62  ;;  %v5344_v43 = vmin.f32 %v15270_v60, 0.0  ;;  %v5590_v42 = vsel %vm5270_vm6, %v15205_v29, %v10155_v61 }
 0x78a   : > { %12171 = vpow2.f32 %v5441_v49  ;;  %v5672_v5 = vpack.c.bf16 %v5591_v17, %v5589_v9  ;;  %v5445_v27 = vmul.f32 1.442695, %v5343_v52  ;;  %v5592_v1 = vsel %vm5272_vm7, %v15218_v7, %v10157_v36 }
 0x78b   : > { %v5182_v0 = vpop.f32.mrb[220].mxu0  ;;  %12173 = vpow2.f32 %v5443_v40  ;;  %v5447_v59 = vmul.f32 1.442695, %v5344_v43  ;;  %v5673_v32 = vpack.c.bf16 %v5592_v1, %v5590_v42  ;;  %vm5279_vm14 = vcmp.gt.f32.partialorder %v15261_v19, 0.0 }
 0x78c   : > { %v12164_v63 = vpop.eup %12163  ;;  %v15276_v44 = vadd.f32 %v5182_v0, %v15027_v38  ;;  %v5184_v33 = vpop.f32.mrb[221].mxu0  ;;  %12175 = vpow2.f32 %v5445_v27  ;;  %vm5280_vm15 = vcmp.gt.f32.partialorder %v15270_v60, 0.0 }
 0x78d   : > { %v10158_v22 = vadd.f32 -1.0, %v12164_v63  ;;  %v15283_v53 = vadd.f32 %v5184_v33, %v15030_v48  ;;  %v5186_v34 = vpop.f32.mrb[222].mxu0  ;;  %v12166_v14 = vpop.eup %12165  ;;  %12177 = vpow2.f32 %v5447_v59  ;;  %5963 = vmatprep.mubr.bf16.mxu0 %v5673_v32 }
 0x78e   : > { %v5345_v58 = vmin.f32 %v15276_v44, 0.0  ;;  %v15287_v37 = vadd.f32 %v5186_v34, %v15027_v38  ;;  %v5188_v45 = vpop.f32.mrb[223].mxu0  ;;  %v12168_v51 = vpop.eup %12167  ;;  %v10159_v29 = vadd.f32 -1.0, %v12166_v14  ;;  %5964 = vmatmul.mubr.bf16.gmra.mrb[16].mxu0 %v5672_v5  ;;  %vm5281_vm0 = vcmp.gt.f32.partialorder %v15276_v44, 0.0 }
 0x78f   : > { %v10160_v7 = vadd.f32 -1.0, %v12168_v51  ;;  %v5346_v10 = vmin.f32 %v15283_v53, 0.0  ;;  %v12170_v28 = vpop.eup %12169  ;;  %v5593_v56 = vsel %vm5273_vm8, %v15224_v4, %v10158_v22  ;;  %v15296_v46 = vadd.f32 %v5188_v45, %v15030_v48 }
 0x790   : > { %v5449_v25 = vmul.f32 1.442695, %v5345_v58  ;;  %v5347_v55 = vmin.f32 %v15287_v37, 0.0  ;;  %v10161_v30 = vadd.f32 -1.0, %v12170_v28  ;;  %vm5282_vm1 = vcmp.gt.f32.partialorder %v15283_v53, 0.0 }
 0x791   : > { %v5595_v47 = vsel %vm5275_vm10, %v15233_v35, %v10160_v7  ;;  %v5451_v39 = vmul.f32 1.442695, %v5346_v10  ;;  %v5348_v4 = vmin.f32 %v15296_v46, 0.0  ;;  %v5594_v35 = vsel %vm5274_vm9, %v15229_v50, %v10159_v29 }
 0x792   : > { %12179 = vpow2.f32 %v5449_v25  ;;  %v5674_v23 = vpack.c.bf16 %v5595_v47, %v5593_v56  ;;  %v5453_v41 = vmul.f32 1.442695, %v5347_v55  ;;  %v5596_v8 = vsel %vm5276_vm11, %v15242_v57, %v10161_v30 }
 0x793   : > { %v5192_v24 = vpop.f32.mrb[224].mxu0  ;;  %12181 = vpow2.f32 %v5451_v39  ;;  %v5455_v12 = vmul.f32 1.442695, %v5348_v4  ;;  %v5675_v9 = vpack.c.bf16 %v5596_v8, %v5594_v35  ;;  %vm5283_vm2 = vcmp.gt.f32.partialorder %v15287_v37, 0.0  ;;  %v11471_v4 = vld [vmem:[%s17617_s3 + $0x70] sm:$0xff]  }
 0x794   : > { %v12172_v18 = vpop.eup %12171  ;;  %v15304_v11 = vadd.f32 %v5192_v24, %v15027_v38  ;;  %v5194_v6 = vpop.f32.mrb[225].mxu0  ;;  %12183 = vpow2.f32 %v5453_v41  ;;  %v11472_v24 = vld [vmem:[%s17617_s3 + $0x30] sm:$0xff]   ;;  %vm5284_vm3 = vcmp.gt.f32.partialorder %v15296_v46, 0.0  ;;  %10864 = vmatprep.subr.bf16.mxu1 %v11471_v4 }
 0x795   : > { %v10162_v21 = vadd.f32 -1.0, %v12172_v18  ;;  %v15311_v61 = vadd.f32 %v5194_v6, %v15030_v48  ;;  %v5196_v20 = vpop.f32.mrb[226].mxu0  ;;  %v12174_v49 = vpop.eup %12173  ;;  %12185 = vpow2.f32 %v5455_v12  ;;  %5973 = vmatprep.mubr.bf16.mxu0 %v5675_v9  ;;  %10865 = vmatpush3.bf16.msra.mxu1 %v11472_v24 }
 0x796   : > { %v5349_v62 = vmin.f32 %v15304_v11, 0.0  ;;  %v15315_v16 = vadd.f32 %v5196_v20, %v15027_v38  ;;  %v5198_v52 = vpop.f32.mrb[227].mxu0  ;;  %v12176_v17 = vpop.eup %12175  ;;  %v10163_v50 = vadd.f32 -1.0, %v12174_v49  ;;  %5974 = vmatmul.mubr.bf16.gmra.mrb[20].mxu0 %v5674_v23  ;;  %vm5285_vm4 = vcmp.gt.f32.partialorder %v15304_v11, 0.0 }
 0x797   : > { %v10164_v57 = vadd.f32 -1.0, %v12176_v17  ;;  %v5350_v40 = vmin.f32 %v15311_v61, 0.0  ;;  %v12178_v5 = vpop.eup %12177  ;;  %v5597_v27 = vsel %vm5277_vm12, %v15250_v31, %v10162_v21  ;;  %v15324_v0 = vadd.f32 %v5198_v52, %v15030_v48 }
 0x798   : > { %v5457_v36 = vmul.f32 1.442695, %v5349_v62  ;;  %v5351_v43 = vmin.f32 %v15315_v16, 0.0  ;;  %v10165_v33 = vadd.f32 -1.0, %v12178_v5  ;;  %vm5286_vm6 = vcmp.gt.f32.partialorder %v15311_v61, 0.0 }
 0x799   : > { %v5599_v63 = vsel %vm5279_vm14, %v15261_v19, %v10164_v57  ;;  %v5459_v42 = vmul.f32 1.442695, %v5350_v40  ;;  %v5352_v59 = vmin.f32 %v15324_v0, 0.0  ;;  %v5598_v19 = vsel %vm5278_vm13, %v15257_v54, %v10163_v50 }
 0x79a   : > { %12187 = vpow2.f32 %v5457_v36  ;;  %v5676_v1 = vpack.c.bf16 %v5599_v63, %v5597_v27  ;;  %v5461_v22 = vmul.f32 1.442695, %v5351_v43  ;;  %v5600_v32 = vsel %vm5280_vm15, %v15270_v60, %v10165_v33 }
 0x79b   : > { %v5202_v31 = vpop.f32.mrb[228].mxu0  ;;  %12189 = vpow2.f32 %v5459_v42  ;;  %v5463_v51 = vmul.f32 1.442695, %v5352_v59  ;;  %v5677_v56 = vpack.c.bf16 %v5600_v32, %v5598_v19  ;;  %vm5287_vm5 = vcmp.gt.f32.partialorder %v15315_v16, 0.0 }
 0x79c   : > { %v12180_v34 = vpop.eup %12179  ;;  %v15330_v14 = vadd.f32 %v5202_v31, %v15027_v38  ;;  %v5204_v58 = vpop.f32.mrb[229].mxu0  ;;  %12191 = vpow2.f32 %v5461_v22  ;;  %vm5288_vm7 = vcmp.gt.f32.partialorder %v15324_v0, 0.0 }
 0x79d   : > { %v10166_v45 = vadd.f32 -1.0, %v12180_v34  ;;  %v15337_v29 = vadd.f32 %v5204_v58, %v15030_v48  ;;  %v5206_v7 = vpop.f32.mrb[230].mxu0  ;;  %v12182_v25 = vpop.eup %12181  ;;  %12193 = vpow2.f32 %v5463_v51  ;;  %5983 = vmatprep.mubr.bf16.mxu0 %v5677_v56 }
 0x79e   : > { %v5353_v10 = vmin.f32 %v15330_v14, 0.0  ;;  %v15341_v28 = vadd.f32 %v5206_v7, %v15027_v38  ;;  %v5208_v55 = vpop.f32.mrb[231].mxu0  ;;  %v12184_v26 = vpop.eup %12183  ;;  %v10167_v54 = vadd.f32 -1.0, %v12182_v25  ;;  %5984 = vmatmul.mubr.bf16.gmra.mrb[24].mxu0 %v5676_v1  ;;  %vm5289_vm8 = vcmp.gt.f32.partialorder %v15330_v14, 0.0 }
 0x79f   : > { %v10168_v60 = vadd.f32 -1.0, %v12184_v26  ;;  %v5354_v47 = vmin.f32 %v15337_v29, 0.0  ;;  %v12186_v30 = vpop.eup %12185  ;;  %v5601_v39 = vsel %vm5281_vm0, %v15276_v44, %v10166_v45  ;;  %v15350_v41 = vadd.f32 %v5208_v55, %v15030_v48 }
 0x7a0   : > { %v5465_v3 = vmul.f32 1.442695, %v5353_v10  ;;  %v5355_v23 = vmin.f32 %v15341_v28, 0.0  ;;  %v10169_v6 = vadd.f32 -1.0, %v12186_v30  ;;  %vm5290_vm9 = vcmp.gt.f32.partialorder %v15337_v29, 0.0 }
 0x7a1   : > { %v5603_v18 = vsel %vm5283_vm2, %v15287_v37, %v10168_v60  ;;  %v5467_v35 = vmul.f32 1.442695, %v5354_v47  ;;  %v5356_v44 = vmin.f32 %v15350_v41, 0.0  ;;  %v5602_v37 = vsel %vm5282_vm1, %v15283_v53, %v10167_v54 }
 0x7a2   : > { %12195 = vpow2.f32 %v5465_v3  ;;  %v5678_v8 = vpack.c.bf16 %v5603_v18, %v5601_v39  ;;  %v5469_v21 = vmul.f32 1.442695, %v5355_v23  ;;  %v5604_v9 = vsel %vm5284_vm3, %v15296_v46, %v10169_v6 }
 0x7a3   : > { %v5212_v12 = vpop.f32.mrb[232].mxu0  ;;  %12197 = vpow2.f32 %v5467_v35  ;;  %v5471_v17 = vmul.f32 1.442695, %v5356_v44  ;;  %v5679_v27 = vpack.c.bf16 %v5604_v9, %v5602_v37  ;;  %vm5291_vm10 = vcmp.gt.f32.partialorder %v15341_v28, 0.0 }
 0x7a4   : > { %v12188_v20 = vpop.eup %12187  ;;  %v15358_v49 = vadd.f32 %v5212_v12, %v15027_v38  ;;  %v5214_v62 = vpop.f32.mrb[233].mxu0  ;;  %12199 = vpow2.f32 %v5469_v21  ;;  %vm5292_vm11 = vcmp.gt.f32.partialorder %v15350_v41, 0.0 }
 0x7a5   : > { %v10170_v52 = vadd.f32 -1.0, %v12188_v20  ;;  %v15365_v50 = vadd.f32 %v5214_v62, %v15030_v48  ;;  %v5216_v57 = vpop.f32.mrb[234].mxu0  ;;  %v12190_v36 = vpop.eup %12189  ;;  %12201 = vpow2.f32 %v5471_v17  ;;  %5993 = vmatprep.mubr.bf16.mxu0 %v5679_v27 }
 0x7a6   : > { %v5357_v40 = vmin.f32 %v15358_v49, 0.0  ;;  %v15369_v5 = vadd.f32 %v5216_v57, %v15027_v38  ;;  %v5218_v43 = vpop.f32.mrb[235].mxu0  ;;  %v12192_v63 = vpop.eup %12191  ;;  %v10171_v53 = vadd.f32 -1.0, %v12190_v36  ;;  %5994 = vmatmul.mubr.bf16.gmra.mrb[28].mxu0 %v5678_v8  ;;  %vm5293_vm12 = vcmp.gt.f32.partialorder %v15358_v49, 0.0 }
 0x7a7   : > { %v10172_v46 = vadd.f32 -1.0, %v12192_v63  ;;  %v5358_v42 = vmin.f32 %v15365_v50, 0.0  ;;  %v12194_v1 = vpop.eup %12193  ;;  %v5605_v22 = vsel %vm5285_vm4, %v15304_v11, %v10170_v52  ;;  %v15378_v31 = vadd.f32 %v5218_v43, %v15030_v48 }
 0x7a8   : > { %v5473_v33 = vmul.f32 1.442695, %v5357_v40  ;;  %v5359_v59 = vmin.f32 %v15369_v5, 0.0  ;;  %v10173_v58 = vadd.f32 -1.0, %v12194_v1  ;;  %vm5294_vm13 = vcmp.gt.f32.partialorder %v15365_v50, 0.0 }
 0x7a9   : > { %v5607_v34 = vsel %vm5287_vm5, %v15315_v16, %v10172_v46  ;;  %v5475_v19 = vmul.f32 1.442695, %v5358_v42  ;;  %v5360_v51 = vmin.f32 %v15378_v31, 0.0  ;;  %v5606_v16 = vsel %vm5286_vm6, %v15311_v61, %v10171_v53 }
 0x7aa   : > { %12203 = vpow2.f32 %v5473_v33  ;;  %v5680_v32 = vpack.c.bf16 %v5607_v34, %v5605_v22  ;;  %v5477_v45 = vmul.f32 1.442695, %v5359_v59  ;;  %v5608_v56 = vsel %vm5288_vm7, %v15324_v0, %v10173_v58 }
 0x7ab   : > { %v5222_v11 = vpop.f32.mrb[236].mxu0  ;;  %12205 = vpow2.f32 %v5475_v19  ;;  %v5479_v26 = vmul.f32 1.442695, %v5360_v51  ;;  %v5681_v39 = vpack.c.bf16 %v5608_v56, %v5606_v16  ;;  %vm5295_vm14 = vcmp.gt.f32.partialorder %v15369_v5, 0.0 }
 0x7ac   : > { %v12196_v7 = vpop.eup %12195  ;;  %v15384_v25 = vadd.f32 %v5222_v11, %v15027_v38  ;;  %v5224_v10 = vpop.f32.mrb[237].mxu0  ;;  %12207 = vpow2.f32 %v5477_v45  ;;  %vm5296_vm15 = vcmp.gt.f32.partialorder %v15378_v31, 0.0 }
 0x7ad   : > { %v10174_v55 = vadd.f32 -1.0, %v12196_v7  ;;  %v15391_v54 = vadd.f32 %v5224_v10, %v15030_v48  ;;  %v5226_v60 = vpop.f32.mrb[238].mxu0  ;;  %v12198_v3 = vpop.eup %12197  ;;  %12209 = vpow2.f32 %v5479_v26  ;;  %6003 = vmatprep.mubr.bf16.mxu0 %v5681_v39 }
 0x7ae   : > { %v5361_v47 = vmin.f32 %v15384_v25, 0.0  ;;  %v15395_v30 = vadd.f32 %v5226_v60, %v15027_v38  ;;  %v5228_v23 = vpop.f32.mrb[239].mxu0  ;;  %v12200_v4 = vpop.eup %12199  ;;  %v10175_v61 = vadd.f32 -1.0, %v12198_v3  ;;  %6004 = vmatmul.mubr.bf16.gmra.mrb[32].mxu0 %v5680_v32  ;;  %vm5297_vm0 = vcmp.gt.f32.partialorder %v15384_v25, 0.0 }
 0x7af   : > { %v10176_v0 = vadd.f32 -1.0, %v12200_v4  ;;  %v5362_v18 = vmin.f32 %v15391_v54, 0.0  ;;  %v12202_v6 = vpop.eup %12201  ;;  %v5609_v35 = vsel %vm5289_vm8, %v15330_v14, %v10174_v55  ;;  %v15404_v21 = vadd.f32 %v5228_v23, %v15030_v48 }
 0x7b0   : > { %v5481_v24 = vmul.f32 1.442695, %v5361_v47  ;;  %v5363_v8 = vmin.f32 %v15395_v30, 0.0  ;;  %v10177_v12 = vadd.f32 -1.0, %v12202_v6  ;;  %vm5299_vm1 = vcmp.gt.f32.partialorder %v15395_v30, 0.0 }
 0x7b1   : > { %v5611_v44 = vsel %vm5291_vm10, %v15341_v28, %v10176_v0  ;;  %v5483_v20 = vmul.f32 1.442695, %v5362_v18  ;;  %v5364_v9 = vmin.f32 %v15404_v21, 0.0  ;;  %v5610_v28 = vsel %vm5290_vm9, %v15337_v29, %v10175_v61  ;;  %v11474_v0 = vld [vmem:[%s17617_s3 + $0x38] sm:$0xff]  }
 0x7b2   : > { %12211 = vpow2.f32 %v5481_v24  ;;  %v5682_v62 = vpack.c.bf16 %v5611_v44, %v5609_v35  ;;  %v5485_v37 = vmul.f32 1.442695, %v5363_v8  ;;  %v5612_v36 = vsel %vm5292_vm11, %v15350_v41, %v10177_v12 }
 0x7b3   : > { %v5232_v14 = vpop.f32.mrb[240].mxu0  ;;  %12213 = vpow2.f32 %v5483_v20  ;;  %v5487_v27 = vmul.f32 1.442695, %v5364_v9  ;;  %v5683_v42 = vpack.c.bf16 %v5612_v36, %v5610_v28  ;;  %vm5298_vm2 = vcmp.gt.f32.partialorder %v15391_v54, 0.0  ;;  %v6799_v28 = vld [vmem:[%s15454_s6 + $0x8] sm:$0xff] }
 0x7b4   : > { %v12204_v52 = vpop.eup %12203  ;;  %v15410_v17 = vadd.f32 %v5232_v14, %v15027_v38  ;;  %v5234_v57 = vpop.f32.mrb[241].mxu0  ;;  %12215 = vpow2.f32 %v5485_v37  ;;  %vm5300_vm3 = vcmp.gt.f32.partialorder %v15404_v21, 0.0  ;;  %vm6894_vm8 = vcmask 392192  }
 0x7b5   : > { %v10178_v40 = vadd.f32 -1.0, %v12204_v52  ;;  %v15417_v43 = vadd.f32 %v5234_v57, %v15030_v48  ;;  %v5236_v63 = vpop.f32.mrb[242].mxu0  ;;  %v12206_v53 = vpop.eup %12205  ;;  %12217 = vpow2.f32 %v5487_v27  ;;  %6013 = vmatprep.mubr.bf16.mxu0 %v5683_v42  ;;  %v6800_v27 = vld [vmem:[%s15454_s6 + $0x10] sm:$0xff] }
 0x7b6   : > { %v5365_v46 = vmin.f32 %v15410_v17, 0.0  ;;  %v15421_v33 = vadd.f32 %v5236_v63, %v15027_v38  ;;  %v5238_v1 = vpop.f32.mrb[243].mxu0  ;;  %v12208_v22 = vpop.eup %12207  ;;  %v10179_v29 = vadd.f32 -1.0, %v12206_v53  ;;  %6014 = vmatmul.mubr.bf16.gmra.mrb[36].mxu0 %v5682_v62  ;;  %vm5301_vm4 = vcmp.gt.f32.partialorder %v15410_v17, 0.0  ;;  %v6802_v53 = vld [vmem:[%s15454_s6 + $0x20] sm:$0xff]  ;;  %v6804_v42 = vld [vmem:[%s15454_s6 + $0x30] sm:$0xff] }
 0x7b7   : > { %v10180_v41 = vadd.f32 -1.0, %v12208_v22  ;;  %v5366_v34 = vmin.f32 %v15417_v43, 0.0  ;;  %v12210_v58 = vpop.eup %12209  ;;  %v5613_v19 = vsel %vm5293_vm12, %v15358_v49, %v10178_v40  ;;  %v5239_v32 = vadd.f32 %v5238_v1, %v15030_v48  ;;  %v6805_v1 = vld [vmem:[%s15454_s6 + $0x38] sm:$0xff] }
 0x7b8   : > { %v5489_v59 = vmul.f32 1.442695, %v5365_v46  ;;  %v5367_v38 = vmin.f32 %v15421_v33, 0.0  ;;  %v10181_v51 = vadd.f32 -1.0, %v12210_v58  ;;  %v5614_v49 = vsel %vm5294_vm13, %v15365_v50, %v10179_v29  ;;  %v11473_v50 = vld [vmem:[%s17617_s3 + $0x78] sm:$0xff]   ;;  %s17619_s3 = sld [smem:[#allocation24_spill]] }
 0x7b9   : > { %v5615_v45 = vsel %vm5295_vm14, %v15369_v5, %v10180_v41  ;;  %v5491_v11 = vmul.f32 1.442695, %v5366_v34  ;;  %v5368_v16 = vmin.f32 %v5239_v32, 0.0  ;;  %10866 = vmatprep.subr.bf16.mxu1 %v11473_v50  ;;  %vm5303_vm6 = vcmp.gt.f32.partialorder %v15421_v33, 0.0  ;;  %v6803_v46 = vld [vmem:[%s15454_s6 + $0x28] sm:$0xff]  ;;  %v6806_v29 = vld [vmem:[%s15454_s6 + $0x40] sm:$0xff] }
 0x7ba   : > { %12219 = vpow2.f32 %v5489_v59  ;;  %v5684_v7 = vpack.c.bf16 %v5615_v45, %v5613_v19  ;;  %v5493_v10 = vmul.f32 1.442695, %v5367_v38  ;;  %v5616_v48 = vsel %vm5296_vm15, %v15378_v31, %v10181_v51  ;;  %10867 = vmatpush3.bf16.msra.mxu1 %v11474_v0  ;;  %v6807_v41 = vld [vmem:[%s15454_s6 + $0x48] sm:$0xff]  ;;  %v6808_v34 = vld [vmem:[%s15454_s6 + $0x50] sm:$0xff]  ;;  %v6809_v58 = vld [vmem:[%s15454_s6 + $0x58] sm:$0xff] }
 0x7bb   : > { %12221 = vpow2.f32 %v5491_v11  ;;  %v5495_v55 = vmul.f32 1.442695, %v5368_v16  ;;  %v5685_v5 = vpack.c.bf16 %v5616_v48, %v5614_v49  ;;  %vm5302_vm5 = vcmp.gt.f32.partialorder %v15417_v43, 0.0  ;;  %v6810_v38 = vld [vmem:[%s15454_s6 + $0x60] sm:$0xff]  ;;  %v6812_v51 = vld [vmem:[%s15454_s6 + $0x70] sm:$0xff]  ;;  %v6813_v11 = vld [vmem:[%s15454_s6 + $0x78] sm:$0xff] }
 0x7bc   : > { %v12212_v56 = vpop.eup %12211  ;;  %12223 = vpow2.f32 %v5493_v10  ;;  %vm5304_vm7 = vcmp.gt.f32.partialorder %v5239_v32, 0.0  ;;  %v6840_v22 = vpack.c.bf16 %v6805_v1, %v6804_v42  ;;  %v6841_v59 = vpack.c.bf16 %v6807_v41, %v6806_v29  ;;  %v6814_v10 = vld [vmem:[%s15454_s6 + $0x80] sm:$0xff]  ;;  %v6815_v16 = vld [vmem:[%s15454_s6 + $0x88] sm:$0xff]  ;;  %v6816_v49 = vld [vmem:[%s15454_s6 + $0x90] sm:$0xff] }
 0x7bd   : > { %v12214_v26 = vpop.eup %12213  ;;  %v10182_v60 = vadd.f32 -1.0, %v12212_v56  ;;  %12225 = vpow2.f32 %v5495_v55  ;;  %6023 = vmatprep.mubr.bf16.mxu0 %v5685_v5  ;;  %v6842_v19 = vpack.c.bf16 %v6809_v58, %v6808_v34  ;;  %v6845_v56 = vpack.c.bf16 %v6815_v16, %v6814_v10  ;;  %v6817_v48 = vld [vmem:[%s15454_s6 + $0x98] sm:$0xff]  ;;  %v6818_v5 = vld [vmem:[%s15454_s6 + $0xa0] sm:$0xff] }
 0x7be   : > { %v12216_v3 = vpop.eup %12215  ;;  %v10183_v47 = vadd.f32 -1.0, %v12214_v26  ;;  %6024 = vmatmul.mubr.bf16.gmra.mrb[40].mxu0 %v5684_v7  ;;  %v11477_v40 = vld [vmem:[%s17619_s3 + $0x4] ss:$8 sps:$4 sm:$0xff]   ;;  %v6844_v7 = vpack.c.bf16 %v6813_v11, %v6812_v51  ;;  %v6846_v55 = vpack.c.bf16 %v6817_v48, %v6816_v49  ;;  %v6825_v29 = vld [vmem:[%s15454_s6 + $0xd8] sm:$0xff] }
 0x7bf   : > { %v10184_v39 = vadd.f32 -1.0, %v12216_v3  ;;  %v12218_v23 = vpop.eup %12217  ;;  %v5617_v31 = vsel %vm5297_vm0, %v15384_v25, %v10182_v60  ;;  %7756 = vmatprep.subr.bf16.mxu1 %v11477_v40  ;;  %v6819_v26 = vld [vmem:[%s15454_s6 + $0xa8] sm:$0xff]  ;;  %v5657_v60 = vld [vmem:[%s17620_s5] sm:$0x3]  ;;  %s16375_s5 = sand.u32 1, %s12825_s23  }
 0x7c0   : > { %v10185_v61 = vadd.f32 -1.0, %v12218_v23  ;;  %v5618_v6 = vsel %vm5298_vm2, %v15391_v54, %v10183_v47  ;;  %v6847_v3 = vpack.c.bf16 %v6819_v26, %v6818_v5  ;;  %v15502_v47 = vrot.slane %v5657_v60, %v13179_v13 }
 0x7c1   : > { %v5619_v4 = vsel %vm5299_vm1, %v15395_v30, %v10184_v39  ;;  %v15505_v39 = vrot.slane %v5657_v60, %v13182_v15 }
 0x7c2   : > { %v5686_v24 = vpack.c.bf16 %v5619_v4, %v5617_v31  ;;  %v5620_v35 = vsel %vm5300_vm3, %v15404_v21, %v10185_v61  ;;  %v6820_v4 = vld [vmem:[%s15454_s6 + $0xb0] sm:$0xff]  ;;  %v6821_v61 = vld [vmem:[%s15454_s6 + $0xb8] sm:$0xff] }
 0x7c3   : > { %v5687_v8 = vpack.c.bf16 %v5620_v35, %v5618_v6 }
 0x7c4   : > { %v12220_v18 = vpop.eup %12219 }
 0x7c5   : > { %v12222_v44 = vpop.eup %12221  ;;  %v10186_v12 = vadd.f32 -1.0, %v12220_v18  ;;  %6033 = vmatprep.mubr.bf16.mxu0 %v5687_v8 }
 0x7c6   : > { %v12224_v25 = vpop.eup %12223  ;;  %v10187_v30 = vadd.f32 -1.0, %v12222_v44  ;;  %6034 = vmatmul.mubr.bf16.gmra.mrb[44].mxu0 %v5686_v24 }
 0x7c7   : > { %v10188_v20 = vadd.f32 -1.0, %v12224_v25  ;;  %v12226_v62 = vpop.eup %12225  ;;  %v5621_v54 = vsel %vm5301_vm4, %v15410_v17, %v10186_v12  ;;  %v6798_v17 = vld [vmem:[%s15454_s6] sm:$0xff]  ;;  %v6848_v12 = vpack.c.bf16 %v6821_v61, %v6820_v4 }
 0x7c8   : > { %v10189_v37 = vadd.f32 -1.0, %v12226_v62  ;;  %v5622_v14 = vsel %vm5302_vm5, %v15417_v43, %v10187_v30  ;;  %v6837_v36 = vpack.c.bf16 %v6799_v28, %v6798_v17  ;;  %v6801_v43 = vld [vmem:[%s15454_s6 + $0x18] sm:$0xff] }
 0x7c9   : > { %v5623_v21 = vsel %vm5303_vm6, %v15421_v33, %v10188_v20  ;;  %v6838_v63 = vpack.c.bf16 %v6801_v43, %v6800_v27  ;;  %v6839_v33 = vpack.c.bf16 %v6803_v46, %v6802_v53 }
 0x7ca   : > { %v5688_v9 = vpack.c.bf16 %v5623_v21, %v5621_v54  ;;  %v5624_v52 = vsel %vm5304_vm7, %v5239_v32, %v10189_v37  ;;  %v6811_v32 = vld [vmem:[%s15454_s6 + $0x68] sm:$0xff] }
 0x7cb   : > { %v5689_v57 = vpack.c.bf16 %v5624_v52, %v5622_v14  ;;  %v6843_v45 = vpack.c.bf16 %v6811_v32, %v6810_v38  ;;  %v6822_v52 = vld [vmem:[%s15454_s6 + $0xc0] sm:$0xff] }
 0x7cd   : > { %6043 = vmatprep.mubr.bf16.mxu0 %v5689_v57  ;;  %v6823_v57 = vld [vmem:[%s15454_s6 + $0xc8] sm:$0xff] }
 0x7ce   : > { %6044 = vmatmul.mubr.bf16.gmra.mrb[48].mxu0 %v5688_v9  ;;  %v6849_v53 = vpack.c.bf16 %v6823_v57, %v6822_v52 }
 0x7cf   : > { %6975 = vmatprep.mubr.bf16.mxu0 %v12866_v2 }
 0x7d6   : > { %10309 = vmatmul.mubr.msk.bf16.vlgmr.msra.gmra.mrb[52].mxu0 %vm6894_vm8, %v6837_v36 }
 0x7d7   : > { %6985 = vmatprep.mubr.bf16.mxu0 %v12866_v2 }
 0x7de   : > { %10310 = vmatmul.mubr.msk.bf16.gmra.mrb[56].mxu0 %vm6894_vm8, %v6838_v63 }
 0x7df   : > { %6995 = vmatprep.mubr.bf16.mxu0 %v12866_v2 }
 0x7e6   : > { %10311 = vmatmul.mubr.msk.bf16.gmra.mrb[60].mxu0 %vm6894_vm8, %v6839_v33 }
 0x7e7   : > { %7005 = vmatprep.mubr.bf16.mxu0 %v12866_v2 }
 0x7ee   : > { %10312 = vmatmul.mubr.msk.bf16.gmra.mrb[64].mxu0 %vm6894_vm8, %v6840_v22  ;;  %v6824_v22 = vld [vmem:[%s15454_s6 + $0xd0] sm:$0xff] }
 0x7ef   : > { %7015 = vmatprep.mubr.bf16.mxu0 %v12866_v2  ;;  %v6850_v32 = vpack.c.bf16 %v6825_v29, %v6824_v22 }
 0x7f6   : > { %10313 = vmatmul.mubr.msk.bf16.gmra.mrb[68].mxu0 %vm6894_vm8, %v6841_v59 }
 0x7f7   : > { %7025 = vmatprep.mubr.bf16.mxu0 %v12866_v2 }
 0x7fe   : > { %10314 = vmatmul.mubr.msk.bf16.gmra.mrb[72].mxu0 %vm6894_vm8, %v6842_v19 }
 0x7ff   : > { %7035 = vmatprep.mubr.bf16.mxu0 %v12866_v2 }
 0x806   : > { %10315 = vmatmul.mubr.msk.bf16.gmra.mrb[76].mxu0 %vm6894_vm8, %v6843_v45 }
 0x807   : > { %7045 = vmatprep.mubr.bf16.mxu0 %v12866_v2 }
 0x80e   : > { %10316 = vmatmul.mubr.msk.bf16.gmra.mrb[80].mxu0 %vm6894_vm8, %v6844_v7 }
 0x80f   : > { %7055 = vmatprep.mubr.bf16.mxu0 %v12866_v2 }
 0x816   : > { %10317 = vmatmul.mubr.msk.bf16.gmra.mrb[84].mxu0 %vm6894_vm8, %v6845_v56 }
 0x817   : > { %7065 = vmatprep.mubr.bf16.mxu0 %v12866_v2 }
 0x81e   : > { %10318 = vmatmul.mubr.msk.bf16.gmra.mrb[88].mxu0 %vm6894_vm8, %v6846_v55 }
 0x81f   : > { %7075 = vmatprep.mubr.bf16.mxu0 %v12866_v2 }
 0x826   : > { %10319 = vmatmul.mubr.msk.bf16.gmra.mrb[92].mxu0 %vm6894_vm8, %v6847_v3 }
 0x827   : > { %7085 = vmatprep.mubr.bf16.mxu0 %v12866_v2 }
 0x829   : > { %v5895_v23 = vpop.f32.mrb[244].mxu0 }
 0x82a   : > { %v15509_v50 = vadd.f32 %v5895_v23, %v15502_v47  ;;  %v5897_v31 = vpop.f32.mrb[245].mxu0 }
 0x82b   : > { %v15515_v0 = vadd.f32 %v5897_v31, %v15505_v39  ;;  %v5899_v24 = vpop.f32.mrb[246].mxu0 }
 0x82c   : > { %v6118_v18 = vmin.f32 %v15509_v50, 0.0  ;;  %v15519_v6 = vadd.f32 %v5899_v24, %v15502_v47  ;;  %v5901_v35 = vpop.f32.mrb[247].mxu0  ;;  %vm6054_vm9 = vcmp.gt.f32.partialorder %v15509_v50, 0.0 }
 0x82d   : > { %v6119_v8 = vmin.f32 %v15515_v0, 0.0  ;;  %v15523_v44 = vadd.f32 %v5901_v35, %v15505_v39  ;;  %vm6055_vm10 = vcmp.gt.f32.partialorder %v15515_v0, 0.0 }
 0x82e   : > { %v6182_v25 = vmul.f32 1.442695, %v6118_v18  ;;  %v6120_v30 = vmin.f32 %v15519_v6, 0.0  ;;  %10320 = vmatmul.mubr.msk.bf16.gmra.mrb[96].mxu0 %vm6894_vm8, %v6848_v12  ;;  %vm6056_vm11 = vcmp.gt.f32.partialorder %v15519_v6, 0.0  ;;  %v6826_v12 = vld [vmem:[%s15454_s6 + $0xe0] sm:$0xff] }
 0x82f   : > { %v6184_v20 = vmul.f32 1.442695, %v6119_v8  ;;  %v6121_v62 = vmin.f32 %v15523_v44, 0.0  ;;  %7095 = vmatprep.mubr.bf16.mxu0 %v12866_v2  ;;  %vm6057_vm12 = vcmp.gt.f32.partialorder %v15523_v44, 0.0 }
 0x830   : > { %12227 = vpow2.f32 %v6182_v25  ;;  %v6186_v54 = vmul.f32 1.442695, %v6120_v30  ;;  %v6827_v25 = vld [vmem:[%s15454_s6 + $0xe8] sm:$0xff] }
 0x831   : > { %12229 = vpow2.f32 %v6184_v20  ;;  %v6188_v21 = vmul.f32 1.442695, %v6121_v62  ;;  %v5905_v37 = vpop.f32.mrb[248].mxu0  ;;  %v11475_v62 = vld [vmem:[%s17619_s3] ss:$8 sps:$4 sm:$0xff]  }
 0x832   : > { %12231 = vpow2.f32 %v6186_v54  ;;  %v15529_v9 = vadd.f32 %v5905_v37, %v15502_v47  ;;  %v5907_v14 = vpop.f32.mrb[249].mxu0 }
 0x833   : > { %12233 = vpow2.f32 %v6188_v21  ;;  %v15535_v17 = vadd.f32 %v5907_v14, %v15505_v39  ;;  %v5909_v28 = vpop.f32.mrb[250].mxu0 }
 0x834   : > { %v6122_v36 = vmin.f32 %v15529_v9, 0.0  ;;  %v15539_v40 = vadd.f32 %v5909_v28, %v15502_v47  ;;  %v5911_v27 = vpop.f32.mrb[251].mxu0  ;;  %vm6058_vm13 = vcmp.gt.f32.partialorder %v15529_v9, 0.0  ;;  %v6851_v28 = vpack.c.bf16 %v6827_v25, %v6826_v12 }
 0x835   : > { %v6123_v43 = vmin.f32 %v15535_v17, 0.0  ;;  %v15543_v63 = vadd.f32 %v5911_v27, %v15505_v39  ;;  %vm6059_vm14 = vcmp.gt.f32.partialorder %v15535_v17, 0.0 }
 0x836   : > { %v6190_v46 = vmul.f32 1.442695, %v6122_v36  ;;  %v6124_v33 = vmin.f32 %v15539_v40, 0.0  ;;  %10321 = vmatmul.mubr.msk.bf16.gmra.mrb[100].mxu0 %vm6894_vm8, %v6849_v53  ;;  %vm6060_vm15 = vcmp.gt.f32.partialorder %v15539_v40, 0.0 }
 0x837   : > { %v6192_v42 = vmul.f32 1.442695, %v6123_v43  ;;  %v6125_v1 = vmin.f32 %v15543_v63, 0.0  ;;  %7105 = vmatprep.mubr.bf16.mxu0 %v12866_v2  ;;  %vm6061_vm0 = vcmp.gt.f32.partialorder %v15543_v63, 0.0 }
 0x838   : > { %12235 = vpow2.f32 %v6190_v46  ;;  %v6194_v41 = vmul.f32 1.442695, %v6124_v33  ;;  %v11478_v33 = vld [vmem:[%s17619_s3 + $0x10] ss:$8 sps:$4 sm:$0xff]  }
 0x839   : > { %12237 = vpow2.f32 %v6192_v42  ;;  %v6196_v59 = vmul.f32 1.442695, %v6125_v1  ;;  %v5915_v34 = vpop.f32.mrb[252].mxu0 }
 0x83a   : > { %v12228_v58 = vpop.eup %12227  ;;  %12239 = vpow2.f32 %v6194_v41  ;;  %v15551_v19 = vadd.f32 %v5915_v34, %v15502_v47  ;;  %v5917_v38 = vpop.f32.mrb[253].mxu0  ;;  %v11483_v41 = vld [vmem:[%s17619_s3 + $0x24] ss:$8 sps:$4 sm:$0xff]  }
 0x83b   : > { %v12230_v45 = vpop.eup %12229  ;;  %v10222_v51 = vadd.f32 -1.0, %v12228_v58  ;;  %12241 = vpow2.f32 %v6196_v59  ;;  %v15556_v11 = vadd.f32 %v5917_v38, %v15505_v39  ;;  %v5919_v7 = vpop.f32.mrb[254].mxu0 }
 0x83c   : > { %v12232_v10 = vpop.eup %12231  ;;  %v10223_v16 = vadd.f32 -1.0, %v12230_v45  ;;  %v6126_v56 = vmin.f32 %v15551_v19, 0.0  ;;  %v15561_v49 = vadd.f32 %v5919_v7, %v15502_v47  ;;  %v5921_v48 = vpop.f32.mrb[255].mxu0  ;;  %vm6062_vm2 = vcmp.gt.f32.partialorder %v15551_v19, 0.0 }
 0x83d   : > { %v12234_v55 = vpop.eup %12233  ;;  %v10224_v5 = vadd.f32 -1.0, %v12232_v10  ;;  %v6127_v26 = vmin.f32 %v15556_v11, 0.0  ;;  %v6374_v60 = vsel %vm6054_vm9, %v15509_v50, %v10222_v51  ;;  %v15572_v24 = vadd.f32 %v5921_v48, %v15505_v39 }
 0x83e   : > { %v10225_v3 = vadd.f32 -1.0, %v12234_v55  ;;  %v6198_v23 = vmul.f32 1.442695, %v6126_v56  ;;  %v6128_v31 = vmin.f32 %v15561_v49, 0.0  ;;  %v6375_v18 = vsel %vm6055_vm10, %v15515_v0, %v10223_v16  ;;  %10322 = vmatmul.mubr.msk.bf16.gmra.mrb[104].mxu0 %vm6894_vm8, %v6850_v32 }
 0x83f   : > { %v6376_v4 = vsel %vm6056_vm11, %v15519_v6, %v10224_v5  ;;  %v6200_v61 = vmul.f32 1.442695, %v6127_v26  ;;  %v6129_v30 = vmin.f32 %v15572_v24, 0.0  ;;  %7115 = vmatprep.mubr.bf16.mxu0 %v12866_v2  ;;  %v6829_v5 = vld [vmem:[%s15454_s6 + $0xf8] sm:$0xff]  ;;  %v11481_v26 = vld [vmem:[%s17619_s3 + $0x20] ss:$8 sps:$4 sm:$0xff]  }
 0x840   : > { %v6471_v35 = vpack.c.bf16 %v6376_v4, %v6374_v60  ;;  %12243 = vpow2.f32 %v6198_v23  ;;  %v6202_v8 = vmul.f32 1.442695, %v6128_v31  ;;  %v6377_v50 = vsel %vm6057_vm12, %v15523_v44, %v10225_v3  ;;  %v11480_v44 = vld [vmem:[%s17619_s3 + $0x14] ss:$8 sps:$4 sm:$0xff]  }
 0x841   : > { %12245 = vpow2.f32 %v6200_v61  ;;  %v5925_v6 = vpop.f32.mrb[0].mxu0  ;;  %v6472_v20 = vpack.c.bf16 %v6377_v50, %v6375_v18  ;;  %v6204_v14 = vmul.f32 1.442695, %v6129_v30  ;;  %v11486_v23 = vld [vmem:[%s17619_s3 + $0x34] ss:$8 sps:$4 sm:$0xff]   ;;  %vm6064_vm1 = vcmp.gt.f32.partialorder %v15561_v49, 0.0 }
 0x842   : > { %v12236_v54 = vpop.eup %12235  ;;  %12247 = vpow2.f32 %v6202_v8  ;;  %v15584_v0 = vadd.f32 %v5925_v6, %v15502_v47  ;;  %v5927_v21 = vpop.f32.mrb[1].mxu0  ;;  %v11484_v6 = vld [vmem:[%s17619_s3 + $0x30] ss:$8 sps:$4 sm:$0xff]   ;;  %vm6063_vm3 = vcmp.gt.f32.partialorder %v15556_v11, 0.0  ;;  %vm6065_vm4 = vcmp.gt.f32.partialorder %v15572_v24, 0.0 }
 0x843   : > { %v12238_v37 = vpop.eup %12237  ;;  %v15590_v52 = vadd.f32 %v5927_v21, %v15505_v39  ;;  %v5929_v57 = vpop.f32.mrb[2].mxu0  ;;  %6637 = vmatprep.mubr.bf16.mxu1 %v6472_v20  ;;  %v10226_v1 = vadd.f32 -1.0, %v12236_v54  ;;  %12249 = vpow2.f32 %v6204_v14 }
 0x844   : > { %v12240_v36 = vpop.eup %12239  ;;  %v10227_v27 = vadd.f32 -1.0, %v12238_v37  ;;  %v6130_v43 = vmin.f32 %v15584_v0, 0.0  ;;  %v15595_v53 = vadd.f32 %v5929_v57, %v15502_v47  ;;  %v5931_v46 = vpop.f32.mrb[3].mxu0  ;;  %6638 = vmatmul.mubr.bf16.vlgmr.msra.gmra.mrb[172].mxu1 %v6471_v35  ;;  %vm6066_vm6 = vcmp.gt.f32.partialorder %v15584_v0, 0.0 }
 0x845   : > { %v12242_v42 = vpop.eup %12241  ;;  %v10228_v22 = vadd.f32 -1.0, %v12240_v36  ;;  %v6131_v29 = vmin.f32 %v15590_v52, 0.0  ;;  %7757 = vmatpush1.bf16.msra.mxu1 %v11475_v62  ;;  %v15604_v32 = vadd.f32 %v5931_v46, %v15505_v39  ;;  %v6378_v55 = vsel %vm6058_vm13, %v15529_v9, %v10226_v1 }
 0x846   : > { %v10229_v59 = vadd.f32 -1.0, %v12242_v42  ;;  %v6206_v34 = vmul.f32 1.442695, %v6130_v43  ;;  %v6132_v58 = vmin.f32 %v15595_v53, 0.0  ;;  %7758 = vmatprep.subr.bf16.mxu1 %v11480_v44  ;;  %v6379_v45 = vsel %vm6059_vm14, %v15535_v17, %v10227_v27  ;;  %10323 = vmatmul.mubr.msk.bf16.gmra.mrb[108].mxu0 %vm6894_vm8, %v6851_v28  ;;  %v6828_v17 = vld [vmem:[%s15454_s6 + $0xf0] sm:$0xff]  ;;  %s17621_s6 = sld [smem:[#allocation23_spill]] }
 0x847   : > { %v6208_v38 = vmul.f32 1.442695, %v6131_v29  ;;  %v6380_v10 = vsel %vm6060_vm15, %v15539_v40, %v10228_v22  ;;  %v6133_v16 = vmin.f32 %v15604_v32, 0.0  ;;  %7125 = vmatprep.mubr.bf16.mxu0 %v12866_v2  ;;  %v6852_v2 = vpack.c.bf16 %v6829_v5, %v6828_v17  ;;  %v11489_v44 = vld [vmem:[%s17619_s3 + $0x44] ss:$8 sps:$4 sm:$0xff]  }
 0x848   : > { %12251 = vpow2.f32 %v6206_v34  ;;  %v6210_v51 = vmul.f32 1.442695, %v6132_v58  ;;  %v6381_v7 = vsel %vm6061_vm0, %v15543_v63, %v10229_v59  ;;  %v6473_v3 = vpack.c.bf16 %v6380_v10, %v6378_v55 }
 0x849   : > { %12253 = vpow2.f32 %v6208_v38  ;;  %v5935_v56 = vpop.f32.mrb[4].mxu0  ;;  %v6474_v48 = vpack.c.bf16 %v6381_v7, %v6379_v45  ;;  %7759 = vmatpush1.bf16.msra.mxu1 %v11478_v33  ;;  %v6212_v4 = vmul.f32 1.442695, %v6133_v16  ;;  %v11487_v33 = vld [vmem:[%s17619_s3 + $0x40] ss:$8 sps:$4 sm:$0xff]   ;;  %vm6068_vm5 = vcmp.gt.f32.partialorder %v15595_v53, 0.0 }
 0x84a   : > { %v12244_v60 = vpop.eup %12243  ;;  %12255 = vpow2.f32 %v6210_v51  ;;  %v15620_v40 = vadd.f32 %v5935_v56, %v15502_v47  ;;  %v5937_v63 = vpop.f32.mrb[5].mxu0  ;;  %7760 = vmatprep.subr.bf16.mxu1 %v11483_v41  ;;  %v11495_v16 = vld [vmem:[%s17619_s3 + $0x64] ss:$8 sps:$4 sm:$0xff]   ;;  %vm6067_vm7 = vcmp.gt.f32.partialorder %v15590_v52, 0.0 }
 0x84b   : > { %v12246_v31 = vpop.eup %12245  ;;  %v15625_v9 = vadd.f32 %v5937_v63, %v15505_v39  ;;  %v5939_v61 = vpop.f32.mrb[6].mxu0  ;;  %6645 = vmatprep.mubr.bf16.mxu1 %v6474_v48  ;;  %v10230_v35 = vadd.f32 -1.0, %v12244_v60  ;;  %12257 = vpow2.f32 %v6212_v4 }
 0x84c   : > { %v12248_v18 = vpop.eup %12247  ;;  %v6134_v8 = vmin.f32 %v15620_v40, 0.0  ;;  %v15629_v50 = vadd.f32 %v5939_v61, %v15502_v47  ;;  %v5941_v12 = vpop.f32.mrb[7].mxu0  ;;  %6646 = vmatmul.mubr.bf16.gmra.mrb[176].mxu1 %v6473_v3  ;;  %v10231_v20 = vadd.f32 -1.0, %v12246_v31  ;;  %v11493_v61 = vld [vmem:[%s17619_s3 + $0x60] ss:$8 sps:$4 sm:$0xff]   ;;  %vm6070_vm9 = vcmp.gt.f32.partialorder %v15620_v40, 0.0 }
 0x84d   : > { %v10232_v25 = vadd.f32 -1.0, %v12248_v18  ;;  %v6135_v30 = vmin.f32 %v15625_v9, 0.0  ;;  %7761 = vmatpush1.bf16.msra.mxu1 %v11481_v26  ;;  %v15636_v21 = vadd.f32 %v5941_v12, %v15505_v39  ;;  %v12250_v37 = vpop.eup %12249  ;;  %v6382_v27 = vsel %vm6062_vm2, %v15551_v19, %v10230_v35  ;;  %v11492_v19 = vld [vmem:[%s17619_s3 + $0x54] ss:$8 sps:$4 sm:$0xff]  }
 0x84e   : > { %v6214_v62 = vmul.f32 1.442695, %v6134_v8  ;;  %v6136_v54 = vmin.f32 %v15629_v50, 0.0  ;;  %7762 = vmatprep.subr.bf16.mxu1 %v11486_v23  ;;  %v10233_v28 = vadd.f32 -1.0, %v12250_v37  ;;  %10324 = vmatmul.mubr.msk.bf16.gmra.mrb[112].mxu0 %vm6894_vm8, %v6852_v2  ;;  %vm6069_vm8 = vcmp.gt.f32.partialorder %v15604_v32, 0.0 }
 0x84f   : > { %v6216_v14 = vmul.f32 1.442695, %v6135_v30  ;;  %v6384_v57 = vsel %vm6064_vm1, %v15561_v49, %v10232_v25  ;;  %v6137_v43 = vmin.f32 %v15636_v21, 0.0  ;;  %v6383_v49 = vsel %vm6063_vm3, %v15556_v11, %v10231_v20  ;;  %v11490_v11 = vld [vmem:[%s17619_s3 + $0x50] ss:$8 sps:$4 sm:$0xff]  }
 0x850   : > { %12259 = vpow2.f32 %v6214_v62  ;;  %v6218_v36 = vmul.f32 1.442695, %v6136_v54  ;;  %v6475_v46 = vpack.c.bf16 %v6384_v57, %v6382_v27  ;;  %v6385_v1 = vsel %vm6065_vm4, %v15572_v24, %v10233_v28  ;;  %v11496_v37 = vld [vmem:[%s17619_s3 + $0x70] ss:$8 sps:$4 sm:$0xff]  }
 0x851   : > { %12261 = vpow2.f32 %v6216_v14  ;;  %7763 = vmatpush1.bf16.msra.mxu1 %v11484_v6  ;;  %v6220_v29 = vmul.f32 1.442695, %v6137_v43  ;;  %v6476_v41 = vpack.c.bf16 %v6385_v1, %v6383_v49  ;;  %v5945_v58 = vpop.f32.mrb[8].mxu0  ;;  %vm6072_vm10 = vcmp.gt.f32.partialorder %v15629_v50, 0.0 }
 0x852   : > { %v12252_v42 = vpop.eup %12251  ;;  %12263 = vpow2.f32 %v6218_v36  ;;  %7764 = vmatprep.subr.bf16.mxu1 %v11489_v44  ;;  %v15655_v45 = vadd.f32 %v5945_v58, %v15502_v47  ;;  %v5947_v51 = vpop.f32.mrb[9].mxu0  ;;  %v11501_v36 = vld [vmem:[%s17619_s3 + $0x84] ss:$8 sps:$4 sm:$0xff]   ;;  %vm6071_vm11 = vcmp.gt.f32.partialorder %v15625_v9, 0.0  ;;  %vm6073_vm12 = vcmp.gt.f32.partialorder %v15636_v21, 0.0 }
 0x853   : > { %v12254_v22 = vpop.eup %12253  ;;  %v10234_v34 = vadd.f32 -1.0, %v12252_v42  ;;  %12265 = vpow2.f32 %v6220_v29  ;;  %6653 = vmatprep.mubr.bf16.mxu1 %v6476_v41  ;;  %v15661_v7 = vadd.f32 %v5947_v51, %v15505_v39  ;;  %v5949_v10 = vpop.f32.mrb[10].mxu0 }
 0x854   : > { %v12256_v59 = vpop.eup %12255  ;;  %v10235_v24 = vadd.f32 -1.0, %v12254_v22  ;;  %6654 = vmatmul.mubr.bf16.gmra.mrb[180].mxu1 %v6475_v46  ;;  %v6138_v48 = vmin.f32 %v15655_v45, 0.0  ;;  %v15667_v55 = vadd.f32 %v5949_v10, %v15502_v47  ;;  %v5951_v17 = vpop.f32.mrb[11].mxu0  ;;  %vm6074_vm13 = vcmp.gt.f32.partialorder %v15655_v45, 0.0 }
 0x855   : > { %v10236_v38 = vadd.f32 -1.0, %v12256_v59  ;;  %7765 = vmatpush1.bf16.msra.mxu1 %v11487_v33  ;;  %v12258_v56 = vpop.eup %12257  ;;  %v6139_v60 = vmin.f32 %v15661_v7, 0.0  ;;  %v15672_v63 = vadd.f32 %v5951_v17, %v15505_v39  ;;  %v6386_v3 = vsel %vm6066_vm6, %v15584_v0, %v10234_v34  ;;  %v11498_v0 = vld [vmem:[%s17619_s3 + $0x74] ss:$8 sps:$4 sm:$0xff]   ;;  %v11499_v34 = vld [vmem:[%s17619_s3 + $0x80] ss:$8 sps:$4 sm:$0xff]  }
 0x856   : > { %7766 = vmatprep.subr.bf16.mxu1 %v11492_v19  ;;  %v10237_v26 = vadd.f32 -1.0, %v12258_v56  ;;  %v6222_v23 = vmul.f32 1.442695, %v6138_v48  ;;  %v6140_v31 = vmin.f32 %v15667_v55, 0.0  ;;  %v6387_v8 = vsel %vm6067_vm7, %v15590_v52, %v10235_v24 }
 0x857   : > { %v6388_v5 = vsel %vm6068_vm5, %v15595_v53, %v10236_v38  ;;  %v6224_v18 = vmul.f32 1.442695, %v6139_v60  ;;  %v6141_v35 = vmin.f32 %v15672_v63, 0.0  ;;  %v11507_v60 = vld [vmem:[%s17619_s3 + $0xa4] ss:$8 sps:$4 sm:$0xff]   ;;  %vm6075_vm14 = vcmp.gt.f32.partialorder %v15661_v7, 0.0 }
 0x858   : > { %v6477_v4 = vpack.c.bf16 %v6388_v5, %v6386_v3  ;;  %v6389_v12 = vsel %vm6069_vm8, %v15604_v32, %v10237_v26  ;;  %12267 = vpow2.f32 %v6222_v23  ;;  %v6226_v25 = vmul.f32 1.442695, %v6140_v31 }
 0x859   : > { %7767 = vmatpush1.bf16.msra.mxu1 %v11490_v11  ;;  %v6478_v30 = vpack.c.bf16 %v6389_v12, %v6387_v8  ;;  %12269 = vpow2.f32 %v6224_v18  ;;  %v6228_v62 = vmul.f32 1.442695, %v6141_v35  ;;  %v5955_v54 = vpop.f32.mrb[12].mxu0  ;;  %vm6076_vm15 = vcmp.gt.f32.partialorder %v15667_v55, 0.0 }
 0x85a   : > { %v12260_v53 = vpop.eup %12259  ;;  %7768 = vmatprep.subr.bf16.mxu1 %v11495_v16  ;;  %12271 = vpow2.f32 %v6226_v25  ;;  %v15688_v52 = vadd.f32 %v5955_v54, %v15502_v47  ;;  %v5957_v32 = vpop.f32.mrb[13].mxu0  ;;  %vm6077_vm0 = vcmp.gt.f32.partialorder %v15672_v63, 0.0  ;;  %v11510_v54 = vld [vmem:[%s17619_s3 + $0xb4] ss:$8 sps:$4 sm:$0xff]  }
 0x85b   : > { %v12262_v2 = vpop.eup %12261  ;;  %v10238_v20 = vadd.f32 -1.0, %v12260_v53  ;;  %6661 = vmatprep.mubr.bf16.mxu1 %v6478_v30  ;;  %12273 = vpow2.f32 %v6228_v62  ;;  %v15693_v57 = vadd.f32 %v5957_v32, %v15505_v39  ;;  %v5959_v28 = vpop.f32.mrb[14].mxu0 }
 0x85c   : > { %v12264_v6 = vpop.eup %12263  ;;  %v10239_v14 = vadd.f32 -1.0, %v12262_v2  ;;  %6662 = vmatmul.mubr.bf16.gmra.mrb[184].mxu1 %v6477_v4  ;;  %v6142_v43 = vmin.f32 %v15688_v52, 0.0  ;;  %v15699_v46 = vadd.f32 %v5959_v28, %v15502_v47  ;;  %v5961_v33 = vpop.f32.mrb[15].mxu0  ;;  %vm6078_vm1 = vcmp.gt.f32.partialorder %v15688_v52, 0.0 }
 0x85d   : > { %v10240_v44 = vadd.f32 -1.0, %v12264_v6  ;;  %7769 = vmatpush1.bf16.msra.mxu1 %v11493_v61  ;;  %v12266_v27 = vpop.eup %12265  ;;  %v6143_v1 = vmin.f32 %v15693_v57, 0.0  ;;  %v15704_v19 = vadd.f32 %v5961_v33, %v15505_v39  ;;  %v6390_v22 = vsel %vm6070_vm9, %v15620_v40, %v10238_v20  ;;  %v11504_v40 = vld [vmem:[%s17619_s3 + $0x94] ss:$8 sps:$4 sm:$0xff]  }
 0x85e   : > { %7770 = vmatprep.subr.bf16.mxu1 %v11498_v0  ;;  %v10241_v49 = vadd.f32 -1.0, %v12266_v27  ;;  %v6230_v29 = vmul.f32 1.442695, %v6142_v43  ;;  %v6144_v41 = vmin.f32 %v15699_v46, 0.0  ;;  %v6391_v38 = vsel %vm6071_vm11, %v15625_v9, %v10239_v14  ;;  %v11502_v9 = vld [vmem:[%s17619_s3 + $0x90] ss:$8 sps:$4 sm:$0xff]  }
 0x85f   : > { %v6392_v42 = vsel %vm6072_vm10, %v15629_v50, %v10240_v44  ;;  %v6232_v50 = vmul.f32 1.442695, %v6143_v1  ;;  %v6145_v58 = vmin.f32 %v15704_v19, 0.0  ;;  %v11505_v0 = vld [vmem:[%s17619_s3 + $0xa0] ss:$8 sps:$4 sm:$0xff]   ;;  %vm6079_vm2 = vcmp.gt.f32.partialorder %v15693_v57, 0.0 }
 0x860   : > { %v6479_v59 = vpack.c.bf16 %v6392_v42, %v6390_v22  ;;  %v6393_v51 = vsel %vm6073_vm12, %v15636_v21, %v10241_v49  ;;  %12275 = vpow2.f32 %v6230_v29  ;;  %v6234_v11 = vmul.f32 1.442695, %v6144_v41  ;;  %v11508_v42 = vld [vmem:[%s17619_s3 + $0xb0] ss:$8 sps:$4 sm:$0xff]  }
 0x861   : > { %7771 = vmatpush1.bf16.msra.mxu1 %v11496_v37  ;;  %v6480_v24 = vpack.c.bf16 %v6393_v51, %v6391_v38  ;;  %12277 = vpow2.f32 %v6232_v50  ;;  %v6236_v10 = vmul.f32 1.442695, %v6145_v58  ;;  %v5965_v16 = vpop.f32.mrb[16].mxu0  ;;  %vm6080_vm3 = vcmp.gt.f32.partialorder %v15699_v46, 0.0 }
 0x862   : > { %7772 = vmatprep.subr.bf16.mxu1 %v11501_v36  ;;  %v12268_v56 = vpop.eup %12267  ;;  %12279 = vpow2.f32 %v6234_v11  ;;  %v15719_v48 = vadd.f32 %v5965_v16, %v15502_v47  ;;  %v5967_v17 = vpop.f32.mrb[17].mxu0  ;;  %v11511_v11 = vld [vmem:[%s17619_s3 + $0xc0] ss:$8 sps:$4 sm:$0xff]   ;;  %vm6081_vm4 = vcmp.gt.f32.partialorder %v15704_v19, 0.0 }
 0x863   : > { %6669 = vmatprep.mubr.bf16.mxu1 %v6480_v24  ;;  %v12270_v5 = vpop.eup %12269  ;;  %12281 = vpow2.f32 %v6236_v10  ;;  %v15724_v21 = vadd.f32 %v5967_v17, %v15505_v39  ;;  %v5969_v26 = vpop.f32.mrb[18].mxu0  ;;  %v10242_v23 = vadd.f32 -1.0, %v12268_v56 }
 0x864   : > { %6670 = vmatmul.mubr.bf16.gmra.mrb[188].mxu1 %v6479_v59  ;;  %v12272_v3 = vpop.eup %12271  ;;  %v10243_v31 = vadd.f32 -1.0, %v12270_v5  ;;  %v6146_v4 = vmin.f32 %v15719_v48, 0.0  ;;  %v15729_v61 = vadd.f32 %v5969_v26, %v15502_v47  ;;  %v5971_v53 = vpop.f32.mrb[19].mxu0  ;;  %v11516_v5 = vld [vmem:[%s17619_s3 + $0xd4] ss:$8 sps:$4 sm:$0xff]   ;;  %vm6082_vm6 = vcmp.gt.f32.partialorder %v15719_v48, 0.0 }
 0x865   : > { %7773 = vmatpush1.bf16.msra.mxu1 %v11499_v34  ;;  %v12274_v18 = vpop.eup %12273  ;;  %v10244_v35 = vadd.f32 -1.0, %v12272_v3  ;;  %v6147_v8 = vmin.f32 %v15724_v21, 0.0  ;;  %v15734_v12 = vadd.f32 %v5971_v53, %v15505_v39  ;;  %v6394_v37 = vsel %vm6074_vm13, %v15655_v45, %v10242_v23 }
 0x866   : > { %7774 = vmatprep.subr.bf16.mxu1 %v11504_v40  ;;  %v10245_v2 = vadd.f32 -1.0, %v12274_v18  ;;  %v6238_v25 = vmul.f32 1.442695, %v6146_v4  ;;  %v6148_v30 = vmin.f32 %v15729_v61, 0.0  ;;  %v6395_v62 = vsel %vm6075_vm14, %v15661_v7, %v10243_v31 }
 0x867   : > { %v6240_v6 = vmul.f32 1.442695, %v6147_v8  ;;  %v6149_v20 = vmin.f32 %v15734_v12, 0.0  ;;  %v6396_v7 = vsel %vm6076_vm15, %v15667_v55, %v10244_v35  ;;  %v11513_v55 = vld [vmem:[%s17619_s3 + $0xc4] ss:$8 sps:$4 sm:$0xff]   ;;  %vm6083_vm5 = vcmp.gt.f32.partialorder %v15724_v21, 0.0 }
 0x868   : > { %12283 = vpow2.f32 %v6238_v25  ;;  %v6242_v44 = vmul.f32 1.442695, %v6148_v30  ;;  %v6397_v32 = vsel %vm6077_vm0, %v15672_v63, %v10245_v2  ;;  %v6481_v63 = vpack.c.bf16 %v6396_v7, %v6394_v37  ;;  %v11514_v8 = vld [vmem:[%s17619_s3 + $0xd0] ss:$8 sps:$4 sm:$0xff]  }
 0x869   : > { %7775 = vmatpush1.bf16.msra.mxu1 %v11502_v9  ;;  %12285 = vpow2.f32 %v6240_v6  ;;  %v6244_v14 = vmul.f32 1.442695, %v6149_v20  ;;  %v5975_v28 = vpop.f32.mrb[20].mxu0  ;;  %v6482_v36 = vpack.c.bf16 %v6397_v32, %v6395_v62  ;;  %vm6084_vm7 = vcmp.gt.f32.partialorder %v15729_v61, 0.0 }
 0x86a   : > { %7776 = vmatprep.subr.bf16.mxu1 %v11507_v60  ;;  %v12276_v27 = vpop.eup %12275  ;;  %12287 = vpow2.f32 %v6242_v44  ;;  %v15751_v43 = vadd.f32 %v5975_v28, %v15502_v47  ;;  %v5977_v33 = vpop.f32.mrb[21].mxu0  ;;  %v11517_v28 = vld [vmem:[%s17619_s3 + $0xe0] ss:$8 sps:$4 sm:$0xff]   ;;  %vm6085_vm8 = vcmp.gt.f32.partialorder %v15734_v12, 0.0 }
 0x86b   : > { %v12278_v49 = vpop.eup %12277  ;;  %12289 = vpow2.f32 %v6244_v14  ;;  %v15756_v45 = vadd.f32 %v5977_v33, %v15505_v39  ;;  %v5979_v1 = vpop.f32.mrb[22].mxu0  ;;  %6677 = vmatprep.mubr.bf16.mxu1 %v6482_v36  ;;  %v10246_v29 = vadd.f32 -1.0, %v12276_v27 }
 0x86c   : > { %v12280_v22 = vpop.eup %12279  ;;  %v10247_v41 = vadd.f32 -1.0, %v12278_v49  ;;  %v6150_v59 = vmin.f32 %v15751_v43, 0.0  ;;  %v15761_v34 = vadd.f32 %v5979_v1, %v15502_v47  ;;  %v5981_v50 = vpop.f32.mrb[23].mxu0  ;;  %6678 = vmatmul.mubr.bf16.gmra.mrb[192].mxu1 %v6481_v63  ;;  %v11522_v49 = vld [vmem:[%s17619_s3 + $0xf4] ss:$8 sps:$4 sm:$0xff]   ;;  %vm6086_vm9 = vcmp.gt.f32.partialorder %v15751_v43, 0.0 }
 0x86d   : > { %7777 = vmatpush1.bf16.msra.mxu1 %v11505_v0  ;;  %v12282_v58 = vpop.eup %12281  ;;  %v10248_v38 = vadd.f32 -1.0, %v12280_v22  ;;  %v6151_v51 = vmin.f32 %v15756_v45, 0.0  ;;  %v15766_v40 = vadd.f32 %v5981_v50, %v15505_v39  ;;  %v6398_v3 = vsel %vm6078_vm1, %v15688_v52, %v10246_v29 }
 0x86e   : > { %7778 = vmatprep.subr.bf16.mxu1 %v11510_v54  ;;  %v10249_v24 = vadd.f32 -1.0, %v12282_v58  ;;  %v6246_v10 = vmul.f32 1.442695, %v6150_v59  ;;  %v6152_v16 = vmin.f32 %v15761_v34, 0.0  ;;  %v6399_v9 = vsel %vm6079_vm2, %v15693_v57, %v10247_v41 }
 0x86f   : > { %v6248_v56 = vmul.f32 1.442695, %v6151_v51  ;;  %v6153_v17 = vmin.f32 %v15766_v40, 0.0  ;;  %v6400_v57 = vsel %vm6080_vm3, %v15699_v46, %v10248_v38  ;;  %v11519_v46 = vld [vmem:[%s17619_s3 + $0xe4] ss:$8 sps:$4 sm:$0xff]   ;;  %vm6087_vm10 = vcmp.gt.f32.partialorder %v15756_v45, 0.0 }
 0x870   : > { %12291 = vpow2.f32 %v6246_v10  ;;  %v6250_v26 = vmul.f32 1.442695, %v6152_v16  ;;  %v6401_v60 = vsel %vm6081_vm4, %v15704_v19, %v10249_v24  ;;  %v6483_v19 = vpack.c.bf16 %v6400_v57, %v6398_v3 }
 0x871   : > { %7779 = vmatpush1.bf16.msra.mxu1 %v11508_v42  ;;  %12293 = vpow2.f32 %v6248_v56  ;;  %v6252_v23 = vmul.f32 1.442695, %v6153_v17  ;;  %v5985_v31 = vpop.f32.mrb[24].mxu0  ;;  %v6484_v4 = vpack.c.bf16 %v6401_v60, %v6399_v9  ;;  %vm6088_vm11 = vcmp.gt.f32.partialorder %v15761_v34, 0.0 }
 0x872   : > { %7780 = vmatprep.subr.bf16.mxu1 %v11513_v55  ;;  %v12284_v53 = vpop.eup %12283  ;;  %12295 = vpow2.f32 %v6250_v26  ;;  %v15783_v18 = vadd.f32 %v5985_v31, %v15502_v47  ;;  %v5987_v35 = vpop.f32.mrb[25].mxu0  ;;  %vm6089_vm12 = vcmp.gt.f32.partialorder %v15766_v40, 0.0 }
 0x873   : > { %v12286_v0 = vpop.eup %12285  ;;  %12297 = vpow2.f32 %v6252_v23  ;;  %v15788_v52 = vadd.f32 %v5987_v35, %v15505_v39  ;;  %v5989_v2 = vpop.f32.mrb[26].mxu0  ;;  %6685 = vmatprep.mubr.bf16.mxu1 %v6484_v4  ;;  %v10250_v30 = vadd.f32 -1.0, %v12284_v53 }
 0x874   : > { %v12288_v25 = vpop.eup %12287  ;;  %v10251_v6 = vadd.f32 -1.0, %v12286_v0  ;;  %v6154_v20 = vmin.f32 %v15783_v18, 0.0  ;;  %v15793_v62 = vadd.f32 %v5989_v2, %v15502_v47  ;;  %v5991_v54 = vpop.f32.mrb[27].mxu0  ;;  %6686 = vmatmul.mubr.bf16.gmra.mrb[196].mxu1 %v6483_v19  ;;  %vm6090_vm13 = vcmp.gt.f32.partialorder %v15783_v18, 0.0 }
 0x875   : > { %7781 = vmatpush1.bf16.msra.mxu1 %v11511_v11  ;;  %v12290_v44 = vpop.eup %12289  ;;  %v10252_v32 = vadd.f32 -1.0, %v12288_v25  ;;  %v6155_v37 = vmin.f32 %v15788_v52, 0.0  ;;  %v15798_v14 = vadd.f32 %v5991_v54, %v15505_v39  ;;  %v6402_v22 = vsel %vm6082_vm6, %v15719_v48, %v10250_v30 }
 0x876   : > { %7782 = vmatprep.subr.bf16.mxu1 %v11516_v5  ;;  %v10253_v36 = vadd.f32 -1.0, %v12290_v44  ;;  %v6254_v7 = vmul.f32 1.442695, %v6154_v20  ;;  %v6156_v27 = vmin.f32 %v15793_v62, 0.0  ;;  %v6403_v42 = vsel %vm6083_vm5, %v15724_v21, %v10251_v6 }
 0x877   : > { %v6256_v33 = vmul.f32 1.442695, %v6155_v37  ;;  %v6157_v63 = vmin.f32 %v15798_v14, 0.0  ;;  %v6404_v50 = vsel %vm6084_vm7, %v15729_v61, %v10252_v32  ;;  %vm6091_vm14 = vcmp.gt.f32.partialorder %v15788_v52, 0.0 }
 0x878   : > { %12299 = vpow2.f32 %v6254_v7  ;;  %v6258_v1 = vmul.f32 1.442695, %v6156_v27  ;;  %v6405_v55 = vsel %vm6085_vm8, %v15734_v12, %v10253_v36  ;;  %v6485_v51 = vpack.c.bf16 %v6404_v50, %v6402_v22  ;;  %v11520_v12 = vld [vmem:[%s17619_s3 + $0xf0] ss:$8 sps:$4 sm:$0xff]   ;;  %s17576_s3 = sshll.u32 %s16375_s5, 8 }
 0x879   : > { %7783 = vmatpush1.bf16.msra.mxu1 %v11514_v8  ;;  %12301 = vpow2.f32 %v6256_v33  ;;  %v6260_v29 = vmul.f32 1.442695, %v6157_v63  ;;  %v5995_v41 = vpop.f32.mrb[28].mxu0  ;;  %v6486_v59 = vpack.c.bf16 %v6405_v55, %v6403_v42  ;;  %vm6092_vm15 = vcmp.gt.f32.partialorder %v15793_v62, 0.0 }
 0x87a   : > { %7784 = vmatprep.subr.bf16.mxu1 %v11519_v46  ;;  %v12292_v21 = vpop.eup %12291  ;;  %12303 = vpow2.f32 %v6258_v1  ;;  %v15815_v58 = vadd.f32 %v5995_v41, %v15502_v47  ;;  %v5997_v38 = vpop.f32.mrb[29].mxu0  ;;  %vm6093_vm0 = vcmp.gt.f32.partialorder %v15798_v14, 0.0 }
 0x87b   : > { %v12294_v11 = vpop.eup %12293  ;;  %12305 = vpow2.f32 %v6260_v29  ;;  %v15820_v48 = vadd.f32 %v5997_v38, %v15505_v39  ;;  %v5999_v24 = vpop.f32.mrb[30].mxu0  ;;  %6693 = vmatprep.mubr.bf16.mxu1 %v6486_v59  ;;  %v10254_v10 = vadd.f32 -1.0, %v12292_v21 }
 0x87c   : > { %v12296_v61 = vpop.eup %12295  ;;  %v10255_v16 = vadd.f32 -1.0, %v12294_v11  ;;  %v6158_v56 = vmin.f32 %v15815_v58, 0.0  ;;  %v15824_v17 = vadd.f32 %v5999_v24, %v15502_v47  ;;  %v6001_v9 = vpop.f32.mrb[31].mxu0  ;;  %6694 = vmatmul.mubr.bf16.gmra.mrb[200].mxu1 %v6485_v51  ;;  %vm6094_vm1 = vcmp.gt.f32.partialorder %v15815_v58, 0.0 }
 0x87d   : > { %7785 = vmatpush1.bf16.msra.mxu1 %v11517_v28  ;;  %v12298_v5 = vpop.eup %12297  ;;  %v10256_v26 = vadd.f32 -1.0, %v12296_v61  ;;  %v6159_v60 = vmin.f32 %v15820_v48, 0.0  ;;  %v15829_v3 = vadd.f32 %v6001_v9, %v15505_v39  ;;  %v6406_v0 = vsel %vm6086_vm9, %v15751_v43, %v10254_v10 }
 0x87e   : > { %7786 = vmatprep.subr.bf16.mxu1 %v11522_v49  ;;  %v10257_v23 = vadd.f32 -1.0, %v12298_v5  ;;  %v6262_v31 = vmul.f32 1.442695, %v6158_v56  ;;  %v6160_v4 = vmin.f32 %v15824_v17, 0.0  ;;  %v6407_v35 = vsel %vm6087_vm10, %v15756_v45, %v10255_v16 }
 0x87f   : > { %v6264_v57 = vmul.f32 1.442695, %v6159_v60  ;;  %v6161_v53 = vmin.f32 %v15829_v3, 0.0  ;;  %v6408_v30 = vsel %vm6088_vm11, %v15761_v34, %v10256_v26  ;;  %vm6095_vm2 = vcmp.gt.f32.partialorder %v15820_v48, 0.0 }
 0x880   : > { %12307 = vpow2.f32 %v6262_v31  ;;  %v6266_v19 = vmul.f32 1.442695, %v6160_v4  ;;  %v6409_v8 = vsel %vm6089_vm12, %v15766_v40, %v10257_v23  ;;  %v6487_v54 = vpack.c.bf16 %v6408_v30, %v6406_v0 }
 0x881   : > { %7787 = vmatpush1.bf16.msra.mxu1 %v11520_v12  ;;  %12309 = vpow2.f32 %v6264_v57  ;;  %v6268_v2 = vmul.f32 1.442695, %v6161_v53  ;;  %v6005_v46 = vpop.f32.mrb[32].mxu0  ;;  %v6488_v25 = vpack.c.bf16 %v6409_v8, %v6407_v35  ;;  %vm6096_vm3 = vcmp.gt.f32.partialorder %v15824_v17, 0.0 }
 0x882   : > { %v12300_v6 = vpop.eup %12299  ;;  %12311 = vpow2.f32 %v6266_v19  ;;  %v15844_v45 = vadd.f32 %v6005_v46, %v15502_v47  ;;  %v6007_v20 = vpop.f32.mrb[33].mxu0  ;;  %vm6097_vm4 = vcmp.gt.f32.partialorder %v15829_v3, 0.0 }
 0x883   : > { %v12302_v40 = vpop.eup %12301  ;;  %12313 = vpow2.f32 %v6268_v2  ;;  %v15848_v43 = vadd.f32 %v6007_v20, %v15505_v39  ;;  %v6009_v44 = vpop.f32.mrb[34].mxu0  ;;  %6701 = vmatprep.mubr.bf16.mxu1 %v6488_v25  ;;  %v10258_v37 = vadd.f32 -1.0, %v12300_v6 }
 0x884   : > { %v12304_v32 = vpop.eup %12303  ;;  %v10259_v28 = vadd.f32 -1.0, %v12302_v40  ;;  %v6162_v34 = vmin.f32 %v15844_v45, 0.0  ;;  %v15852_v36 = vadd.f32 %v6009_v44, %v15502_v47  ;;  %v6011_v7 = vpop.f32.mrb[35].mxu0  ;;  %6702 = vmatmul.mubr.bf16.gmra.mrb[204].mxu1 %v6487_v54  ;;  %vm6098_vm6 = vcmp.gt.f32.partialorder %v15844_v45, 0.0 }
 0x885   : > { %v12306_v27 = vpop.eup %12305  ;;  %v10260_v33 = vadd.f32 -1.0, %v12304_v32  ;;  %v6163_v63 = vmin.f32 %v15848_v43, 0.0  ;;  %v15857_v42 = vadd.f32 %v6011_v7, %v15505_v39  ;;  %v6410_v21 = vsel %vm6090_vm13, %v15783_v18, %v10258_v37 }
 0x886   : > { %v10261_v49 = vadd.f32 -1.0, %v12306_v27  ;;  %v6270_v1 = vmul.f32 1.442695, %v6162_v34  ;;  %v6164_v55 = vmin.f32 %v15852_v36, 0.0  ;;  %v6411_v41 = vsel %vm6091_vm14, %v15788_v52, %v10259_v28 }
 0x887   : > { %v6272_v22 = vmul.f32 1.442695, %v6163_v63  ;;  %v6165_v29 = vmin.f32 %v15857_v42, 0.0  ;;  %v6412_v11 = vsel %vm6092_vm15, %v15793_v62, %v10260_v33  ;;  %vm6099_vm5 = vcmp.gt.f32.partialorder %v15848_v43, 0.0 }
 0x888   : > { %12315 = vpow2.f32 %v6270_v1  ;;  %v6274_v59 = vmul.f32 1.442695, %v6164_v55  ;;  %v6413_v50 = vsel %vm6093_vm0, %v15798_v14, %v10261_v49  ;;  %v6489_v10 = vpack.c.bf16 %v6412_v11, %v6410_v21 }
 0x889   : > { %12317 = vpow2.f32 %v6272_v22  ;;  %v6276_v38 = vmul.f32 1.442695, %v6165_v29  ;;  %v6015_v51 = vpop.f32.mrb[36].mxu0  ;;  %v6490_v12 = vpack.c.bf16 %v6413_v50, %v6411_v41  ;;  %vm6100_vm7 = vcmp.gt.f32.partialorder %v15852_v36, 0.0 }
 0x88a   : > { %v12308_v24 = vpop.eup %12307  ;;  %12319 = vpow2.f32 %v6274_v59  ;;  %v15872_v52 = vadd.f32 %v6015_v51, %v15502_v47  ;;  %v6017_v61 = vpop.f32.mrb[37].mxu0  ;;  %vm6101_vm8 = vcmp.gt.f32.partialorder %v15857_v42, 0.0 }
 0x88b   : > { %v12310_v14 = vpop.eup %12309  ;;  %12321 = vpow2.f32 %v6276_v38  ;;  %v15876_v18 = vadd.f32 %v6017_v61, %v15505_v39  ;;  %v6019_v16 = vpop.f32.mrb[38].mxu0  ;;  %6709 = vmatprep.mubr.bf16.mxu1 %v6490_v12  ;;  %v10262_v9 = vadd.f32 -1.0, %v12308_v24 }
 0x88c   : > { %v12312_v56 = vpop.eup %12311  ;;  %v10263_v5 = vadd.f32 -1.0, %v12310_v14  ;;  %v6166_v62 = vmin.f32 %v15872_v52, 0.0  ;;  %v15880_v26 = vadd.f32 %v6019_v16, %v15502_v47  ;;  %v6021_v60 = vpop.f32.mrb[39].mxu0  ;;  %6710 = vmatmul.mubr.bf16.gmra.mrb[208].mxu1 %v6489_v10  ;;  %vm6102_vm9 = vcmp.gt.f32.partialorder %v15872_v52, 0.0 }
 0x88d   : > { %v12314_v23 = vpop.eup %12313  ;;  %v10264_v31 = vadd.f32 -1.0, %v12312_v56  ;;  %v6167_v4 = vmin.f32 %v15876_v18, 0.0  ;;  %v15885_v57 = vadd.f32 %v6021_v60, %v15505_v39  ;;  %v6414_v30 = vsel %vm6094_vm1, %v15815_v58, %v10262_v9 }
 0x88e   : > { %v10265_v53 = vadd.f32 -1.0, %v12314_v23  ;;  %v6278_v35 = vmul.f32 1.442695, %v6166_v62  ;;  %v6168_v19 = vmin.f32 %v15880_v26, 0.0  ;;  %v6415_v2 = vsel %vm6095_vm2, %v15820_v48, %v10263_v5 }
 0x88f   : > { %v6280_v8 = vmul.f32 1.442695, %v6167_v4  ;;  %v6169_v0 = vmin.f32 %v15885_v57, 0.0  ;;  %v6416_v40 = vsel %vm6096_vm3, %v15824_v17, %v10264_v31  ;;  %vm6103_vm10 = vcmp.gt.f32.partialorder %v15876_v18, 0.0 }
 0x890   : > { %12323 = vpow2.f32 %v6278_v35  ;;  %v6282_v46 = vmul.f32 1.442695, %v6168_v19  ;;  %v6417_v25 = vsel %vm6097_vm4, %v15829_v3, %v10265_v53  ;;  %v6491_v37 = vpack.c.bf16 %v6416_v40, %v6414_v30 }
 0x891   : > { %12325 = vpow2.f32 %v6280_v8  ;;  %v6284_v6 = vmul.f32 1.442695, %v6169_v0  ;;  %v6025_v20 = vpop.f32.mrb[40].mxu0  ;;  %v6492_v54 = vpack.c.bf16 %v6417_v25, %v6415_v2  ;;  %vm6104_vm11 = vcmp.gt.f32.partialorder %v15880_v26, 0.0 }
 0x892   : > { %v12316_v44 = vpop.eup %12315  ;;  %12327 = vpow2.f32 %v6282_v46  ;;  %v15900_v48 = vadd.f32 %v6025_v20, %v15502_v47  ;;  %v6027_v32 = vpop.f32.mrb[41].mxu0  ;;  %vm6105_vm12 = vcmp.gt.f32.partialorder %v15885_v57, 0.0  ;;  %v6836_v20 = vld [vmem:[%s17621_s6] sm:$0x3]  ;;  %s17623_s6 = sld [smem:[#allocation21_spill]] }
 0x893   : > { %v12318_v3 = vpop.eup %12317  ;;  %12329 = vpow2.f32 %v6284_v6  ;;  %v15904_v58 = vadd.f32 %v6027_v32, %v15505_v39  ;;  %v6029_v28 = vpop.f32.mrb[42].mxu0  ;;  %6717 = vmatprep.mubr.bf16.mxu1 %v6492_v54  ;;  %v10266_v7 = vadd.f32 -1.0, %v12316_v44 }
 0x894   : > { %v12320_v34 = vpop.eup %12319  ;;  %v10267_v27 = vadd.f32 -1.0, %v12318_v3  ;;  %v6170_v17 = vmin.f32 %v15900_v48, 0.0  ;;  %v15908_v33 = vadd.f32 %v6029_v28, %v15502_v47  ;;  %v6031_v63 = vpop.f32.mrb[43].mxu0  ;;  %6718 = vmatmul.mubr.bf16.gmra.mrb[212].mxu1 %v6491_v37  ;;  %vm6106_vm13 = vcmp.gt.f32.partialorder %v15900_v48, 0.0 }
 0x895   : > { %v12322_v49 = vpop.eup %12321  ;;  %v10268_v1 = vadd.f32 -1.0, %v12320_v34  ;;  %v6171_v55 = vmin.f32 %v15904_v58, 0.0  ;;  %v15913_v22 = vadd.f32 %v6031_v63, %v15505_v39  ;;  %v6418_v11 = vsel %vm6098_vm6, %v15844_v45, %v10266_v7 }
 0x896   : > { %v10269_v29 = vadd.f32 -1.0, %v12322_v49  ;;  %v6286_v41 = vmul.f32 1.442695, %v6170_v17  ;;  %v6172_v59 = vmin.f32 %v15908_v33, 0.0  ;;  %v6419_v38 = vsel %vm6099_vm5, %v15848_v43, %v10267_v27 }
 0x897   : > { %v6288_v50 = vmul.f32 1.442695, %v6171_v55  ;;  %v6173_v21 = vmin.f32 %v15913_v22, 0.0  ;;  %v6420_v14 = vsel %vm6100_vm7, %v15852_v36, %v10268_v1  ;;  %vm6107_vm14 = vcmp.gt.f32.partialorder %v15904_v58, 0.0 }
 0x898   : > { %12331 = vpow2.f32 %v6286_v41  ;;  %v6290_v51 = vmul.f32 1.442695, %v6172_v59  ;;  %v6421_v12 = vsel %vm6101_vm8, %v15857_v42, %v10269_v29  ;;  %v6493_v9 = vpack.c.bf16 %v6420_v14, %v6418_v11 }
 0x899   : > { %12333 = vpow2.f32 %v6288_v50  ;;  %v6292_v24 = vmul.f32 1.442695, %v6173_v21  ;;  %v6035_v61 = vpop.f32.mrb[44].mxu0  ;;  %v6494_v10 = vpack.c.bf16 %v6421_v12, %v6419_v38  ;;  %vm6108_vm15 = vcmp.gt.f32.partialorder %v15908_v33, 0.0 }
 0x89a   : > { %v12324_v16 = vpop.eup %12323  ;;  %12335 = vpow2.f32 %v6290_v51  ;;  %v15928_v43 = vadd.f32 %v6035_v61, %v15502_v47  ;;  %v6037_v56 = vpop.f32.mrb[45].mxu0  ;;  %vm6109_vm0 = vcmp.gt.f32.partialorder %v15913_v22, 0.0 }
 0x89b   : > { %v12326_v42 = vpop.eup %12325  ;;  %12337 = vpow2.f32 %v6292_v24  ;;  %v15932_v45 = vadd.f32 %v6037_v56, %v15505_v39  ;;  %v6039_v5 = vpop.f32.mrb[46].mxu0  ;;  %6725 = vmatprep.mubr.bf16.mxu1 %v6494_v10  ;;  %v10270_v60 = vadd.f32 -1.0, %v12324_v16 }
 0x89c   : > { %v12328_v62 = vpop.eup %12327  ;;  %v10271_v23 = vadd.f32 -1.0, %v12326_v42  ;;  %v6174_v36 = vmin.f32 %v15928_v43, 0.0  ;;  %v15936_v31 = vadd.f32 %v6039_v5, %v15502_v47  ;;  %v6041_v4 = vpop.f32.mrb[47].mxu0  ;;  %6726 = vmatmul.mubr.bf16.gmra.mrb[216].mxu1 %v6493_v9  ;;  %vm6110_vm1 = vcmp.gt.f32.partialorder %v15928_v43, 0.0 }
 0x89d   : > { %v12330_v53 = vpop.eup %12329  ;;  %v10272_v35 = vadd.f32 -1.0, %v12328_v62  ;;  %v6175_v19 = vmin.f32 %v15932_v45, 0.0  ;;  %v15941_v8 = vadd.f32 %v6041_v4, %v15505_v39  ;;  %v6422_v44 = vsel %vm6102_vm9, %v15872_v52, %v10270_v60 }
 0x89e   : > { %v10273_v0 = vadd.f32 -1.0, %v12330_v53  ;;  %v6294_v2 = vmul.f32 1.442695, %v6174_v36  ;;  %v6176_v46 = vmin.f32 %v15936_v31, 0.0  ;;  %v6423_v6 = vsel %vm6103_vm10, %v15876_v18, %v10271_v23 }
 0x89f   : > { %v6296_v25 = vmul.f32 1.442695, %v6175_v19  ;;  %v6177_v30 = vmin.f32 %v15941_v8, 0.0  ;;  %v6424_v28 = vsel %vm6104_vm11, %v15880_v26, %v10272_v35  ;;  %v15967_v26 = vrot.slane %v6836_v20, %v13182_v15 }
 0x8a0   : > { %12339 = vpow2.f32 %v6294_v2  ;;  %v6298_v54 = vmul.f32 1.442695, %v6176_v46  ;;  %v6425_v40 = vsel %vm6105_vm12, %v15885_v57, %v10273_v0  ;;  %v6495_v27 = vpack.c.bf16 %v6424_v28, %v6422_v44 }
 0x8a1   : > { %12341 = vpow2.f32 %v6296_v25  ;;  %v6300_v32 = vmul.f32 1.442695, %v6177_v30  ;;  %v6045_v37 = vpop.f32.mrb[48].mxu0  ;;  %v6496_v3 = vpack.c.bf16 %v6425_v40, %v6423_v6  ;;  %v15960_v57 = vrot.slane %v6836_v20, %v13179_v13 }
 0x8a2   : > { %v12332_v34 = vpop.eup %12331  ;;  %12343 = vpow2.f32 %v6298_v54  ;;  %v15957_v18 = vadd.f32 %v6045_v37, %v15502_v47  ;;  %v6047_v7 = vpop.f32.mrb[49].mxu0  ;;  %vm6111_vm2 = vcmp.gt.f32.partialorder %v15932_v45, 0.0  ;;  %vm6112_vm3 = vcmp.gt.f32.partialorder %v15936_v31, 0.0 }
 0x8a3   : > { %v12334_v17 = vpop.eup %12333  ;;  %12345 = vpow2.f32 %v6300_v32  ;;  %v15964_v52 = vadd.f32 %v6047_v7, %v15505_v39  ;;  %v6049_v63 = vpop.f32.mrb[50].mxu0  ;;  %6733 = vmatprep.mubr.bf16.mxu1 %v6496_v3  ;;  %v10274_v1 = vadd.f32 -1.0, %v12332_v34  ;;  %vm6113_vm4 = vcmp.gt.f32.partialorder %v15941_v8, 0.0 }
 0x8a4   : > { %v12336_v49 = vpop.eup %12335  ;;  %v10275_v55 = vadd.f32 -1.0, %v12334_v17  ;;  %v6178_v29 = vmin.f32 %v15957_v18, 0.0  ;;  %v15971_v41 = vadd.f32 %v6049_v63, %v15502_v47  ;;  %v6051_v59 = vpop.f32.mrb[51].mxu0  ;;  %6734 = vmatmul.mubr.bf16.gmra.mrb[220].mxu1 %v6495_v27  ;;  %vm6114_vm6 = vcmp.gt.f32.partialorder %v15957_v18, 0.0 }
 0x8a5   : > { %v12338_v50 = vpop.eup %12337  ;;  %v10276_v21 = vadd.f32 -1.0, %v12336_v49  ;;  %v6179_v38 = vmin.f32 %v15964_v52, 0.0  ;;  %v15976_v51 = vadd.f32 %v6051_v59, %v15505_v39  ;;  %v6426_v39 = vsel %vm6106_vm13, %v15900_v48, %v10274_v1 }
 0x8a6   : > { %v10277_v12 = vadd.f32 -1.0, %v12338_v50  ;;  %v6302_v11 = vmul.f32 1.442695, %v6178_v29  ;;  %v6180_v24 = vmin.f32 %v15971_v41, 0.0  ;;  %v6427_v10 = vsel %vm6107_vm14, %v15904_v58, %v10275_v55 }
 0x8a7   : > { %v6304_v47 = vmul.f32 1.442695, %v6179_v38  ;;  %v6181_v61 = vmin.f32 %v15976_v51, 0.0  ;;  %v6428_v5 = vsel %vm6108_vm15, %v15908_v33, %v10276_v21  ;;  %vm6115_vm5 = vcmp.gt.f32.partialorder %v15964_v52, 0.0 }
 0x8a8   : > { %12347 = vpow2.f32 %v6302_v11  ;;  %v6306_v14 = vmul.f32 1.442695, %v6180_v24  ;;  %v6429_v16 = vsel %vm6109_vm0, %v15913_v22, %v10277_v12  ;;  %v6497_v23 = vpack.c.bf16 %v6428_v5, %v6426_v39 }
 0x8a9   : > { %12349 = vpow2.f32 %v6304_v47  ;;  %v6308_v56 = vmul.f32 1.442695, %v6181_v61  ;;  %v6977_v9 = vpop.f32.mrb[52].mxu0  ;;  %v6498_v42 = vpack.c.bf16 %v6429_v16, %v6427_v10  ;;  %vm6116_vm7 = vcmp.gt.f32.partialorder %v15971_v41, 0.0 }
 0x8aa   : > { %v12340_v62 = vpop.eup %12339  ;;  %12351 = vpow2.f32 %v6306_v14  ;;  %v15991_v58 = vadd.f32 %v6977_v9, %v15960_v57  ;;  %v6979_v60 = vpop.f32.mrb[53].mxu0  ;;  %vm6117_vm8 = vcmp.gt.f32.partialorder %v15976_v51, 0.0 }
 0x8ab   : > { %v12342_v22 = vpop.eup %12341  ;;  %12353 = vpow2.f32 %v6308_v56  ;;  %v15995_v48 = vadd.f32 %v6979_v60, %v15967_v26  ;;  %6741 = vmatprep.mubr.bf16.mxu1 %v6498_v42  ;;  %v6981_v36 = vpop.f32.mrb[54].mxu0  ;;  %v10278_v53 = vadd.f32 -1.0, %v12340_v62 }
 0x8ac   : > { %v12344_v4 = vpop.eup %12343  ;;  %v10279_v35 = vadd.f32 -1.0, %v12342_v22  ;;  %v7200_v33 = vmin.f32 %v15991_v58, 0.0  ;;  %v15999_v19 = vadd.f32 %v6981_v36, %v15960_v57  ;;  %6742 = vmatmul.mubr.bf16.gmra.mrb[224].mxu1 %v6497_v23  ;;  %v6983_v0 = vpop.f32.mrb[55].mxu0  ;;  %vm7136_vm9 = vcmp.gt.f32.partialorder %v15991_v58, 0.0 }
 0x8ad   : > { %v12346_v2 = vpop.eup %12345  ;;  %v10280_v46 = vadd.f32 -1.0, %v12344_v4  ;;  %v7201_v25 = vmin.f32 %v15995_v48, 0.0  ;;  %v16004_v30 = vadd.f32 %v6983_v0, %v15967_v26  ;;  %v6430_v28 = vsel %vm6110_vm1, %v15928_v43, %v10278_v53  ;;  %v11523_v53 = vld [vmem:[%s17622_s1] ss:$8 sps:$4 sm:$0xff]  }
 0x8ae   : > { %v10281_v6 = vadd.f32 -1.0, %v12346_v2  ;;  %v7264_v20 = vmul.f32 1.442695, %v7200_v33  ;;  %v7202_v54 = vmin.f32 %v15999_v19, 0.0  ;;  %v6431_v32 = vsel %vm6111_vm2, %v15932_v45, %v10279_v35  ;;  %v11525_v35 = vld [vmem:[%s17622_s1 + $0x4] ss:$8 sps:$4 sm:$0xff]  }
 0x8af   : > { %v7266_v40 = vmul.f32 1.442695, %v7201_v25  ;;  %v7203_v44 = vmin.f32 %v16004_v30, 0.0  ;;  %v6432_v17 = vsel %vm6112_vm3, %v15936_v31, %v10280_v46  ;;  %vm7137_vm10 = vcmp.gt.f32.partialorder %v15995_v48, 0.0  ;;  %8569 = vmatprep.subr.bf16.mxu0 %v11525_v35 }
 0x8b0   : > { %12355 = vpow2.f32 %v7264_v20  ;;  %v7268_v37 = vmul.f32 1.442695, %v7202_v54  ;;  %v6433_v3 = vsel %vm6113_vm4, %v15941_v8, %v10281_v6  ;;  %v6499_v1 = vpack.c.bf16 %v6432_v17, %v6430_v28  ;;  %8570 = vmatpush1.bf16.msra.mxu0 %v11523_v53 }
 0x8b1   : > { %12357 = vpow2.f32 %v7266_v40  ;;  %v7270_v34 = vmul.f32 1.442695, %v7203_v44  ;;  %v6987_v7 = vpop.f32.mrb[56].mxu0  ;;  %v6500_v27 = vpack.c.bf16 %v6433_v3, %v6431_v32  ;;  %vm7138_vm11 = vcmp.gt.f32.partialorder %v15999_v19, 0.0  ;;  %v11526_v32 = vld [vmem:[%s17622_s1 + $0x10] ss:$8 sps:$4 sm:$0xff]  }
 0x8b2   : > { %v12348_v63 = vpop.eup %12347  ;;  %12359 = vpow2.f32 %v7268_v37  ;;  %v16019_v45 = vadd.f32 %v6987_v7, %v15960_v57  ;;  %v6989_v49 = vpop.f32.mrb[57].mxu0  ;;  %vm7139_vm12 = vcmp.gt.f32.partialorder %v16004_v30, 0.0  ;;  %v11528_v37 = vld [vmem:[%s17622_s1 + $0x14] ss:$8 sps:$4 sm:$0xff]  }
 0x8b3   : > { %v12350_v8 = vpop.eup %12349  ;;  %12361 = vpow2.f32 %v7270_v34  ;;  %v16024_v43 = vadd.f32 %v6989_v49, %v15967_v26  ;;  %6749 = vmatprep.mubr.bf16.mxu1 %v6500_v27  ;;  %v6991_v55 = vpop.f32.mrb[58].mxu0  ;;  %v10282_v31 = vadd.f32 -1.0, %v12348_v63  ;;  %8571 = vmatprep.subr.bf16.mxu0 %v11528_v37 }
 0x8b4   : > { %v12352_v29 = vpop.eup %12351  ;;  %v10283_v59 = vadd.f32 -1.0, %v12350_v8  ;;  %v7204_v50 = vmin.f32 %v16019_v45, 0.0  ;;  %v16028_v21 = vadd.f32 %v6991_v55, %v15960_v57  ;;  %6750 = vmatmul.mubr.bf16.gmra.mrb[228].mxu1 %v6499_v1  ;;  %v6993_v38 = vpop.f32.mrb[59].mxu0  ;;  %8572 = vmatpush1.bf16.msra.mxu0 %v11526_v32  ;;  %vm7140_vm13 = vcmp.gt.f32.partialorder %v16019_v45, 0.0 }
 0x8b5   : > { %v12354_v12 = vpop.eup %12353  ;;  %v10284_v11 = vadd.f32 -1.0, %v12352_v29  ;;  %v7205_v24 = vmin.f32 %v16024_v43, 0.0  ;;  %v16033_v47 = vadd.f32 %v6993_v38, %v15967_v26  ;;  %v6434_v5 = vsel %vm6114_vm6, %v15957_v18, %v10282_v31 }
 0x8b6   : > { %v10285_v61 = vadd.f32 -1.0, %v12354_v12  ;;  %v7272_v10 = vmul.f32 1.442695, %v7204_v50  ;;  %v7206_v14 = vmin.f32 %v16028_v21, 0.0  ;;  %v6435_v56 = vsel %vm6115_vm5, %v15964_v52, %v10283_v59 }
 0x8b7   : > { %v7274_v16 = vmul.f32 1.442695, %v7205_v24  ;;  %v7207_v39 = vmin.f32 %v16033_v47, 0.0  ;;  %v6436_v22 = vsel %vm6116_vm7, %v15971_v41, %v10284_v11  ;;  %vm7141_vm14 = vcmp.gt.f32.partialorder %v16024_v43, 0.0 }
 0x8b8   : > { %12363 = vpow2.f32 %v7272_v10  ;;  %v7276_v9 = vmul.f32 1.442695, %v7206_v14  ;;  %v6437_v42 = vsel %vm6117_vm8, %v15976_v51, %v10285_v61  ;;  %v6501_v4 = vpack.c.bf16 %v6436_v22, %v6434_v5 }
 0x8b9   : > { %12365 = vpow2.f32 %v7274_v16  ;;  %v7278_v62 = vmul.f32 1.442695, %v7207_v39  ;;  %v6997_v60 = vpop.f32.mrb[60].mxu0  ;;  %v6502_v23 = vpack.c.bf16 %v6437_v42, %v6435_v56  ;;  %vm7142_vm15 = vcmp.gt.f32.partialorder %v16028_v21, 0.0 }
 0x8ba   : > { %v12356_v36 = vpop.eup %12355  ;;  %12367 = vpow2.f32 %v7276_v9  ;;  %v16051_v52 = vadd.f32 %v6997_v60, %v15960_v57  ;;  %v6999_v51 = vpop.f32.mrb[61].mxu0  ;;  %v11529_v60 = vld [vmem:[%s17622_s1 + $0x20] ss:$8 sps:$4 sm:$0xff]   ;;  %vm7143_vm0 = vcmp.gt.f32.partialorder %v16033_v47, 0.0 }
 0x8bb   : > { %v12358_v18 = vpop.eup %12357  ;;  %v10325_v33 = vadd.f32 -1.0, %v12356_v36  ;;  %12369 = vpow2.f32 %v7278_v62  ;;  %v16057_v0 = vadd.f32 %v6999_v51, %v15967_v26  ;;  %6757 = vmatprep.mubr.bf16.mxu1 %v6502_v23  ;;  %v7001_v41 = vpop.f32.mrb[62].mxu0  ;;  %v11531_v51 = vld [vmem:[%s17622_s1 + $0x24] ss:$8 sps:$4 sm:$0xff]  }
 0x8bc   : > { %v12360_v2 = vpop.eup %12359  ;;  %v10326_v46 = vadd.f32 -1.0, %v12358_v18  ;;  %v7208_v25 = vmin.f32 %v16051_v52, 0.0  ;;  %v16062_v6 = vadd.f32 %v7001_v41, %v15960_v57  ;;  %6758 = vmatmul.mubr.bf16.gmra.mrb[232].mxu1 %v6501_v4  ;;  %v7003_v20 = vpop.f32.mrb[63].mxu0  ;;  %8573 = vmatprep.subr.bf16.mxu0 %v11531_v51  ;;  %vm7144_vm2 = vcmp.gt.f32.partialorder %v16051_v52, 0.0 }
 0x8bd   : > { %v12362_v54 = vpop.eup %12361  ;;  %v10327_v40 = vadd.f32 -1.0, %v12360_v2  ;;  %v7209_v44 = vmin.f32 %v16057_v0, 0.0  ;;  %v7456_v3 = vsel %vm7136_vm9, %v15991_v58, %v10325_v33  ;;  %v16075_v63 = vadd.f32 %v7003_v20, %v15967_v26  ;;  %8574 = vmatpush1.bf16.msra.mxu0 %v11529_v60 }
 0x8be   : > { %v10328_v28 = vadd.f32 -1.0, %v12362_v54  ;;  %v7280_v34 = vmul.f32 1.442695, %v7208_v25  ;;  %v7210_v7 = vmin.f32 %v16062_v6, 0.0  ;;  %v7457_v49 = vsel %vm7137_vm10, %v15995_v48, %v10326_v46 }
 0x8bf   : > { %v7458_v27 = vsel %vm7138_vm11, %v15999_v19, %v10327_v40  ;;  %v7282_v17 = vmul.f32 1.442695, %v7209_v44  ;;  %v7211_v55 = vmin.f32 %v16075_v63, 0.0  ;;  %vm7146_vm1 = vcmp.gt.f32.partialorder %v16062_v6, 0.0 }
 0x8c0   : > { %v7553_v1 = vpack.c.bf16 %v7458_v27, %v7456_v3  ;;  %12371 = vpow2.f32 %v7280_v34  ;;  %v7284_v58 = vmul.f32 1.442695, %v7210_v7  ;;  %v7459_v8 = vsel %vm7139_vm12, %v16004_v30, %v10328_v28  ;;  %v11532_v7 = vld [vmem:[%s17622_s1 + $0x30] ss:$8 sps:$4 sm:$0xff]  }
 0x8c1   : > { %12373 = vpow2.f32 %v7282_v17  ;;  %v7007_v19 = vpop.f32.mrb[64].mxu0  ;;  %v7554_v29 = vpack.c.bf16 %v7459_v8, %v7457_v49  ;;  %v7286_v38 = vmul.f32 1.442695, %v7211_v55  ;;  %vm7145_vm3 = vcmp.gt.f32.partialorder %v16057_v0, 0.0 }
 0x8c2   : > { %v12364_v31 = vpop.eup %12363  ;;  %12375 = vpow2.f32 %v7284_v58  ;;  %v16085_v59 = vadd.f32 %v7007_v19, %v15960_v57  ;;  %v7009_v48 = vpop.f32.mrb[65].mxu0  ;;  %v11534_v58 = vld [vmem:[%s17622_s1 + $0x34] ss:$8 sps:$4 sm:$0xff]   ;;  %vm7147_vm4 = vcmp.gt.f32.partialorder %v16075_v63, 0.0 }
 0x8c3   : > { %v12366_v50 = vpop.eup %12365  ;;  %v16090_v30 = vadd.f32 %v7009_v48, %v15967_v26  ;;  %v7011_v12 = vpop.f32.mrb[66].mxu0  ;;  %7788 = vmatprep.mubr.bf16.mxu1 %v7554_v29  ;;  %v10329_v39 = vadd.f32 -1.0, %v12364_v31  ;;  %12377 = vpow2.f32 %v7286_v38  ;;  %8575 = vmatprep.subr.bf16.mxu0 %v11534_v58 }
 0x8c4   : > { %v12368_v11 = vpop.eup %12367  ;;  %v10330_v24 = vadd.f32 -1.0, %v12366_v50  ;;  %v7212_v61 = vmin.f32 %v16085_v59, 0.0  ;;  %v16095_v10 = vadd.f32 %v7011_v12, %v15960_v57  ;;  %v7013_v14 = vpop.f32.mrb[67].mxu0  ;;  %7789 = vmatmul.mubr.bf16.vlgmr.msra.gmra.mrb[236].mxu1 %v7553_v1  ;;  %8576 = vmatpush1.bf16.msra.mxu0 %v11532_v7  ;;  %vm7148_vm5 = vcmp.gt.f32.partialorder %v16085_v59, 0.0 }
 0x8c5   : > { %v12370_v16 = vpop.eup %12369  ;;  %v10331_v56 = vadd.f32 -1.0, %v12368_v11  ;;  %v7213_v9 = vmin.f32 %v16090_v30, 0.0  ;;  %v16102_v22 = vadd.f32 %v7013_v14, %v15967_v26  ;;  %v7460_v2 = vsel %vm7140_vm13, %v16019_v45, %v10329_v39 }
 0x8c6   : > { %v10332_v42 = vadd.f32 -1.0, %v12370_v16  ;;  %v7288_v5 = vmul.f32 1.442695, %v7212_v61  ;;  %v7214_v62 = vmin.f32 %v16095_v10, 0.0  ;;  %v7461_v36 = vsel %vm7141_vm14, %v16024_v43, %v10330_v24 }
 0x8c7   : > { %v7290_v23 = vmul.f32 1.442695, %v7213_v9  ;;  %v7462_v35 = vsel %vm7142_vm15, %v16028_v21, %v10331_v56  ;;  %v7215_v18 = vmin.f32 %v16102_v22, 0.0  ;;  %vm7150_vm6 = vcmp.gt.f32.partialorder %v16095_v10, 0.0 }
 0x8c8   : > { %12379 = vpow2.f32 %v7288_v5  ;;  %v7292_v4 = vmul.f32 1.442695, %v7214_v62  ;;  %v7463_v53 = vsel %vm7143_vm0, %v16033_v47, %v10332_v42  ;;  %v7555_v25 = vpack.c.bf16 %v7462_v35, %v7460_v2 }
 0x8c9   : > { %12381 = vpow2.f32 %v7290_v23  ;;  %v7017_v33 = vpop.f32.mrb[68].mxu0  ;;  %v7556_v41 = vpack.c.bf16 %v7463_v53, %v7461_v36  ;;  %v7294_v20 = vmul.f32 1.442695, %v7215_v18  ;;  %v11535_v36 = vld [vmem:[%s17622_s1 + $0x40] ss:$8 sps:$4 sm:$0xff]   ;;  %vm7149_vm7 = vcmp.gt.f32.partialorder %v16090_v30, 0.0 }
 0x8ca   : > { %v12372_v43 = vpop.eup %12371  ;;  %12383 = vpow2.f32 %v7292_v4  ;;  %v16117_v46 = vadd.f32 %v7017_v33, %v15960_v57  ;;  %v7019_v47 = vpop.f32.mrb[69].mxu0  ;;  %v11537_v18 = vld [vmem:[%s17622_s1 + $0x44] ss:$8 sps:$4 sm:$0xff]   ;;  %vm7151_vm8 = vcmp.gt.f32.partialorder %v16102_v22, 0.0 }
 0x8cb   : > { %v12374_v21 = vpop.eup %12373  ;;  %v16120_v54 = vadd.f32 %v7019_v47, %v15967_v26  ;;  %v7021_v40 = vpop.f32.mrb[70].mxu0  ;;  %7798 = vmatprep.mubr.bf16.mxu1 %v7556_v41  ;;  %v10333_v45 = vadd.f32 -1.0, %v12372_v43  ;;  %12385 = vpow2.f32 %v7294_v20  ;;  %8577 = vmatprep.subr.bf16.mxu0 %v11537_v18 }
 0x8cc   : > { %v12376_v44 = vpop.eup %12375  ;;  %v7216_v32 = vmin.f32 %v16117_v46, 0.0  ;;  %v16124_v37 = vadd.f32 %v7021_v40, %v15960_v57  ;;  %v7023_v3 = vpop.f32.mrb[71].mxu0  ;;  %7799 = vmatmul.mubr.bf16.gmra.mrb[240].mxu1 %v7555_v25  ;;  %v10334_v27 = vadd.f32 -1.0, %v12374_v21  ;;  %8578 = vmatpush1.bf16.msra.mxu0 %v11535_v36  ;;  %vm7152_vm10 = vcmp.gt.f32.partialorder %v16117_v46, 0.0 }
 0x8cd   : > { %v10335_v28 = vadd.f32 -1.0, %v12376_v44  ;;  %v7217_v34 = vmin.f32 %v16120_v54, 0.0  ;;  %v16131_v1 = vadd.f32 %v7023_v3, %v15967_v26  ;;  %v12378_v8 = vpop.eup %12377  ;;  %v7464_v48 = vsel %vm7144_vm2, %v16051_v52, %v10333_v45 }
 0x8ce   : > { %v7296_v17 = vmul.f32 1.442695, %v7216_v32  ;;  %v7218_v49 = vmin.f32 %v16124_v37, 0.0  ;;  %v10336_v29 = vadd.f32 -1.0, %v12378_v8  ;;  %v7465_v61 = vsel %vm7145_vm3, %v16057_v0, %v10334_v27 }
 0x8cf   : > { %v7298_v55 = vmul.f32 1.442695, %v7217_v34  ;;  %v7466_v19 = vsel %vm7146_vm1, %v16062_v6, %v10335_v28  ;;  %v7219_v50 = vmin.f32 %v16131_v1, 0.0  ;;  %vm7154_vm9 = vcmp.gt.f32.partialorder %v16124_v37, 0.0 }
 0x8d0   : > { %12387 = vpow2.f32 %v7296_v17  ;;  %v7300_v31 = vmul.f32 1.442695, %v7218_v49  ;;  %v7557_v12 = vpack.c.bf16 %v7466_v19, %v7464_v48  ;;  %v7467_v52 = vsel %vm7147_vm4, %v16075_v63, %v10336_v29  ;;  %v11538_v19 = vld [vmem:[%s17622_s1 + $0x50] ss:$8 sps:$4 sm:$0xff]  }
 0x8d1   : > { %12389 = vpow2.f32 %v7298_v55  ;;  %v7027_v38 = vpop.f32.mrb[72].mxu0  ;;  %v7302_v16 = vmul.f32 1.442695, %v7219_v50  ;;  %v7558_v9 = vpack.c.bf16 %v7467_v52, %v7465_v61  ;;  %vm7153_vm11 = vcmp.gt.f32.partialorder %v16120_v54, 0.0 }
 0x8d2   : > { %v12380_v11 = vpop.eup %12379  ;;  %12391 = vpow2.f32 %v7300_v31  ;;  %v16141_v24 = vadd.f32 %v7027_v38, %v15960_v57  ;;  %v7029_v6 = vpop.f32.mrb[73].mxu0  ;;  %v11540_v38 = vld [vmem:[%s17622_s1 + $0x54] ss:$8 sps:$4 sm:$0xff]   ;;  %vm7155_vm12 = vcmp.gt.f32.partialorder %v16131_v1, 0.0 }
 0x8d3   : > { %v12382_v14 = vpop.eup %12381  ;;  %v16148_v39 = vadd.f32 %v7029_v6, %v15967_v26  ;;  %v7031_v56 = vpop.f32.mrb[74].mxu0  ;;  %v10337_v5 = vadd.f32 -1.0, %v12380_v11  ;;  %12393 = vpow2.f32 %v7302_v16  ;;  %7808 = vmatprep.mubr.bf16.mxu1 %v7558_v9  ;;  %8579 = vmatprep.subr.bf16.mxu0 %v11540_v38 }
 0x8d4   : > { %v12384_v42 = vpop.eup %12383  ;;  %v7220_v62 = vmin.f32 %v16141_v24, 0.0  ;;  %v16152_v60 = vadd.f32 %v7031_v56, %v15960_v57  ;;  %v7033_v23 = vpop.f32.mrb[75].mxu0  ;;  %v10338_v51 = vadd.f32 -1.0, %v12382_v14  ;;  %7809 = vmatmul.mubr.bf16.gmra.mrb[244].mxu1 %v7557_v12  ;;  %8580 = vmatpush1.bf16.msra.mxu0 %v11538_v19  ;;  %vm7156_vm13 = vcmp.gt.f32.partialorder %v16141_v24, 0.0 }
 0x8d5   : > { %v10339_v0 = vadd.f32 -1.0, %v12384_v42  ;;  %v7221_v63 = vmin.f32 %v16148_v39, 0.0  ;;  %v16159_v35 = vadd.f32 %v7033_v23, %v15967_v26  ;;  %v12386_v33 = vpop.eup %12385  ;;  %v7468_v25 = vsel %vm7148_vm5, %v16085_v59, %v10337_v5 }
 0x8d6   : > { %v7304_v4 = vmul.f32 1.442695, %v7220_v62  ;;  %v7222_v53 = vmin.f32 %v16152_v60, 0.0  ;;  %v10340_v43 = vadd.f32 -1.0, %v12386_v33  ;;  %v7469_v32 = vsel %vm7149_vm7, %v16090_v30, %v10338_v51 }
 0x8d7   : > { %v7306_v41 = vmul.f32 1.442695, %v7221_v63  ;;  %v7470_v2 = vsel %vm7150_vm6, %v16095_v10, %v10339_v0  ;;  %v7223_v21 = vmin.f32 %v16159_v35, 0.0  ;;  %vm7158_vm14 = vcmp.gt.f32.partialorder %v16152_v60, 0.0 }
 0x8d8   : > { %12395 = vpow2.f32 %v7304_v4  ;;  %v7308_v47 = vmul.f32 1.442695, %v7222_v53  ;;  %v7559_v40 = vpack.c.bf16 %v7470_v2, %v7468_v25  ;;  %v7471_v59 = vsel %vm7151_vm8, %v16102_v22, %v10340_v43 }
 0x8d9   : > { %v7037_v20 = vpop.f32.mrb[76].mxu0  ;;  %v7310_v28 = vmul.f32 1.442695, %v7223_v21  ;;  %v7560_v27 = vpack.c.bf16 %v7471_v59, %v7469_v32  ;;  %vm7157_vm15 = vcmp.gt.f32.partialorder %v16148_v39, 0.0  ;;  %vm7159_vm0 = vcmp.gt.f32.partialorder %v16159_v35, 0.0 }
 0x8da   : > { %v12388_v44 = vpop.eup %12387  ;;  %12397 = vpow2.f32 %v7308_v47  ;;  %v16169_v45 = vadd.f32 %v7037_v20, %v15960_v57  ;;  %v7039_v10 = vpop.f32.mrb[77].mxu0 }
 0x8db   : > { %v12390_v3 = vpop.eup %12389  ;;  %v16174_v34 = vadd.f32 %v7039_v10, %v15967_v26  ;;  %v7041_v7 = vpop.f32.mrb[78].mxu0  ;;  %v10341_v49 = vadd.f32 -1.0, %v12388_v44  ;;  %12399 = vpow2.f32 %v7306_v41  ;;  %7818 = vmatprep.mubr.bf16.mxu1 %v7560_v27  ;;  %v11543_v41 = vld [vmem:[%s17622_s1 + $0x64] ss:$8 sps:$4 sm:$0xff]  }
 0x8dc   : > { %v12392_v17 = vpop.eup %12391  ;;  %v7224_v58 = vmin.f32 %v16169_v45, 0.0  ;;  %v16178_v8 = vadd.f32 %v7041_v7, %v15960_v57  ;;  %v7043_v30 = vpop.f32.mrb[79].mxu0  ;;  %12401 = vpow2.f32 %v7310_v28  ;;  %v10342_v29 = vadd.f32 -1.0, %v12390_v3  ;;  %7819 = vmatmul.mubr.bf16.gmra.mrb[248].mxu1 %v7559_v40  ;;  %8581 = vmatprep.subr.bf16.mxu0 %v11543_v41 }
 0x8dd   : > { %v10343_v22 = vadd.f32 -1.0, %v12392_v17  ;;  %v7225_v55 = vmin.f32 %v16174_v34, 0.0  ;;  %v16185_v50 = vadd.f32 %v7043_v30, %v15967_v26  ;;  %v12394_v12 = vpop.eup %12393  ;;  %v7472_v14 = vsel %vm7152_vm10, %v16117_v46, %v10341_v49 }
 0x8de   : > { %v7312_v31 = vmul.f32 1.442695, %v7224_v58  ;;  %v7226_v48 = vmin.f32 %v16178_v8, 0.0  ;;  %v10344_v61 = vadd.f32 -1.0, %v12394_v12  ;;  %v7473_v46 = vsel %vm7153_vm11, %v16120_v54, %v10342_v29 }
 0x8df   : > { %v7314_v11 = vmul.f32 1.442695, %v7225_v55  ;;  %v7474_v6 = vsel %vm7154_vm9, %v16124_v37, %v10343_v22  ;;  %v7227_v16 = vmin.f32 %v16185_v50, 0.0  ;;  %vm7160_vm1 = vcmp.gt.f32.partialorder %v16169_v45, 0.0 }
 0x8e0   : > { %12403 = vpow2.f32 %v7312_v31  ;;  %v7316_v52 = vmul.f32 1.442695, %v7226_v48  ;;  %v7561_v9 = vpack.c.bf16 %v7474_v6, %v7472_v14  ;;  %v7475_v62 = vsel %vm7155_vm12, %v16131_v1, %v10344_v61  ;;  %v11541_v1 = vld [vmem:[%s17622_s1 + $0x60] ss:$8 sps:$4 sm:$0xff]   ;;  %v11544_v6 = vld [vmem:[%s17622_s1 + $0x70] ss:$8 sps:$4 sm:$0xff]  }
 0x8e1   : > { %12405 = vpow2.f32 %v7314_v11  ;;  %v7047_v56 = vpop.f32.mrb[80].mxu0  ;;  %v7318_v0 = vmul.f32 1.442695, %v7227_v16  ;;  %v7562_v51 = vpack.c.bf16 %v7475_v62, %v7473_v46  ;;  %8582 = vmatpush1.bf16.msra.mxu0 %v11541_v1  ;;  %vm7162_vm2 = vcmp.gt.f32.partialorder %v16178_v8, 0.0  ;;  %v11546_v61 = vld [vmem:[%s17622_s1 + $0x74] ss:$8 sps:$4 sm:$0xff]  }
 0x8e2   : > { %v12396_v42 = vpop.eup %12395  ;;  %12407 = vpow2.f32 %v7316_v52  ;;  %v16197_v5 = vadd.f32 %v7047_v56, %v15960_v57  ;;  %v7049_v37 = vpop.f32.mrb[81].mxu0  ;;  %8583 = vmatprep.subr.bf16.mxu0 %v11546_v61  ;;  %vm7161_vm3 = vcmp.gt.f32.partialorder %v16174_v34, 0.0  ;;  %vm7163_vm4 = vcmp.gt.f32.partialorder %v16185_v50, 0.0 }
 0x8e3   : > { %v10345_v23 = vadd.f32 -1.0, %v12396_v42  ;;  %v16204_v63 = vadd.f32 %v7049_v37, %v15967_v26  ;;  %v7051_v36 = vpop.f32.mrb[82].mxu0  ;;  %12409 = vpow2.f32 %v7318_v0  ;;  %7828 = vmatprep.mubr.bf16.mxu1 %v7562_v51 }
 0x8e4   : > { %v12398_v4 = vpop.eup %12397  ;;  %v7228_v53 = vmin.f32 %v16197_v5, 0.0  ;;  %v16208_v18 = vadd.f32 %v7051_v36, %v15960_v57  ;;  %v7053_v33 = vpop.f32.mrb[83].mxu0  ;;  %7829 = vmatmul.mubr.bf16.gmra.mrb[252].mxu1 %v7561_v9  ;;  %vm7164_vm6 = vcmp.gt.f32.partialorder %v16197_v5, 0.0 }
 0x8e5   : > { %v10347_v54 = vadd.f32 -1.0, %v12398_v4  ;;  %v12400_v2 = vpop.eup %12399  ;;  %v7229_v47 = vmin.f32 %v16204_v63, 0.0  ;;  %v7476_v20 = vsel %vm7156_vm13, %v16141_v24, %v10345_v23  ;;  %v16219_v44 = vadd.f32 %v7053_v33, %v15967_v26  ;;  %8584 = vmatpush1.bf16.msra.mxu0 %v11544_v6 }
 0x8e6   : > { %v7320_v43 = vmul.f32 1.442695, %v7228_v53  ;;  %v7230_v25 = vmin.f32 %v16208_v18, 0.0  ;;  %v12402_v21 = vpop.eup %12401  ;;  %v10346_v3 = vadd.f32 -1.0, %v12400_v2  ;;  %vm7165_vm5 = vcmp.gt.f32.partialorder %v16204_v63, 0.0 }
 0x8e7   : > { %v7478_v40 = vsel %vm7158_vm14, %v16152_v60, %v10347_v54  ;;  %v10348_v32 = vadd.f32 -1.0, %v12402_v21  ;;  %v7322_v59 = vmul.f32 1.442695, %v7229_v47  ;;  %v7231_v7 = vmin.f32 %v16219_v44, 0.0 }
 0x8e8   : > { %v7563_v10 = vpack.c.bf16 %v7478_v40, %v7476_v20  ;;  %12411 = vpow2.f32 %v7320_v43  ;;  %v7324_v28 = vmul.f32 1.442695, %v7230_v25  ;;  %v7477_v11 = vsel %vm7157_vm15, %v16148_v39, %v10346_v3  ;;  %v11549_v40 = vld [vmem:[%s17622_s1 + $0x84] ss:$8 sps:$4 sm:$0xff]  }
 0x8e9   : > { %v7057_v27 = vpop.f32.mrb[84].mxu0  ;;  %12413 = vpow2.f32 %v7322_v59  ;;  %v7326_v30 = vmul.f32 1.442695, %v7231_v7  ;;  %v7479_v48 = vsel %vm7159_vm0, %v16159_v35, %v10348_v32  ;;  %vm7166_vm7 = vcmp.gt.f32.partialorder %v16208_v18, 0.0  ;;  %8585 = vmatprep.subr.bf16.mxu0 %v11549_v40 }
 0x8ea   : > { %v12404_v17 = vpop.eup %12403  ;;  %v16225_v24 = vadd.f32 %v7057_v27, %v15960_v57  ;;  %v7059_v60 = vpop.f32.mrb[85].mxu0  ;;  %12415 = vpow2.f32 %v7324_v28  ;;  %v7564_v37 = vpack.c.bf16 %v7479_v48, %v7477_v11  ;;  %vm7167_vm8 = vcmp.gt.f32.partialorder %v16219_v44, 0.0 }
 0x8eb   : > { %v12406_v49 = vpop.eup %12405  ;;  %v10349_v58 = vadd.f32 -1.0, %v12404_v17  ;;  %v16228_v22 = vadd.f32 %v7059_v60, %v15967_v26  ;;  %v7061_v55 = vpop.f32.mrb[86].mxu0  ;;  %12417 = vpow2.f32 %v7326_v30 }
 0x8ec   : > { %v12408_v19 = vpop.eup %12407  ;;  %v7232_v29 = vmin.f32 %v16225_v24, 0.0  ;;  %v16233_v31 = vadd.f32 %v7061_v55, %v15960_v57  ;;  %v7063_v38 = vpop.f32.mrb[87].mxu0  ;;  %v10350_v52 = vadd.f32 -1.0, %v12406_v49  ;;  %7838 = vmatprep.mubr.bf16.mxu1 %v7564_v37  ;;  %vm7168_vm9 = vcmp.gt.f32.partialorder %v16225_v24, 0.0 }
 0x8ed   : > { %v10351_v12 = vadd.f32 -1.0, %v12408_v19  ;;  %v7233_v16 = vmin.f32 %v16228_v22, 0.0  ;;  %v12410_v9 = vpop.eup %12409  ;;  %v7480_v35 = vsel %vm7160_vm1, %v16169_v45, %v10349_v58  ;;  %v16249_v46 = vadd.f32 %v7063_v38, %v15967_v26  ;;  %7839 = vmatmul.mubr.bf16.gmra.mrb[0].mxu1 %v7563_v10 }
 0x8ee   : > { %v7328_v14 = vmul.f32 1.442695, %v7232_v29  ;;  %v7234_v56 = vmin.f32 %v16233_v31, 0.0  ;;  %v10352_v62 = vadd.f32 -1.0, %v12410_v9  ;;  %v7481_v53 = vsel %vm7161_vm3, %v16174_v34, %v10350_v52 }
 0x8ef   : > { %v7482_v42 = vsel %vm7162_vm2, %v16178_v8, %v10351_v12  ;;  %v7330_v23 = vmul.f32 1.442695, %v7233_v16  ;;  %v7235_v45 = vmin.f32 %v16249_v46, 0.0  ;;  %vm7169_vm10 = vcmp.gt.f32.partialorder %v16228_v22, 0.0 }
 0x8f0   : > { %v7565_v39 = vpack.c.bf16 %v7482_v42, %v7480_v35  ;;  %12419 = vpow2.f32 %v7328_v14  ;;  %v7332_v0 = vmul.f32 1.442695, %v7234_v56  ;;  %v7483_v33 = vsel %vm7163_vm4, %v16185_v50, %v10352_v62  ;;  %v11547_v50 = vld [vmem:[%s17622_s1 + $0x80] ss:$8 sps:$4 sm:$0xff]   ;;  %v11552_v42 = vld [vmem:[%s17622_s1 + $0x94] ss:$8 sps:$4 sm:$0xff]  }
 0x8f1   : > { %v7067_v36 = vpop.f32.mrb[88].mxu0  ;;  %12421 = vpow2.f32 %v7330_v23  ;;  %v7334_v1 = vmul.f32 1.442695, %v7235_v45  ;;  %v7566_v21 = vpack.c.bf16 %v7483_v33, %v7481_v53  ;;  %8586 = vmatpush1.bf16.msra.mxu0 %v11547_v50  ;;  %vm7170_vm11 = vcmp.gt.f32.partialorder %v16233_v31, 0.0 }
 0x8f2   : > { %v12412_v8 = vpop.eup %12411  ;;  %v16255_v51 = vadd.f32 %v7067_v36, %v15960_v57  ;;  %v7069_v4 = vpop.f32.mrb[89].mxu0  ;;  %12423 = vpow2.f32 %v7332_v0  ;;  %8587 = vmatprep.subr.bf16.mxu0 %v11552_v42  ;;  %vm7171_vm12 = vcmp.gt.f32.partialorder %v16249_v46, 0.0 }
 0x8f3   : > { %v10353_v54 = vadd.f32 -1.0, %v12412_v8  ;;  %v16260_v41 = vadd.f32 %v7069_v4, %v15967_v26  ;;  %v7071_v2 = vpop.f32.mrb[90].mxu0  ;;  %v12414_v43 = vpop.eup %12413  ;;  %12425 = vpow2.f32 %v7334_v1  ;;  %7848 = vmatprep.mubr.bf16.mxu1 %v7566_v21 }
 0x8f4   : > { %v7236_v47 = vmin.f32 %v16255_v51, 0.0  ;;  %v16264_v25 = vadd.f32 %v7071_v2, %v15960_v57  ;;  %v7073_v20 = vpop.f32.mrb[91].mxu0  ;;  %v12416_v34 = vpop.eup %12415  ;;  %v10354_v10 = vadd.f32 -1.0, %v12414_v43  ;;  %vm7172_vm13 = vcmp.gt.f32.partialorder %v16255_v51, 0.0 }
 0x8f5   : > { %v10355_v32 = vadd.f32 -1.0, %v12416_v34  ;;  %v7237_v3 = vmin.f32 %v16260_v41, 0.0  ;;  %v12418_v28 = vpop.eup %12417  ;;  %v7484_v7 = vsel %vm7164_vm6, %v16197_v5, %v10353_v54  ;;  %v16275_v17 = vadd.f32 %v7073_v20, %v15967_v26  ;;  %7849 = vmatmul.mubr.bf16.gmra.mrb[4].mxu1 %v7565_v39 }
 0x8f6   : > { %v7336_v59 = vmul.f32 1.442695, %v7236_v47  ;;  %v7238_v27 = vmin.f32 %v16264_v25, 0.0  ;;  %v10356_v49 = vadd.f32 -1.0, %v12418_v28  ;;  %vm7173_vm14 = vcmp.gt.f32.partialorder %v16260_v41, 0.0 }
 0x8f7   : > { %v7486_v60 = vsel %vm7166_vm7, %v16208_v18, %v10355_v32  ;;  %v7338_v58 = vmul.f32 1.442695, %v7237_v3  ;;  %v7239_v5 = vmin.f32 %v16275_v17, 0.0  ;;  %v7485_v18 = vsel %vm7165_vm5, %v16204_v63, %v10354_v10 }
 0x8f8   : > { %12427 = vpow2.f32 %v7336_v59  ;;  %v7567_v30 = vpack.c.bf16 %v7486_v60, %v7484_v7  ;;  %v7340_v55 = vmul.f32 1.442695, %v7238_v27  ;;  %v7487_v12 = vsel %vm7167_vm8, %v16219_v44, %v10356_v49  ;;  %v11550_v44 = vld [vmem:[%s17622_s1 + $0x90] ss:$8 sps:$4 sm:$0xff]   ;;  %v11555_v27 = vld [vmem:[%s17622_s1 + $0xa4] ss:$8 sps:$4 sm:$0xff]  }
 0x8f9   : > { %v7077_v19 = vpop.f32.mrb[92].mxu0  ;;  %12429 = vpow2.f32 %v7338_v58  ;;  %v7342_v6 = vmul.f32 1.442695, %v7239_v5  ;;  %v7568_v9 = vpack.c.bf16 %v7487_v12, %v7485_v18  ;;  %8588 = vmatpush1.bf16.msra.mxu0 %v11550_v44  ;;  %vm7174_vm15 = vcmp.gt.f32.partialorder %v16264_v25, 0.0 }
 0x8fa   : > { %v12420_v29 = vpop.eup %12419  ;;  %v16281_v48 = vadd.f32 %v7077_v19, %v15960_v57  ;;  %v7079_v38 = vpop.f32.mrb[93].mxu0  ;;  %12431 = vpow2.f32 %v7340_v55  ;;  %8589 = vmatprep.subr.bf16.mxu0 %v11555_v27  ;;  %vm7175_vm0 = vcmp.gt.f32.partialorder %v16275_v17, 0.0 }
 0x8fb   : > { %v10357_v11 = vadd.f32 -1.0, %v12420_v29  ;;  %v16288_v61 = vadd.f32 %v7079_v38, %v15967_v26  ;;  %v7081_v52 = vpop.f32.mrb[94].mxu0  ;;  %v12422_v14 = vpop.eup %12421  ;;  %12433 = vpow2.f32 %v7342_v6  ;;  %7858 = vmatprep.mubr.bf16.mxu1 %v7568_v9 }
 0x8fc   : > { %v7240_v16 = vmin.f32 %v16281_v48, 0.0  ;;  %v16292_v56 = vadd.f32 %v7081_v52, %v15960_v57  ;;  %v7083_v35 = vpop.f32.mrb[95].mxu0  ;;  %v12424_v63 = vpop.eup %12423  ;;  %v10358_v37 = vadd.f32 -1.0, %v12422_v14  ;;  %vm7176_vm1 = vcmp.gt.f32.partialorder %v16281_v48, 0.0 }
 0x8fd   : > { %v10359_v39 = vadd.f32 -1.0, %v12424_v63  ;;  %v7241_v23 = vmin.f32 %v16288_v61, 0.0  ;;  %v12426_v0 = vpop.eup %12425  ;;  %v7488_v45 = vsel %vm7168_vm9, %v16225_v24, %v10357_v11  ;;  %v16303_v8 = vadd.f32 %v7083_v35, %v15967_v26  ;;  %7859 = vmatmul.mubr.bf16.gmra.mrb[8].mxu1 %v7567_v30 }
 0x8fe   : > { %v7344_v62 = vmul.f32 1.442695, %v7240_v16  ;;  %v7242_v36 = vmin.f32 %v16292_v56, 0.0  ;;  %v10360_v53 = vadd.f32 -1.0, %v12426_v0  ;;  %vm7177_vm2 = vcmp.gt.f32.partialorder %v16288_v61, 0.0 }
 0x8ff   : > { %v7490_v4 = vsel %vm7170_vm11, %v16233_v31, %v10359_v39  ;;  %v7346_v33 = vmul.f32 1.442695, %v7241_v23  ;;  %v7243_v24 = vmin.f32 %v16303_v8, 0.0  ;;  %v7489_v31 = vsel %vm7169_vm10, %v16228_v22, %v10358_v37 }
 0x900   : > { %12435 = vpow2.f32 %v7344_v62  ;;  %v7569_v54 = vpack.c.bf16 %v7490_v4, %v7488_v45  ;;  %v7348_v1 = vmul.f32 1.442695, %v7242_v36  ;;  %v7491_v20 = vsel %vm7171_vm12, %v16249_v46, %v10360_v53  ;;  %v11553_v46 = vld [vmem:[%s17622_s1 + $0xa0] ss:$8 sps:$4 sm:$0xff]   ;;  %v11558_v36 = vld [vmem:[%s17622_s1 + $0xb4] ss:$8 sps:$4 sm:$0xff]  }
 0x901   : > { %v7087_v2 = vpop.f32.mrb[96].mxu0  ;;  %12437 = vpow2.f32 %v7346_v33  ;;  %v7350_v50 = vmul.f32 1.442695, %v7243_v24  ;;  %v7570_v28 = vpack.c.bf16 %v7491_v20, %v7489_v31  ;;  %8590 = vmatpush1.bf16.msra.mxu0 %v11553_v46  ;;  %vm7178_vm3 = vcmp.gt.f32.partialorder %v16292_v56, 0.0 }
 0x902   : > { %v12428_v43 = vpop.eup %12427  ;;  %v16309_v47 = vadd.f32 %v7087_v2, %v15960_v57  ;;  %v7089_v21 = vpop.f32.mrb[97].mxu0  ;;  %12439 = vpow2.f32 %v7348_v1  ;;  %8591 = vmatprep.subr.bf16.mxu0 %v11558_v36  ;;  %vm7179_vm4 = vcmp.gt.f32.partialorder %v16303_v8, 0.0 }
 0x903   : > { %v10361_v34 = vadd.f32 -1.0, %v12428_v43  ;;  %v16316_v40 = vadd.f32 %v7089_v21, %v15967_v26  ;;  %v7091_v10 = vpop.f32.mrb[98].mxu0  ;;  %v12430_v32 = vpop.eup %12429  ;;  %12441 = vpow2.f32 %v7350_v50  ;;  %7868 = vmatprep.mubr.bf16.mxu1 %v7570_v28 }
 0x904   : > { %v7244_v59 = vmin.f32 %v16309_v47, 0.0  ;;  %v16320_v3 = vadd.f32 %v7091_v10, %v15960_v57  ;;  %v7093_v7 = vpop.f32.mrb[99].mxu0  ;;  %v12432_v22 = vpop.eup %12431  ;;  %v10362_v60 = vadd.f32 -1.0, %v12430_v32  ;;  %vm7180_vm6 = vcmp.gt.f32.partialorder %v16309_v47, 0.0 }
 0x905   : > { %v10363_v49 = vadd.f32 -1.0, %v12432_v22  ;;  %v7245_v30 = vmin.f32 %v16316_v40, 0.0  ;;  %v12434_v55 = vpop.eup %12433  ;;  %v7492_v5 = vsel %vm7172_vm13, %v16255_v51, %v10361_v34  ;;  %v16331_v29 = vadd.f32 %v7093_v7, %v15967_v26  ;;  %7869 = vmatmul.mubr.bf16.gmra.mrb[12].mxu1 %v7569_v54 }
 0x906   : > { %v7352_v58 = vmul.f32 1.442695, %v7244_v59  ;;  %v7246_v19 = vmin.f32 %v16320_v3, 0.0  ;;  %v10364_v18 = vadd.f32 -1.0, %v12434_v55  ;;  %vm7181_vm5 = vcmp.gt.f32.partialorder %v16316_v40, 0.0 }
 0x907   : > { %v7494_v38 = vsel %vm7174_vm15, %v16264_v25, %v10363_v49  ;;  %v7354_v12 = vmul.f32 1.442695, %v7245_v30  ;;  %v7247_v51 = vmin.f32 %v16331_v29, 0.0  ;;  %v7493_v25 = vsel %vm7173_vm14, %v16260_v41, %v10362_v60 }
 0x908   : > { %12443 = vpow2.f32 %v7352_v58  ;;  %v7571_v11 = vpack.c.bf16 %v7494_v38, %v7492_v5  ;;  %v7356_v6 = vmul.f32 1.442695, %v7246_v19  ;;  %v7495_v35 = vsel %vm7175_vm0, %v16275_v17, %v10364_v18  ;;  %v11556_v17 = vld [vmem:[%s17622_s1 + $0xb0] ss:$8 sps:$4 sm:$0xff]   ;;  %v11559_v38 = vld [vmem:[%s17622_s1 + $0xc0] ss:$8 sps:$4 sm:$0xff]  }
 0x909   : > { %v7097_v52 = vpop.f32.mrb[100].mxu0  ;;  %12445 = vpow2.f32 %v7354_v12  ;;  %v7358_v44 = vmul.f32 1.442695, %v7247_v51  ;;  %v7572_v0 = vpack.c.bf16 %v7495_v35, %v7493_v25  ;;  %8592 = vmatpush1.bf16.msra.mxu0 %v11556_v17  ;;  %vm7182_vm7 = vcmp.gt.f32.partialorder %v16320_v3, 0.0  ;;  %v16398_v25 = vld [vmem:[%s17623_s6] ss:$0 sm:$0xff] }
 0x90a   : > { %v12436_v14 = vpop.eup %12435  ;;  %v16337_v16 = vadd.f32 %v7097_v52, %v15960_v57  ;;  %v7099_v9 = vpop.f32.mrb[101].mxu0  ;;  %12447 = vpow2.f32 %v7356_v6  ;;  %vm7183_vm8 = vcmp.gt.f32.partialorder %v16331_v29, 0.0  ;;  %s16417_s6 = scalar_lea.vmem [#allocation2], %s17576_s3  ;;  %s17624_s3 = sld [smem:[#allocation25_spill]] }
 0x90b   : > { %v10365_v63 = vadd.f32 -1.0, %v12436_v14  ;;  %v16344_v42 = vadd.f32 %v7099_v9, %v15967_v26  ;;  %v7101_v37 = vpop.f32.mrb[102].mxu0  ;;  %v12438_v39 = vpop.eup %12437  ;;  %12449 = vpow2.f32 %v7358_v44  ;;  %7878 = vmatprep.mubr.bf16.mxu1 %v7572_v0  ;;  %v11561_v44 = vld [vmem:[%s17622_s1 + $0xc4] ss:$8 sps:$4 sm:$0xff]   ;;  %s9525_s7 = sshll.u32 %s16417_s6, 4  ;;  %s17432_s7 = int_to_ptr.vmem [resolvable:$true] %s9525_s7 }
 0x90c   : > { %v7248_v62 = vmin.f32 %v16337_v16, 0.0  ;;  %v16348_v23 = vadd.f32 %v7101_v37, %v15960_v57  ;;  %v7103_v45 = vpop.f32.mrb[103].mxu0  ;;  %v12440_v41 = vpop.eup %12439  ;;  %v10366_v4 = vadd.f32 -1.0, %v12438_v39  ;;  %8593 = vmatprep.subr.bf16.mxu0 %v11561_v44  ;;  %vm7184_vm9 = vcmp.gt.f32.partialorder %v16337_v16, 0.0  ;;  %s12739_s9 = scalar_lea.vmem %s17432_s7, 4096 }
 0x90d   : > { %v10367_v53 = vadd.f32 -1.0, %v12440_v41  ;;  %v7249_v54 = vmin.f32 %v16344_v42, 0.0  ;;  %v12442_v1 = vpop.eup %12441  ;;  %v16356_v24 = vsel %vm7176_vm1, %v16281_v48, %v10365_v63  ;;  %v16361_v43 = vadd.f32 %v7103_v45, %v15967_v26  ;;  %7879 = vmatmul.mubr.bf16.gmra.mrb[16].mxu1 %v7571_v11  ;;  %8594 = vmatpush1.bf16.msra.mxu0 %v11559_v38  ;;  %p12740_p11 = scmp.ne.s32.totalorder %s17432_s7, %s12739_s9 }
 0x90e   : > { %v7360_v33 = vmul.f32 1.442695, %v7248_v62  ;;  %v7250_v2 = vmin.f32 %v16348_v23, 0.0  ;;  %v10368_v31 = vadd.f32 -1.0, %v12442_v1  ;;  %v7497_v28 = vsel %vm7177_vm2, %v16288_v61, %v10366_v4 }
 0x90f   : > { %v7498_v21 = vsel %vm7178_vm3, %v16292_v56, %v10367_v53  ;;  %v7362_v20 = vmul.f32 1.442695, %v7249_v54  ;;  %v7251_v50 = vmin.f32 %v16361_v43, 0.0  ;;  %vm7186_vm10 = vcmp.gt.f32.partialorder %v16348_v23, 0.0  ;;  %p12741_p12 = pnand %p12740_p11, %p13074_p5 }
 0x910   : > { %12451 = vpow2.f32 %v7360_v33  ;;  %v7573_v34 = vpack.c.bf16 %v7498_v21, %v16356_v24  ;;  %v7364_v48 = vmul.f32 1.442695, %v7250_v2  ;;  %v7499_v7 = vsel %vm7179_vm4, %v16303_v8, %v10368_v31 }
 0x911   : > { %v7107_v10 = vpop.f32.mrb[104].mxu0  ;;  %12453 = vpow2.f32 %v7362_v20  ;;  %v7366_v46 = vmul.f32 1.442695, %v7251_v50  ;;  %v7574_v61 = vpack.c.bf16 %v7499_v7, %v7497_v28  ;;  %vm7185_vm11 = vcmp.gt.f32.partialorder %v16344_v42, 0.0  ;;  %p12742_p13 = pneg %p12741_p12 }
 0x912   : > { %v12444_v32 = vpop.eup %12443  ;;  %v16368_v59 = vadd.f32 %v7107_v10, %v15960_v57  ;;  %v7109_v56 = vpop.f32.mrb[105].mxu0  ;;  %12455 = vpow2.f32 %v7364_v48  ;;  %vm7187_vm13 = vcmp.gt.f32.partialorder %v16361_v43, 0.0 }
 0x913   : > { %v10369_v22 = vadd.f32 -1.0, %v12444_v32  ;;  %v16378_v27 = vadd.f32 %v7109_v56, %v15967_v26  ;;  %v7111_v60 = vpop.f32.mrb[106].mxu0  ;;  %v12446_v49 = vpop.eup %12445  ;;  %12457 = vpow2.f32 %v7366_v46  ;;  %7888 = vmatprep.mubr.bf16.mxu1 %v7574_v61 }
 0x914   : > { %v7252_v58 = vmin.f32 %v16368_v59, 0.0  ;;  %v16382_v30 = vadd.f32 %v7111_v60, %v15960_v57  ;;  %v7113_v55 = vpop.f32.mrb[107].mxu0  ;;  %v12448_v5 = vpop.eup %12447  ;;  %v10370_v37 = vadd.f32 -1.0, %v12446_v49  ;;  %vm7188_vm12 = vcmp.gt.f32.partialorder %v16368_v59, 0.0 }
 0x915   : > { %v10371_v18 = vadd.f32 -1.0, %v12448_v5  ;;  %v7253_v11 = vmin.f32 %v16378_v27, 0.0  ;;  %v12450_v51 = vpop.eup %12449  ;;  %v16391_v52 = vsel %vm7180_vm6, %v16309_v47, %v10369_v22  ;;  %v16395_v9 = vadd.f32 %v7113_v55, %v15967_v26  ;;  %7889 = vmatmul.mubr.bf16.gmra.mrb[20].mxu1 %v7573_v34 }
 0x916   : > { %v7368_v12 = vmul.f32 1.442695, %v7252_v58  ;;  %v7254_v14 = vmin.f32 %v16382_v30, 0.0  ;;  %v10372_v0 = vadd.f32 -1.0, %v12450_v51  ;;  %v7501_v32 = vsel %vm7181_vm5, %v16316_v40, %v10370_v37 }
 0x917   : > { %v10868_v8 = vpop.f32.mrb[172].mxu1  ;;  %v16402_v39 = vsel %vm7182_vm7, %v16320_v3, %v10371_v18  ;;  %v7370_v62 = vmul.f32 1.442695, %v7253_v11  ;;  %v7255_v41 = vmin.f32 %v16395_v9, 0.0  ;;  %vm7190_vm14 = vcmp.gt.f32.partialorder %v16382_v30, 0.0 }
 0x918   : > { %v10869_v19 = vpop.f32.mrb[173].mxu1  ;;  %12459 = vpow2.f32 %v7368_v12  ;;  %v7575_v47 = vpack.c.bf16 %v16402_v39, %v16391_v52  ;;  %v7372_v45 = vmul.f32 1.442695, %v7254_v14  ;;  %v7503_v61 = vsel %vm7183_vm8, %v16331_v29, %v10372_v0 }
 0x919   : > { %v10871_v6 = vpop.f32.mrb[174].mxu1  ;;  %v10870_v35 = vadd.f32 %v10869_v19, %v10868_v8  ;;  %v7117_v17 = vpop.f32.mrb[108].mxu0  ;;  %12461 = vpow2.f32 %v7370_v62  ;;  %v7374_v1 = vmul.f32 1.442695, %v7255_v41  ;;  %v7576_v11 = vpack.c.bf16 %v7503_v61, %v7501_v32 }
 0x91a   : > { %v10872_v63 = vpop.f32.mrb[175].mxu1  ;;  %v12452_v36 = vpop.eup %12451  ;;  %v16409_v3 = vadd.f32 %v7117_v17, %v15960_v57  ;;  %12463 = vpow2.f32 %v7372_v45  ;;  %vm7189_vm15 = vcmp.gt.f32.partialorder %v16378_v27, 0.0  ;;  %vm7191_vm0 = vcmp.gt.f32.partialorder %v16395_v9, 0.0 }
 0x91b   : > { %v6640_v4 = vadd.f32 %v10870_v35, %v16398_v25  ;;  %v10873_v53 = vadd.f32 %v10872_v63, %v10871_v6  ;;  %v7119_v33 = vpop.f32.mrb[109].mxu0  ;;  %v10373_v54 = vadd.f32 -1.0, %v12452_v36  ;;  %v12454_v21 = vpop.eup %12453  ;;  %12465 = vpow2.f32 %v7374_v1  ;;  %7898 = vmatprep.mubr.bf16.mxu1 %v7576_v11 }
 0x91c   : > { %v16412_v24 = vadd.f32 %v7119_v33, %v15967_v26  ;;  %v7121_v2 = vpop.f32.mrb[110].mxu0  ;;  %v7256_v31 = vmin.f32 %v16409_v3, 0.0  ;;  %v12456_v10 = vpop.eup %12455  ;;  %v10374_v8 = vadd.f32 -1.0, %v12454_v21  ;;  %vm7192_vm1 = vcmp.gt.f32.partialorder %v16409_v3, 0.0 }
 0x91d   : > { %6766 = vst [vmem:[%s16417_s6] sm:$0xff] %v6640_v4  ;;  %v6643_v20 = vadd.f32 %v10873_v53, %v16398_v25  ;;  %v16423_v34 = vadd.f32 %v7121_v2, %v15960_v57  ;;  %v7123_v48 = vpop.f32.mrb[111].mxu0  ;;  %v16431_v28 = vsel %vm7184_vm9, %v16337_v16, %v10373_v54  ;;  %v10375_v7 = vadd.f32 -1.0, %v12456_v10  ;;  %v12458_v49 = vpop.eup %12457  ;;  %7899 = vmatmul.mubr.bf16.gmra.mrb[24].mxu1 %v7575_v47 }
 0x91e   : > { %v7376_v22 = vmul.f32 1.442695, %v7256_v31  ;;  %v7257_v46 = vmin.f32 %v16412_v24, 0.0  ;;  %v16441_v40 = vadd.f32 %v7123_v48, %v15967_v26  ;;  %v10376_v18 = vadd.f32 -1.0, %v12458_v49 }
 0x91f   : > { %v10874_v50 = vpop.f32.mrb[176].mxu1  ;;  %6767 = vst [vmem:[%s16417_s6 + $0x8] sm:$0xff] %v6643_v20  ;;  %v7258_v58 = vmin.f32 %v16423_v34, 0.0  ;;  %v16446_v5 = vsel %vm7186_vm10, %v16348_v23, %v10375_v7  ;;  %vm7194_vm2 = vcmp.gt.f32.partialorder %v16423_v34, 0.0  ;;  %vm7193_vm3 = vcmp.gt.f32.partialorder %v16412_v24, 0.0 }
 0x920   : > { %v10875_v56 = vpop.f32.mrb[177].mxu1  ;;  %12467 = vpow2.f32 %v7376_v22  ;;  %v7378_v19 = vmul.f32 1.442695, %v7257_v46  ;;  %v7577_v38 = vpack.c.bf16 %v16446_v5, %v16431_v28  ;;  %v7259_v51 = vmin.f32 %v16441_v40, 0.0 }
 0x921   : > { %v10877_v60 = vpop.f32.mrb[178].mxu1  ;;  %v10876_v16 = vadd.f32 %v10875_v56, %v10874_v50  ;;  %v7380_v12 = vmul.f32 1.442695, %v7258_v58  ;;  %v7127_v29 = vpop.f32.mrb[112].mxu0  ;;  %v7507_v21 = vsel %vm7187_vm13, %v16361_v43, %v10376_v18  ;;  %vm7195_vm4 = vcmp.gt.f32.partialorder %v16441_v40, 0.0 }
 0x922   : > { %v10878_v55 = vpop.f32.mrb[179].mxu1  ;;  %v12460_v6 = vpop.eup %12459  ;;  %12469 = vpow2.f32 %v7378_v19  ;;  %v16453_v35 = vadd.f32 %v7127_v29, %v15960_v57  ;;  %v7382_v45 = vmul.f32 1.442695, %v7259_v51  ;;  %v11562_v29 = vld [vmem:[%s17622_s1 + $0xd0] ss:$8 sps:$4 sm:$0xff]  }
 0x923   : > { %v6648_v14 = vadd.f32 %v10876_v16, %v16398_v25  ;;  %v7129_v23 = vpop.f32.mrb[113].mxu0  ;;  %v10377_v63 = vadd.f32 -1.0, %v12460_v6  ;;  %12471 = vpow2.f32 %v7380_v12  ;;  %v10879_v44 = vadd.f32 %v10878_v55, %v10877_v60  ;;  %v12462_v0 = vpop.eup %12461  ;;  %v11564_v12 = vld [vmem:[%s17622_s1 + $0xd4] ss:$8 sps:$4 sm:$0xff]  }
 0x924   : > { %v16456_v37 = vadd.f32 %v7129_v23, %v15967_v26  ;;  %v7131_v62 = vpop.f32.mrb[114].mxu0  ;;  %v7260_v41 = vmin.f32 %v16453_v35, 0.0  ;;  %v12464_v4 = vpop.eup %12463  ;;  %12473 = vpow2.f32 %v7382_v45  ;;  %8595 = vmatprep.subr.bf16.mxu0 %v11564_v12  ;;  %vm7196_vm6 = vcmp.gt.f32.partialorder %v16453_v35, 0.0 }
 0x925   : > { %6768 = vst [vmem:[%s16417_s6 + $0x10] sm:$0xff] %v6648_v14  ;;  %v16465_v17 = vadd.f32 %v7131_v62, %v15960_v57  ;;  %v7133_v36 = vpop.f32.mrb[115].mxu0  ;;  %v16469_v53 = vsel %vm7188_vm12, %v16368_v59, %v10377_v63  ;;  %v6651_v33 = vadd.f32 %v10879_v44, %v16398_v25  ;;  %v10379_v52 = vadd.f32 -1.0, %v12464_v4  ;;  %v12466_v1 = vpop.eup %12465  ;;  %8596 = vmatpush1.bf16.msra.mxu0 %v11562_v29  ;;  %v11567_v62 = vld [vmem:[%s17622_s1 + $0xe4] ss:$8 sps:$4 sm:$0xff]  }
 0x926   : > { %v7384_v39 = vmul.f32 1.442695, %v7260_v41  ;;  %v7261_v47 = vmin.f32 %v16456_v37, 0.0  ;;  %v10378_v57 = vadd.f32 -1.0, %v12462_v0  ;;  %v7505_v59 = vsel %vm7185_vm11, %v16344_v42, %v10374_v8  ;;  %v11565_v41 = vld [vmem:[%s17622_s1 + $0xe0] ss:$8 sps:$4 sm:$0xff]   ;;  %8597 = vmatprep.subr.bf16.mxu0 %v11567_v62 }
 0x927   : > { %v10880_v54 = vpop.f32.mrb[180].mxu1  ;;  %6769 = vst [vmem:[%s16417_s6 + $0x18] sm:$0xff] %v6651_v33  ;;  %v7262_v2 = vmin.f32 %v16465_v17, 0.0  ;;  %v16481_v20 = vsel %vm7190_vm14, %v16382_v30, %v10379_v52  ;;  %v10380_v48 = vadd.f32 -1.0, %v12466_v1  ;;  %v7578_v7 = vpack.c.bf16 %v7507_v21, %v7505_v59 }
 0x928   : > { %v10881_v31 = vpop.f32.mrb[181].mxu1  ;;  %12475 = vpow2.f32 %v7384_v39  ;;  %v7386_v50 = vmul.f32 1.442695, %v7261_v47  ;;  %v7579_v32 = vpack.c.bf16 %v16481_v20, %v16469_v53  ;;  %v16486_v22 = vadd.f32 %v7133_v36, %v15967_v26  ;;  %v11570_v47 = vld [vmem:[%s17622_s1 + $0xf4] ss:$8 sps:$4 sm:$0xff]  }
 0x929   : > { %v10883_v10 = vpop.f32.mrb[182].mxu1  ;;  %v7388_v56 = vmul.f32 1.442695, %v7262_v2  ;;  %v10882_v43 = vadd.f32 %v10881_v31, %v10880_v54  ;;  %7908 = vmatprep.mubr.bf16.mxu1 %v7578_v7  ;;  %v7509_v26 = vsel %vm7189_vm15, %v16378_v27, %v10378_v57  ;;  %v7511_v55 = vsel %vm7191_vm0, %v16395_v9, %v10380_v48  ;;  %8598 = vmatpush1.bf16.msra.mxu0 %v11565_v41  ;;  %v11568_v57 = vld [vmem:[%s17622_s1 + $0xf0] ss:$8 sps:$4 sm:$0xff]  }
 0x92a   : > { %v10884_v46 = vpop.f32.mrb[183].mxu1  ;;  %v12468_v42 = vpop.eup %12467  ;;  %12477 = vpow2.f32 %v7386_v50  ;;  %v7263_v60 = vmin.f32 %v16486_v22, 0.0  ;;  %7909 = vmatmul.mubr.bf16.gmra.mrb[28].mxu1 %v7577_v38  ;;  %v7580_v18 = vpack.c.bf16 %v7511_v55, %v7509_v26  ;;  %vm7198_vm5 = vcmp.gt.f32.partialorder %v16465_v17, 0.0  ;;  %8599 = vmatprep.subr.bf16.mxu0 %v11570_v47 }
 0x92b   : > { %v10885_v30 = vadd.f32 %v10884_v46, %v10883_v10  ;;  %12479 = vpow2.f32 %v7388_v56  ;;  %v10381_v58 = vadd.f32 -1.0, %v12468_v42  ;;  %v6656_v61 = vadd.f32 %v10882_v43, %v16398_v25 }
 0x92c   : > { %v12470_v49 = vpop.eup %12469  ;;  %v7390_v19 = vmul.f32 1.442695, %v7263_v60  ;;  %7918 = vmatprep.mubr.bf16.mxu1 %v7580_v18  ;;  %vm7197_vm7 = vcmp.gt.f32.partialorder %v16456_v37, 0.0  ;;  %vm7199_vm8 = vcmp.gt.f32.partialorder %v16486_v22, 0.0 }
 0x92d   : > { %v6659_v16 = vadd.f32 %v10885_v30, %v16398_v25  ;;  %v12472_v8 = vpop.eup %12471  ;;  %6770 = vst [vmem:[%s16417_s6 + $0x20] sm:$0xff] %v6656_v61  ;;  %v10382_v28 = vadd.f32 -1.0, %v12470_v49  ;;  %v7512_v38 = vsel %vm7192_vm1, %v16409_v3, %v10381_v58  ;;  %8600 = vmatpush1.bf16.msra.mxu0 %v11568_v57 }
 0x92e   : > { %v10383_v11 = vadd.f32 -1.0, %v12472_v8  ;;  %12481 = vpow2.f32 %v7390_v19  ;;  %v12474_v9 = vpop.eup %12473 }
 0x92f   : > { %6771 = vst [vmem:[%s16417_s6 + $0x28] sm:$0xff] %v6659_v16  ;;  %v10886_v27 = vpop.f32.mrb[184].mxu1  ;;  %v10384_v63 = vadd.f32 -1.0, %v12474_v9 }
 0x930   : > { %v10887_v5 = vpop.f32.mrb[185].mxu1  ;;  %v7514_v6 = vsel %vm7194_vm2, %v16423_v34, %v10383_v11  ;;  %v7513_v34 = vsel %vm7193_vm3, %v16412_v24, %v10382_v28 }
 0x931   : > { %v10888_v51 = vadd.f32 %v10887_v5, %v10886_v27  ;;  %v10889_v14 = vpop.f32.mrb[186].mxu1  ;;  %v7581_v23 = vpack.c.bf16 %v7514_v6, %v7512_v38  ;;  %v7515_v36 = vsel %vm7195_vm4, %v16441_v40, %v10384_v63 }
 0x932   : > { %v10890_v44 = vpop.f32.mrb[187].mxu1  ;;  %v12476_v0 = vpop.eup %12475  ;;  %7919 = vmatmul.mubr.bf16.gmra.mrb[32].mxu1 %v7579_v32  ;;  %v7582_v52 = vpack.c.bf16 %v7515_v36, %v7513_v34 }
 0x933   : > { %v6664_v45 = vadd.f32 %v10888_v51, %v16398_v25  ;;  %v10891_v3 = vadd.f32 %v10890_v44, %v10889_v14  ;;  %v10385_v53 = vadd.f32 -1.0, %v12476_v0 }
 0x934   : > { %v12478_v4 = vpop.eup %12477  ;;  %7928 = vmatprep.mubr.bf16.mxu1 %v7582_v52 }
 0x935   : > { %6772 = vst [vmem:[%s16417_s6 + $0x30] sm:$0xff] %v6664_v45  ;;  %v6667_v33 = vadd.f32 %v10891_v3, %v16398_v25  ;;  %v12480_v39 = vpop.eup %12479  ;;  %v7516_v40 = vsel %vm7196_vm6, %v16453_v35, %v10385_v53  ;;  %v10386_v2 = vadd.f32 -1.0, %v12478_v4 }
 0x936   : > { %v10387_v54 = vadd.f32 -1.0, %v12480_v39 }
 0x937   : > { %6773 = vst [vmem:[%s16417_s6 + $0x38] sm:$0xff] %v6667_v33  ;;  %v10892_v1 = vpop.f32.mrb[188].mxu1 }
 0x938   : > { %v10893_v24 = vpop.f32.mrb[189].mxu1  ;;  %v7518_v59 = vsel %vm7198_vm5, %v16465_v17, %v10387_v54  ;;  %v12482_v20 = vpop.eup %12481  ;;  %v7517_v17 = vsel %vm7197_vm7, %v16456_v37, %v10386_v2 }
 0x939   : > { %v10894_v21 = vadd.f32 %v10893_v24, %v10892_v1  ;;  %v10895_v31 = vpop.f32.mrb[190].mxu1  ;;  %v7583_v48 = vpack.c.bf16 %v7518_v59, %v7516_v40  ;;  %v10388_v10 = vadd.f32 -1.0, %v12482_v20 }
 0x93a   : > { %v10896_v50 = vpop.f32.mrb[191].mxu1  ;;  %7929 = vmatmul.mubr.bf16.gmra.mrb[36].mxu1 %v7581_v23 }
 0x93b   : > { %v6672_v32 = vadd.f32 %v10894_v21, %v16398_v25  ;;  %v10897_v56 = vadd.f32 %v10896_v50, %v10895_v31  ;;  %v7519_v7 = vsel %vm7199_vm8, %v16486_v22, %v10388_v10 }
 0x93c   : > { %v7584_v46 = vpack.c.bf16 %v7519_v7, %v7517_v17 }
 0x93d   : > { %6774 = vst [vmem:[%s16417_s6 + $0x40] sm:$0xff] %v6672_v32  ;;  %v6675_v35 = vadd.f32 %v10897_v56, %v16398_v25 }
 0x93e   : > { %7938 = vmatprep.mubr.bf16.mxu1 %v7584_v46 }
 0x93f   : > { %6775 = vst [vmem:[%s16417_s6 + $0x48] sm:$0xff] %v6675_v35  ;;  %v10898_v42 = vpop.f32.mrb[192].mxu1 }
 0x940   : > { %v10899_v43 = vpop.f32.mrb[193].mxu1 }
 0x941   : > { %v10900_v30 = vadd.f32 %v10899_v43, %v10898_v42  ;;  %v10901_v60 = vpop.f32.mrb[194].mxu1 }
 0x942   : > { %v10902_v26 = vpop.f32.mrb[195].mxu1  ;;  %7939 = vmatmul.mubr.bf16.gmra.mrb[40].mxu1 %v7583_v48 }
 0x943   : > { %v6680_v49 = vadd.f32 %v10900_v30, %v16398_v25  ;;  %v10903_v58 = vadd.f32 %v10902_v26, %v10901_v60 }
 0x945   : > { %6776 = vst [vmem:[%s16417_s6 + $0x50] sm:$0xff] %v6680_v49  ;;  %v6683_v61 = vadd.f32 %v10903_v58, %v16398_v25 }
 0x947   : > { %6777 = vst [vmem:[%s16417_s6 + $0x58] sm:$0xff] %v6683_v61  ;;  %v10904_v37 = vpop.f32.mrb[196].mxu1 }
 0x948   : > { %v10905_v22 = vpop.f32.mrb[197].mxu1 }
 0x949   : > { %v10906_v16 = vadd.f32 %v10905_v22, %v10904_v37  ;;  %v10907_v55 = vpop.f32.mrb[198].mxu1 }
 0x94a   : > { %v10908_v8 = vpop.f32.mrb[199].mxu1 }
 0x94b   : > { %v6688_v19 = vadd.f32 %v10906_v16, %v16398_v25  ;;  %v10909_v18 = vadd.f32 %v10908_v8, %v10907_v55 }
 0x94d   : > { %6778 = vst [vmem:[%s16417_s6 + $0x60] sm:$0xff] %v6688_v19  ;;  %v6691_v12 = vadd.f32 %v10909_v18, %v16398_v25 }
 0x94f   : > { %6779 = vst [vmem:[%s16417_s6 + $0x68] sm:$0xff] %v6691_v12  ;;  %v10910_v11 = vpop.f32.mrb[200].mxu1 }
 0x950   : > { %v10911_v27 = vpop.f32.mrb[201].mxu1 }
 0x951   : > { %v10912_v29 = vadd.f32 %v10911_v27, %v10910_v11  ;;  %v10913_v28 = vpop.f32.mrb[202].mxu1 }
 0x952   : > { %v10914_v5 = vpop.f32.mrb[203].mxu1 }
 0x953   : > { %v6696_v9 = vadd.f32 %v10912_v29, %v16398_v25  ;;  %v10915_v38 = vadd.f32 %v10914_v5, %v10913_v28 }
 0x955   : > { %6780 = vst [vmem:[%s16417_s6 + $0x70] sm:$0xff] %v6696_v9  ;;  %v6699_v6 = vadd.f32 %v10915_v38, %v16398_v25 }
 0x957   : > { %6781 = vst [vmem:[%s16417_s6 + $0x78] sm:$0xff] %v6699_v6  ;;  %v10916_v51 = vpop.f32.mrb[204].mxu1  ;;  %v7552_v6 = vld [vmem:[%s17624_s3] sm:$0x3]  ;;  %s17625_s3 = sld [smem:[#allocation27_spill]] }
 0x958   : > { %v10917_v14 = vpop.f32.mrb[205].mxu1 }
 0x959   : > { %v10918_v23 = vadd.f32 %v10917_v14, %v10916_v51  ;;  %v10919_v63 = vpop.f32.mrb[206].mxu1 }
 0x95a   : > { %v10920_v44 = vpop.f32.mrb[207].mxu1 }
 0x95b   : > { %v6704_v62 = vadd.f32 %v10918_v23, %v16398_v25  ;;  %v10921_v0 = vadd.f32 %v10920_v44, %v10919_v63  ;;  %v16573_v63 = vrot.slane %v7552_v6, %v13179_v13 }
 0x95d   : > { %6782 = vst [vmem:[%s16417_s6 + $0x80] sm:$0xff] %v6704_v62  ;;  %v6707_v45 = vadd.f32 %v10921_v0, %v16398_v25  ;;  %v16578_v62 = vrot.slane %v7552_v6, %v13182_v15 }
 0x95f   : > { %6783 = vst [vmem:[%s16417_s6 + $0x88] sm:$0xff] %v6707_v45  ;;  %v10922_v3 = vpop.f32.mrb[208].mxu1 }
 0x960   : > { %v10923_v41 = vpop.f32.mrb[209].mxu1 }
 0x961   : > { %v10924_v34 = vadd.f32 %v10923_v41, %v10922_v3  ;;  %v10925_v36 = vpop.f32.mrb[210].mxu1 }
 0x962   : > { %v10926_v4 = vpop.f32.mrb[211].mxu1 }
 0x963   : > { %v6712_v53 = vadd.f32 %v10924_v34, %v16398_v25  ;;  %v10927_v33 = vadd.f32 %v10926_v4, %v10925_v36 }
 0x965   : > { %6784 = vst [vmem:[%s16417_s6 + $0x90] sm:$0xff] %v6712_v53  ;;  %v6715_v52 = vadd.f32 %v10927_v33, %v16398_v25 }
 0x967   : > { %6785 = vst [vmem:[%s16417_s6 + $0x98] sm:$0xff] %v6715_v52  ;;  %v10928_v39 = vpop.f32.mrb[212].mxu1 }
 0x968   : > { %v10929_v47 = vpop.f32.mrb[213].mxu1 }
 0x969   : > { %v10930_v54 = vadd.f32 %v10929_v47, %v10928_v39  ;;  %v10931_v1 = vpop.f32.mrb[214].mxu1 }
 0x96a   : > { %v10932_v57 = vpop.f32.mrb[215].mxu1 }
 0x96b   : > { %v6720_v24 = vadd.f32 %v10930_v54, %v16398_v25  ;;  %v10933_v40 = vadd.f32 %v10932_v57, %v10931_v1 }
 0x96d   : > { %6786 = vst [vmem:[%s16417_s6 + $0xa0] sm:$0xff] %v6720_v24  ;;  %v6723_v2 = vadd.f32 %v10933_v40, %v16398_v25 }
 0x96f   : > { %6787 = vst [vmem:[%s16417_s6 + $0xa8] sm:$0xff] %v6723_v2  ;;  %v10934_v59 = vpop.f32.mrb[216].mxu1 }
 0x970   : > { %v10935_v21 = vpop.f32.mrb[217].mxu1 }
 0x971   : > { %v10936_v31 = vadd.f32 %v10935_v21, %v10934_v59  ;;  %v10937_v20 = vpop.f32.mrb[218].mxu1 }
 0x972   : > { %v10938_v48 = vpop.f32.mrb[219].mxu1 }
 0x973   : > { %v6728_v50 = vadd.f32 %v10936_v31, %v16398_v25  ;;  %v10939_v10 = vadd.f32 %v10938_v48, %v10937_v20 }
 0x975   : > { %6788 = vst [vmem:[%s16417_s6 + $0xb0] sm:$0xff] %v6728_v50  ;;  %v6731_v32 = vadd.f32 %v10939_v10, %v16398_v25 }
 0x977   : > { %6789 = vst [vmem:[%s16417_s6 + $0xb8] sm:$0xff] %v6731_v32  ;;  %v10940_v56 = vpop.f32.mrb[220].mxu1 }
 0x978   : > { %v10941_v35 = vpop.f32.mrb[221].mxu1 }
 0x979   : > { %v10942_v17 = vadd.f32 %v10941_v35, %v10940_v56  ;;  %v10943_v7 = vpop.f32.mrb[222].mxu1 }
 0x97a   : > { %v10944_v46 = vpop.f32.mrb[223].mxu1 }
 0x97b   : > { %v6736_v42 = vadd.f32 %v10942_v17, %v16398_v25  ;;  %v10945_v43 = vadd.f32 %v10944_v46, %v10943_v7 }
 0x97d   : > { %6790 = vst [vmem:[%s16417_s6 + $0xc0] sm:$0xff] %v6736_v42  ;;  %v6739_v30 = vadd.f32 %v10945_v43, %v16398_v25 }
 0x97f   : > { %6791 = vst [vmem:[%s16417_s6 + $0xc8] sm:$0xff] %v6739_v30  ;;  %v10946_v60 = vpop.f32.mrb[224].mxu1 }
 0x980   : > { %v10947_v26 = vpop.f32.mrb[225].mxu1 }
 0x981   : > { %v10948_v49 = vadd.f32 %v10947_v26, %v10946_v60  ;;  %v10949_v58 = vpop.f32.mrb[226].mxu1 }
 0x982   : > { %v10950_v61 = vpop.f32.mrb[227].mxu1 }
 0x983   : > { %v6744_v37 = vadd.f32 %v10948_v49, %v16398_v25  ;;  %v10951_v22 = vadd.f32 %v10950_v61, %v10949_v58 }
 0x985   : > { %6792 = vst [vmem:[%s16417_s6 + $0xd0] sm:$0xff] %v6744_v37  ;;  %v6747_v16 = vadd.f32 %v10951_v22, %v16398_v25 }
 0x987   : > { %6793 = vst [vmem:[%s16417_s6 + $0xd8] sm:$0xff] %v6747_v16  ;;  %v10952_v55 = vpop.f32.mrb[228].mxu1 }
 0x988   : > { %v10953_v8 = vpop.f32.mrb[229].mxu1 }
 0x989   : > { %v10954_v19 = vadd.f32 %v10953_v8, %v10952_v55  ;;  %v10955_v18 = vpop.f32.mrb[230].mxu1 }
 0x98a   : > { %v10956_v12 = vpop.f32.mrb[231].mxu1 }
 0x98b   : > { %v6752_v11 = vadd.f32 %v10954_v19, %v16398_v25  ;;  %v10957_v27 = vadd.f32 %v10956_v12, %v10955_v18 }
 0x98d   : > { %6794 = vst [vmem:[%s16417_s6 + $0xe0] sm:$0xff] %v6752_v11  ;;  %v6755_v29 = vadd.f32 %v10957_v27, %v16398_v25 }
 0x98f   : > { %6795 = vst [vmem:[%s16417_s6 + $0xe8] sm:$0xff] %v6755_v29  ;;  %v10958_v28 = vpop.f32.mrb[232].mxu1 }
 0x990   : > { %v10959_v5 = vpop.f32.mrb[233].mxu1 }
 0x991   : > { %v10960_v9 = vadd.f32 %v10959_v5, %v10958_v28  ;;  %v10961_v38 = vpop.f32.mrb[234].mxu1 }
 0x992   : > { %v10962_v51 = vpop.f32.mrb[235].mxu1 }
 0x993   : > { %v6760_v14 = vadd.f32 %v10960_v9, %v16398_v25  ;;  %v10963_v23 = vadd.f32 %v10962_v51, %v10961_v38 }
 0x995   : > { %6796 = vst [vmem:[%s16417_s6 + $0xf0] sm:$0xff] %v6760_v14  ;;  %v6763_v44 = vadd.f32 %v10963_v23, %v16398_v25  ;;  %v11571_v14 = vld [vmem:[%s13019_s27 + $0x40] sm:$0xff]  }
 0x996   : > { %v11572_v23 = vld [vmem:[%s13019_s27] sm:$0xff]   ;;  %10964 = vmatprep.subr.bf16.mxu1 %v11571_v14 }
 0x997   : > { %6797 = vst [vmem:[%s16417_s6 + $0xf8] sm:$0xff] %v6763_v44  ;;  %v7790_v0 = vpop.f32.mrb[236].mxu1  ;;  %10965 = vmatpush3.bf16.msra.mxu1 %v11572_v23  ;;  %v11579_v14 = vld [vmem:[%s13019_s27 + $0x60] sm:$0xff]   ;;  %s12867_s6 = smov [#allocation2]  }
 0x998   : > { %v7791_v45 = vadd.f32 %v7790_v0, %v16573_v63  ;;  %v7792_v3 = vpop.f32.mrb[237].mxu1 }
 0x999   : > { %v16583_v41 = vadd.f32 %v7792_v3, %v16578_v62  ;;  %v7794_v34 = vpop.f32.mrb[238].mxu1 }
 0x99a   : > { %v8013_v36 = vmin.f32 %v7791_v45, 0.0  ;;  %v7795_v4 = vadd.f32 %v7794_v34, %v16573_v63  ;;  %v7796_v53 = vpop.f32.mrb[239].mxu1  ;;  %vm7949_vm9 = vcmp.gt.f32.partialorder %v7791_v45, 0.0 }
 0x99b   : > { %v8014_v33 = vmin.f32 %v16583_v41, 0.0  ;;  %v16588_v25 = vadd.f32 %v7796_v53, %v16578_v62  ;;  %vm7950_vm11 = vcmp.gt.f32.partialorder %v16583_v41, 0.0 }
 0x99c   : > { %v8077_v52 = vmul.f32 1.442695, %v8013_v36  ;;  %v8015_v39 = vmin.f32 %v7795_v4, 0.0  ;;  %vm7951_vm10 = vcmp.gt.f32.partialorder %v7795_v4, 0.0 }
 0x99d   : > { %v8079_v47 = vmul.f32 1.442695, %v8014_v33  ;;  %v8016_v54 = vmin.f32 %v16588_v25, 0.0  ;;  %vm7952_vm12 = vcmp.gt.f32.partialorder %v16588_v25, 0.0 }
 0x99e   : > { %12483 = vpow2.f32 %v8077_v52  ;;  %v8081_v1 = vmul.f32 1.442695, %v8015_v39 }
 0x99f   : > { %12485 = vpow2.f32 %v8079_v47  ;;  %v8083_v57 = vmul.f32 1.442695, %v8016_v54  ;;  %v7800_v24 = vpop.f32.mrb[240].mxu1 }
 0x9a0   : > { %12487 = vpow2.f32 %v8081_v1  ;;  %v16592_v40 = vadd.f32 %v7800_v24, %v16573_v63  ;;  %v7802_v2 = vpop.f32.mrb[241].mxu1 }
 0x9a1   : > { %12489 = vpow2.f32 %v8083_v57  ;;  %v16595_v59 = vadd.f32 %v7802_v2, %v16578_v62  ;;  %v7804_v21 = vpop.f32.mrb[242].mxu1 }
 0x9a2   : > { %v8017_v31 = vmin.f32 %v16592_v40, 0.0  ;;  %v16599_v20 = vadd.f32 %v7804_v21, %v16573_v63  ;;  %v7806_v48 = vpop.f32.mrb[243].mxu1  ;;  %vm7953_vm13 = vcmp.gt.f32.partialorder %v16592_v40, 0.0 }
 0x9a3   : > { %v8018_v50 = vmin.f32 %v16595_v59, 0.0  ;;  %v16603_v10 = vadd.f32 %v7806_v48, %v16578_v62  ;;  %v11573_v48 = vld [vmem:[%s13019_s27 + $0x48] sm:$0xff]   ;;  %vm7954_vm15 = vcmp.gt.f32.partialorder %v16595_v59, 0.0 }
 0x9a4   : > { %v8085_v32 = vmul.f32 1.442695, %v8017_v31  ;;  %v8019_v56 = vmin.f32 %v16599_v20, 0.0  ;;  %vm7955_vm14 = vcmp.gt.f32.partialorder %v16599_v20, 0.0  ;;  %10966 = vmatprep.subr.bf16.mxu1 %v11573_v48  ;;  %v11582_v48 = vld [vmem:[%s13019_s27 + $0x28] sm:$0xff]  }
 0x9a5   : > { %v8087_v35 = vmul.f32 1.442695, %v8018_v50  ;;  %v8020_v17 = vmin.f32 %v16603_v10, 0.0  ;;  %v11574_v50 = vld [vmem:[%s13019_s27 + $0x8] sm:$0xff]   ;;  %vm7956_vm0 = vcmp.gt.f32.partialorder %v16603_v10, 0.0 }
 0x9a6   : > { %12491 = vpow2.f32 %v8085_v32  ;;  %v8089_v7 = vmul.f32 1.442695, %v8019_v56  ;;  %10967 = vmatpush3.bf16.msra.mxu1 %v11574_v50 }
 0x9a7   : > { %12493 = vpow2.f32 %v8087_v35  ;;  %v8091_v46 = vmul.f32 1.442695, %v8020_v17  ;;  %v7810_v60 = vpop.f32.mrb[244].mxu1 }
 0x9a8   : > { %v12484_v42 = vpop.eup %12483  ;;  %12495 = vpow2.f32 %v8089_v7  ;;  %v16608_v49 = vadd.f32 %v7810_v60, %v16573_v63  ;;  %v7812_v58 = vpop.f32.mrb[245].mxu1  ;;  %v11575_v7 = vld [vmem:[%s13019_s27 + $0x50] sm:$0xff]  }
 0x9a9   : > { %v12486_v43 = vpop.eup %12485  ;;  %v10421_v30 = vadd.f32 -1.0, %v12484_v42  ;;  %12497 = vpow2.f32 %v8091_v46  ;;  %v16611_v22 = vadd.f32 %v7812_v58, %v16578_v62  ;;  %v7814_v16 = vpop.f32.mrb[246].mxu1  ;;  %10968 = vmatprep.subr.bf16.mxu1 %v11575_v7 }
 0x9aa   : > { %v12488_v26 = vpop.eup %12487  ;;  %v10422_v55 = vadd.f32 -1.0, %v12486_v43  ;;  %v8021_v19 = vmin.f32 %v16608_v49, 0.0  ;;  %v16615_v18 = vadd.f32 %v7814_v16, %v16573_v63  ;;  %v7816_v12 = vpop.f32.mrb[247].mxu1  ;;  %vm7957_vm1 = vcmp.gt.f32.partialorder %v16608_v49, 0.0 }
 0x9ab   : > { %v12490_v61 = vpop.eup %12489  ;;  %v10423_v37 = vadd.f32 -1.0, %v12488_v26  ;;  %v8269_v11 = vsel %vm7949_vm9, %v7791_v45, %v10421_v30  ;;  %v8022_v29 = vmin.f32 %v16611_v22, 0.0  ;;  %v16619_v28 = vadd.f32 %v7816_v12, %v16578_v62 }
 0x9ac   : > { %v10424_v8 = vadd.f32 -1.0, %v12490_v61  ;;  %v8093_v9 = vmul.f32 1.442695, %v8021_v19  ;;  %v8023_v38 = vmin.f32 %v16615_v18, 0.0  ;;  %v8270_v45 = vsel %vm7950_vm11, %v16583_v41, %v10422_v55  ;;  %v11577_v61 = vld [vmem:[%s13019_s27 + $0x58] sm:$0xff]  }
 0x9ad   : > { %v8271_v27 = vsel %vm7951_vm10, %v7795_v4, %v10423_v37  ;;  %v8095_v6 = vmul.f32 1.442695, %v8022_v29  ;;  %v8024_v51 = vmin.f32 %v16619_v28, 0.0  ;;  %v11578_v29 = vld [vmem:[%s13019_s27 + $0x18] sm:$0xff]   ;;  %vm7958_vm2 = vcmp.gt.f32.partialorder %v16611_v22, 0.0 }
 0x9ae   : > { %v8366_v5 = vpack.c.bf16 %v8271_v27, %v8269_v11  ;;  %12499 = vpow2.f32 %v8093_v9  ;;  %v8097_v0 = vmul.f32 1.442695, %v8023_v38  ;;  %v8272_v3 = vsel %vm7952_vm12, %v16588_v25, %v10424_v8 }
 0x9af   : > { %12501 = vpow2.f32 %v8095_v6  ;;  %v8099_v4 = vmul.f32 1.442695, %v8024_v51  ;;  %v7820_v53 = vpop.f32.mrb[248].mxu1  ;;  %v8367_v33 = vpack.c.bf16 %v8272_v3, %v8270_v45  ;;  %vm7959_vm3 = vcmp.gt.f32.partialorder %v16615_v18, 0.0 }
 0x9b0   : > { %v12492_v44 = vpop.eup %12491  ;;  %12503 = vpow2.f32 %v8097_v0  ;;  %v16631_v39 = vadd.f32 %v7820_v53, %v16573_v63  ;;  %v7822_v47 = vpop.f32.mrb[249].mxu1  ;;  %vm7960_vm4 = vcmp.gt.f32.partialorder %v16619_v28, 0.0 }
 0x9b1   : > { %v12494_v34 = vpop.eup %12493  ;;  %v10425_v36 = vadd.f32 -1.0, %v12492_v44  ;;  %12505 = vpow2.f32 %v8099_v4  ;;  %v16635_v54 = vadd.f32 %v7822_v47, %v16578_v62  ;;  %v7824_v1 = vpop.f32.mrb[250].mxu1  ;;  %8601 = vmatprep.mubr.bf16.mxu0 %v8367_v33  ;;  %v11580_v47 = vld [vmem:[%s13019_s27 + $0x20] sm:$0xff]  }
 0x9b2   : > { %v12496_v52 = vpop.eup %12495  ;;  %v10426_v57 = vadd.f32 -1.0, %v12494_v34  ;;  %v8025_v2 = vmin.f32 %v16631_v39, 0.0  ;;  %v16639_v21 = vadd.f32 %v7824_v1, %v16573_v63  ;;  %v7826_v31 = vpop.f32.mrb[251].mxu1  ;;  %8602 = vmatmul.mubr.bf16.vlgmr.msra.gmra.mrb[116].mxu0 %v8366_v5  ;;  %v11581_v1 = vld [vmem:[%s13019_s27 + $0x68] sm:$0xff]   ;;  %vm7961_vm6 = vcmp.gt.f32.partialorder %v16631_v39, 0.0 }
 0x9b3   : > { %v12498_v41 = vpop.eup %12497  ;;  %v10427_v25 = vadd.f32 -1.0, %v12496_v52  ;;  %v8273_v32 = vsel %vm7953_vm13, %v16592_v40, %v10425_v36  ;;  %v8026_v35 = vmin.f32 %v16635_v54, 0.0  ;;  %v16649_v17 = vadd.f32 %v7826_v31, %v16578_v62 }
 0x9b4   : > { %v10428_v24 = vadd.f32 -1.0, %v12498_v41  ;;  %v8101_v42 = vmul.f32 1.442695, %v8025_v2  ;;  %v8027_v43 = vmin.f32 %v16639_v21, 0.0  ;;  %v8274_v26 = vsel %vm7954_vm15, %v16595_v59, %v10426_v57 }
 0x9b5   : > { %v8275_v56 = vsel %vm7955_vm14, %v16599_v20, %v10427_v25  ;;  %v8103_v30 = vmul.f32 1.442695, %v8026_v35  ;;  %v8028_v40 = vmin.f32 %v16649_v17, 0.0  ;;  %v11576_v20 = vld [vmem:[%s13019_s27 + $0x10] sm:$0xff]   ;;  %vm7963_vm5 = vcmp.gt.f32.partialorder %v16639_v21, 0.0 }
 0x9b6   : > { %v8368_v46 = vpack.c.bf16 %v8275_v56, %v8273_v32  ;;  %12507 = vpow2.f32 %v8101_v42  ;;  %v8105_v60 = vmul.f32 1.442695, %v8027_v43  ;;  %v8276_v58 = vsel %vm7956_vm0, %v16603_v10, %v10428_v24  ;;  %10969 = vmatpush3.bf16.msra.mxu1 %v11576_v20  ;;  %v11583_v32 = vld [vmem:[%s13019_s27 + $0x70] sm:$0xff]  }
 0x9b7   : > { %12509 = vpow2.f32 %v8103_v30  ;;  %v8107_v37 = vmul.f32 1.442695, %v8028_v40  ;;  %v7830_v16 = vpop.f32.mrb[252].mxu1  ;;  %v8369_v55 = vpack.c.bf16 %v8276_v58, %v8274_v26  ;;  %10970 = vmatprep.subr.bf16.mxu1 %v11577_v61  ;;  %vm7962_vm7 = vcmp.gt.f32.partialorder %v16635_v54, 0.0  ;;  %v11584_v26 = vld [vmem:[%s13019_s27 + $0x30] sm:$0xff]  }
 0x9b8   : > { %v12500_v8 = vpop.eup %12499  ;;  %12511 = vpow2.f32 %v8105_v60  ;;  %v16661_v19 = vadd.f32 %v7830_v16, %v16573_v63  ;;  %v7832_v12 = vpop.f32.mrb[253].mxu1  ;;  %vm7964_vm8 = vcmp.gt.f32.partialorder %v16649_v17, 0.0 }
 0x9b9   : > { %v12502_v11 = vpop.eup %12501  ;;  %v10429_v59 = vadd.f32 -1.0, %v12500_v8  ;;  %12513 = vpow2.f32 %v8107_v37  ;;  %v16665_v10 = vadd.f32 %v7832_v12, %v16578_v62  ;;  %v7834_v27 = vpop.f32.mrb[254].mxu1  ;;  %8611 = vmatprep.mubr.bf16.mxu0 %v8369_v55 }
 0x9ba   : > { %v12504_v5 = vpop.eup %12503  ;;  %v10430_v9 = vadd.f32 -1.0, %v12502_v11  ;;  %v8029_v38 = vmin.f32 %v16661_v19, 0.0  ;;  %v16671_v6 = vadd.f32 %v7834_v27, %v16573_v63  ;;  %v7836_v51 = vpop.f32.mrb[255].mxu1  ;;  %8612 = vmatmul.mubr.bf16.gmra.mrb[120].mxu0 %v8368_v46  ;;  %10971 = vmatpush3.bf16.msra.mxu1 %v11578_v29  ;;  %vm7965_vm9 = vcmp.gt.f32.partialorder %v16661_v19, 0.0 }
 0x9bb   : > { %v12506_v23 = vpop.eup %12505  ;;  %v10431_v44 = vadd.f32 -1.0, %v12504_v5  ;;  %v8030_v0 = vmin.f32 %v16665_v10, 0.0  ;;  %v8277_v45 = vsel %vm7957_vm1, %v16608_v49, %v10429_v59  ;;  %v16683_v33 = vadd.f32 %v7836_v51, %v16578_v62  ;;  %10972 = vmatprep.subr.bf16.mxu1 %v11579_v14 }
 0x9bc   : > { %v10432_v3 = vadd.f32 -1.0, %v12506_v23  ;;  %v8109_v34 = vmul.f32 1.442695, %v8029_v38  ;;  %v8031_v36 = vmin.f32 %v16671_v6, 0.0  ;;  %v8278_v52 = vsel %vm7958_vm2, %v16611_v22, %v10430_v9 }
 0x9bd   : > { %v8279_v4 = vsel %vm7959_vm3, %v16615_v18, %v10431_v44  ;;  %v8111_v53 = vmul.f32 1.442695, %v8030_v0  ;;  %v8032_v18 = vmin.f32 %v16683_v33, 0.0  ;;  %vm7967_vm10 = vcmp.gt.f32.partialorder %v16671_v6, 0.0 }
 0x9be   : > { %v8370_v41 = vpack.c.bf16 %v8279_v4, %v8277_v45  ;;  %12515 = vpow2.f32 %v8109_v34  ;;  %v8113_v49 = vmul.f32 1.442695, %v8031_v36  ;;  %v8280_v25 = vsel %vm7960_vm4, %v16619_v28, %v10432_v3  ;;  %10973 = vmatpush3.bf16.msra.mxu1 %v11580_v47 }
 0x9bf   : > { %12517 = vpow2.f32 %v8111_v53  ;;  %v8371_v57 = vpack.c.bf16 %v8280_v25, %v8278_v52  ;;  %v8115_v22 = vmul.f32 1.442695, %v8032_v18  ;;  %10974 = vmatprep.subr.bf16.mxu1 %v11581_v1  ;;  %vm7968_vm11 = vcmp.gt.f32.partialorder %v16683_v33, 0.0 }
 0x9c0   : > { %v12508_v24 = vpop.eup %12507  ;;  %12519 = vpow2.f32 %v8113_v49  ;;  %v7840_v7 = vpop.f32.mrb[0].mxu1  ;;  %vm7966_vm12 = vcmp.gt.f32.partialorder %v16665_v10, 0.0 }
 0x9c1   : > { %v12510_v2 = vpop.eup %12509  ;;  %v10433_v31 = vadd.f32 -1.0, %v12508_v24  ;;  %8621 = vmatprep.mubr.bf16.mxu0 %v8371_v57  ;;  %12521 = vpow2.f32 %v8115_v22  ;;  %v16697_v42 = vadd.f32 %v7840_v7, %v16573_v63  ;;  %v7842_v43 = vpop.f32.mrb[1].mxu1 }
 0x9c2   : > { %v12512_v50 = vpop.eup %12511  ;;  %8622 = vmatmul.mubr.bf16.gmra.mrb[124].mxu0 %v8370_v41  ;;  %v10434_v56 = vadd.f32 -1.0, %v12510_v2  ;;  %v16703_v20 = vadd.f32 %v7842_v43, %v16578_v62  ;;  %v7844_v60 = vpop.f32.mrb[2].mxu1  ;;  %10975 = vmatpush3.bf16.msra.mxu1 %v11582_v48 }
 0x9c3   : > { %v12514_v28 = vpop.eup %12513  ;;  %v10435_v35 = vadd.f32 -1.0, %v12512_v50  ;;  %v8281_v30 = vsel %vm7961_vm6, %v16631_v39, %v10433_v31  ;;  %v8033_v61 = vmin.f32 %v16697_v42, 0.0  ;;  %v16709_v37 = vadd.f32 %v7844_v60, %v16573_v63  ;;  %v7846_v16 = vpop.f32.mrb[3].mxu1  ;;  %10976 = vmatprep.subr.bf16.mxu1 %v11583_v32 }
 0x9c4   : > { %v10436_v46 = vadd.f32 -1.0, %v12514_v28  ;;  %v8034_v39 = vmin.f32 %v16703_v20, 0.0  ;;  %v8282_v55 = vsel %vm7962_vm7, %v16635_v54, %v10434_v56  ;;  %vm7969_vm13 = vcmp.gt.f32.partialorder %v16697_v42, 0.0 }
 0x9c5   : > { %v8283_v40 = vsel %vm7963_vm5, %v16639_v21, %v10435_v35  ;;  %v16713_v21 = vadd.f32 %v7846_v16, %v16578_v62  ;;  %v8117_v11 = vmul.f32 1.442695, %v8033_v61  ;;  %v8035_v59 = vmin.f32 %v16709_v37, 0.0 }
 0x9c6   : > { %v8372_v58 = vpack.c.bf16 %v8283_v40, %v8281_v30  ;;  %v8284_v8 = vsel %vm7964_vm8, %v16649_v17, %v10436_v46  ;;  %v8119_v9 = vmul.f32 1.442695, %v8034_v39  ;;  %10977 = vmatpush3.bf16.msra.mxu1 %v11584_v26  ;;  %vm7971_vm14 = vcmp.gt.f32.partialorder %v16709_v37, 0.0 }
 0x9c7   : > { %v8373_v27 = vpack.c.bf16 %v8284_v8, %v8282_v55  ;;  %v8036_v38 = vmin.f32 %v16713_v21, 0.0  ;;  %12523 = vpow2.f32 %v8117_v11  ;;  %v8121_v14 = vmul.f32 1.442695, %v8035_v59 }
 0x9c8   : > { %v12516_v12 = vpop.eup %12515  ;;  %12525 = vpow2.f32 %v8119_v9  ;;  %v7850_v23 = vpop.f32.mrb[4].mxu1  ;;  %vm7970_vm15 = vcmp.gt.f32.partialorder %v16703_v20, 0.0  ;;  %vm7972_vm0 = vcmp.gt.f32.partialorder %v16713_v21, 0.0 }
 0x9c9   : > { %v12518_v29 = vpop.eup %12517  ;;  %v10437_v5 = vadd.f32 -1.0, %v12516_v12  ;;  %8631 = vmatprep.mubr.bf16.mxu0 %v8373_v27  ;;  %v8123_v17 = vmul.f32 1.442695, %v8036_v38  ;;  %12527 = vpow2.f32 %v8121_v14  ;;  %v16722_v0 = vadd.f32 %v7850_v23, %v16573_v63  ;;  %v7852_v45 = vpop.f32.mrb[5].mxu1 }
 0x9ca   : > { %v12520_v51 = vpop.eup %12519  ;;  %8632 = vmatmul.mubr.bf16.gmra.mrb[128].mxu0 %v8372_v58  ;;  %v10438_v44 = vadd.f32 -1.0, %v12518_v29  ;;  %v16727_v4 = vadd.f32 %v7852_v45, %v16578_v62  ;;  %v7854_v53 = vpop.f32.mrb[6].mxu1 }
 0x9cb   : > { %v10439_v54 = vadd.f32 -1.0, %v12520_v51  ;;  %v12522_v3 = vpop.eup %12521  ;;  %v8285_v34 = vsel %vm7965_vm9, %v16661_v19, %v10437_v5  ;;  %12529 = vpow2.f32 %v8123_v17  ;;  %v8037_v41 = vmin.f32 %v16722_v0, 0.0  ;;  %v7856_v49 = vpop.f32.mrb[7].mxu1 }
 0x9cc   : > { %v10440_v47 = vadd.f32 -1.0, %v12522_v3  ;;  %v8038_v25 = vmin.f32 %v16727_v4, 0.0  ;;  %v16733_v1 = vadd.f32 %v7854_v53, %v16573_v63  ;;  %v16736_v19 = vadd.f32 %v7856_v49, %v16578_v62 }
 0x9cd   : > { %v8287_v36 = vsel %vm7967_vm10, %v16671_v6, %v10439_v54  ;;  %v8125_v6 = vmul.f32 1.442695, %v8037_v41  ;;  %v8286_v2 = vsel %vm7966_vm12, %v16665_v10, %v10438_v44  ;;  %vm7973_vm1 = vcmp.gt.f32.partialorder %v16722_v0, 0.0 }
 0x9ce   : > { %v8374_v52 = vpack.c.bf16 %v8287_v36, %v8285_v34  ;;  %v8288_v18 = vsel %vm7968_vm11, %v16683_v33, %v10440_v47  ;;  %v8127_v57 = vmul.f32 1.442695, %v8038_v25  ;;  %v8039_v24 = vmin.f32 %v16733_v1, 0.0 }
 0x9cf   : > { %12531 = vpow2.f32 %v8125_v6  ;;  %v8040_v31 = vmin.f32 %v16736_v19, 0.0  ;;  %v8375_v22 = vpack.c.bf16 %v8288_v18, %v8286_v2  ;;  %vm7974_vm2 = vcmp.gt.f32.partialorder %v16727_v4, 0.0 }
 0x9d0   : > { %12533 = vpow2.f32 %v8127_v57  ;;  %v8129_v48 = vmul.f32 1.442695, %v8039_v24  ;;  %v7860_v50 = vpop.f32.mrb[8].mxu1  ;;  %vm7975_vm3 = vcmp.gt.f32.partialorder %v16733_v1, 0.0  ;;  %vm7976_vm4 = vcmp.gt.f32.partialorder %v16736_v19, 0.0 }
 0x9d1   : > { %v12524_v32 = vpop.eup %12523  ;;  %v8131_v28 = vmul.f32 1.442695, %v8040_v31  ;;  %v16744_v56 = vadd.f32 %v7860_v50, %v16573_v63  ;;  %v7862_v35 = vpop.f32.mrb[9].mxu1  ;;  %8641 = vmatprep.mubr.bf16.mxu0 %v8375_v22 }
 0x9d2   : > { %v12526_v33 = vpop.eup %12525  ;;  %v10441_v7 = vadd.f32 -1.0, %v12524_v32  ;;  %12535 = vpow2.f32 %v8129_v48  ;;  %v16747_v46 = vadd.f32 %v7862_v35, %v16578_v62  ;;  %v7864_v10 = vpop.f32.mrb[10].mxu1  ;;  %8642 = vmatmul.mubr.bf16.gmra.mrb[132].mxu0 %v8374_v52 }
 0x9d3   : > { %v12528_v43 = vpop.eup %12527  ;;  %12537 = vpow2.f32 %v8131_v28  ;;  %v8041_v30 = vmin.f32 %v16744_v56, 0.0  ;;  %v7866_v40 = vpop.f32.mrb[11].mxu1  ;;  %v10442_v26 = vadd.f32 -1.0, %v12526_v33  ;;  %v16754_v55 = vadd.f32 %v7864_v10, %v16573_v63 }
 0x9d4   : > { %v10443_v58 = vadd.f32 -1.0, %v12528_v43  ;;  %v8042_v61 = vmin.f32 %v16747_v46, 0.0  ;;  %v16757_v8 = vadd.f32 %v7866_v40, %v16578_v62  ;;  %v8289_v12 = vsel %vm7969_vm13, %v16697_v42, %v10441_v7 }
 0x9d5   : > { %v12530_v60 = vpop.eup %12529  ;;  %v8133_v39 = vmul.f32 1.442695, %v8041_v30  ;;  %v8043_v29 = vmin.f32 %v16754_v55, 0.0  ;;  %v8290_v38 = vsel %vm7970_vm15, %v16703_v20, %v10442_v26  ;;  %vm7977_vm6 = vcmp.gt.f32.partialorder %v16744_v56, 0.0 }
 0x9d6   : > { %v10444_v16 = vadd.f32 -1.0, %v12530_v60  ;;  %v8291_v11 = vsel %vm7971_vm14, %v16709_v37, %v10443_v58  ;;  %v8135_v59 = vmul.f32 1.442695, %v8042_v61  ;;  %v8044_v5 = vmin.f32 %v16757_v8, 0.0 }
 0x9d7   : > { %v8376_v27 = vpack.c.bf16 %v8291_v11, %v8289_v12  ;;  %12539 = vpow2.f32 %v8133_v39  ;;  %v8137_v14 = vmul.f32 1.442695, %v8043_v29  ;;  %vm7978_vm5 = vcmp.gt.f32.partialorder %v16747_v46, 0.0 }
 0x9d8   : > { %12541 = vpow2.f32 %v8135_v59  ;;  %v7870_v9 = vpop.f32.mrb[12].mxu1  ;;  %v8292_v51 = vsel %vm7972_vm0, %v16713_v21, %v10444_v16  ;;  %v8139_v44 = vmul.f32 1.442695, %v8044_v5  ;;  %vm7979_vm7 = vcmp.gt.f32.partialorder %v16754_v55, 0.0 }
 0x9d9   : > { %v12532_v42 = vpop.eup %12531  ;;  %v16768_v54 = vadd.f32 %v7870_v9, %v16573_v63  ;;  %v7872_v37 = vpop.f32.mrb[13].mxu1  ;;  %v8377_v17 = vpack.c.bf16 %v8292_v51, %v8290_v38  ;;  %12543 = vpow2.f32 %v8137_v14  ;;  %vm7980_vm8 = vcmp.gt.f32.partialorder %v16757_v8, 0.0 }
 0x9da   : > { %v12534_v23 = vpop.eup %12533  ;;  %v16771_v45 = vadd.f32 %v7872_v37, %v16578_v62  ;;  %v7874_v3 = vpop.f32.mrb[14].mxu1  ;;  %v10445_v34 = vadd.f32 -1.0, %v12532_v42  ;;  %12545 = vpow2.f32 %v8139_v44 }
 0x9db   : > { %v8045_v36 = vmin.f32 %v16768_v54, 0.0  ;;  %8651 = vmatprep.mubr.bf16.mxu0 %v8377_v17  ;;  %v7876_v20 = vpop.f32.mrb[15].mxu1  ;;  %v10446_v53 = vadd.f32 -1.0, %v12534_v23  ;;  %v16777_v25 = vadd.f32 %v7874_v3, %v16573_v63  ;;  %vm7981_vm9 = vcmp.gt.f32.partialorder %v16768_v54, 0.0 }
 0x9dc   : > { %v12536_v21 = vpop.eup %12535  ;;  %v8046_v52 = vmin.f32 %v16771_v45, 0.0  ;;  %8652 = vmatmul.mubr.bf16.gmra.mrb[136].mxu0 %v8376_v27  ;;  %v16780_v6 = vadd.f32 %v7876_v20, %v16578_v62  ;;  %v8293_v24 = vsel %vm7973_vm1, %v16722_v0, %v10445_v34  ;;  %vm7982_vm10 = vcmp.gt.f32.partialorder %v16771_v45, 0.0 }
 0x9dd   : > { %v12538_v47 = vpop.eup %12537  ;;  %v10447_v41 = vadd.f32 -1.0, %v12536_v21  ;;  %v8141_v49 = vmul.f32 1.442695, %v8045_v36  ;;  %v8047_v31 = vmin.f32 %v16777_v25, 0.0  ;;  %v8294_v0 = vsel %vm7974_vm2, %v16727_v4, %v10446_v53 }
 0x9de   : > { %v10448_v18 = vadd.f32 -1.0, %v12538_v47  ;;  %v8143_v57 = vmul.f32 1.442695, %v8046_v52  ;;  %v8048_v48 = vmin.f32 %v16780_v6, 0.0  ;;  %vm7983_vm11 = vcmp.gt.f32.partialorder %v16777_v25, 0.0 }
 0x9df   : > { %v8295_v2 = vsel %vm7975_vm3, %v16733_v1, %v10447_v41  ;;  %12547 = vpow2.f32 %v8141_v49  ;;  %v8145_v28 = vmul.f32 1.442695, %v8047_v31  ;;  %vm7984_vm12 = vcmp.gt.f32.partialorder %v16780_v6, 0.0 }
 0x9e0   : > { %v8378_v22 = vpack.c.bf16 %v8295_v2, %v8293_v24  ;;  %12549 = vpow2.f32 %v8143_v57  ;;  %v7880_v50 = vpop.f32.mrb[16].mxu1  ;;  %v8296_v1 = vsel %vm7976_vm4, %v16736_v19, %v10448_v18  ;;  %v8147_v10 = vmul.f32 1.442695, %v8048_v48 }
 0x9e1   : > { %v12540_v32 = vpop.eup %12539  ;;  %v16790_v35 = vadd.f32 %v7880_v50, %v16573_v63  ;;  %v7882_v33 = vpop.f32.mrb[17].mxu1  ;;  %v8379_v40 = vpack.c.bf16 %v8296_v1, %v8294_v0  ;;  %12551 = vpow2.f32 %v8145_v28 }
 0x9e2   : > { %v12542_v7 = vpop.eup %12541  ;;  %v16797_v43 = vadd.f32 %v7882_v33, %v16578_v62  ;;  %v7884_v30 = vpop.f32.mrb[18].mxu1  ;;  %v10449_v60 = vadd.f32 -1.0, %v12540_v32  ;;  %12553 = vpow2.f32 %v8147_v10 }
 0x9e3   : > { %v8049_v26 = vmin.f32 %v16790_v35, 0.0  ;;  %v7886_v58 = vpop.f32.mrb[19].mxu1  ;;  %v10450_v61 = vadd.f32 -1.0, %v12542_v7  ;;  %8661 = vmatprep.mubr.bf16.mxu0 %v8379_v40  ;;  %v12544_v19 = vpop.eup %12543  ;;  %v16804_v39 = vadd.f32 %v7884_v30, %v16573_v63  ;;  %vm7985_vm13 = vcmp.gt.f32.partialorder %v16790_v35, 0.0 }
 0x9e4   : > { %v8050_v4 = vmin.f32 %v16797_v43, 0.0  ;;  %v16807_v12 = vadd.f32 %v7886_v58, %v16578_v62  ;;  %8662 = vmatmul.mubr.bf16.gmra.mrb[140].mxu0 %v8378_v22  ;;  %v12546_v11 = vpop.eup %12545  ;;  %v10451_v59 = vadd.f32 -1.0, %v12544_v19  ;;  %v8297_v29 = vsel %vm7977_vm6, %v16744_v56, %v10449_v60 }
 0x9e5   : > { %v8149_v16 = vmul.f32 1.442695, %v8049_v26  ;;  %v10452_v5 = vadd.f32 -1.0, %v12546_v11  ;;  %v8051_v9 = vmin.f32 %v16804_v39, 0.0  ;;  %v8298_v14 = vsel %vm7978_vm5, %v16747_v46, %v10450_v61 }
 0x9e6   : > { %v8151_v27 = vmul.f32 1.442695, %v8050_v4  ;;  %v8299_v38 = vsel %vm7979_vm7, %v16754_v55, %v10451_v59  ;;  %v8052_v51 = vmin.f32 %v16807_v12, 0.0  ;;  %vm7986_vm14 = vcmp.gt.f32.partialorder %v16797_v43, 0.0 }
 0x9e7   : > { %12555 = vpow2.f32 %v8149_v16  ;;  %v8380_v17 = vpack.c.bf16 %v8299_v38, %v8297_v29  ;;  %v8153_v23 = vmul.f32 1.442695, %v8051_v9  ;;  %v8300_v3 = vsel %vm7980_vm8, %v16757_v8, %v10452_v5 }
 0x9e8   : > { %12557 = vpow2.f32 %v8151_v27  ;;  %v7890_v42 = vpop.f32.mrb[20].mxu1  ;;  %v8155_v34 = vmul.f32 1.442695, %v8052_v51  ;;  %v8381_v21 = vpack.c.bf16 %v8300_v3, %v8298_v14  ;;  %vm7987_vm15 = vcmp.gt.f32.partialorder %v16804_v39, 0.0 }
 0x9e9   : > { %v12548_v37 = vpop.eup %12547  ;;  %v16821_v44 = vadd.f32 %v7890_v42, %v16573_v63  ;;  %v7892_v56 = vpop.f32.mrb[21].mxu1  ;;  %12559 = vpow2.f32 %v8153_v23  ;;  %vm7988_vm0 = vcmp.gt.f32.partialorder %v16807_v12, 0.0 }
 0x9ea   : > { %v12550_v55 = vpop.eup %12549  ;;  %v16827_v36 = vadd.f32 %v7892_v56, %v16578_v62  ;;  %v7894_v20 = vpop.f32.mrb[22].mxu1  ;;  %v10453_v52 = vadd.f32 -1.0, %v12548_v37  ;;  %12561 = vpow2.f32 %v8155_v34  ;;  %8671 = vmatprep.mubr.bf16.mxu0 %v8381_v21 }
 0x9eb   : > { %v8053_v46 = vmin.f32 %v16821_v44, 0.0  ;;  %v7896_v53 = vpop.f32.mrb[23].mxu1  ;;  %v12552_v41 = vpop.eup %12551  ;;  %v10454_v8 = vadd.f32 -1.0, %v12550_v55  ;;  %v16833_v18 = vadd.f32 %v7894_v20, %v16573_v63  ;;  %vm7989_vm1 = vcmp.gt.f32.partialorder %v16821_v44, 0.0 }
 0x9ec   : > { %v8054_v47 = vmin.f32 %v16827_v36, 0.0  ;;  %v16836_v57 = vadd.f32 %v7896_v53, %v16578_v62  ;;  %8672 = vmatmul.mubr.bf16.gmra.mrb[144].mxu0 %v8380_v17  ;;  %v12554_v24 = vpop.eup %12553  ;;  %v10455_v2 = vadd.f32 -1.0, %v12552_v41  ;;  %v8301_v50 = vsel %vm7981_vm9, %v16768_v54, %v10453_v52 }
 0x9ed   : > { %v8157_v49 = vmul.f32 1.442695, %v8053_v46  ;;  %v10456_v22 = vadd.f32 -1.0, %v12554_v24  ;;  %v8055_v48 = vmin.f32 %v16833_v18, 0.0  ;;  %v8302_v7 = vsel %vm7982_vm10, %v16771_v45, %v10454_v8 }
 0x9ee   : > { %v8159_v31 = vmul.f32 1.442695, %v8054_v47  ;;  %v8303_v32 = vsel %vm7983_vm11, %v16777_v25, %v10455_v2  ;;  %v8056_v28 = vmin.f32 %v16836_v57, 0.0  ;;  %vm7990_vm2 = vcmp.gt.f32.partialorder %v16827_v36, 0.0 }
 0x9ef   : > { %12563 = vpow2.f32 %v8157_v49  ;;  %v8382_v0 = vpack.c.bf16 %v8303_v32, %v8301_v50  ;;  %v8161_v1 = vmul.f32 1.442695, %v8055_v48  ;;  %v8304_v10 = vsel %vm7984_vm12, %v16780_v6, %v10456_v22 }
 0x9f0   : > { %12565 = vpow2.f32 %v8159_v31  ;;  %v8163_v40 = vmul.f32 1.442695, %v8056_v28  ;;  %v7900_v60 = vpop.f32.mrb[24].mxu1  ;;  %v8383_v26 = vpack.c.bf16 %v8304_v10, %v8302_v7  ;;  %vm7991_vm3 = vcmp.gt.f32.partialorder %v16833_v18, 0.0 }
 0x9f1   : > { %v12556_v33 = vpop.eup %12555  ;;  %12567 = vpow2.f32 %v8161_v1  ;;  %v16850_v54 = vadd.f32 %v7900_v60, %v16573_v63  ;;  %v7902_v25 = vpop.f32.mrb[25].mxu1  ;;  %vm7992_vm4 = vcmp.gt.f32.partialorder %v16836_v57, 0.0 }
 0x9f2   : > { %v12558_v30 = vpop.eup %12557  ;;  %v10457_v58 = vadd.f32 -1.0, %v12556_v33  ;;  %12569 = vpow2.f32 %v8163_v40  ;;  %v16854_v4 = vadd.f32 %v7902_v25, %v16578_v62  ;;  %v7904_v45 = vpop.f32.mrb[26].mxu1  ;;  %8681 = vmatprep.mubr.bf16.mxu0 %v8383_v26 }
 0x9f3   : > { %v10458_v61 = vadd.f32 -1.0, %v12558_v30  ;;  %v12560_v6 = vpop.eup %12559  ;;  %v8057_v19 = vmin.f32 %v16850_v54, 0.0  ;;  %v16860_v16 = vadd.f32 %v7904_v45, %v16573_v63  ;;  %v7906_v11 = vpop.f32.mrb[27].mxu1  ;;  %vm7993_vm6 = vcmp.gt.f32.partialorder %v16850_v54, 0.0 }
 0x9f4   : > { %8682 = vmatmul.mubr.bf16.gmra.mrb[148].mxu0 %v8382_v0  ;;  %v12562_v59 = vpop.eup %12561  ;;  %v10459_v27 = vadd.f32 -1.0, %v12560_v6  ;;  %v8058_v29 = vmin.f32 %v16854_v4, 0.0  ;;  %v16865_v5 = vadd.f32 %v7906_v11, %v16578_v62  ;;  %v8305_v9 = vsel %vm7985_vm13, %v16790_v35, %v10457_v58 }
 0x9f5   : > { %v10460_v38 = vadd.f32 -1.0, %v12562_v59  ;;  %v8165_v51 = vmul.f32 1.442695, %v8057_v19  ;;  %v8059_v42 = vmin.f32 %v16860_v16, 0.0  ;;  %v8306_v23 = vsel %vm7986_vm14, %v16797_v43, %v10458_v61 }
 0x9f6   : > { %v8307_v14 = vsel %vm7987_vm15, %v16804_v39, %v10459_v27  ;;  %v8167_v37 = vmul.f32 1.442695, %v8058_v29  ;;  %v8060_v17 = vmin.f32 %v16865_v5, 0.0  ;;  %vm7994_vm5 = vcmp.gt.f32.partialorder %v16854_v4, 0.0 }
 0x9f7   : > { %v8384_v3 = vpack.c.bf16 %v8307_v14, %v8305_v9  ;;  %12571 = vpow2.f32 %v8165_v51  ;;  %v8169_v55 = vmul.f32 1.442695, %v8059_v42  ;;  %v8308_v34 = vsel %vm7988_vm0, %v16807_v12, %v10460_v38 }
 0x9f8   : > { %12573 = vpow2.f32 %v8167_v37  ;;  %v8171_v20 = vmul.f32 1.442695, %v8060_v17  ;;  %v8385_v46 = vpack.c.bf16 %v8308_v34, %v8306_v23  ;;  %vm7995_vm7 = vcmp.gt.f32.partialorder %v16860_v16, 0.0 }
 0x9f9   : > { %v12564_v56 = vpop.eup %12563  ;;  %12575 = vpow2.f32 %v8169_v55  ;;  %vm7996_vm8 = vcmp.gt.f32.partialorder %v16865_v5, 0.0 }
 0x9fa   : > { %v12566_v35 = vpop.eup %12565  ;;  %v10461_v53 = vadd.f32 -1.0, %v12564_v56  ;;  %12577 = vpow2.f32 %v8171_v20  ;;  %8691 = vmatprep.mubr.bf16.mxu0 %v8385_v46 }
 0x9fb   : > { %v10462_v43 = vadd.f32 -1.0, %v12566_v35  ;;  %v12568_v12 = vpop.eup %12567 }
 0x9fc   : > { %8692 = vmatmul.mubr.bf16.gmra.mrb[152].mxu0 %v8384_v3  ;;  %v12570_v2 = vpop.eup %12569  ;;  %v10463_v31 = vadd.f32 -1.0, %v12568_v12  ;;  %v8309_v50 = vsel %vm7989_vm1, %v16821_v44, %v10461_v53 }
 0x9fd   : > { %v7910_v21 = vpop.f32.mrb[28].mxu1  ;;  %v10464_v32 = vadd.f32 -1.0, %v12570_v2  ;;  %v8310_v10 = vsel %vm7990_vm2, %v16827_v36, %v10462_v43 }
 0x9fe   : > { %v16878_v39 = vadd.f32 %v7910_v21, %v16573_v63  ;;  %v7912_v52 = vpop.f32.mrb[29].mxu1  ;;  %v8311_v0 = vsel %vm7991_vm3, %v16833_v18, %v10463_v31 }
 0x9ff   : > { %v16882_v47 = vadd.f32 %v7912_v52, %v16578_v62  ;;  %v7914_v41 = vpop.f32.mrb[30].mxu1  ;;  %v8386_v30 = vpack.c.bf16 %v8311_v0, %v8309_v50  ;;  %v8312_v60 = vsel %vm7992_vm4, %v16836_v57, %v10464_v32 }
 0xa00   : > { %v8061_v8 = vmin.f32 %v16878_v39, 0.0  ;;  %v16888_v49 = vadd.f32 %v7914_v41, %v16573_v63  ;;  %v7916_v24 = vpop.f32.mrb[31].mxu1  ;;  %v8387_v58 = vpack.c.bf16 %v8312_v60, %v8310_v10  ;;  %vm7997_vm9 = vcmp.gt.f32.partialorder %v16878_v39, 0.0 }
 0xa01   : > { %v8062_v22 = vmin.f32 %v16882_v47, 0.0  ;;  %v16893_v48 = vadd.f32 %v7916_v24, %v16578_v62  ;;  %v12572_v25 = vpop.eup %12571  ;;  %vm7998_vm10 = vcmp.gt.f32.partialorder %v16882_v47, 0.0 }
 0xa02   : > { %v8173_v28 = vmul.f32 1.442695, %v8061_v8  ;;  %v8063_v33 = vmin.f32 %v16888_v49, 0.0  ;;  %v12574_v45 = vpop.eup %12573  ;;  %v10465_v6 = vadd.f32 -1.0, %v12572_v25  ;;  %8701 = vmatprep.mubr.bf16.mxu0 %v8387_v58  ;;  %vm7999_vm11 = vcmp.gt.f32.partialorder %v16888_v49, 0.0 }
 0xa03   : > { %v8175_v1 = vmul.f32 1.442695, %v8062_v22  ;;  %v8064_v7 = vmin.f32 %v16893_v48, 0.0  ;;  %v12576_v57 = vpop.eup %12575  ;;  %v10466_v11 = vadd.f32 -1.0, %v12574_v45  ;;  %vm8000_vm12 = vcmp.gt.f32.partialorder %v16893_v48, 0.0 }
 0xa04   : > { %12579 = vpow2.f32 %v8173_v28  ;;  %v8177_v40 = vmul.f32 1.442695, %v8063_v33  ;;  %8702 = vmatmul.mubr.bf16.gmra.mrb[156].mxu0 %v8386_v30  ;;  %v12578_v9 = vpop.eup %12577  ;;  %v10467_v38 = vadd.f32 -1.0, %v12576_v57  ;;  %v8313_v42 = vsel %vm7993_vm6, %v16850_v54, %v10465_v6 }
 0xa05   : > { %12581 = vpow2.f32 %v8175_v1  ;;  %v8179_v44 = vmul.f32 1.442695, %v8064_v7  ;;  %v7920_v26 = vpop.f32.mrb[32].mxu1  ;;  %v10468_v14 = vadd.f32 -1.0, %v12578_v9  ;;  %v8314_v55 = vsel %vm7994_vm5, %v16854_v4, %v10466_v11 }
 0xa06   : > { %12583 = vpow2.f32 %v8177_v40  ;;  %v16906_v18 = vadd.f32 %v7920_v26, %v16573_v63  ;;  %v7922_v61 = vpop.f32.mrb[33].mxu1  ;;  %v8315_v23 = vsel %vm7995_vm7, %v16860_v16, %v10467_v38 }
 0xa07   : > { %12585 = vpow2.f32 %v8179_v44  ;;  %v16910_v36 = vadd.f32 %v7922_v61, %v16578_v62  ;;  %v7924_v19 = vpop.f32.mrb[34].mxu1  ;;  %v8388_v34 = vpack.c.bf16 %v8315_v23, %v8313_v42  ;;  %v8316_v20 = vsel %vm7996_vm8, %v16865_v5, %v10468_v14 }
 0xa08   : > { %v8065_v59 = vmin.f32 %v16906_v18, 0.0  ;;  %v16915_v27 = vadd.f32 %v7924_v19, %v16573_v63  ;;  %v7926_v29 = vpop.f32.mrb[35].mxu1  ;;  %v8389_v46 = vpack.c.bf16 %v8316_v20, %v8314_v55  ;;  %vm8001_vm13 = vcmp.gt.f32.partialorder %v16906_v18, 0.0 }
 0xa09   : > { %v8066_v51 = vmin.f32 %v16910_v36, 0.0  ;;  %v16926_v3 = vadd.f32 %v7926_v29, %v16578_v62  ;;  %vm8002_vm15 = vcmp.gt.f32.partialorder %v16910_v36, 0.0 }
 0xa0a   : > { %v8181_v37 = vmul.f32 1.442695, %v8065_v59  ;;  %v8067_v17 = vmin.f32 %v16915_v27, 0.0  ;;  %8711 = vmatprep.mubr.bf16.mxu0 %v8389_v46  ;;  %vm8003_vm14 = vcmp.gt.f32.partialorder %v16915_v27, 0.0 }
 0xa0b   : > { %v8183_v56 = vmul.f32 1.442695, %v8066_v51  ;;  %v8068_v54 = vmin.f32 %v16926_v3, 0.0  ;;  %vm8004_vm0 = vcmp.gt.f32.partialorder %v16926_v3, 0.0 }
 0xa0c   : > { %12587 = vpow2.f32 %v8181_v37  ;;  %v8185_v35 = vmul.f32 1.442695, %v8067_v17  ;;  %8712 = vmatmul.mubr.bf16.gmra.mrb[160].mxu0 %v8388_v34 }
 0xa0d   : > { %12589 = vpow2.f32 %v8183_v56  ;;  %v7930_v21 = vpop.f32.mrb[36].mxu1  ;;  %v8187_v41 = vmul.f32 1.442695, %v8068_v54 }
 0xa0e   : > { %v12580_v53 = vpop.eup %12579  ;;  %12591 = vpow2.f32 %v8185_v35  ;;  %v16934_v16 = vadd.f32 %v7930_v21, %v16573_v63  ;;  %v7932_v52 = vpop.f32.mrb[37].mxu1 }
 0xa0f   : > { %v12582_v43 = vpop.eup %12581  ;;  %v10469_v4 = vadd.f32 -1.0, %v12580_v53  ;;  %v16938_v12 = vadd.f32 %v7932_v52, %v16578_v62  ;;  %v7934_v5 = vpop.f32.mrb[38].mxu1  ;;  %12593 = vpow2.f32 %v8187_v41 }
 0xa10   : > { %v12584_v8 = vpop.eup %12583  ;;  %v10470_v24 = vadd.f32 -1.0, %v12582_v43  ;;  %v8069_v2 = vmin.f32 %v16934_v16, 0.0  ;;  %v16943_v31 = vadd.f32 %v7934_v5, %v16573_v63  ;;  %v7936_v22 = vpop.f32.mrb[39].mxu1  ;;  %vm8005_vm1 = vcmp.gt.f32.partialorder %v16934_v16, 0.0 }
 0xa11   : > { %v12586_v50 = vpop.eup %12585  ;;  %v10471_v32 = vadd.f32 -1.0, %v12584_v8  ;;  %v8317_v28 = vsel %vm7997_vm9, %v16878_v39, %v10469_v4  ;;  %v8070_v1 = vmin.f32 %v16938_v12, 0.0  ;;  %v16954_v30 = vadd.f32 %v7936_v22, %v16578_v62  ;;  %v11585_v8 = vld [vmem:[%s13019_s27 + $0x78] sm:$0xff]  }
 0xa12   : > { %v10472_v33 = vadd.f32 -1.0, %v12586_v50  ;;  %v8189_v0 = vmul.f32 1.442695, %v8069_v2  ;;  %v8071_v10 = vmin.f32 %v16943_v31, 0.0  ;;  %v8318_v40 = vsel %vm7998_vm10, %v16882_v47, %v10470_v24  ;;  %10978 = vmatprep.subr.bf16.mxu1 %v11585_v8 }
 0xa13   : > { %v8319_v7 = vsel %vm7999_vm11, %v16888_v49, %v10471_v32  ;;  %v8191_v44 = vmul.f32 1.442695, %v8070_v1  ;;  %v8072_v58 = vmin.f32 %v16954_v30, 0.0  ;;  %vm8007_vm2 = vcmp.gt.f32.partialorder %v16943_v31, 0.0 }
 0xa14   : > { %v8390_v60 = vpack.c.bf16 %v8319_v7, %v8317_v28  ;;  %12595 = vpow2.f32 %v8189_v0  ;;  %v8320_v39 = vsel %vm8000_vm12, %v16893_v48, %v10472_v33  ;;  %v8193_v26 = vmul.f32 1.442695, %v8071_v10 }
 0xa15   : > { %v7940_v25 = vpop.f32.mrb[40].mxu1  ;;  %v8391_v61 = vpack.c.bf16 %v8320_v39, %v8318_v40  ;;  %12597 = vpow2.f32 %v8191_v44  ;;  %v8195_v47 = vmul.f32 1.442695, %v8072_v58  ;;  %vm8006_vm3 = vcmp.gt.f32.partialorder %v16938_v12, 0.0 }
 0xa16   : > { %v12588_v49 = vpop.eup %12587  ;;  %v16962_v45 = vadd.f32 %v7940_v25, %v16573_v63  ;;  %v7942_v6 = vpop.f32.mrb[41].mxu1  ;;  %12599 = vpow2.f32 %v8193_v26  ;;  %vm8008_vm4 = vcmp.gt.f32.partialorder %v16954_v30, 0.0  ;;  %v8365_v25 = vld [vmem:[%s17625_s3] sm:$0x3]  ;;  %s17627_s3 = sshll.u32 %s16375_s5, 8 }
 0xa17   : > { %v12590_v19 = vpop.eup %12589  ;;  %v10473_v57 = vadd.f32 -1.0, %v12588_v49  ;;  %v16965_v11 = vadd.f32 %v7942_v6, %v16578_v62  ;;  %v7944_v59 = vpop.f32.mrb[42].mxu1  ;;  %8721 = vmatprep.mubr.bf16.mxu0 %v8391_v61  ;;  %12601 = vpow2.f32 %v8195_v47  ;;  %v17000_v61 = vrot.slane %v8365_v25, %v13179_v13  ;;  %s17420_s1 = scalar_lea.vmem [#allocation4], %s17627_s3 }
 0xa18   : > { %v12592_v48 = vpop.eup %12591  ;;  %v8073_v29 = vmin.f32 %v16962_v45, 0.0  ;;  %v16969_v9 = vadd.f32 %v7944_v59, %v16573_v63  ;;  %v7946_v38 = vpop.f32.mrb[43].mxu1  ;;  %8722 = vmatmul.mubr.bf16.gmra.mrb[164].mxu0 %v8390_v60  ;;  %v10474_v42 = vadd.f32 -1.0, %v12590_v19  ;;  %vm8009_vm6 = vcmp.gt.f32.partialorder %v16962_v45, 0.0 }
 0xa19   : > { %v10475_v51 = vadd.f32 -1.0, %v12592_v48  ;;  %v8074_v37 = vmin.f32 %v16965_v11, 0.0  ;;  %v12594_v23 = vpop.eup %12593  ;;  %v8321_v56 = vsel %vm8001_vm13, %v16906_v18, %v10473_v57  ;;  %v7947_v55 = vadd.f32 %v7946_v38, %v16578_v62 }
 0xa1a   : > { %v8197_v14 = vmul.f32 1.442695, %v8073_v29  ;;  %v8075_v17 = vmin.f32 %v16969_v9, 0.0  ;;  %v10476_v35 = vadd.f32 -1.0, %v12594_v23  ;;  %v8322_v53 = vsel %vm8002_vm15, %v16910_v36, %v10474_v42  ;;  %v11586_v36 = vld [vmem:[%s13019_s27 + $0x38] sm:$0xff]  }
 0xa1b   : > { %v8323_v63 = vsel %vm8003_vm14, %v16915_v27, %v10475_v51  ;;  %v8199_v20 = vmul.f32 1.442695, %v8074_v37  ;;  %v8076_v21 = vmin.f32 %v7947_v55, 0.0  ;;  %10979 = vmatpush3.bf16.msra.mxu1 %v11586_v36  ;;  %vm8011_vm5 = vcmp.gt.f32.partialorder %v16969_v9, 0.0 }
 0xa1c   : > { %v8392_v34 = vpack.c.bf16 %v8323_v63, %v8321_v56  ;;  %12603 = vpow2.f32 %v8197_v14  ;;  %v8201_v54 = vmul.f32 1.442695, %v8075_v17  ;;  %v8324_v18 = vsel %vm8004_vm0, %v16926_v3, %v10476_v35 }
 0xa1d   : > { %12605 = vpow2.f32 %v8199_v20  ;;  %v8203_v62 = vmul.f32 1.442695, %v8076_v21  ;;  %v8393_v27 = vpack.c.bf16 %v8324_v18, %v8322_v53  ;;  %vm8010_vm7 = vcmp.gt.f32.partialorder %v16965_v11, 0.0 }
 0xa1e   : > { %v12596_v46 = vpop.eup %12595  ;;  %12607 = vpow2.f32 %v8201_v54  ;;  %vm8012_vm8 = vcmp.gt.f32.partialorder %v7947_v55, 0.0  ;;  %v17003_v49 = vrot.slane %v8365_v25, %v13182_v15 }
 0xa1f   : > { %v12598_v52 = vpop.eup %12597  ;;  %v10477_v43 = vadd.f32 -1.0, %v12596_v46  ;;  %12609 = vpow2.f32 %v8203_v62  ;;  %8731 = vmatprep.mubr.bf16.mxu0 %v8393_v27 }
 0xa20   : > { %v12600_v4 = vpop.eup %12599  ;;  %v10478_v41 = vadd.f32 -1.0, %v12598_v52  ;;  %8732 = vmatmul.mubr.bf16.gmra.mrb[168].mxu0 %v8392_v34 }
 0xa21   : > { %v10479_v5 = vadd.f32 -1.0, %v12600_v4  ;;  %v12602_v24 = vpop.eup %12601  ;;  %v8325_v3 = vsel %vm8005_vm1, %v16934_v16, %v10477_v43 }
 0xa22   : > { %v10480_v22 = vadd.f32 -1.0, %v12602_v24  ;;  %v8326_v28 = vsel %vm8006_vm3, %v16938_v12, %v10478_v41 }
 0xa23   : > { %v8327_v2 = vsel %vm8007_vm2, %v16943_v31, %v10479_v5 }
 0xa24   : > { %v8394_v50 = vpack.c.bf16 %v8327_v2, %v8325_v3  ;;  %v8328_v33 = vsel %vm8008_vm4, %v16954_v30, %v10480_v22 }
 0xa25   : > { %v8395_v0 = vpack.c.bf16 %v8328_v33, %v8326_v28 }
 0xa26   : > { %v12604_v32 = vpop.eup %12603 }
 0xa27   : > { %v12606_v1 = vpop.eup %12605  ;;  %v10481_v7 = vadd.f32 -1.0, %v12604_v32  ;;  %8741 = vmatprep.mubr.bf16.mxu0 %v8395_v0 }
 0xa28   : > { %v12608_v10 = vpop.eup %12607  ;;  %v10482_v16 = vadd.f32 -1.0, %v12606_v1  ;;  %8742 = vmatmul.mubr.bf16.gmra.mrb[172].mxu0 %v8394_v50 }
 0xa29   : > { %v10483_v31 = vadd.f32 -1.0, %v12608_v10  ;;  %v12610_v40 = vpop.eup %12609  ;;  %v8329_v60 = vsel %vm8009_vm6, %v16962_v45, %v10481_v7 }
 0xa2a   : > { %v10484_v44 = vadd.f32 -1.0, %v12610_v40  ;;  %v8330_v39 = vsel %vm8010_vm7, %v16965_v11, %v10482_v16 }
 0xa2b   : > { %v8331_v12 = vsel %vm8011_vm5, %v16969_v9, %v10483_v31 }
 0xa2c   : > { %v8396_v30 = vpack.c.bf16 %v8331_v12, %v8329_v60  ;;  %v8332_v26 = vsel %vm8012_vm8, %v7947_v55, %v10484_v44 }
 0xa2d   : > { %v8397_v58 = vpack.c.bf16 %v8332_v26, %v8330_v39 }
 0xa2f   : > { %8751 = vmatprep.mubr.bf16.mxu0 %v8397_v58 }
 0xa30   : > { %8752 = vmatmul.mubr.bf16.gmra.mrb[176].mxu0 %v8396_v30 }
 0xa85   : > { %v8603_v45 = vpop.f32.mrb[116].mxu0 }
 0xa86   : > { %v8604_v6 = vadd.f32 %v8603_v45, %v17000_v61  ;;  %v8605_v19 = vpop.f32.mrb[117].mxu0 }
 0xa87   : > { %v17007_v57 = vadd.f32 %v8605_v19, %v17003_v49  ;;  %v8607_v47 = vpop.f32.mrb[118].mxu0 }
 0xa88   : > { %v8826_v11 = vmin.f32 %v8604_v6, 0.0  ;;  %v8608_v59 = vadd.f32 %v8607_v47, %v17000_v61  ;;  %v8609_v48 = vpop.f32.mrb[119].mxu0  ;;  %vm8762_vm9 = vcmp.gt.f32.partialorder %v8604_v6, 0.0 }
 0xa89   : > { %v8827_v29 = vmin.f32 %v17007_v57, 0.0  ;;  %v17012_v13 = vadd.f32 %v8609_v48, %v17003_v49  ;;  %vm8763_vm10 = vcmp.gt.f32.partialorder %v17007_v57, 0.0 }
 0xa8a   : > { %v8890_v9 = vmul.f32 1.442695, %v8826_v11  ;;  %v8828_v15 = vmin.f32 %v8608_v59, 0.0  ;;  %vm8764_vm11 = vcmp.gt.f32.partialorder %v8608_v59, 0.0 }
 0xa8b   : > { %v8892_v38 = vmul.f32 1.442695, %v8827_v29  ;;  %v8829_v51 = vmin.f32 %v17012_v13, 0.0  ;;  %vm8765_vm12 = vcmp.gt.f32.partialorder %v17012_v13, 0.0 }
 0xa8c   : > { %12611 = vpow2.f32 %v8890_v9  ;;  %v8894_v42 = vmul.f32 1.442695, %v8828_v15 }
 0xa8d   : > { %12613 = vpow2.f32 %v8892_v38  ;;  %v8896_v14 = vmul.f32 1.442695, %v8829_v51  ;;  %v8613_v37 = vpop.f32.mrb[120].mxu0 }
 0xa8e   : > { %12615 = vpow2.f32 %v8894_v42  ;;  %v17016_v17 = vadd.f32 %v8613_v37, %v17000_v61  ;;  %v8615_v23 = vpop.f32.mrb[121].mxu0 }
 0xa8f   : > { %12617 = vpow2.f32 %v8896_v14  ;;  %v17019_v56 = vadd.f32 %v8615_v23, %v17003_v49  ;;  %v8617_v63 = vpop.f32.mrb[122].mxu0 }
 0xa90   : > { %v8830_v55 = vmin.f32 %v17016_v17, 0.0  ;;  %v17023_v34 = vadd.f32 %v8617_v63, %v17000_v61  ;;  %v8619_v35 = vpop.f32.mrb[123].mxu0  ;;  %vm8766_vm13 = vcmp.gt.f32.partialorder %v17016_v17, 0.0 }
 0xa91   : > { %v8831_v20 = vmin.f32 %v17019_v56, 0.0  ;;  %v17027_v54 = vadd.f32 %v8619_v35, %v17003_v49  ;;  %vm8767_vm14 = vcmp.gt.f32.partialorder %v17019_v56, 0.0 }
 0xa92   : > { %v8898_v21 = vmul.f32 1.442695, %v8830_v55  ;;  %v8832_v46 = vmin.f32 %v17023_v34, 0.0  ;;  %vm8768_vm15 = vcmp.gt.f32.partialorder %v17023_v34, 0.0 }
 0xa93   : > { %v8900_v53 = vmul.f32 1.442695, %v8831_v20  ;;  %v8833_v18 = vmin.f32 %v17027_v54, 0.0  ;;  %vm8769_vm0 = vcmp.gt.f32.partialorder %v17027_v54, 0.0 }
 0xa94   : > { %12619 = vpow2.f32 %v8898_v21  ;;  %v8902_v62 = vmul.f32 1.442695, %v8832_v46 }
 0xa95   : > { %12621 = vpow2.f32 %v8900_v53  ;;  %v8904_v27 = vmul.f32 1.442695, %v8833_v18  ;;  %v8623_v52 = vpop.f32.mrb[124].mxu0 }
 0xa96   : > { %v12612_v43 = vpop.eup %12611  ;;  %12623 = vpow2.f32 %v8902_v62  ;;  %v17032_v4 = vadd.f32 %v8623_v52, %v17000_v61  ;;  %v8625_v41 = vpop.f32.mrb[125].mxu0 }
 0xa97   : > { %v12614_v5 = vpop.eup %12613  ;;  %v10517_v8 = vadd.f32 -1.0, %v12612_v43  ;;  %12625 = vpow2.f32 %v8904_v27  ;;  %v17035_v24 = vadd.f32 %v8625_v41, %v17003_v49  ;;  %v8627_v36 = vpop.f32.mrb[126].mxu0 }
 0xa98   : > { %v12616_v3 = vpop.eup %12615  ;;  %v10518_v2 = vadd.f32 -1.0, %v12614_v5  ;;  %v8834_v22 = vmin.f32 %v17032_v4, 0.0  ;;  %v17040_v50 = vadd.f32 %v8627_v36, %v17000_v61  ;;  %v8629_v32 = vpop.f32.mrb[127].mxu0  ;;  %vm8770_vm1 = vcmp.gt.f32.partialorder %v17032_v4, 0.0 }
 0xa99   : > { %v12618_v28 = vpop.eup %12617  ;;  %v10519_v33 = vadd.f32 -1.0, %v12616_v3  ;;  %v8835_v0 = vmin.f32 %v17035_v24, 0.0  ;;  %v9082_v1 = vsel %vm8762_vm9, %v8604_v6, %v10517_v8  ;;  %v17047_v60 = vadd.f32 %v8629_v32, %v17003_v49 }
 0xa9a   : > { %v10520_v7 = vadd.f32 -1.0, %v12618_v28  ;;  %v8906_v10 = vmul.f32 1.442695, %v8834_v22  ;;  %v8836_v16 = vmin.f32 %v17040_v50, 0.0  ;;  %v9083_v12 = vsel %vm8763_vm10, %v17007_v57, %v10518_v2 }
 0xa9b   : > { %v9084_v31 = vsel %vm8764_vm11, %v8608_v59, %v10519_v33  ;;  %v8908_v40 = vmul.f32 1.442695, %v8835_v0  ;;  %v8837_v26 = vmin.f32 %v17047_v60, 0.0  ;;  %vm8772_vm2 = vcmp.gt.f32.partialorder %v17040_v50, 0.0 }
 0xa9c   : > { %v9179_v44 = vpack.c.bf16 %v9084_v31, %v9082_v1  ;;  %12627 = vpow2.f32 %v8906_v10  ;;  %v8910_v30 = vmul.f32 1.442695, %v8836_v16  ;;  %v9085_v39 = vsel %vm8765_vm12, %v17012_v13, %v10520_v7 }
 0xa9d   : > { %12629 = vpow2.f32 %v8908_v40  ;;  %v9180_v58 = vpack.c.bf16 %v9085_v39, %v9083_v12  ;;  %v8633_v45 = vpop.f32.mrb[128].mxu0  ;;  %v8912_v47 = vmul.f32 1.442695, %v8837_v26  ;;  %vm8773_vm3 = vcmp.gt.f32.partialorder %v17047_v60, 0.0 }
 0xa9e   : > { %v12620_v25 = vpop.eup %12619  ;;  %12631 = vpow2.f32 %v8910_v30  ;;  %v17055_v11 = vadd.f32 %v8633_v45, %v17000_v61  ;;  %v8635_v59 = vpop.f32.mrb[129].mxu0  ;;  %vm8771_vm4 = vcmp.gt.f32.partialorder %v17035_v24, 0.0 }
 0xa9f   : > { %v12622_v6 = vpop.eup %12621  ;;  %v10521_v19 = vadd.f32 -1.0, %v12620_v25  ;;  %9345 = vmatprep.mubr.bf16.mxu1 %v9180_v58  ;;  %v17060_v48 = vadd.f32 %v8635_v59, %v17003_v49  ;;  %v8637_v29 = vpop.f32.mrb[130].mxu0  ;;  %12633 = vpow2.f32 %v8912_v47 }
 0xaa0   : > { %v12624_v57 = vpop.eup %12623  ;;  %9346 = vmatmul.mubr.bf16.vlgmr.msra.gmra.mrb[44].mxu1 %v9179_v44  ;;  %v10522_v9 = vadd.f32 -1.0, %v12622_v6  ;;  %v8639_v38 = vpop.f32.mrb[131].mxu0  ;;  %v8838_v42 = vmin.f32 %v17055_v11, 0.0  ;;  %v17069_v63 = vadd.f32 %v8637_v29, %v17000_v61  ;;  %vm8774_vm6 = vcmp.gt.f32.partialorder %v17055_v11, 0.0 }
 0xaa1   : > { %v12626_v13 = vpop.eup %12625  ;;  %v10523_v15 = vadd.f32 -1.0, %v12624_v57  ;;  %v8839_v14 = vmin.f32 %v17060_v48, 0.0  ;;  %v9086_v37 = vsel %vm8766_vm13, %v17016_v17, %v10521_v19  ;;  %v17072_v55 = vadd.f32 %v8639_v38, %v17003_v49 }
 0xaa2   : > { %v10524_v51 = vadd.f32 -1.0, %v12626_v13  ;;  %v8914_v20 = vmul.f32 1.442695, %v8838_v42  ;;  %v8840_v53 = vmin.f32 %v17069_v63, 0.0  ;;  %v9087_v17 = vsel %vm8767_vm14, %v17019_v56, %v10522_v9 }
 0xaa3   : > { %v9088_v23 = vsel %vm8768_vm15, %v17023_v34, %v10523_v15  ;;  %v8916_v21 = vmul.f32 1.442695, %v8839_v14  ;;  %v8841_v18 = vmin.f32 %v17072_v55, 0.0  ;;  %vm8775_vm5 = vcmp.gt.f32.partialorder %v17060_v48, 0.0 }
 0xaa4   : > { %v9181_v35 = vpack.c.bf16 %v9088_v23, %v9086_v37  ;;  %v9089_v46 = vsel %vm8769_vm0, %v17027_v54, %v10524_v51  ;;  %12635 = vpow2.f32 %v8914_v20  ;;  %v8918_v43 = vmul.f32 1.442695, %v8840_v53 }
 0xaa5   : > { %v9182_v62 = vpack.c.bf16 %v9089_v46, %v9087_v17  ;;  %12637 = vpow2.f32 %v8916_v21  ;;  %v8920_v41 = vmul.f32 1.442695, %v8841_v18  ;;  %v8643_v8 = vpop.f32.mrb[132].mxu0  ;;  %vm8776_vm7 = vcmp.gt.f32.partialorder %v17069_v63, 0.0 }
 0xaa6   : > { %v12628_v34 = vpop.eup %12627  ;;  %12639 = vpow2.f32 %v8918_v43  ;;  %v17082_v36 = vadd.f32 %v8643_v8, %v17000_v61  ;;  %v8645_v3 = vpop.f32.mrb[133].mxu0  ;;  %vm8777_vm8 = vcmp.gt.f32.partialorder %v17072_v55, 0.0 }
 0xaa7   : > { %v12630_v27 = vpop.eup %12629  ;;  %v10525_v52 = vadd.f32 -1.0, %v12628_v34  ;;  %9353 = vmatprep.mubr.bf16.mxu1 %v9182_v62  ;;  %12641 = vpow2.f32 %v8920_v41  ;;  %v17086_v2 = vadd.f32 %v8645_v3, %v17003_v49  ;;  %v8647_v22 = vpop.f32.mrb[134].mxu0 }
 0xaa8   : > { %v12632_v5 = vpop.eup %12631  ;;  %9354 = vmatmul.mubr.bf16.gmra.mrb[48].mxu1 %v9181_v35  ;;  %v10526_v56 = vadd.f32 -1.0, %v12630_v27  ;;  %v8842_v0 = vmin.f32 %v17082_v36, 0.0  ;;  %v17092_v1 = vadd.f32 %v8647_v22, %v17000_v61  ;;  %v8649_v7 = vpop.f32.mrb[135].mxu0  ;;  %vm8778_vm9 = vcmp.gt.f32.partialorder %v17082_v36, 0.0 }
 0xaa9   : > { %v10527_v54 = vadd.f32 -1.0, %v12632_v5  ;;  %v12634_v32 = vpop.eup %12633  ;;  %v9090_v28 = vsel %vm8770_vm1, %v17032_v4, %v10525_v52  ;;  %v8843_v31 = vmin.f32 %v17086_v2, 0.0  ;;  %v17098_v44 = vadd.f32 %v8649_v7, %v17003_v49 }
 0xaaa   : > { %v10528_v16 = vadd.f32 -1.0, %v12634_v32  ;;  %v8922_v40 = vmul.f32 1.442695, %v8842_v0  ;;  %v8844_v12 = vmin.f32 %v17092_v1, 0.0  ;;  %v9091_v26 = vsel %vm8771_vm4, %v17035_v24, %v10526_v56 }
 0xaab   : > { %v9092_v33 = vsel %vm8772_vm2, %v17040_v50, %v10527_v54  ;;  %v8924_v4 = vmul.f32 1.442695, %v8843_v31  ;;  %v8845_v39 = vmin.f32 %v17098_v44, 0.0  ;;  %vm8779_vm10 = vcmp.gt.f32.partialorder %v17086_v2, 0.0 }
 0xaac   : > { %v9183_v10 = vpack.c.bf16 %v9092_v33, %v9090_v28  ;;  %v9093_v50 = vsel %vm8773_vm3, %v17047_v60, %v10528_v16  ;;  %12643 = vpow2.f32 %v8922_v40  ;;  %v8926_v30 = vmul.f32 1.442695, %v8844_v12 }
 0xaad   : > { %12645 = vpow2.f32 %v8924_v4  ;;  %v9184_v25 = vpack.c.bf16 %v9093_v50, %v9091_v26  ;;  %v8928_v6 = vmul.f32 1.442695, %v8845_v39  ;;  %vm8780_vm11 = vcmp.gt.f32.partialorder %v17092_v1, 0.0 }
 0xaae   : > { %v12636_v58 = vpop.eup %12635  ;;  %12647 = vpow2.f32 %v8926_v30  ;;  %vm8781_vm12 = vcmp.gt.f32.partialorder %v17098_v44, 0.0 }
 0xaaf   : > { %v12638_v45 = vpop.eup %12637  ;;  %v10529_v19 = vadd.f32 -1.0, %v12636_v58  ;;  %v8653_v47 = vpop.f32.mrb[136].mxu0  ;;  %9361 = vmatprep.mubr.bf16.mxu1 %v9184_v25  ;;  %12649 = vpow2.f32 %v8928_v6 }
 0xab0   : > { %v12640_v59 = vpop.eup %12639  ;;  %v17106_v60 = vadd.f32 %v8653_v47, %v17000_v61  ;;  %v8655_v57 = vpop.f32.mrb[137].mxu0  ;;  %9362 = vmatmul.mubr.bf16.gmra.mrb[52].mxu1 %v9183_v10  ;;  %v10530_v24 = vadd.f32 -1.0, %v12638_v45 }
 0xab1   : > { %v12642_v29 = vpop.eup %12641  ;;  %v10531_v13 = vadd.f32 -1.0, %v12640_v59  ;;  %v17110_v9 = vadd.f32 %v8655_v57, %v17003_v49  ;;  %v8657_v15 = vpop.f32.mrb[138].mxu0  ;;  %v9094_v37 = vsel %vm8774_vm6, %v17055_v11, %v10529_v19 }
 0xab2   : > { %v10532_v38 = vadd.f32 -1.0, %v12642_v29  ;;  %v8846_v51 = vmin.f32 %v17106_v60, 0.0  ;;  %v17115_v42 = vadd.f32 %v8657_v15, %v17000_v61  ;;  %v8659_v14 = vpop.f32.mrb[139].mxu0  ;;  %v9095_v11 = vsel %vm8775_vm5, %v17060_v48, %v10530_v24 }
 0xab3   : > { %v9096_v23 = vsel %vm8776_vm7, %v17069_v63, %v10531_v13  ;;  %v8847_v35 = vmin.f32 %v17110_v9, 0.0  ;;  %v17123_v20 = vadd.f32 %v8659_v14, %v17003_v49  ;;  %vm8782_vm13 = vcmp.gt.f32.partialorder %v17106_v60, 0.0 }
 0xab4   : > { %v9185_v21 = vpack.c.bf16 %v9096_v23, %v9094_v37  ;;  %v8930_v46 = vmul.f32 1.442695, %v8846_v51  ;;  %v8848_v53 = vmin.f32 %v17115_v42, 0.0  ;;  %v9097_v63 = vsel %vm8777_vm8, %v17072_v55, %v10532_v38 }
 0xab5   : > { %v8932_v18 = vmul.f32 1.442695, %v8847_v35  ;;  %v8849_v17 = vmin.f32 %v17123_v20, 0.0  ;;  %v9186_v27 = vpack.c.bf16 %v9097_v63, %v9095_v11  ;;  %vm8783_vm14 = vcmp.gt.f32.partialorder %v17110_v9, 0.0 }
 0xab6   : > { %v12644_v34 = vpop.eup %12643  ;;  %12651 = vpow2.f32 %v8930_v46  ;;  %v8934_v62 = vmul.f32 1.442695, %v8848_v53  ;;  %vm8784_vm15 = vcmp.gt.f32.partialorder %v17115_v42, 0.0  ;;  %vm8785_vm0 = vcmp.gt.f32.partialorder %v17123_v20, 0.0 }
 0xab7   : > { %v12646_v52 = vpop.eup %12645  ;;  %v10533_v43 = vadd.f32 -1.0, %v12644_v34  ;;  %12653 = vpow2.f32 %v8932_v18  ;;  %v8936_v41 = vmul.f32 1.442695, %v8849_v17  ;;  %v8663_v8 = vpop.f32.mrb[140].mxu0  ;;  %9369 = vmatprep.mubr.bf16.mxu1 %v9186_v27 }
 0xab8   : > { %v12648_v5 = vpop.eup %12647  ;;  %12655 = vpow2.f32 %v8934_v62  ;;  %v10534_v54 = vadd.f32 -1.0, %v12646_v52  ;;  %v17133_v56 = vadd.f32 %v8663_v8, %v17000_v61  ;;  %v8665_v48 = vpop.f32.mrb[141].mxu0  ;;  %9370 = vmatmul.mubr.bf16.gmra.mrb[56].mxu1 %v9185_v21 }
 0xab9   : > { %v10535_v3 = vadd.f32 -1.0, %v12648_v5  ;;  %12657 = vpow2.f32 %v8936_v41  ;;  %v12650_v55 = vpop.eup %12649  ;;  %v17139_v22 = vadd.f32 %v8665_v48, %v17003_v49  ;;  %v8667_v32 = vpop.f32.mrb[142].mxu0  ;;  %v9098_v28 = vsel %vm8778_vm9, %v17082_v36, %v10533_v43 }
 0xaba   : > { %v10536_v0 = vadd.f32 -1.0, %v12650_v55  ;;  %v8850_v7 = vmin.f32 %v17133_v56, 0.0  ;;  %v8669_v10 = vpop.f32.mrb[143].mxu0  ;;  %v17147_v40 = vadd.f32 %v8667_v32, %v17000_v61  ;;  %v9099_v36 = vsel %vm8779_vm10, %v17086_v2, %v10534_v54 }
 0xabb   : > { %v9100_v33 = vsel %vm8780_vm11, %v17092_v1, %v10535_v3  ;;  %v8851_v31 = vmin.f32 %v17139_v22, 0.0  ;;  %v17150_v4 = vadd.f32 %v8669_v10, %v17003_v49  ;;  %vm8786_vm1 = vcmp.gt.f32.partialorder %v17133_v56, 0.0 }
 0xabc   : > { %v9187_v16 = vpack.c.bf16 %v9100_v33, %v9098_v28  ;;  %v8938_v12 = vmul.f32 1.442695, %v8850_v7  ;;  %v9101_v1 = vsel %vm8781_vm12, %v17098_v44, %v10536_v0  ;;  %v8852_v30 = vmin.f32 %v17147_v40, 0.0 }
 0xabd   : > { %v8940_v50 = vmul.f32 1.442695, %v8851_v31  ;;  %v9188_v39 = vpack.c.bf16 %v9101_v1, %v9099_v36  ;;  %v8853_v26 = vmin.f32 %v17150_v4, 0.0  ;;  %vm8787_vm2 = vcmp.gt.f32.partialorder %v17139_v22, 0.0 }
 0xabe   : > { %12659 = vpow2.f32 %v8938_v12  ;;  %v8942_v25 = vmul.f32 1.442695, %v8852_v30  ;;  %vm8788_vm3 = vcmp.gt.f32.partialorder %v17147_v40, 0.0  ;;  %vm8789_vm4 = vcmp.gt.f32.partialorder %v17150_v4, 0.0 }
 0xabf   : > { %12661 = vpow2.f32 %v8940_v50  ;;  %v8673_v45 = vpop.f32.mrb[144].mxu0  ;;  %9377 = vmatprep.mubr.bf16.mxu1 %v9188_v39  ;;  %v8944_v47 = vmul.f32 1.442695, %v8853_v26 }
 0xac0   : > { %v12652_v58 = vpop.eup %12651  ;;  %v17157_v59 = vadd.f32 %v8673_v45, %v17000_v61  ;;  %v8675_v2 = vpop.f32.mrb[145].mxu0  ;;  %9378 = vmatmul.mubr.bf16.gmra.mrb[60].mxu1 %v9187_v16  ;;  %12663 = vpow2.f32 %v8942_v25 }
 0xac1   : > { %v12654_v6 = vpop.eup %12653  ;;  %v10537_v19 = vadd.f32 -1.0, %v12652_v58  ;;  %v17162_v57 = vadd.f32 %v8675_v2, %v17003_v49  ;;  %v8677_v29 = vpop.f32.mrb[146].mxu0  ;;  %12665 = vpow2.f32 %v8944_v47 }
 0xac2   : > { %v12656_v44 = vpop.eup %12655  ;;  %v10538_v13 = vadd.f32 -1.0, %v12654_v6  ;;  %v8679_v38 = vpop.f32.mrb[147].mxu0  ;;  %v8854_v14 = vmin.f32 %v17157_v59, 0.0  ;;  %v17171_v21 = vadd.f32 %v8677_v29, %v17000_v61  ;;  %vm8790_vm6 = vcmp.gt.f32.partialorder %v17157_v59, 0.0 }
 0xac3   : > { %v12658_v24 = vpop.eup %12657  ;;  %v10539_v15 = vadd.f32 -1.0, %v12656_v44  ;;  %v8855_v37 = vmin.f32 %v17162_v57, 0.0  ;;  %v9102_v23 = vsel %vm8782_vm13, %v17106_v60, %v10537_v19  ;;  %v17174_v46 = vadd.f32 %v8679_v38, %v17003_v49 }
 0xac4   : > { %v10540_v51 = vadd.f32 -1.0, %v12658_v24  ;;  %v8946_v18 = vmul.f32 1.442695, %v8854_v14  ;;  %v8856_v63 = vmin.f32 %v17171_v21, 0.0  ;;  %v9103_v60 = vsel %vm8783_vm14, %v17110_v9, %v10538_v13 }
 0xac5   : > { %v9104_v35 = vsel %vm8784_vm15, %v17115_v42, %v10539_v15  ;;  %v8948_v17 = vmul.f32 1.442695, %v8855_v37  ;;  %v8857_v34 = vmin.f32 %v17174_v46, 0.0  ;;  %vm8791_vm5 = vcmp.gt.f32.partialorder %v17162_v57, 0.0 }
 0xac6   : > { %v9189_v53 = vpack.c.bf16 %v9104_v35, %v9102_v23  ;;  %v9105_v11 = vsel %vm8785_vm0, %v17123_v20, %v10540_v51  ;;  %12667 = vpow2.f32 %v8946_v18  ;;  %v8950_v52 = vmul.f32 1.442695, %v8856_v63 }
 0xac7   : > { %v8683_v42 = vpop.f32.mrb[148].mxu0  ;;  %v9190_v62 = vpack.c.bf16 %v9105_v11, %v9103_v60  ;;  %12669 = vpow2.f32 %v8948_v17  ;;  %v8952_v43 = vmul.f32 1.442695, %v8857_v34  ;;  %vm8792_vm7 = vcmp.gt.f32.partialorder %v17171_v21, 0.0 }
 0xac8   : > { %v12660_v27 = vpop.eup %12659  ;;  %v17183_v41 = vadd.f32 %v8683_v42, %v17000_v61  ;;  %v8685_v5 = vpop.f32.mrb[149].mxu0  ;;  %12671 = vpow2.f32 %v8950_v52  ;;  %vm8793_vm8 = vcmp.gt.f32.partialorder %v17174_v46, 0.0 }
 0xac9   : > { %v12662_v20 = vpop.eup %12661  ;;  %v17186_v8 = vadd.f32 %v8685_v5, %v17003_v49  ;;  %v8687_v54 = vpop.f32.mrb[150].mxu0  ;;  %9385 = vmatprep.mubr.bf16.mxu1 %v9190_v62  ;;  %v10541_v3 = vadd.f32 -1.0, %v12660_v27  ;;  %12673 = vpow2.f32 %v8952_v43 }
 0xaca   : > { %v8858_v9 = vmin.f32 %v17183_v41, 0.0  ;;  %v8689_v48 = vpop.f32.mrb[151].mxu0  ;;  %9386 = vmatmul.mubr.bf16.gmra.mrb[64].mxu1 %v9189_v53  ;;  %v12664_v55 = vpop.eup %12663  ;;  %v10542_v32 = vadd.f32 -1.0, %v12662_v20  ;;  %v17192_v10 = vadd.f32 %v8687_v54, %v17000_v61  ;;  %vm8794_vm9 = vcmp.gt.f32.partialorder %v17183_v41, 0.0 }
 0xacb   : > { %v8859_v28 = vmin.f32 %v17186_v8, 0.0  ;;  %v12666_v33 = vpop.eup %12665  ;;  %v10543_v0 = vadd.f32 -1.0, %v12664_v55  ;;  %v17195_v16 = vadd.f32 %v8689_v48, %v17003_v49  ;;  %v9106_v36 = vsel %vm8786_vm1, %v17133_v56, %v10541_v3 }
 0xacc   : > { %v8954_v7 = vmul.f32 1.442695, %v8858_v9  ;;  %v10544_v31 = vadd.f32 -1.0, %v12666_v33  ;;  %v8860_v50 = vmin.f32 %v17192_v10, 0.0  ;;  %v9107_v56 = vsel %vm8787_vm2, %v17139_v22, %v10542_v32 }
 0xacd   : > { %v8956_v12 = vmul.f32 1.442695, %v8859_v28  ;;  %v9108_v1 = vsel %vm8788_vm3, %v17147_v40, %v10543_v0  ;;  %v8861_v39 = vmin.f32 %v17195_v16, 0.0  ;;  %vm8795_vm10 = vcmp.gt.f32.partialorder %v17186_v8, 0.0 }
 0xace   : > { %12675 = vpow2.f32 %v8954_v7  ;;  %v9191_v30 = vpack.c.bf16 %v9108_v1, %v9106_v36  ;;  %v8958_v58 = vmul.f32 1.442695, %v8860_v50  ;;  %v9109_v40 = vsel %vm8789_vm4, %v17150_v4, %v10544_v31 }
 0xacf   : > { %12677 = vpow2.f32 %v8956_v12  ;;  %v8693_v26 = vpop.f32.mrb[152].mxu0  ;;  %v8960_v19 = vmul.f32 1.442695, %v8861_v39  ;;  %v9192_v44 = vpack.c.bf16 %v9109_v40, %v9107_v56  ;;  %vm8796_vm11 = vcmp.gt.f32.partialorder %v17192_v10, 0.0 }
 0xad0   : > { %v17205_v25 = vadd.f32 %v8693_v26, %v17000_v61  ;;  %v8695_v45 = vpop.f32.mrb[153].mxu0  ;;  %v12668_v6 = vpop.eup %12667  ;;  %12679 = vpow2.f32 %v8958_v58  ;;  %vm8797_vm12 = vcmp.gt.f32.partialorder %v17195_v16, 0.0 }
 0xad1   : > { %v17212_v47 = vadd.f32 %v8695_v45, %v17003_v49  ;;  %v8697_v2 = vpop.f32.mrb[154].mxu0  ;;  %v12670_v29 = vpop.eup %12669  ;;  %v10545_v24 = vadd.f32 -1.0, %v12668_v6  ;;  %12681 = vpow2.f32 %v8960_v19  ;;  %9393 = vmatprep.mubr.bf16.mxu1 %v9192_v44 }
 0xad2   : > { %v8862_v13 = vmin.f32 %v17205_v25, 0.0  ;;  %v8699_v15 = vpop.f32.mrb[155].mxu0  ;;  %v10546_v38 = vadd.f32 -1.0, %v12670_v29  ;;  %v12672_v4 = vpop.eup %12671  ;;  %v17219_v14 = vadd.f32 %v8697_v2, %v17000_v61  ;;  %9394 = vmatmul.mubr.bf16.gmra.mrb[68].mxu1 %v9191_v30  ;;  %vm8798_vm13 = vcmp.gt.f32.partialorder %v17205_v25, 0.0 }
 0xad3   : > { %v8863_v22 = vmin.f32 %v17212_v47, 0.0  ;;  %v17222_v37 = vadd.f32 %v8699_v15, %v17003_v49  ;;  %v12674_v23 = vpop.eup %12673  ;;  %v10547_v35 = vadd.f32 -1.0, %v12672_v4  ;;  %v9110_v18 = vsel %vm8790_vm6, %v17157_v59, %v10545_v24 }
 0xad4   : > { %v8962_v51 = vmul.f32 1.442695, %v8862_v13  ;;  %v10548_v17 = vadd.f32 -1.0, %v12674_v23  ;;  %v8864_v11 = vmin.f32 %v17219_v14, 0.0  ;;  %v9111_v42 = vsel %vm8791_vm5, %v17162_v57, %v10546_v38 }
 0xad5   : > { %v8964_v53 = vmul.f32 1.442695, %v8863_v22  ;;  %v9112_v63 = vsel %vm8792_vm7, %v17171_v21, %v10547_v35  ;;  %v8865_v34 = vmin.f32 %v17222_v37, 0.0  ;;  %vm8799_vm14 = vcmp.gt.f32.partialorder %v17212_v47, 0.0 }
 0xad6   : > { %12683 = vpow2.f32 %v8962_v51  ;;  %v9193_v27 = vpack.c.bf16 %v9112_v63, %v9110_v18  ;;  %v8966_v52 = vmul.f32 1.442695, %v8864_v11  ;;  %v9113_v5 = vsel %vm8793_vm8, %v17174_v46, %v10548_v17 }
 0xad7   : > { %12685 = vpow2.f32 %v8964_v53  ;;  %v8703_v60 = vpop.f32.mrb[156].mxu0  ;;  %v8968_v20 = vmul.f32 1.442695, %v8865_v34  ;;  %v9194_v9 = vpack.c.bf16 %v9113_v5, %v9111_v42  ;;  %vm8800_vm15 = vcmp.gt.f32.partialorder %v17219_v14, 0.0 }
 0xad8   : > { %v12676_v62 = vpop.eup %12675  ;;  %v17236_v43 = vadd.f32 %v8703_v60, %v17000_v61  ;;  %v8705_v59 = vpop.f32.mrb[157].mxu0  ;;  %12687 = vpow2.f32 %v8966_v52  ;;  %vm8801_vm0 = vcmp.gt.f32.partialorder %v17222_v37, 0.0 }
 0xad9   : > { %v12678_v21 = vpop.eup %12677  ;;  %v17242_v54 = vadd.f32 %v8705_v59, %v17003_v49  ;;  %v8707_v3 = vpop.f32.mrb[158].mxu0  ;;  %v10549_v48 = vadd.f32 -1.0, %v12676_v62  ;;  %12689 = vpow2.f32 %v8968_v20  ;;  %9401 = vmatprep.mubr.bf16.mxu1 %v9194_v9 }
 0xada   : > { %v8866_v57 = vmin.f32 %v17236_v43, 0.0  ;;  %v8709_v55 = vpop.f32.mrb[159].mxu0  ;;  %v10550_v32 = vadd.f32 -1.0, %v12678_v21  ;;  %v12680_v46 = vpop.eup %12679  ;;  %v17249_v0 = vadd.f32 %v8707_v3, %v17000_v61  ;;  %9402 = vmatmul.mubr.bf16.gmra.mrb[72].mxu1 %v9193_v27  ;;  %vm8802_vm1 = vcmp.gt.f32.partialorder %v17236_v43, 0.0 }
 0xadb   : > { %v8867_v28 = vmin.f32 %v17242_v54, 0.0  ;;  %v17252_v7 = vadd.f32 %v8709_v55, %v17003_v49  ;;  %v12682_v31 = vpop.eup %12681  ;;  %v10551_v12 = vadd.f32 -1.0, %v12680_v46  ;;  %v9114_v1 = vsel %vm8794_vm9, %v17183_v41, %v10549_v48 }
 0xadc   : > { %v8970_v33 = vmul.f32 1.442695, %v8866_v57  ;;  %v10552_v50 = vadd.f32 -1.0, %v12682_v31  ;;  %v8868_v30 = vmin.f32 %v17249_v0, 0.0  ;;  %v9115_v45 = vsel %vm8795_vm10, %v17186_v8, %v10550_v32 }
 0xadd   : > { %v8972_v36 = vmul.f32 1.442695, %v8867_v28  ;;  %v9116_v39 = vsel %vm8796_vm11, %v17192_v10, %v10551_v12  ;;  %v8869_v26 = vmin.f32 %v17252_v7, 0.0  ;;  %vm8803_vm2 = vcmp.gt.f32.partialorder %v17242_v54, 0.0 }
 0xade   : > { %12691 = vpow2.f32 %v8970_v33  ;;  %v9195_v40 = vpack.c.bf16 %v9116_v39, %v9114_v1  ;;  %v8974_v6 = vmul.f32 1.442695, %v8868_v30  ;;  %v9117_v2 = vsel %vm8797_vm12, %v17195_v16, %v10552_v50 }
 0xadf   : > { %12693 = vpow2.f32 %v8972_v36  ;;  %v8713_v58 = vpop.f32.mrb[160].mxu0  ;;  %v8976_v44 = vmul.f32 1.442695, %v8869_v26  ;;  %v9196_v13 = vpack.c.bf16 %v9117_v2, %v9115_v45  ;;  %vm8804_vm3 = vcmp.gt.f32.partialorder %v17249_v0, 0.0 }
 0xae0   : > { %v12684_v56 = vpop.eup %12683  ;;  %v17266_v19 = vadd.f32 %v8713_v58, %v17000_v61  ;;  %v8715_v41 = vpop.f32.mrb[161].mxu0  ;;  %12695 = vpow2.f32 %v8974_v6  ;;  %vm8805_vm4 = vcmp.gt.f32.partialorder %v17252_v7, 0.0 }
 0xae1   : > { %v12686_v10 = vpop.eup %12685  ;;  %v17272_v29 = vadd.f32 %v8715_v41, %v17003_v49  ;;  %v8717_v24 = vpop.f32.mrb[162].mxu0  ;;  %v10553_v15 = vadd.f32 -1.0, %v12684_v56  ;;  %12697 = vpow2.f32 %v8976_v44  ;;  %9409 = vmatprep.mubr.bf16.mxu1 %v9196_v13 }
 0xae2   : > { %v8870_v8 = vmin.f32 %v17266_v19, 0.0  ;;  %v8719_v38 = vpop.f32.mrb[163].mxu0  ;;  %v10554_v22 = vadd.f32 -1.0, %v12686_v10  ;;  %v12688_v16 = vpop.eup %12687  ;;  %v17279_v23 = vadd.f32 %v8717_v24, %v17000_v61  ;;  %9410 = vmatmul.mubr.bf16.gmra.mrb[76].mxu1 %v9195_v40  ;;  %vm8806_vm6 = vcmp.gt.f32.partialorder %v17266_v19, 0.0 }
 0xae3   : > { %v8871_v4 = vmin.f32 %v17272_v29, 0.0  ;;  %v17282_v35 = vadd.f32 %v8719_v38, %v17003_v49  ;;  %v12690_v53 = vpop.eup %12689  ;;  %v10555_v18 = vadd.f32 -1.0, %v12688_v16  ;;  %v9118_v11 = vsel %vm8798_vm13, %v17205_v25, %v10553_v15 }
 0xae4   : > { %v8978_v51 = vmul.f32 1.442695, %v8870_v8  ;;  %v10556_v63 = vadd.f32 -1.0, %v12690_v53  ;;  %v8872_v34 = vmin.f32 %v17279_v23, 0.0  ;;  %v9119_v27 = vsel %vm8799_vm14, %v17212_v47, %v10554_v22 }
 0xae5   : > { %v8980_v17 = vmul.f32 1.442695, %v8871_v4  ;;  %v9120_v60 = vsel %vm8800_vm15, %v17219_v14, %v10555_v18  ;;  %v8873_v42 = vmin.f32 %v17282_v35, 0.0  ;;  %vm8807_vm5 = vcmp.gt.f32.partialorder %v17272_v29, 0.0 }
 0xae6   : > { %12699 = vpow2.f32 %v8978_v51  ;;  %v9197_v59 = vpack.c.bf16 %v9120_v60, %v9118_v11  ;;  %v8982_v5 = vmul.f32 1.442695, %v8872_v34  ;;  %v9121_v20 = vsel %vm8801_vm0, %v17222_v37, %v10556_v63 }
 0xae7   : > { %12701 = vpow2.f32 %v8980_v17  ;;  %v8984_v3 = vmul.f32 1.442695, %v8873_v42  ;;  %v9198_v57 = vpack.c.bf16 %v9121_v20, %v9119_v27  ;;  %vm8808_vm7 = vcmp.gt.f32.partialorder %v17279_v23, 0.0 }
 0xae8   : > { %v12692_v52 = vpop.eup %12691  ;;  %12703 = vpow2.f32 %v8982_v5  ;;  %vm8809_vm8 = vcmp.gt.f32.partialorder %v17282_v35, 0.0 }
 0xae9   : > { %v12694_v14 = vpop.eup %12693  ;;  %v10557_v32 = vadd.f32 -1.0, %v12692_v52  ;;  %12705 = vpow2.f32 %v8984_v3  ;;  %9417 = vmatprep.mubr.bf16.mxu1 %v9198_v57 }
 0xaea   : > { %v12696_v46 = vpop.eup %12695  ;;  %v10558_v37 = vadd.f32 -1.0, %v12694_v14  ;;  %9418 = vmatmul.mubr.bf16.gmra.mrb[80].mxu1 %v9197_v59 }
 0xaeb   : > { %v8723_v62 = vpop.f32.mrb[164].mxu0  ;;  %v12698_v36 = vpop.eup %12697  ;;  %v10559_v1 = vadd.f32 -1.0, %v12696_v46  ;;  %v9122_v26 = vsel %vm8802_vm1, %v17236_v43, %v10557_v32 }
 0xaec   : > { %v17296_v21 = vadd.f32 %v8723_v62, %v17000_v61  ;;  %v8725_v25 = vpop.f32.mrb[165].mxu0  ;;  %v10560_v30 = vadd.f32 -1.0, %v12698_v36  ;;  %v9123_v41 = vsel %vm8803_vm2, %v17242_v54, %v10558_v37 }
 0xaed   : > { %v17302_v9 = vadd.f32 %v8725_v25, %v17003_v49  ;;  %v8727_v48 = vpop.f32.mrb[166].mxu0  ;;  %v9124_v58 = vsel %vm8804_vm3, %v17249_v0, %v10559_v1 }
 0xaee   : > { %v8874_v47 = vmin.f32 %v17296_v21, 0.0  ;;  %v8729_v55 = vpop.f32.mrb[167].mxu0  ;;  %v17308_v31 = vadd.f32 %v8727_v48, %v17000_v61  ;;  %v9199_v40 = vpack.c.bf16 %v9124_v58, %v9122_v26  ;;  %v9125_v2 = vsel %vm8805_vm4, %v17252_v7, %v10560_v30 }
 0xaef   : > { %v8875_v28 = vmin.f32 %v17302_v9, 0.0  ;;  %v17311_v12 = vadd.f32 %v8729_v55, %v17003_v49  ;;  %v9200_v13 = vpack.c.bf16 %v9125_v2, %v9123_v41  ;;  %vm8810_vm9 = vcmp.gt.f32.partialorder %v17296_v21, 0.0 }
 0xaf0   : > { %v8986_v33 = vmul.f32 1.442695, %v8874_v47  ;;  %v8876_v39 = vmin.f32 %v17308_v31, 0.0  ;;  %v12700_v56 = vpop.eup %12699  ;;  %vm8811_vm10 = vcmp.gt.f32.partialorder %v17302_v9, 0.0  ;;  %vm8812_vm11 = vcmp.gt.f32.partialorder %v17308_v31, 0.0 }
 0xaf1   : > { %v8988_v50 = vmul.f32 1.442695, %v8875_v28  ;;  %v8877_v45 = vmin.f32 %v17311_v12, 0.0  ;;  %v12702_v10 = vpop.eup %12701  ;;  %v10561_v15 = vadd.f32 -1.0, %v12700_v56  ;;  %9425 = vmatprep.mubr.bf16.mxu1 %v9200_v13  ;;  %vm8813_vm12 = vcmp.gt.f32.partialorder %v17311_v12, 0.0 }
 0xaf2   : > { %12707 = vpow2.f32 %v8986_v33  ;;  %v8990_v6 = vmul.f32 1.442695, %v8876_v39  ;;  %v10562_v8 = vadd.f32 -1.0, %v12702_v10  ;;  %v12704_v7 = vpop.eup %12703  ;;  %9426 = vmatmul.mubr.bf16.gmra.mrb[84].mxu1 %v9199_v40 }
 0xaf3   : > { %12709 = vpow2.f32 %v8988_v50  ;;  %v8992_v44 = vmul.f32 1.442695, %v8877_v45  ;;  %v8733_v24 = vpop.f32.mrb[168].mxu0  ;;  %v12706_v51 = vpop.eup %12705  ;;  %v10563_v53 = vadd.f32 -1.0, %v12704_v7  ;;  %v9126_v11 = vsel %vm8806_vm6, %v17266_v19, %v10561_v15 }
 0xaf4   : > { %12711 = vpow2.f32 %v8990_v6  ;;  %v17325_v43 = vadd.f32 %v8733_v24, %v17000_v61  ;;  %v8735_v0 = vpop.f32.mrb[169].mxu0  ;;  %v10564_v63 = vadd.f32 -1.0, %v12706_v51  ;;  %v9127_v52 = vsel %vm8807_vm5, %v17272_v29, %v10562_v8 }
 0xaf5   : > { %12713 = vpow2.f32 %v8992_v44  ;;  %v17329_v38 = vadd.f32 %v8735_v0, %v17003_v49  ;;  %v8737_v54 = vpop.f32.mrb[170].mxu0  ;;  %v9128_v42 = vsel %vm8808_vm7, %v17279_v23, %v10563_v53 }
 0xaf6   : > { %v8878_v22 = vmin.f32 %v17325_v43, 0.0  ;;  %v17335_v4 = vadd.f32 %v8737_v54, %v17000_v61  ;;  %v8739_v16 = vpop.f32.mrb[171].mxu0  ;;  %v9201_v5 = vpack.c.bf16 %v9128_v42, %v9126_v11  ;;  %v9129_v20 = vsel %vm8809_vm8, %v17282_v35, %v10564_v63 }
 0xaf7   : > { %v8879_v18 = vmin.f32 %v17329_v38, 0.0  ;;  %v17340_v17 = vadd.f32 %v8739_v16, %v17003_v49  ;;  %v9202_v48 = vpack.c.bf16 %v9129_v20, %v9127_v52  ;;  %vm8814_vm13 = vcmp.gt.f32.partialorder %v17325_v43, 0.0 }
 0xaf8   : > { %v8994_v34 = vmul.f32 1.442695, %v8878_v22  ;;  %v8880_v60 = vmin.f32 %v17335_v4, 0.0  ;;  %vm8815_vm14 = vcmp.gt.f32.partialorder %v17329_v38, 0.0  ;;  %vm8816_vm15 = vcmp.gt.f32.partialorder %v17335_v4, 0.0 }
 0xaf9   : > { %v8996_v62 = vmul.f32 1.442695, %v8879_v18  ;;  %v8881_v27 = vmin.f32 %v17340_v17, 0.0  ;;  %9433 = vmatprep.mubr.bf16.mxu1 %v9202_v48  ;;  %vm8817_vm0 = vcmp.gt.f32.partialorder %v17340_v17, 0.0 }
 0xafa   : > { %12715 = vpow2.f32 %v8994_v34  ;;  %v8998_v25 = vmul.f32 1.442695, %v8880_v60  ;;  %9434 = vmatmul.mubr.bf16.gmra.mrb[88].mxu1 %v9201_v5 }
 0xafb   : > { %12717 = vpow2.f32 %v8996_v62  ;;  %v9000_v14 = vmul.f32 1.442695, %v8881_v27  ;;  %v8743_v3 = vpop.f32.mrb[172].mxu0 }
 0xafc   : > { %v12708_v59 = vpop.eup %12707  ;;  %12719 = vpow2.f32 %v8998_v25  ;;  %v17353_v23 = vadd.f32 %v8743_v3, %v17000_v61  ;;  %v8745_v47 = vpop.f32.mrb[173].mxu0 }
 0xafd   : > { %v12710_v19 = vpop.eup %12709  ;;  %v10565_v57 = vadd.f32 -1.0, %v12708_v59  ;;  %12721 = vpow2.f32 %v9000_v14  ;;  %v17357_v55 = vadd.f32 %v8745_v47, %v17003_v49  ;;  %v8747_v32 = vpop.f32.mrb[174].mxu0 }
 0xafe   : > { %v10566_v29 = vadd.f32 -1.0, %v12710_v19  ;;  %v12712_v35 = vpop.eup %12711  ;;  %v8882_v28 = vmin.f32 %v17353_v23, 0.0  ;;  %v17363_v46 = vadd.f32 %v8747_v32, %v17000_v61  ;;  %v8749_v37 = vpop.f32.mrb[175].mxu0  ;;  %vm8818_vm1 = vcmp.gt.f32.partialorder %v17353_v23, 0.0 }
 0xaff   : > { %v12714_v33 = vpop.eup %12713  ;;  %v10567_v36 = vadd.f32 -1.0, %v12712_v35  ;;  %v8883_v1 = vmin.f32 %v17357_v55, 0.0  ;;  %v17368_v50 = vadd.f32 %v8749_v37, %v17003_v49  ;;  %v9130_v30 = vsel %vm8810_vm9, %v17296_v21, %v10565_v57 }
 0xb00   : > { %v10568_v39 = vadd.f32 -1.0, %v12714_v33  ;;  %v9002_v26 = vmul.f32 1.442695, %v8882_v28  ;;  %v8884_v58 = vmin.f32 %v17363_v46, 0.0  ;;  %v9131_v6 = vsel %vm8811_vm10, %v17302_v9, %v10566_v29 }
 0xb01   : > { %v9132_v45 = vsel %vm8812_vm11, %v17308_v31, %v10567_v36  ;;  %v9004_v56 = vmul.f32 1.442695, %v8883_v1  ;;  %v8885_v40 = vmin.f32 %v17368_v50, 0.0  ;;  %vm8820_vm2 = vcmp.gt.f32.partialorder %v17363_v46, 0.0 }
 0xb02   : > { %v9203_v41 = vpack.c.bf16 %v9132_v45, %v9130_v30  ;;  %12723 = vpow2.f32 %v9002_v26  ;;  %v9006_v2 = vmul.f32 1.442695, %v8884_v58  ;;  %v9133_v10 = vsel %vm8813_vm12, %v17311_v12, %v10568_v39 }
 0xb03   : > { %12725 = vpow2.f32 %v9004_v56  ;;  %v9008_v21 = vmul.f32 1.442695, %v8885_v40  ;;  %v8753_v44 = vpop.f32.mrb[176].mxu0  ;;  %v9204_v24 = vpack.c.bf16 %v9133_v10, %v9131_v6  ;;  %vm8819_vm3 = vcmp.gt.f32.partialorder %v17357_v55, 0.0 }
 0xb04   : > { %v12716_v13 = vpop.eup %12715  ;;  %12727 = vpow2.f32 %v9006_v2  ;;  %v17381_v31 = vadd.f32 %v8753_v44, %v17000_v61  ;;  %v8755_v15 = vpop.f32.mrb[177].mxu0  ;;  %vm8821_vm4 = vcmp.gt.f32.partialorder %v17368_v50, 0.0 }
 0xb05   : > { %v12718_v0 = vpop.eup %12717  ;;  %v10569_v8 = vadd.f32 -1.0, %v12716_v13  ;;  %12729 = vpow2.f32 %v9008_v21  ;;  %v17385_v9 = vadd.f32 %v8755_v15, %v17003_v49  ;;  %v8757_v54 = vpop.f32.mrb[178].mxu0  ;;  %9441 = vmatprep.mubr.bf16.mxu1 %v9204_v24 }
 0xb06   : > { %v12720_v12 = vpop.eup %12719  ;;  %v10570_v7 = vadd.f32 -1.0, %v12718_v0  ;;  %v8886_v22 = vmin.f32 %v17381_v31, 0.0  ;;  %v8758_v16 = vadd.f32 %v8757_v54, %v17000_v61  ;;  %v8759_v51 = vpop.f32.mrb[179].mxu0  ;;  %9442 = vmatmul.mubr.bf16.gmra.mrb[92].mxu1 %v9203_v41  ;;  %vm8822_vm6 = vcmp.gt.f32.partialorder %v17381_v31, 0.0  ;;  %v17415_v41 = vld [vmem:[%s17626_s4] ss:$0 sm:$0xff] }
 0xb07   : > { %v12722_v53 = vpop.eup %12721  ;;  %v10571_v18 = vadd.f32 -1.0, %v12720_v12  ;;  %v8887_v11 = vmin.f32 %v17385_v9, 0.0  ;;  %v9134_v63 = vsel %vm8814_vm13, %v17325_v43, %v10569_v8  ;;  %v8760_v27 = vadd.f32 %v8759_v51, %v17003_v49  ;;  %s17579_s4 = sshll.u32 %s13057_s0, 12 }
 0xb08   : > { %v10572_v34 = vadd.f32 -1.0, %v12722_v53  ;;  %v9010_v60 = vmul.f32 1.442695, %v8886_v22  ;;  %v8888_v42 = vmin.f32 %v8758_v16, 0.0  ;;  %v9135_v52 = vsel %vm8815_vm14, %v17329_v38, %v10570_v7  ;;  %s17430_s8 = scalar_lea.hbm %s13029_s13, %s17579_s4  ;;  %s12743_s4 = sshll.u32 %s12867_s6, 4  ;;  %s12744_s4 = int_to_ptr.vmem [resolvable:$false] %s12743_s4 }
 0xb09   : > { %v9136_v62 = vsel %vm8816_vm15, %v17335_v4, %v10571_v18  ;;  %v9012_v61 = vmul.f32 1.442695, %v8887_v11  ;;  %v8889_v20 = vmin.f32 %v8760_v27, 0.0  ;;  %vm8824_vm5 = vcmp.gt.f32.partialorder %v8758_v16, 0.0  ;;  %s12745_s10 = scalar_lea.vmem %s12744_s4, 8192  ;;  %p12746_p0 = scmp.lt.s32.totalorder %s17432_s7, %s12744_s4 }
 0xb0a   : > { %v9205_v59 = vpack.c.bf16 %v9136_v62, %v9134_v63  ;;  %12731 = vpow2.f32 %v9010_v60  ;;  %v9014_v5 = vmul.f32 1.442695, %v8888_v42  ;;  %v9137_v25 = vsel %vm8817_vm0, %v17340_v17, %v10572_v34  ;;  %p12747_p1 = scmp.lt.s32.totalorder %s12745_s10, %s12739_s9 }
 0xb0b   : > { %12733 = vpow2.f32 %v9012_v61  ;;  %v9206_v43 = vpack.c.bf16 %v9137_v25, %v9135_v52  ;;  %v9016_v4 = vmul.f32 1.442695, %v8889_v20  ;;  %vm8823_vm7 = vcmp.gt.f32.partialorder %v17385_v9, 0.0 }
 0xb0c   : > { %v12724_v19 = vpop.eup %12723  ;;  %12735 = vpow2.f32 %v9014_v5  ;;  %vm8825_vm8 = vcmp.gt.f32.partialorder %v8760_v27, 0.0  ;;  %p12748_p2 = por %p12747_p1, %p12746_p0 }
 0xb0d   : > { %v12726_v14 = vpop.eup %12725  ;;  %v10573_v3 = vadd.f32 -1.0, %v12724_v19  ;;  %9449 = vmatprep.mubr.bf16.mxu1 %v9206_v43  ;;  %12737 = vpow2.f32 %v9016_v4 }
 0xb0e   : > { %v12728_v48 = vpop.eup %12727  ;;  %v10574_v49 = vadd.f32 -1.0, %v12726_v14  ;;  %9450 = vmatmul.mubr.bf16.gmra.mrb[96].mxu1 %v9205_v59  ;;  %p12749_p3 = pnand %p12748_p2, %p12742_p13 }
 0xb0f   : > { %v12730_v57 = vpop.eup %12729  ;;  %v10575_v47 = vadd.f32 -1.0, %v12728_v48  ;;  %v9138_v17 = vsel %vm8818_vm1, %v17353_v23, %v10573_v3 }
 0xb10   : > { %v10576_v38 = vadd.f32 -1.0, %v12730_v57  ;;  %v9139_v35 = vsel %vm8819_vm3, %v17357_v55, %v10574_v49 }
 0xb11   : > { %v9140_v29 = vsel %vm8820_vm2, %v17363_v46, %v10575_v47 }
 0xb12   : > { %v9207_v32 = vpack.c.bf16 %v9140_v29, %v9138_v17  ;;  %v9141_v28 = vsel %vm8821_vm4, %v17368_v50, %v10576_v38 }
 0xb13   : > { %v9208_v37 = vpack.c.bf16 %v9141_v28, %v9139_v35 }
 0xb14   : > { %v12732_v33 = vpop.eup %12731 }
 0xb15   : > { %v12734_v36 = vpop.eup %12733  ;;  %v10577_v1 = vadd.f32 -1.0, %v12732_v33  ;;  %9457 = vmatprep.mubr.bf16.mxu1 %v9208_v37 }
 0xb16   : > { %v12736_v30 = vpop.eup %12735  ;;  %9458 = vmatmul.mubr.bf16.gmra.mrb[100].mxu1 %v9207_v32  ;;  %v10578_v23 = vadd.f32 -1.0, %v12734_v36 }
 0xb17   : > { %v10579_v39 = vadd.f32 -1.0, %v12736_v30  ;;  %v12738_v46 = vpop.eup %12737  ;;  %v9142_v26 = vsel %vm8822_vm6, %v17381_v31, %v10577_v1 }
 0xb18   : > { %v10580_v45 = vadd.f32 -1.0, %v12738_v46  ;;  %v9143_v50 = vsel %vm8823_vm7, %v17385_v9, %v10578_v23 }
 0xb19   : > { %v9144_v58 = vsel %vm8824_vm5, %v8758_v16, %v10579_v39 }
 0xb1a   : > { %v9209_v55 = vpack.c.bf16 %v9144_v58, %v9142_v26  ;;  %v9145_v56 = vsel %vm8825_vm8, %v8760_v27, %v10580_v45 }
 0xb1b   : > { %v9210_v40 = vpack.c.bf16 %v9145_v56, %v9143_v50 }
 0xb1d   : > { %9465 = vmatprep.mubr.bf16.mxu1 %v9210_v40 }
 0xb1e   : > { %9466 = vmatmul.mubr.bf16.gmra.mrb[104].mxu1 %v9209_v55 }
 0xb73   : > { %v10980_v6 = vpop.f32.mrb[44].mxu1 }
 0xb74   : > { %v10981_v2 = vpop.f32.mrb[45].mxu1 }
 0xb75   : > { %v10982_v10 = vadd.f32 %v10981_v2, %v10980_v6  ;;  %v10983_v21 = vpop.f32.mrb[46].mxu1 }
 0xb76   : > { %v10984_v44 = vpop.f32.mrb[47].mxu1 }
 0xb77   : > { %v9348_v24 = vadd.f32 %v10982_v10, %v17415_v41  ;;  %v10985_v13 = vadd.f32 %v10984_v44, %v10983_v21 }
 0xb79   : > { %9474 = vst [vmem:[%s17420_s1] sm:$0xff] %v9348_v24  ;;  %v9351_v31 = vadd.f32 %v10985_v13, %v17415_v41 }
 0xb7b   : > { %9475 = vst [vmem:[%s17420_s1 + $0x8] sm:$0xff] %v9351_v31  ;;  %v10986_v15 = vpop.f32.mrb[48].mxu1 }
 0xb7c   : > { %v10987_v0 = vpop.f32.mrb[49].mxu1 }
 0xb7d   : > { %v10988_v8 = vadd.f32 %v10987_v0, %v10986_v15  ;;  %v10989_v9 = vpop.f32.mrb[50].mxu1 }
 0xb7e   : > { %v10990_v54 = vpop.f32.mrb[51].mxu1 }
 0xb7f   : > { %v9356_v12 = vadd.f32 %v10988_v8, %v17415_v41  ;;  %v10991_v7 = vadd.f32 %v10990_v54, %v10989_v9 }
 0xb80   : > { %12752 = shalt.err (!%p12749_p3)
}
 0xb81   : > { %s12753_s3 = scalar_lea.hbm %s17430_s8, 4096  ;;  %s12757_s6 = scalar_lea.hbm %s13029_s13, 8192 }
 0xb82   : > { %p12754_p4 = scmp.ne.s32.totalorder %s17430_s8, %s12753_s3  ;;  %p12758_p9 = scmp.lt.u32.totalorder %s17430_s8, %s13029_s13 }
 0xb83   : > { %p12759_p10 = scmp.lt.u32.totalorder %s12757_s6, %s12753_s3  ;;  %p12761_p12 = scmp.lt.u32.totalorder %s12753_s3, %s17430_s8 }
 0xb84   : > { %p12755_p7 = pnand %p12754_p4, %p13074_p5 }
 0xb85   : > { %p12760_p11 = por %p12759_p10, %p12758_p9 }
 0xb86   : > { %p12756_p8 = pneg %p12755_p7 }
 0xb87   : > { %p12762_p0 = por %p12761_p12, %p12760_p11 }
 0xb89   : > { %p12763_p13 = pnand %p12762_p0, %p12756_p8 }
 0xb8b   : > { %12766 = shalt.err (!%p12763_p13)
}
 0xb8c   : > { %s17581_s9 = smov 128   ;;  %s17582_s4 = smov 8   ;;  %9476 = vst [vmem:[%s17420_s1 + $0x10] sm:$0xff] %v9356_v12  ;;  %v9359_v22 = vadd.f32 %v10991_v7, %v17415_v41  ;;  %v10992_v16 = vpop.f32.mrb[52].mxu1 }
 0xb8d   : > { %s17628_s10 = scalar_lea.sflag [#allocation3], %s16375_s5  ;;  %v10993_v51 = vpop.f32.mrb[53].mxu1  ;;  %s9512_s6 = scalar_lea.sflag [#allocation5], %s16375_s5 }
 0xb8e   : > { %11196 = dma.vmem_to_hbm [thread:$0]  (%p13074_p5), %s17432_s7, 4096, %s17430_s8, %s17628_s10, %s17581_s9, %s17581_s9, %s17582_s4   ;;  %v10994_v53 = vadd.f32 %v10993_v51, %v10992_v16  ;;  %v10995_v18 = vpop.f32.mrb[54].mxu1 }
 0xb8f   : > { %9477 = vst [vmem:[%s17420_s1 + $0x18] sm:$0xff] %v9359_v22  ;;  %v10996_v11 = vpop.f32.mrb[55].mxu1  ;;  %s9541_s8 = sshll.u32 %s17420_s1, 4  ;;  %s17629_s7 = sshll.u32 %s13057_s0, 12  ;;  %s17522_s8 = int_to_ptr.vmem [resolvable:$true] %s9541_s8 }
 0xb90   : > { %v9364_v63 = vadd.f32 %v10994_v53, %v17415_v41  ;;  %v10997_v34 = vadd.f32 %v10996_v11, %v10995_v18  ;;  %v10998_v42 = vpop.f32.mrb[56].mxu1  ;;  %s17520_s3 = scalar_lea.hbm %s13034_s20, %s17629_s7  ;;  %s12767_s10 = scalar_lea.vmem %s17522_s8, 4096 }
 0xb91   : > { %v10999_v62 = vpop.f32.mrb[57].mxu1  ;;  %p12768_p1 = scmp.ne.s32.totalorder %s17522_s8, %s12767_s10  ;;  %s12870_s9 = smov [#allocation4]  }
 0xb92   : > { %9478 = vst [vmem:[%s17420_s1 + $0x20] sm:$0xff] %v9364_v63  ;;  %v9367_v60 = vadd.f32 %v10997_v34, %v17415_v41  ;;  %v11000_v61 = vadd.f32 %v10999_v62, %v10998_v42  ;;  %v11001_v27 = vpop.f32.mrb[58].mxu1  ;;  %s12771_s4 = sshll.u32 %s12870_s9, 4  ;;  %s12772_s4 = int_to_ptr.vmem [resolvable:$false] %s12771_s4 }
 0xb93   : > { %v11002_v52 = vpop.f32.mrb[59].mxu1  ;;  %p12769_p2 = pnand %p12768_p1, %p13074_p5  ;;  %s12773_s12 = scalar_lea.vmem %s12772_s4, 8192 }
 0xb94   : > { %9479 = vst [vmem:[%s17420_s1 + $0x28] sm:$0xff] %v9367_v60  ;;  %v9372_v59 = vadd.f32 %v11000_v61, %v17415_v41  ;;  %v11003_v5 = vadd.f32 %v11002_v52, %v11001_v27  ;;  %v11004_v20 = vpop.f32.mrb[60].mxu1  ;;  %p12774_p4 = scmp.lt.s32.totalorder %s17522_s8, %s12772_s4  ;;  %p12775_p7 = scmp.lt.s32.totalorder %s12773_s12, %s12767_s10 }
 0xb95   : > { %v11005_v43 = vpop.f32.mrb[61].mxu1  ;;  %p12770_p3 = pneg %p12769_p2 }
 0xb96   : > { %9480 = vst [vmem:[%s17420_s1 + $0x30] sm:$0xff] %v9372_v59  ;;  %v9375_v25 = vadd.f32 %v11003_v5, %v17415_v41  ;;  %v11006_v19 = vadd.f32 %v11005_v43, %v11004_v20  ;;  %v11007_v14 = vpop.f32.mrb[62].mxu1  ;;  %p12776_p8 = por %p12775_p7, %p12774_p4 }
 0xb97   : > { %v11008_v3 = vpop.f32.mrb[63].mxu1 }
 0xb98   : > { %9481 = vst [vmem:[%s17420_s1 + $0x38] sm:$0xff] %v9375_v25  ;;  %v9380_v4 = vadd.f32 %v11006_v19, %v17415_v41  ;;  %v11009_v48 = vadd.f32 %v11008_v3, %v11007_v14  ;;  %p12777_p9 = pnand %p12776_p8, %p12770_p3 }
 0xb9a   : > { %9482 = vst [vmem:[%s17420_s1 + $0x40] sm:$0xff] %v9380_v4  ;;  %v9383_v49 = vadd.f32 %v11009_v48, %v17415_v41 }
 0xb9c   : > { %9483 = vst [vmem:[%s17420_s1 + $0x48] sm:$0xff] %v9383_v49 }
 0xb9d   : > { %v11010_v57 = vpop.f32.mrb[64].mxu1 }
 0xb9e   : > { %v11011_v47 = vpop.f32.mrb[65].mxu1 }
 0xb9f   : > { %v11012_v38 = vadd.f32 %v11011_v47, %v11010_v57  ;;  %v11013_v17 = vpop.f32.mrb[66].mxu1 }
 0xba0   : > { %v11014_v29 = vpop.f32.mrb[67].mxu1 }
 0xba1   : > { %v9388_v32 = vadd.f32 %v11012_v38, %v17415_v41  ;;  %v11015_v35 = vadd.f32 %v11014_v29, %v11013_v17 }
 0xba3   : > { %9484 = vst [vmem:[%s17420_s1 + $0x50] sm:$0xff] %v9388_v32  ;;  %v9391_v28 = vadd.f32 %v11015_v35, %v17415_v41 }
 0xba5   : > { %9485 = vst [vmem:[%s17420_s1 + $0x58] sm:$0xff] %v9391_v28  ;;  %v11016_v37 = vpop.f32.mrb[68].mxu1 }
 0xba6   : > { %v11017_v33 = vpop.f32.mrb[69].mxu1 }
 0xba7   : > { %v11018_v36 = vadd.f32 %v11017_v33, %v11016_v37  ;;  %v11019_v1 = vpop.f32.mrb[70].mxu1 }
 0xba8   : > { %v11020_v30 = vpop.f32.mrb[71].mxu1 }
 0xba9   : > { %v9396_v39 = vadd.f32 %v11018_v36, %v17415_v41  ;;  %v11021_v23 = vadd.f32 %v11020_v30, %v11019_v1 }
 0xbab   : > { %9486 = vst [vmem:[%s17420_s1 + $0x60] sm:$0xff] %v9396_v39  ;;  %v9399_v46 = vadd.f32 %v11021_v23, %v17415_v41 }
 0xbad   : > { %9487 = vst [vmem:[%s17420_s1 + $0x68] sm:$0xff] %v9399_v46  ;;  %v11022_v26 = vpop.f32.mrb[72].mxu1 }
 0xbae   : > { %v11023_v58 = vpop.f32.mrb[73].mxu1 }
 0xbaf   : > { %v11024_v55 = vadd.f32 %v11023_v58, %v11022_v26  ;;  %v11025_v45 = vpop.f32.mrb[74].mxu1 }
 0xbb0   : > { %v11026_v50 = vpop.f32.mrb[75].mxu1 }
 0xbb1   : > { %v9404_v56 = vadd.f32 %v11024_v55, %v17415_v41  ;;  %v11027_v40 = vadd.f32 %v11026_v50, %v11025_v45 }
 0xbb3   : > { %9488 = vst [vmem:[%s17420_s1 + $0x70] sm:$0xff] %v9404_v56  ;;  %v9407_v6 = vadd.f32 %v11027_v40, %v17415_v41 }
 0xbb5   : > { %9489 = vst [vmem:[%s17420_s1 + $0x78] sm:$0xff] %v9407_v6  ;;  %v11028_v2 = vpop.f32.mrb[76].mxu1 }
 0xbb6   : > { %v11029_v10 = vpop.f32.mrb[77].mxu1 }
 0xbb7   : > { %v11030_v21 = vadd.f32 %v11029_v10, %v11028_v2  ;;  %v11031_v44 = vpop.f32.mrb[78].mxu1 }
 0xbb8   : > { %v11032_v24 = vpop.f32.mrb[79].mxu1 }
 0xbb9   : > { %v9412_v13 = vadd.f32 %v11030_v21, %v17415_v41  ;;  %v11033_v31 = vadd.f32 %v11032_v24, %v11031_v44 }
 0xbbb   : > { %9490 = vst [vmem:[%s17420_s1 + $0x80] sm:$0xff] %v9412_v13  ;;  %v9415_v15 = vadd.f32 %v11033_v31, %v17415_v41 }
 0xbbd   : > { %9491 = vst [vmem:[%s17420_s1 + $0x88] sm:$0xff] %v9415_v15  ;;  %v11034_v0 = vpop.f32.mrb[80].mxu1 }
 0xbbe   : > { %v11035_v8 = vpop.f32.mrb[81].mxu1 }
 0xbbf   : > { %v11036_v9 = vadd.f32 %v11035_v8, %v11034_v0  ;;  %v11037_v54 = vpop.f32.mrb[82].mxu1 }
 0xbc0   : > { %v11038_v12 = vpop.f32.mrb[83].mxu1 }
 0xbc1   : > { %v9420_v7 = vadd.f32 %v11036_v9, %v17415_v41  ;;  %v11039_v22 = vadd.f32 %v11038_v12, %v11037_v54 }
 0xbc3   : > { %9492 = vst [vmem:[%s17420_s1 + $0x90] sm:$0xff] %v9420_v7  ;;  %v9423_v16 = vadd.f32 %v11039_v22, %v17415_v41 }
 0xbc5   : > { %9493 = vst [vmem:[%s17420_s1 + $0x98] sm:$0xff] %v9423_v16  ;;  %v11040_v51 = vpop.f32.mrb[84].mxu1 }
 0xbc6   : > { %v11041_v53 = vpop.f32.mrb[85].mxu1 }
 0xbc7   : > { %v11042_v18 = vadd.f32 %v11041_v53, %v11040_v51  ;;  %v11043_v11 = vpop.f32.mrb[86].mxu1 }
 0xbc8   : > { %v11044_v63 = vpop.f32.mrb[87].mxu1 }
 0xbc9   : > { %v9428_v34 = vadd.f32 %v11042_v18, %v17415_v41  ;;  %v11045_v60 = vadd.f32 %v11044_v63, %v11043_v11 }
 0xbcb   : > { %9494 = vst [vmem:[%s17420_s1 + $0xa0] sm:$0xff] %v9428_v34  ;;  %v9431_v42 = vadd.f32 %v11045_v60, %v17415_v41 }
 0xbcd   : > { %9495 = vst [vmem:[%s17420_s1 + $0xa8] sm:$0xff] %v9431_v42  ;;  %v11046_v62 = vpop.f32.mrb[88].mxu1 }
 0xbce   : > { %v11047_v61 = vpop.f32.mrb[89].mxu1 }
 0xbcf   : > { %v11048_v27 = vadd.f32 %v11047_v61, %v11046_v62  ;;  %v11049_v52 = vpop.f32.mrb[90].mxu1 }
 0xbd0   : > { %v11050_v59 = vpop.f32.mrb[91].mxu1 }
 0xbd1   : > { %v9436_v5 = vadd.f32 %v11048_v27, %v17415_v41  ;;  %v11051_v25 = vadd.f32 %v11050_v59, %v11049_v52 }
 0xbd3   : > { %9496 = vst [vmem:[%s17420_s1 + $0xb0] sm:$0xff] %v9436_v5  ;;  %v9439_v20 = vadd.f32 %v11051_v25, %v17415_v41 }
 0xbd5   : > { %9497 = vst [vmem:[%s17420_s1 + $0xb8] sm:$0xff] %v9439_v20 }
 0xbd9   : > { %v11052_v43 = vpop.f32.mrb[92].mxu1 }
 0xbda   : > { %v11053_v19 = vpop.f32.mrb[93].mxu1 }
 0xbdb   : > { %v11054_v14 = vadd.f32 %v11053_v19, %v11052_v43  ;;  %v11055_v3 = vpop.f32.mrb[94].mxu1 }
 0xbdc   : > { %v11056_v4 = vpop.f32.mrb[95].mxu1 }
 0xbdd   : > { %v9444_v48 = vadd.f32 %v11054_v14, %v17415_v41  ;;  %v11057_v49 = vadd.f32 %v11056_v4, %v11055_v3 }
 0xbdf   : > { %9498 = vst [vmem:[%s17420_s1 + $0xc0] sm:$0xff] %v9444_v48  ;;  %v9447_v57 = vadd.f32 %v11057_v49, %v17415_v41 }
 0xbe1   : > { %9499 = vst [vmem:[%s17420_s1 + $0xc8] sm:$0xff] %v9447_v57  ;;  %v11058_v47 = vpop.f32.mrb[96].mxu1 }
 0xbe2   : > { %v11059_v38 = vpop.f32.mrb[97].mxu1 }
 0xbe3   : > { %v11060_v17 = vadd.f32 %v11059_v38, %v11058_v47  ;;  %v11061_v29 = vpop.f32.mrb[98].mxu1 }
 0xbe4   : > { %v11062_v32 = vpop.f32.mrb[99].mxu1 }
 0xbe5   : > { %v9452_v35 = vadd.f32 %v11060_v17, %v17415_v41  ;;  %v11063_v28 = vadd.f32 %v11062_v32, %v11061_v29 }
 0xbe7   : > { %9500 = vst [vmem:[%s17420_s1 + $0xd0] sm:$0xff] %v9452_v35  ;;  %v9455_v37 = vadd.f32 %v11063_v28, %v17415_v41 }
 0xbe9   : > { %9501 = vst [vmem:[%s17420_s1 + $0xd8] sm:$0xff] %v9455_v37  ;;  %v11064_v33 = vpop.f32.mrb[100].mxu1 }
 0xbea   : > { %v11065_v36 = vpop.f32.mrb[101].mxu1 }
 0xbeb   : > { %v11066_v1 = vadd.f32 %v11065_v36, %v11064_v33  ;;  %v11067_v30 = vpop.f32.mrb[102].mxu1 }
 0xbec   : > { %v11068_v39 = vpop.f32.mrb[103].mxu1 }
 0xbed   : > { %v9460_v23 = vadd.f32 %v11066_v1, %v17415_v41  ;;  %v11069_v46 = vadd.f32 %v11068_v39, %v11067_v30 }
 0xbef   : > { %9502 = vst [vmem:[%s17420_s1 + $0xe0] sm:$0xff] %v9460_v23  ;;  %v9463_v26 = vadd.f32 %v11069_v46, %v17415_v41 }
 0xbf1   : > { %9503 = vst [vmem:[%s17420_s1 + $0xe8] sm:$0xff] %v9463_v26  ;;  %v11070_v58 = vpop.f32.mrb[104].mxu1 }
 0xbf2   : > { %v11071_v55 = vpop.f32.mrb[105].mxu1 }
 0xbf3   : > { %v11072_v45 = vadd.f32 %v11071_v55, %v11070_v58  ;;  %v11073_v50 = vpop.f32.mrb[106].mxu1 }
 0xbf4   : > { %v11074_v56 = vpop.f32.mrb[107].mxu1 }
 0xbf5   : > { %v9468_v40 = vadd.f32 %v11072_v45, %v17415_v41  ;;  %v11075_v6 = vadd.f32 %v11074_v56, %v11073_v50 }
 0xbf7   : > { %9504 = vst [vmem:[%s17420_s1 + $0xf0] sm:$0xff] %v9468_v40  ;;  %v9471_v2 = vadd.f32 %v11075_v6, %v17415_v41 }
 0xbf9   : > { %9505 = vst [vmem:[%s17420_s1 + $0xf8] sm:$0xff] %v9471_v2 }
 0xbfa   : > { %12780 = shalt.err (!%p12777_p9)
}
 0xbfb   : > { %s12781_s0 = scalar_lea.hbm %s17520_s3, 4096  ;;  %s12785_s1 = scalar_lea.hbm %s13034_s20, 8192 }
 0xbfc   : > { %p12782_p10 = scmp.ne.s32.totalorder %s17520_s3, %s12781_s0  ;;  %p12786_p0 = scmp.lt.u32.totalorder %s17520_s3, %s13034_s20 }
 0xbfd   : > { %p12787_p13 = scmp.lt.u32.totalorder %s12785_s1, %s12781_s0  ;;  %p12789_p2 = scmp.lt.u32.totalorder %s12781_s0, %s17520_s3 }
 0xbfe   : > { %p12783_p11 = pnand %p12782_p10, %p13074_p5 }
 0xbff   : > { %p12788_p1 = por %p12787_p13, %p12786_p0 }
 0xc00   : > { %p12784_p12 = pneg %p12783_p11 }
 0xc01   : > { %p12790_p4 = por %p12789_p2, %p12788_p1 }
 0xc03   : > { %p12791_p3 = pnand %p12790_p4, %p12784_p12 }
 0xc05   : > { %12794 = shalt.err (!%p12791_p3)
}
 0xc06   : > { %s17630_s12 = smov 8   ;;  %s17631_s9 = smov 128  }
 0xc07   : > { %11197 = dma.vmem_to_hbm [thread:$0]  (%p13074_p5), %s17522_s8, 4096, %s17520_s3, %s9512_s6, %s17631_s9, %s17631_s9, %s17630_s12  }
 0xc08 PF: > { %p11207_p7 = scmp.ge.s32.totalorder %s12833_s28, 2  ;;  %s9556_s4 = sand.u32 1, %s12821_s22  }
 0xc09   : > { %s9557_s7 = scalar_lea.sflag [#allocation3], %s9556_s4 }
 0xc0a   : > { %p11201_p8 = pnand %p11207_p7, %p13078_p6 }
 0xc0c   : > { %12812 = dma.done.wait (!%p11201_p8), %s9557_s7, 4096  }
 0xc0d   : > { %12814 = vsyncadd (!%p11201_p8), %s9557_s7, 4294963200  ;;  %s9566_s15 = scalar_lea.sflag [#allocation5], %s9556_s4 }
 0xc0e   : > { %12816 = dma.done.wait (!%p11201_p8), %s9566_s15, 4096  }
 0xc0f   : > { %12818 = vsyncadd (!%p11201_p8), %s9566_s15, 4294963200  ;;  %p77_p5 = scmp.ge.s32.totalorder %s13061_s2, 4   ;;  %s17632_s22 = smov %s12825_s23 }
 0xc10   : > { %s17633_s23 = smov %s12829_s26  ;;  %s17634_s26 = smov %s13072_s11 }
 0xc11   : > { %s17635_s28 = smov %s13061_s2  ;;  %79 = sbr.rel (!%p77_p5) target bundleno = 65 (0x41), region = 229 }
 0xc18   :  { %9571 = vsyncpa [#allocation3], 1 }
 0xc19   :  { %9573 = vsyncpa [#allocation3 + $0x1], 1 }
 0xc1a   :  { %9574 = vsyncpa [#allocation5], 1 }
 0xc1b   :  { %9576 = vsyncpa [#allocation5 + $0x1], 1 }

</bundles_post_ra>
